<compile_context>
chip_gen: v7x
topology: tpu7x:2x2x1
jax: 0.10.0
libtpu: 0.0.40
codegen_flags: <defaults>
</compile_context>

<pallas_src>
import jax
import jax.numpy as jnp
from jax.experimental import pallas as pl
from jax.experimental.pallas import tpu as pltpu


def _flora_kernel(gt_ref, p0t_ref, p1_ref, o_ref):
    # gt_ref : (r1, r0)  scale * G^T, fully VMEM-resident
    # p0t_ref: (r0, d0)  P0^T, fully VMEM-resident
    # p1_ref : (tm, r1)  row-panel of P1
    # o_ref  : (tm, d0)  row-panel of the (d1, d0) synthesized weight
    a = jnp.dot(p1_ref[...], gt_ref[...],
                preferred_element_type=jnp.float32,
                precision=jax.lax.Precision.HIGHEST)        # (tm, r0), tiny
    out = jnp.dot(a, p0t_ref[...],
                  preferred_element_type=jnp.float32,
                  precision=jax.lax.Precision.HIGHEST)      # (tm, d0)
    o_ref[...] = out.astype(o_ref.dtype)


def _ceil_div(a, b):
    return -(-a // b)


def _round_down(x, m):
    return max(m, (x // m) * m)


def _sublane_multiple(dtype):
    # Packed sublane tile: 8 for 4-byte, 16 for 2-byte, 32 for 1-byte dtypes.
    return max(8, 32 // jnp.dtype(dtype).itemsize)


def _tpu_topology():
    """(physical VMEM bytes, # TensorCores per chip) with safe fallbacks."""
    phys_vmem = 128 << 20
    num_cores = 1
    try:
        info = pltpu.get_tpu_info()
        for name in ("vmem_capacity_bytes", "vmem_bytes", "vmem_size_bytes"):
            v = getattr(info, name, None)
            if v:
                phys_vmem = int(v)
                break
        for name in ("num_cores", "core_count", "num_tensorcores",
                     "tensorcores_per_chip"):
            c = getattr(info, name, None)
            if c:
                num_cores = int(c)
                break
    except Exception:
        pass
    try:
        kind = jax.devices()[0].device_kind.lower()
        if "v7" in kind or "7x" in kind:
            num_cores = max(num_cores, 2)
    except Exception:
        pass
    return phys_vmem, num_cores


def _flora_pallas(gt, p0t, p1, out_dtype, *, target_block_bytes,
                  phys_vmem, num_cores, single_buffer_resident):
    r1, r0 = gt.shape
    _, d0 = p0t.shape
    d1, _ = p1.shape

    out_it = jnp.dtype(out_dtype).itemsize
    p1_it = jnp.dtype(p1.dtype).itemsize
    p0_it = jnp.dtype(p0t.dtype).itemsize
    g_it = jnp.dtype(gt.dtype).itemsize

    sub = max(_sublane_multiple(out_dtype), _sublane_multiple(p1.dtype))

    # VMEM budgets derived from this chip's physical VMEM (64 MiB v7x,
    # 128 MiB v5e/v6e), leaving headroom for Mosaic internal scratch.
    vmem_cap = max(16 << 20, min(phys_vmem - (12 << 20), 100 << 20))
    vmem_budget = vmem_cap - (4 << 20)

    resident_mult = 1 if single_buffer_resident else 2
    resident = resident_mult * (r0 * d0 * p0_it + r0 * r1 * g_it)
    row_bytes = 2 * (d0 * out_it + r1 * p1_it)      # double-buffered, per row
    tm_cap_vmem = max(sub, (vmem_budget - resident) // row_bytes)
    tm_cap_tgt = max(sub, target_block_bytes // max(1, d0 * out_it))
    tm = min(d1, tm_cap_vmem, tm_cap_tgt)
    if tm < d1:
        tm = _round_down(tm, sub)   # block second-minor dim: sublane multiple

    # Only split a fitting full-height panel on multi-TensorCore parts (v7x):
    # give each core >= 2 panels so stores overlap the next panel's issue.
    # On single-TC v5e/v6e a split only adds grid-step overhead.
    if num_cores >= 2:
        desired_steps = 2 * num_cores
        if _ceil_div(d1, tm) < desired_steps:
            cand = _round_down(_ceil_div(d1, desired_steps), sub)
            if sub <= cand < d1:
                tm = cand

    grid = (_ceil_div(d1, tm),)

    usage = 2 * tm * (d0 * out_it + r1 * p1_it) + resident
    vmem_limit = int(min(vmem_cap, max(16 << 20, usage + (4 << 20))))

    cost = pl.CostEstimate(
        flops=2 * d1 * r1 * r0 + 2 * d1 * d0 * r0,
        transcendentals=0,
        bytes_accessed=d1 * d0 * out_it + d1 * r1 * p1_it
                       + d0 * r0 * p0_it + r0 * r1 * g_it,
    )

    if single_buffer_resident:
        gt_spec = pl.BlockSpec((r1, r0), lambda i: (0, 0),
                               pipeline_mode=pl.Buffered(1))
        p0t_spec = pl.BlockSpec((r0, d0), lambda i: (0, 0),
                                pipeline_mode=pl.Buffered(1))
    else:
        gt_spec = pl.BlockSpec((r1, r0), lambda i: (0, 0))
        p0t_spec = pl.BlockSpec((r0, d0), lambda i: (0, 0))

    return pl.pallas_call(
        _flora_kernel,
        out_shape=jax.ShapeDtypeStruct((d1, d0), out_dtype),
        grid_spec=pltpu.PrefetchScalarGridSpec(
            num_scalar_prefetch=0,
            grid=grid,
            in_specs=[
                gt_spec,                                      # scale*G^T, resident
                p0t_spec,                                     # P0^T, resident
                pl.BlockSpec((tm, r1), lambda i: (i, 0)),     # P1 row-panel
            ],
            out_specs=pl.BlockSpec((tm, d0), lambda i: (i, 0)),
        ),
        compiler_params=pltpu.CompilerParams(
            dimension_semantics=("parallel",),
            vmem_limit_bytes=vmem_limit,
        ),
        cost_estimate=cost,
    )(gt, p0t, p1)


def flora_forward(param_G, param_0, param_1, scale=1.0, *,
                  out_dtype=None, target_block_bytes=None):
    """scale * param_1 @ param_G^T @ param_0^T, tiled as full-width row panels.

    out_dtype defaults to the promoted parameter dtype (PyTorch parity); pass
    jnp.bfloat16 if the consumer accepts it — that halves the store-bound
    writeback and is the single largest speedup available here.
    """
    d0, r0 = param_0.shape
    d1, r1 = param_1.shape
    assert param_G.shape == (r0, r1), "param_G must be (r[0], r[1])"

    if out_dtype is None:
        out_dtype = jnp.result_type(param_G.dtype, param_0.dtype, param_1.dtype)

    phys_vmem, num_cores = _tpu_topology()
    if target_block_bytes is None:
        # Bigger panels amortize the ~0.35 us grid-step overhead; v7x's faster
        # HBM needs them most but has only 64 MiB VMEM, hence 12 vs 16 MiB.
        target_block_bytes = (12 << 20) if phys_vmem <= (64 << 20) else (16 << 20)

    # Fold scale into the tiny G^T (works for traced/learned scale with no
    # retrace) and pre-transpose the small factors once in the wrapper so the
    # kernel body is two natural NN matmuls (no in-kernel XLU transposes).
    gt = jnp.transpose(param_G).astype(jnp.float32) * jnp.asarray(scale, jnp.float32)
    p0t = jnp.transpose(param_0)

    try:
        return _flora_pallas(gt, p0t, param_1, out_dtype,
                             target_block_bytes=target_block_bytes,
                             phys_vmem=phys_vmem, num_cores=num_cores,
                             single_buffer_resident=True)
    except Exception:
        # pl.Buffered(1) on the constant-index resident inputs is a pure VMEM
        # saving; fall back to default double-buffering if rejected.
        return _flora_pallas(gt, p0t, param_1, out_dtype,
                             target_block_bytes=target_block_bytes,
                             phys_vmem=phys_vmem, num_cores=num_cores,
                             single_buffer_resident=False)


def flora_reference(param_G, param_0, param_1, scale=1.0):
    """Pure-JAX transcription of the PyTorch forward (N=2, style='v2')."""
    dt = jnp.tensordot(param_G, param_0, axes=[[0], [1]],
                       precision=jax.lax.Precision.HIGHEST)   # (r1, d0)
    dt = jnp.tensordot(dt, param_1, axes=[[0], [1]],
                       precision=jax.lax.Precision.HIGHEST)   # (d0, d1)
    dt = dt.T                                                 # (d1, d0)
    return scale * dt


if __name__ == "__main__":
    # Module defaults: N=2, dims=[256, 512], r=[8, 8].
    dims = [256, 512]
    r = [8, 8]
    scale = 0.5

    key = jax.random.PRNGKey(0)
    kG, k0, k1 = jax.random.split(key, 3)
    # Deterministic "torch.randn"-style init (synthetic; no checkpoint load).
    param_G = jax.random.normal(kG, (r[0], r[1]), dtype=jnp.float32)
    param_0 = jax.random.normal(k0, (dims[0], r[0]), dtype=jnp.float32)
    param_1 = jax.random.normal(k1, (dims[1], r[1]), dtype=jnp.float32)

    out = flora_forward(param_G, param_0, param_1, scale=scale)
    out = jax.block_until_ready(out)

    ref = flora_reference(param_G, param_0, param_1, scale=scale)
    assert out.shape == (dims[1], dims[0])
    assert jnp.allclose(out, ref, atol=1e-4, rtol=1e-4), "mismatch vs reference"

    # TODO(synk): general N>2 chained tensordots (rank-N param_G) are not
    # expressed as a single Pallas kernel; only the default N=2 matmul path is
    # kernelized.
    print("KERNEL_OK")
</pallas_src>

<mosaic_0001>
module attributes {stable_mosaic.version = 11 : i64} {
  func.func @_flora_kernel(%arg0: i32, %arg1: memref<8x8xf32, #tpu.memory_space<vmem>>, %arg2: memref<8x256xf32, #tpu.memory_space<vmem>>, %arg3: memref<512x8xf32, #tpu.memory_space<vmem>>, %arg4: memref<512x256xf32, #tpu.memory_space<vmem>>) attributes {dimension_semantics = [#tpu.dimension_semantics<parallel>], iteration_bounds = array<i64: 1>, scalar_prefetch = 0 : i64, scratch_operands = 0 : i64, tpu.core_type = #tpu.core_type<tc>, window_params = [{pipeline_mode = #tpu.pipeline_mode<synchronous>, transform_indices = @transform_0, window_bounds = array<i64: 8, 8>}, {pipeline_mode = #tpu.pipeline_mode<synchronous>, transform_indices = @transform_1, window_bounds = array<i64: 8, 256>}, {transform_indices = @transform_2, window_bounds = array<i64: 512, 8>}, {transform_indices = @transform_3, window_bounds = array<i64: 512, 256>}]} {
    %c0 = arith.constant 0 : index
    %c0_0 = arith.constant 0 : index
    %0 = vector.load %arg3[%c0, %c0_0] : memref<512x8xf32, #tpu.memory_space<vmem>>, vector<512x8xf32>
    %c0_1 = arith.constant 0 : index
    %c0_2 = arith.constant 0 : index
    %1 = vector.load %arg1[%c0_1, %c0_2] : memref<8x8xf32, #tpu.memory_space<vmem>>, vector<8x8xf32>
    %cst = arith.constant dense<0.000000e+00> : vector<512x8xf32>
    %2 = tpu.matmul %0, %1, %cst {dimension_numbers = #tpu.dot_dimension_numbers<[1], [0], [0], [1], [0, 0, 1, 1], [], []>, precision = #tpu.contract_precision<fp32>} : vector<512x8xf32>, vector<8x8xf32>, vector<512x8xf32> -> vector<512x8xf32>
    %c0_3 = arith.constant 0 : index
    %c0_4 = arith.constant 0 : index
    %3 = vector.load %arg2[%c0_3, %c0_4] : memref<8x256xf32, #tpu.memory_space<vmem>>, vector<8x256xf32>
    %cst_5 = arith.constant dense<0.000000e+00> : vector<512x256xf32>
    %4 = tpu.matmul %2, %3, %cst_5 {dimension_numbers = #tpu.dot_dimension_numbers<[1], [0], [0], [1], [0, 0, 1, 1], [], []>, precision = #tpu.contract_precision<fp32>} : vector<512x8xf32>, vector<8x256xf32>, vector<512x256xf32> -> vector<512x256xf32>
    %c0_6 = arith.constant 0 : index
    %c0_7 = arith.constant 0 : index
    %5 = vector.load %arg4[%c0_6, %c0_7] : memref<512x256xf32, #tpu.memory_space<vmem>>, vector<512x256xf32>
    tpu.vector_store %arg4[%c0_6, %c0_7], %4 {strides = array<i32>} : memref<512x256xf32, #tpu.memory_space<vmem>>, vector<512x256xf32>,
    return
  }
  func.func @transform_0(%arg0: i32) -> (i32, i32) {
    %c0_i32 = arith.constant 0 : i32
    %c0_i32_0 = arith.constant 0 : i32
    %c0_i32_1 = arith.constant 0 : i32
    return %c0_i32, %c0_i32_0 : i32, i32
  }
  func.func @transform_1(%arg0: i32) -> (i32, i32) {
    %c0_i32 = arith.constant 0 : i32
    %c0_i32_0 = arith.constant 0 : i32
    %c0_i32_1 = arith.constant 0 : i32
    return %c0_i32, %c0_i32_0 : i32, i32
  }
  func.func @transform_2(%arg0: i32) -> (i32, i32) {
    %c0_i32 = arith.constant 0 : i32
    %c0_i32_0 = arith.constant 0 : i32
    return %arg0, %c0_i32 : i32, i32
  }
  func.func @transform_3(%arg0: i32) -> (i32, i32) {
    %c0_i32 = arith.constant 0 : i32
    %c0_i32_0 = arith.constant 0 : i32
    return %arg0, %c0_i32 : i32, i32
  }
}

module attributes {stable_mosaic.version = 11 : i64} {
  func.func @_flora_kernel(%arg0: i32, %arg1: memref<8x8xf32, #tpu.memory_space<vmem>>, %arg2: memref<8x256xf32, #tpu.memory_space<vmem>>, %arg3: memref<512x8xf32, #tpu.memory_space<vmem>>, %arg4: memref<512x256xf32, #tpu.memory_space<vmem>>) attributes {dimension_semantics = [#tpu.dimension_semantics<parallel>], iteration_bounds = array<i64: 1>, scalar_prefetch = 0 : i64, scratch_operands = 0 : i64, tpu.core_type = #tpu.core_type<tc>, window_params = [{pipeline_mode = #tpu.pipeline_mode<synchronous>, transform_indices = @transform_0, window_bounds = array<i64: 8, 8>}, {pipeline_mode = #tpu.pipeline_mode<synchronous>, transform_indices = @transform_1, window_bounds = array<i64: 8, 256>}, {transform_indices = @transform_2, window_bounds = array<i64: 512, 8>}, {transform_indices = @transform_3, window_bounds = array<i64: 512, 256>}]} {
    %c0 = arith.constant 0 : index
    %c0_0 = arith.constant 0 : index
    %0 = vector.load %arg3[%c0, %c0_0] : memref<512x8xf32, #tpu.memory_space<vmem>>, vector<512x8xf32>
    %c0_1 = arith.constant 0 : index
    %c0_2 = arith.constant 0 : index
    %1 = vector.load %arg1[%c0_1, %c0_2] : memref<8x8xf32, #tpu.memory_space<vmem>>, vector<8x8xf32>
    %cst = arith.constant dense<0.000000e+00> : vector<512x8xf32>
    %2 = tpu.matmul %0, %1, %cst {dimension_numbers = #tpu.dot_dimension_numbers<[1], [0], [0], [1], [0, 0, 1, 1], [], []>, precision = #tpu.contract_precision<fp32>} : vector<512x8xf32>, vector<8x8xf32>, vector<512x8xf32> -> vector<512x8xf32>
    %c0_3 = arith.constant 0 : index
    %c0_4 = arith.constant 0 : index
    %3 = vector.load %arg2[%c0_3, %c0_4] : memref<8x256xf32, #tpu.memory_space<vmem>>, vector<8x256xf32>
    %cst_5 = arith.constant dense<0.000000e+00> : vector<512x256xf32>
    %4 = tpu.matmul %2, %3, %cst_5 {dimension_numbers = #tpu.dot_dimension_numbers<[1], [0], [0], [1], [0, 0, 1, 1], [], []>, precision = #tpu.contract_precision<fp32>} : vector<512x8xf32>, vector<8x256xf32>, vector<512x256xf32> -> vector<512x256xf32>
    %c0_6 = arith.constant 0 : index
    %c0_7 = arith.constant 0 : index
    %5 = vector.load %arg4[%c0_6, %c0_7] : memref<512x256xf32, #tpu.memory_space<vmem>>, vector<512x256xf32>
    tpu.vector_store %arg4[%c0_6, %c0_7], %4 {strides = array<i32>} : memref<512x256xf32, #tpu.memory_space<vmem>>, vector<512x256xf32>,
    return
  }
  func.func @transform_0(%arg0: i32) -> (i32, i32) {
    %c0_i32 = arith.constant 0 : i32
    %c0_i32_0 = arith.constant 0 : i32
    %c0_i32_1 = arith.constant 0 : i32
    return %c0_i32, %c0_i32_0 : i32, i32
  }
  func.func @transform_1(%arg0: i32) -> (i32, i32) {
    %c0_i32 = arith.constant 0 : i32
    %c0_i32_0 = arith.constant 0 : i32
    %c0_i32_1 = arith.constant 0 : i32
    return %c0_i32, %c0_i32_0 : i32, i32
  }
  func.func @transform_2(%arg0: i32) -> (i32, i32) {
    %c0_i32 = arith.constant 0 : i32
    %c0_i32_0 = arith.constant 0 : i32
    return %arg0, %c0_i32 : i32, i32
  }
  func.func @transform_3(%arg0: i32) -> (i32, i32) {
    %c0_i32 = arith.constant 0 : i32
    %c0_i32_0 = arith.constant 0 : i32
    return %arg0, %c0_i32 : i32, i32
  }
}

</mosaic_0001>

<bundles_post_ra>
// kernel: tpu_custom_call.1
= control target key start
LH: loop header
LB: loop body
LE: loop exit
PB: predicated region body
PF: predicated region fallthrough
CT: control target
= control target key end

     0   :  { %vm80_vm0 = vcmask 64512   ;;  %s12631_s0 = inlined_call_operand.vmem [shape: f32[8,8], index: 0, kind: input, shape index: {}]   ;;  %s12632_s1 = inlined_call_operand.vmem [shape: f32[8,256], index: 1, kind: input, shape index: {}]   ;;  %s12633_s2 = inlined_call_operand.vmem [shape: f32[512,8], index: 2, kind: input, shape index: {}]   ;;  %s12634_s3 = inlined_call_operand.hbm [shape: f32[512,256], index: 3, kind: output, shape index: {}]  }
   0x1   :  { %v79_v0 = vld [vmem:[%s12631_s0] sm:$0xff]  ;;  %v16_v2 = vld [vmem:[%s12633_s2 + $0x8] sm:$0xff]  ;;  %v17_v6 = vld [vmem:[%s12633_s2 + $0x10] sm:$0xff] }
   0x2   :  { %v15_v1 = vld [vmem:[%s12633_s2] sm:$0xff]  ;;  %v9319_v3 = vand.u32 4294901760, %v79_v0  ;;  %v85_v5 = vsel %vm80_vm0, %v16_v2, 0  ;;  %v18_v7 = vld [vmem:[%s12633_s2 + $0x18] sm:$0xff]  ;;  %v88_v11 = vsel %vm80_vm0, %v17_v6, 0  ;;  %v20_v13 = vld [vmem:[%s12633_s2 + $0x28] sm:$0xff] }
   0x3   :  { %v82_v4 = vsel %vm80_vm0, %v15_v1, 0  ;;  %v19_v8 = vld [vmem:[%s12633_s2 + $0x20] sm:$0xff]  ;;  %v9334_v10 = vand.u32 4294901760, %v85_v5  ;;  %v91_v12 = vsel %vm80_vm0, %v18_v7, 0  ;;  %v9345_v15 = vand.u32 4294901760, %v88_v11  ;;  %v21_v18 = vld [vmem:[%s12633_s2 + $0x30] sm:$0xff] }
   0x4   :  { %v9332_v9 = vand.u32 4294901760, %v82_v4  ;;  %7708 = vmatprep.subr.mxu0 %v9319_v3  ;;  %v9343_v14 = vsub.f32 %v79_v0, %v9319_v3  ;;  %v9347_v16 = vand.u32 4294901760, %v91_v12  ;;  %v94_v17 = vsel %vm80_vm0, %v19_v8, 0  ;;  %v22_v39 = vld [vmem:[%s12633_s2 + $0x38] sm:$0xff]  ;;  %v23_v44 = vld [vmem:[%s12633_s2 + $0x40] sm:$0xff]  ;;  %v24_v49 = vld [vmem:[%s12633_s2 + $0x48] sm:$0xff] }
   0x5   :  { %13135 = vst [vmem:[#allocation6_spill] sm:$0xff] %v9334_v10  ;;  %13136 = vst [vmem:[#allocation7_spill] sm:$0xff] %v9345_v15  ;;  %7709 = vmatpush3.msra.mxu0 %v9319_v3  ;;  %v9358_v20 = vsub.f32 %v85_v5, %v9334_v10  ;;  %v9360_v21 = vand.u32 4294901760, %v94_v17  ;;  %v97_v22 = vsel %vm80_vm0, %v20_v13, 0  ;;  %v9367_v24 = vsub.f32 %v88_v11, %v9345_v15  ;;  %v25_v50 = vld [vmem:[%s12633_s2 + $0x50] sm:$0xff]  ;;  %v26_v55 = vld [vmem:[%s12633_s2 + $0x58] sm:$0xff] }
   0x6   :  { %13134 = vst [vmem:[#allocation5_spill] sm:$0xff] %v9332_v9  ;;  %13137 = vst [vmem:[#allocation8_spill] sm:$0xff] %v9347_v16  ;;  %v9355_v19 = vsub.f32 %v82_v4, %v9332_v9  ;;  %v9364_v23 = vand.u32 4294901760, %v9343_v14  ;;  %v9370_v25 = vsub.f32 %v91_v12, %v9347_v16  ;;  %v9372_v26 = vand.u32 4294901760, %v97_v22  ;;  %v27_v60 = vld [vmem:[%s12633_s2 + $0x60] sm:$0xff]  ;;  %v28_v61 = vld [vmem:[%s12633_s2 + $0x68] sm:$0xff] }
   0x7   :  { %13139 = vst [vmem:[#allocation10_spill] sm:$0xff] %v9358_v20  ;;  %13140 = vst [vmem:[#allocation11_spill] sm:$0xff] %v9360_v21  ;;  %v12648_v28 = vand.u32 4294901760, %v9358_v20  ;;  %v9377_v29 = vsub.f32 %v94_v17, %v9360_v21  ;;  %v100_v30 = vsel %vm80_vm0, %v21_v18, 0  ;;  %v12647_v32 = vand.u32 4294901760, %v9367_v24  ;;  %v29_v13 = vld [vmem:[%s12633_s2 + $0x70] sm:$0xff] }
   0x8   :  { %13138 = vst [vmem:[#allocation9_spill] sm:$0xff] %v9355_v19  ;;  %13141 = vst [vmem:[#allocation12_spill] sm:$0xff] %v9364_v23  ;;  %v12650_v27 = vand.u32 4294901760, %v9355_v19  ;;  %v983_v31 = vsub.f32 %v9343_v14, %v9364_v23  ;;  %v12646_v33 = vand.u32 4294901760, %v9370_v25  ;;  %v9385_v34 = vsub.f32 %v97_v22, %v9372_v26 }
   0x9   :  { %13142 = vst [vmem:[#allocation13_spill] sm:$0xff] %v9367_v24  ;;  %13143 = vst [vmem:[#allocation14_spill] sm:$0xff] %v9370_v25  ;;  %v352_v36 = vsub.f32 %v9358_v20, %v12648_v28  ;;  %v12643_v37 = vand.u32 4294901760, %v9377_v29  ;;  %v9394_v38 = vand.u32 4294901760, %v100_v30  ;;  %v362_v41 = vsub.f32 %v9367_v24, %v12647_v32 }
   0xa   :  { %13144 = vst [vmem:[#allocation15_spill] sm:$0xff] %v9372_v26  ;;  %13145 = vst [vmem:[#allocation16_spill] sm:$0xff] %v9377_v29  ;;  %v342_v35 = vsub.f32 %v9355_v19, %v12650_v27  ;;  %v984_v40 = vand.u32 4294901760, %v983_v31  ;;  %v372_v42 = vsub.f32 %v9370_v25, %v12646_v33  ;;  %v12642_v43 = vand.u32 4294901760, %v9385_v34 }
   0xb   :  { %13146 = vst [vmem:[#allocation17_spill] sm:$0xff] %v9385_v34  ;;  %13147 = vst [vmem:[#allocation18_spill] sm:$0xff] %v9394_v38  ;;  %v353_v46 = vand.u32 4294901760, %v352_v36  ;;  %v382_v47 = vsub.f32 %v9377_v29, %v12643_v37  ;;  %v9413_v48 = vsub.f32 %v100_v30, %v9394_v38  ;;  %v363_v51 = vand.u32 4294901760, %v362_v41 }
   0xc   :  { %v343_v45 = vand.u32 4294901760, %v342_v35  ;;  %7806 = vmatprep.subr.mxu0 %v984_v40  ;;  %v373_v52 = vand.u32 4294901760, %v372_v42  ;;  %v392_v53 = vsub.f32 %v9385_v34, %v12642_v43  ;;  %v103_v54 = vsel %vm80_vm0, %v22_v39, 0 }
   0xd   :  { %13148 = vst [vmem:[#allocation19_spill] sm:$0xff] %v9413_v48  ;;  %v383_v56 = vand.u32 4294901760, %v382_v47  ;;  %v12641_v57 = vand.u32 4294901760, %v9413_v48  ;;  %v9429_v58 = vand.u32 4294901760, %v103_v54  ;;  %v106_v59 = vsel %vm80_vm0, %v23_v44, 0 }
   0xe   :  { %7710 = vmatprep.mubr.f32.mxu0 %v343_v45  ;;  %v393_v62 = vand.u32 4294901760, %v392_v53  ;;  %v9438_v63 = vand.u32 4294901760, %v106_v59  ;;  %v109_v0 = vsel %vm80_vm0, %v24_v49, 0  ;;  %v112_v1 = vsel %vm80_vm0, %v25_v50, 0  ;;  %v30_v50 = vld [vmem:[%s12633_s2 + $0x78] sm:$0xff] }
   0xf   :  { %13149 = vst [vmem:[#allocation20_spill] sm:$0xff] %v9429_v58  ;;  %7711 = vmatmul.mubr.f32.vlgmr.msra.gmra.mrb[0].mxu0 %v353_v46  ;;  %v402_v2 = vsub.f32 %v9413_v48, %v12641_v57  ;;  %v9446_v4 = vsub.f32 %v103_v54, %v9429_v58  ;;  %v9448_v5 = vand.u32 4294901760, %v109_v0  ;;  %v9450_v6 = vand.u32 4294901760, %v112_v1 }
  0x10   :  { %13150 = vst [vmem:[#allocation21_spill] sm:$0xff] %v9438_v63  ;;  %7807 = vmatpush3.msra.mxu0 %v984_v40  ;;  %7713 = vmatprep.mubr.f32.mxu0 %v363_v51  ;;  %v9453_v7 = vsub.f32 %v106_v59, %v9438_v63  ;;  %v115_v8 = vsel %vm80_vm0, %v26_v55, 0  ;;  %v118_v11 = vsel %vm80_vm0, %v27_v60, 0  ;;  %v121_v12 = vsel %vm80_vm0, %v28_v61, 0  ;;  %v31_v59 = vld [vmem:[%s12633_s2 + $0x80] sm:$0xff]  ;;  %v32_v60 = vld [vmem:[%s12633_s2 + $0x88] sm:$0xff] }
  0x11   :  { %13151 = vst [vmem:[#allocation22_spill] sm:$0xff] %v9446_v4  ;;  %13152 = vst [vmem:[#allocation23_spill] sm:$0xff] %v9448_v5  ;;  %7904 = vmatprep.subr.mxu0 %v9343_v14  ;;  %v403_v17 = vand.u32 4294901760, %v402_v2  ;;  %v12640_v18 = vand.u32 4294901760, %v9446_v4  ;;  %v9464_v22 = vsub.f32 %v109_v0, %v9448_v5  ;;  %v9467_v30 = vsub.f32 %v112_v1, %v9450_v6  ;;  %v33_v61 = vld [vmem:[%s12633_s2 + $0x90] sm:$0xff] }
  0x12   :  { %13153 = vst [vmem:[#allocation24_spill] sm:$0xff] %v9450_v6  ;;  %13154 = vst [vmem:[#allocation25_spill] sm:$0xff] %v9453_v7  ;;  %v12639_v31 = vand.u32 4294901760, %v9453_v7  ;;  %v9470_v35 = vand.u32 4294901760, %v115_v8  ;;  %v9472_v36 = vand.u32 4294901760, %v118_v11  ;;  %v9474_v39 = vand.u32 4294901760, %v121_v12 }
  0x13   :  { %13155 = vst [vmem:[#allocation26_spill] sm:$0xff] %v9464_v22  ;;  %13156 = vst [vmem:[#allocation27_spill] sm:$0xff] %v9467_v30  ;;  %7714 = vmatmul.mubr.f32.gmra.mrb[2].mxu0 %v373_v52  ;;  %v412_v40 = vsub.f32 %v9446_v4, %v12640_v18  ;;  %v12637_v41 = vand.u32 4294901760, %v9464_v22  ;;  %v12636_v42 = vand.u32 4294901760, %v9467_v30  ;;  %v124_v44 = vsel %vm80_vm0, %v29_v13, 0 }
  0x14   :  { %13157 = vst [vmem:[#allocation28_spill] sm:$0xff] %v9470_v35  ;;  %13158 = vst [vmem:[#allocation29_spill] sm:$0xff] %v9472_v36  ;;  %7716 = vmatprep.mubr.f32.mxu0 %v383_v56  ;;  %v422_v45 = vsub.f32 %v9453_v7, %v12639_v31  ;;  %v9486_v46 = vsub.f32 %v115_v8, %v9470_v35  ;;  %v9489_v47 = vsub.f32 %v118_v11, %v9472_v36 }
  0x15   :  { %13159 = vst [vmem:[#allocation30_spill] sm:$0xff] %v9474_v39  ;;  %v9492_v49 = vsub.f32 %v121_v12, %v9474_v39  ;;  %v413_v51 = vand.u32 4294901760, %v412_v40  ;;  %v9497_v52 = vand.u32 4294901760, %v124_v44  ;;  %v432_v53 = vsub.f32 %v9464_v22, %v12637_v41 }
  0x16   :  { %13160 = vst [vmem:[#allocation31_spill] sm:$0xff] %v9486_v46  ;;  %13161 = vst [vmem:[#allocation32_spill] sm:$0xff] %v9489_v47  ;;  %v442_v54 = vsub.f32 %v9467_v30, %v12636_v42  ;;  %v12635_v55 = vand.u32 4294901760, %v9486_v46  ;;  %v12638_v56 = vand.u32 4294901760, %v9489_v47  ;;  %v127_v1 = vsel %vm80_vm0, %v30_v50, 0 }
  0x17   :  { %13162 = vst [vmem:[#allocation33_spill] sm:$0xff] %v9492_v49  ;;  %13163 = vst [vmem:[#allocation34_spill] sm:$0xff] %v9497_v52  ;;  %7717 = vmatmul.mubr.f32.gmra.mrb[4].mxu0 %v393_v62  ;;  %v423_v62 = vand.u32 4294901760, %v422_v45  ;;  %v9517_v0 = vsub.f32 %v124_v44, %v9497_v52  ;;  %v12644_v2 = vand.u32 4294901760, %v9492_v49  ;;  %v9521_v8 = vand.u32 4294901760, %v127_v1 }
  0x18   :  { %7719 = vmatprep.mubr.f32.mxu0 %v403_v17 }
  0x19   :  { %13164 = vst [vmem:[#allocation35_spill] sm:$0xff] %v9517_v0  ;;  %13165 = vst [vmem:[#allocation36_spill] sm:$0xff] %v9521_v8 }
  0x1a   :  { %8 = vsyncpa [#allocation3], 0  ;;  %v452_v11 = vsub.f32 %v9486_v46, %v12635_v55  ;;  %v130_v12 = vsel %vm80_vm0, %v31_v59, 0  ;;  %v133_v13 = vsel %vm80_vm0, %v32_v60, 0  ;;  %v136_v17 = vsel %vm80_vm0, %v33_v61, 0  ;;  %v34_v40 = vld [vmem:[%s12633_s2 + $0x98] sm:$0xff] }
  0x1b   :  { %v35_v44 = vld [vmem:[%s12633_s2 + $0xa0] sm:$0xff]  ;;  %7720 = vmatmul.mubr.f32.gmra.mrb[6].mxu0 %v413_v51  ;;  %v433_v45 = vand.u32 4294901760, %v432_v53  ;;  %v443_v50 = vand.u32 4294901760, %v442_v54  ;;  %v462_v55 = vsub.f32 %v9489_v47, %v12638_v56  ;;  %v9539_v59 = vsub.f32 %v127_v1, %v9521_v8  ;;  %v36_v51 = vld [vmem:[%s12633_s2 + $0xa8] sm:$0xff] }
  0x1c   :  { %7722 = vmatprep.mubr.f32.mxu0 %v423_v62  ;;  %v12645_v60 = vand.u32 4294901760, %v9517_v0  ;;  %v9542_v61 = vand.u32 4294901760, %v130_v12  ;;  %v9544_v42 = vand.u32 4294901760, %v133_v13  ;;  %v9546_v41 = vand.u32 4294901760, %v136_v17  ;;  %v37_v62 = vld [vmem:[%s12633_s2 + $0xb0] sm:$0xff]  ;;  %v39_v28 = vld [vmem:[%s12633_s2 + $0xc0] sm:$0xff] }
  0x1d   :  { %13166 = vst [vmem:[#allocation37_spill] sm:$0xff] %v9539_v59  ;;  %v12649_v53 = vand.u32 4294901760, %v9539_v59  ;;  %v139_v54 = vsel %vm80_vm0, %v34_v40, 0  ;;  %v142_v1 = vsel %vm80_vm0, %v35_v44, 0  ;;  %v453_v56 = vand.u32 4294901760, %v452_v11 }
  0x1e   :  { %13167 = vst [vmem:[#allocation38_spill] sm:$0xff] %v9542_v61  ;;  %13168 = vst [vmem:[#allocation39_spill] sm:$0xff] %v9544_v42  ;;  %v472_v31 = vsub.f32 %v9492_v49, %v12644_v2  ;;  %v9561_v18 = vsub.f32 %v130_v12, %v9542_v61  ;;  %v9564_v57 = vsub.f32 %v133_v13, %v9544_v42  ;;  %v463_v43 = vand.u32 4294901760, %v462_v55  ;;  %v38_v55 = vld [vmem:[%s12633_s2 + $0xb8] sm:$0xff] }
  0x1f   :  { %13169 = vst [vmem:[#allocation40_spill] sm:$0xff] %v9546_v41  ;;  %7723 = vmatmul.mubr.f32.gmra.mrb[8].mxu0 %v433_v45  ;;  %v9567_v40 = vsub.f32 %v136_v17, %v9546_v41  ;;  %v9569_v44 = vand.u32 4294901760, %v139_v54  ;;  %v145_v37 = vsel %vm80_vm0, %v36_v51, 0  ;;  %v482_v11 = vsub.f32 %v9517_v0, %v12645_v60 }
  0x20   :  { %13170 = vst [vmem:[#allocation41_spill] sm:$0xff] %v9561_v18  ;;  %13171 = vst [vmem:[#allocation42_spill] sm:$0xff] %v9564_v57  ;;  %7725 = vmatprep.mubr.f32.mxu0 %v443_v50  ;;  %v12651_v12 = vand.u32 4294901760, %v9561_v18  ;;  %v9576_v2 = vand.u32 4294901760, %v142_v1  ;;  %v148_v13 = vsel %vm80_vm0, %v37_v62, 0  ;;  %v492_v17 = vsub.f32 %v9539_v59, %v12649_v53 }
  0x21   :  { %13172 = vst [vmem:[#allocation43_spill] sm:$0xff] %v9567_v40  ;;  %13173 = vst [vmem:[#allocation44_spill] sm:$0xff] %v9569_v44  ;;  %v473_v45 = vand.u32 4294901760, %v472_v31  ;;  %v12658_v50 = vand.u32 4294901760, %v9564_v57  ;;  %v9586_v51 = vand.u32 4294901760, %v145_v37  ;;  %v12661_v60 = vand.u32 4294901760, %v9567_v40 }
  0x22   :  { %13174 = vst [vmem:[#allocation45_spill] sm:$0xff] %v9576_v2  ;;  %v9590_v33 = vsub.f32 %v139_v54, %v9569_v44  ;;  %v9592_v62 = vand.u32 4294901760, %v148_v13  ;;  %v151_v32 = vsel %vm80_vm0, %v38_v55, 0  ;;  %v483_v31 = vand.u32 4294901760, %v482_v11  ;;  %v40_v54 = vld [vmem:[%s12633_s2 + $0xc8] sm:$0xff]  ;;  %v41_v55 = vld [vmem:[%s12633_s2 + $0xd0] sm:$0xff] }
  0x23   :  { %13175 = vst [vmem:[#allocation46_spill] sm:$0xff] %v9586_v51  ;;  %7726 = vmatmul.mubr.f32.gmra.mrb[10].mxu0 %v453_v56  ;;  %v502_v53 = vsub.f32 %v9561_v18, %v12651_v12  ;;  %v9602_v56 = vsub.f32 %v142_v1, %v9576_v2  ;;  %v493_v27 = vand.u32 4294901760, %v492_v17  ;;  %v9614_v11 = vsub.f32 %v145_v37, %v9586_v51 }
  0x24   :  { %13176 = vst [vmem:[#allocation47_spill] sm:$0xff] %v9590_v33  ;;  %13177 = vst [vmem:[#allocation48_spill] sm:$0xff] %v9592_v62  ;;  %7728 = vmatprep.mubr.f32.mxu0 %v463_v43  ;;  %v512_v43 = vsub.f32 %v9564_v57, %v12658_v50  ;;  %v9616_v12 = vand.u32 4294901760, %v151_v32  ;;  %v154_v1 = vsel %vm80_vm0, %v39_v28, 0  ;;  %v522_v17 = vsub.f32 %v9567_v40, %v12661_v60 }
  0x25   :  { %13178 = vst [vmem:[#allocation49_spill] sm:$0xff] %v9602_v56  ;;  %13179 = vst [vmem:[#allocation50_spill] sm:$0xff] %v9614_v11  ;;  %v9624_v59 = vsub.f32 %v148_v13, %v9592_v62  ;;  %v157_v0 = vsel %vm80_vm0, %v40_v54, 0  ;;  %v503_v50 = vand.u32 4294901760, %v502_v53  ;;  %v9628_v57 = vand.u32 4294901760, %v154_v1  ;;  %v43_v53 = vld [vmem:[%s12633_s2 + $0xe0] sm:$0xff] }
  0x26   :  { %13180 = vst [vmem:[#allocation51_spill] sm:$0xff] %v9616_v12  ;;  %v160_v28 = vsel %vm80_vm0, %v41_v55, 0  ;;  %v513_v60 = vand.u32 4294901760, %v512_v43  ;;  %v9636_v13 = vsub.f32 %v151_v32, %v9616_v12  ;;  %v9638_v40 = vand.u32 4294901760, %v157_v0  ;;  %v44_v32 = vld [vmem:[%s12633_s2 + $0xe8] sm:$0xff] }
  0x27   :  { %7729 = vmatmul.mubr.f32.gmra.mrb[12].mxu0 %v473_v45  ;;  %13181 = vst [vmem:[#allocation52_spill] sm:$0xff] %v9624_v59  ;;  %13182 = vst [vmem:[#allocation53_spill] sm:$0xff] %v9628_v57  ;;  %v42_v45 = vld [vmem:[%s12633_s2 + $0xd8] sm:$0xff]  ;;  %v9647_v37 = vand.u32 4294901760, %v160_v28  ;;  %v523_v18 = vand.u32 4294901760, %v522_v17  ;;  %v13187_v49 = vand.u32 4294901760, %v9602_v56  ;;  %v9657_v47 = vsub.f32 %v154_v1, %v9628_v57 }
  0x28   :  { %7731 = vmatprep.mubr.f32.mxu0 %v483_v31  ;;  %13183 = vst [vmem:[#allocation54_spill] sm:$0xff] %v9636_v13  ;;  %13184 = vst [vmem:[#allocation55_spill] sm:$0xff] %v9638_v40  ;;  %v13185_v31 = vand.u32 4294901760, %v9590_v33  ;;  %v163_v43 = vsel %vm80_vm0, %v42_v45, 0  ;;  %v169_v46 = vsel %vm80_vm0, %v44_v32, 0  ;;  %v13191_v1 = vand.u32 4294901760, %v9614_v11 }
  0x29   :  { %13186 = vst [vmem:[#allocation56_spill] sm:$0xff] %v9647_v37  ;;  %13188 = vst [vmem:[#allocation57_spill] sm:$0xff] %v9657_v47  ;;  %v9664_v45 = vand.u32 4294901760, %v163_v43  ;;  %v13198_v7 = vand.u32 4294901760, %v9657_v47 }
  0x2a   :  { %v532_v54 = vsub.f32 %v9590_v33, %v13185_v31  ;;  %v166_v31 = vsel %vm80_vm0, %v43_v53, 0  ;;  %v9662_v33 = vsub.f32 %v157_v0, %v9638_v40  ;;  %v552_v17 = vsub.f32 %v9614_v11, %v13191_v1 }
  0x2b   :  { %7732 = vmatmul.mubr.f32.gmra.mrb[14].mxu0 %v493_v27  ;;  %v542_v27 = vsub.f32 %v9602_v56, %v13187_v49  ;;  %13190 = vst [vmem:[#allocation59_spill] sm:$0xff] %v9664_v45  ;;  %v13192_v53 = vand.u32 4294901760, %v9624_v59  ;;  %v9677_v0 = vsub.f32 %v160_v28, %v9647_v37  ;;  %v9680_v30 = vand.u32 4294901760, %v166_v31 }
  0x2c   :  { %7734 = vmatprep.mubr.f32.mxu0 %v503_v50  ;;  %13189 = vst [vmem:[#allocation58_spill] sm:$0xff] %v9662_v33  ;;  %v45_v50 = vld [vmem:[%s12633_s2 + $0xf0] sm:$0xff]  ;;  %v533_v49 = vand.u32 4294901760, %v532_v54  ;;  %v9685_v54 = vand.u32 4294901760, %v169_v46  ;;  %v13196_v28 = vand.u32 4294901760, %v9636_v13  ;;  %v9696_v32 = vsub.f32 %v163_v43, %v9664_v45 }
  0x2d   :  { %v562_v55 = vsub.f32 %v9624_v59, %v13192_v53  ;;  %13193 = vst [vmem:[#allocation60_spill] sm:$0xff] %v9677_v0  ;;  %v543_v56 = vand.u32 4294901760, %v542_v27  ;;  %13194 = vst [vmem:[#allocation61_spill] sm:$0xff] %v9680_v30  ;;  %v172_v1 = vsel %vm80_vm0, %v45_v50, 0  ;;  %v47_v53 = vld [vmem:[%s12633_s2 + $0x100] sm:$0xff]  ;;  %v12694_v27 = vand.u32 4294901760, %v9662_v33 }
  0x2e   :  { %13195 = vst [vmem:[#allocation62_spill] sm:$0xff] %v9685_v54  ;;  %13197 = vst [vmem:[#allocation63_spill] sm:$0xff] %v9696_v32  ;;  %v553_v59 = vand.u32 4294901760, %v552_v17  ;;  %v12695_v22 = vand.u32 4294901760, %v9677_v0  ;;  %v582_v4 = vsub.f32 %v9657_v47, %v13198_v7  ;;  %v9704_v48 = vsub.f32 %v166_v31, %v9680_v30 }
  0x2f   :  { %7735 = vmatmul.mubr.f32.gmra.mrb[16].mxu0 %v513_v60  ;;  %v46_v60 = vld [vmem:[%s12633_s2 + $0xf8] sm:$0xff]  ;;  %v563_v11 = vand.u32 4294901760, %v562_v55  ;;  %v178_v43 = vsel %vm80_vm0, %v47_v53, 0  ;;  %v48_v55 = vld [vmem:[%s12633_s2 + $0x108] sm:$0xff]  ;;  %v592_v7 = vsub.f32 %v9662_v33, %v12694_v27 }
  0x30   :  { %7737 = vmatprep.mubr.f32.mxu0 %v523_v18  ;;  %v572_v18 = vsub.f32 %v9636_v13, %v13196_v28  ;;  %v175_v50 = vsel %vm80_vm0, %v46_v60, 0  ;;  %13199 = vst [vmem:[#allocation64_spill] sm:$0xff] %v9704_v48  ;;  %v9706_v28 = vand.u32 4294901760, %v172_v1  ;;  %v602_v53 = vsub.f32 %v9677_v0, %v12695_v22  ;;  %v51_v22 = vld [vmem:[%s12633_s2 + $0x120] sm:$0xff] }
  0x31   :  { %v9722_v60 = vand.u32 4294901760, %v175_v50  ;;  %v9727_v47 = vand.u32 4294901760, %v178_v43  ;;  %v181_v13 = vsel %vm80_vm0, %v48_v55, 0  ;;  %v13205_v55 = vand.u32 4294901760, %v9696_v32 }
  0x32   :  { %13200 = vst [vmem:[#allocation65_spill] sm:$0xff] %v9706_v28  ;;  %v573_v17 = vand.u32 4294901760, %v572_v18  ;;  %v583_v18 = vand.u32 4294901760, %v582_v4  ;;  %v9733_v27 = vsub.f32 %v172_v1, %v9706_v28  ;;  %v593_v31 = vand.u32 4294901760, %v592_v7 }
  0x33   :  { %7738 = vmatmul.mubr.f32.gmra.mrb[18].mxu0 %v533_v49  ;;  %v49_v49 = vld [vmem:[%s12633_s2 + $0x110] sm:$0xff]  ;;  %13202 = vst [vmem:[#allocation67_spill] sm:$0xff] %v9722_v60  ;;  %13203 = vst [vmem:[#allocation68_spill] sm:$0xff] %v9727_v47  ;;  %v9746_v4 = vsub.f32 %v175_v50, %v9722_v60  ;;  %v603_v34 = vand.u32 4294901760, %v602_v53  ;;  %v9753_v0 = vsub.f32 %v178_v43, %v9727_v47  ;;  %v13210_v33 = vand.u32 4294901760, %v9704_v48 }
  0x34   :  { %7740 = vmatprep.mubr.f32.mxu0 %v543_v56  ;;  %v9716_v56 = vsub.f32 %v169_v46, %v9685_v54  ;;  %v184_v46 = vsel %vm80_vm0, %v49_v49, 0  ;;  %13204 = vst [vmem:[#allocation69_spill] sm:$0xff] %v9733_v27  ;;  %v9748_v49 = vand.u32 4294901760, %v181_v13 }
  0x35   :  { %13206 = vst [vmem:[#allocation70_spill] sm:$0xff] %v9746_v4  ;;  %v9750_v1 = vand.u32 4294901760, %v184_v46  ;;  %13209 = vst [vmem:[#allocation73_spill] sm:$0xff] %v9753_v0  ;;  %v622_v29 = vsub.f32 %v9704_v48, %v13210_v33 }
  0x36   :  { %13201 = vst [vmem:[#allocation66_spill] sm:$0xff] %v9716_v56  ;;  %13207 = vst [vmem:[#allocation71_spill] sm:$0xff] %v9748_v49  ;;  %v13211_v7 = vand.u32 4294901760, %v9716_v56  ;;  %v9769_v25 = vsub.f32 %v181_v13, %v9748_v49  ;;  %v13216_v13 = vand.u32 4294901760, %v9733_v27 }
  0x37   :  { %7741 = vmatmul.mubr.f32.gmra.mrb[20].mxu0 %v553_v59  ;;  %v50_v59 = vld [vmem:[%s12633_s2 + $0x118] sm:$0xff]  ;;  %13208 = vst [vmem:[#allocation72_spill] sm:$0xff] %v9750_v1  ;;  %v9772_v33 = vsub.f32 %v184_v46, %v9750_v1 }
  0x38   :  { %7743 = vmatprep.mubr.f32.mxu0 %v563_v11  ;;  %v612_v11 = vsub.f32 %v9696_v32, %v13205_v55  ;;  %v187_v50 = vsel %vm80_vm0, %v50_v59, 0  ;;  %v190_v32 = vsel %vm80_vm0, %v51_v22, 0  ;;  %v632_v43 = vsub.f32 %v9716_v56, %v13211_v7  ;;  %13212 = vst [vmem:[#allocation74_spill] sm:$0xff] %v9769_v25  ;;  %v53_v22 = vld [vmem:[%s12633_s2 + $0x130] sm:$0xff] }
  0x39   :  { %13213 = vst [vmem:[#allocation75_spill] sm:$0xff] %v9772_v33  ;;  %v9778_v55 = vand.u32 4294901760, %v187_v50  ;;  %v9780_v48 = vand.u32 4294901760, %v190_v32  ;;  %v623_v7 = vand.u32 4294901760, %v622_v29  ;;  %v642_v46 = vsub.f32 %v9733_v27, %v13216_v13 }
  0x3a   :  { %v613_v53 = vand.u32 4294901760, %v612_v11  ;;  %v633_v56 = vand.u32 4294901760, %v632_v43  ;;  %v13217_v59 = vand.u32 4294901760, %v9746_v4  ;;  %v13219_v13 = vand.u32 4294901760, %v9753_v0 }
  0x3b   :  { %7744 = vmatmul.mubr.f32.gmra.mrb[22].mxu0 %v573_v17  ;;  %v52_v17 = vld [vmem:[%s12633_s2 + $0x128] sm:$0xff]  ;;  %13214 = vst [vmem:[#allocation76_spill] sm:$0xff] %v9778_v55  ;;  %13215 = vst [vmem:[#allocation77_spill] sm:$0xff] %v9780_v48 }
  0x3c   :  { %7746 = vmatprep.mubr.f32.mxu0 %v583_v18  ;;  %v193_v11 = vsel %vm80_vm0, %v52_v17, 0  ;;  %v54_v18 = vld [vmem:[%s12633_s2 + $0x138] sm:$0xff]  ;;  %v652_v23 = vsub.f32 %v9746_v4, %v13217_v59  ;;  %v55_v17 = vld [vmem:[%s12633_s2 + $0x140] sm:$0xff]  ;;  %v662_v43 = vsub.f32 %v9753_v0, %v13219_v13  ;;  %v9807_v59 = vsub.f32 %v190_v32, %v9780_v48 }
  0x3d   :  { %v9795_v29 = vand.u32 4294901760, %v193_v11  ;;  %v199_v24 = vsel %vm80_vm0, %v54_v18, 0  ;;  %v202_v27 = vsel %vm80_vm0, %v55_v17, 0  ;;  %v13223_v13 = vand.u32 4294901760, %v9769_v25 }
  0x3e   :  { %13221 = vst [vmem:[#allocation80_spill] sm:$0xff] %v9807_v59  ;;  %v13224_v18 = vand.u32 4294901760, %v9772_v33  ;;  %v9828_v17 = vand.u32 4294901760, %v199_v24  ;;  %v653_v0 = vand.u32 4294901760, %v652_v23  ;;  %v663_v20 = vand.u32 4294901760, %v662_v43  ;;  %v59_v23 = vld [vmem:[%s12633_s2 + $0x160] sm:$0xff] }
  0x3f   :  { %7747 = vmatmul.mubr.f32.gmra.mrb[24].mxu0 %v593_v31  ;;  %v196_v31 = vsel %vm80_vm0, %v53_v22, 0  ;;  %13218 = vst [vmem:[#allocation78_spill] sm:$0xff] %v9795_v29  ;;  %v9804_v22 = vsub.f32 %v187_v50, %v9778_v55  ;;  %v57_v50 = vld [vmem:[%s12633_s2 + $0x150] sm:$0xff]  ;;  %v672_v32 = vsub.f32 %v9769_v25, %v13223_v13  ;;  %v9835_v13 = vand.u32 4294901760, %v202_v27 }
  0x40   :  { %7749 = vmatprep.mubr.f32.mxu0 %v603_v34  ;;  %v643_v34 = vand.u32 4294901760, %v642_v46  ;;  %v9810_v4 = vand.u32 4294901760, %v196_v31  ;;  %v9826_v46 = vsub.f32 %v193_v11, %v9795_v29  ;;  %13226 = vst [vmem:[#allocation83_spill] sm:$0xff] %v9828_v17  ;;  %v208_v11 = vsel %vm80_vm0, %v57_v50, 0 }
  0x41   :  { %13220 = vst [vmem:[#allocation79_spill] sm:$0xff] %v9804_v22  ;;  %v12732_v19 = vand.u32 4294901760, %v9804_v22  ;;  %13228 = vst [vmem:[#allocation85_spill] sm:$0xff] %v9835_v13  ;;  %v673_v43 = vand.u32 4294901760, %v672_v32  ;;  %v60_v32 = vld [vmem:[%s12633_s2 + $0x168] sm:$0xff] }
  0x42   :  { %13222 = vst [vmem:[#allocation81_spill] sm:$0xff] %v9810_v4  ;;  %13225 = vst [vmem:[#allocation82_spill] sm:$0xff] %v9826_v46  ;;  %v9833_v55 = vsub.f32 %v196_v31, %v9810_v4  ;;  %v9847_v31 = vsub.f32 %v199_v24, %v9828_v17 }
  0x43   :  { %7750 = vmatmul.mubr.f32.gmra.mrb[26].mxu0 %v613_v53  ;;  %v56_v53 = vld [vmem:[%s12633_s2 + $0x148] sm:$0xff] }
  0x44   :  { %7752 = vmatprep.mubr.f32.mxu0 %v623_v7  ;;  %v682_v7 = vsub.f32 %v9772_v33, %v13224_v18  ;;  %13227 = vst [vmem:[#allocation84_spill] sm:$0xff] %v9833_v55  ;;  %v205_v18 = vsel %vm80_vm0, %v56_v53, 0  ;;  %13229 = vst [vmem:[#allocation86_spill] sm:$0xff] %v9847_v31  ;;  %v692_v53 = vsub.f32 %v9804_v22, %v12732_v19  ;;  %v9854_v33 = vand.u32 4294901760, %v208_v11 }
  0x45   :  { %v9852_v50 = vand.u32 4294901760, %v205_v18  ;;  %v214_v19 = vsel %vm80_vm0, %v59_v23, 0  ;;  %v13234_v22 = vand.u32 4294901760, %v9826_v46  ;;  %v13239_v17 = vand.u32 4294901760, %v9833_v55 }
  0x46   :  { %v683_v48 = vand.u32 4294901760, %v682_v7  ;;  %13231 = vst [vmem:[#allocation88_spill] sm:$0xff] %v9854_v33  ;;  %v13232_v7 = vand.u32 4294901760, %v9807_v59  ;;  %v9882_v23 = vsub.f32 %v208_v11, %v9854_v33  ;;  %v13241_v33 = vand.u32 4294901760, %v9847_v31 }
  0x47   :  { %7753 = vmatmul.mubr.f32.gmra.mrb[28].mxu0 %v633_v56  ;;  %v58_v56 = vld [vmem:[%s12633_s2 + $0x158] sm:$0xff]  ;;  %13230 = vst [vmem:[#allocation87_spill] sm:$0xff] %v9852_v50 }
  0x48   :  { %7755 = vmatprep.mubr.f32.mxu0 %v643_v34  ;;  %v211_v25 = vsel %vm80_vm0, %v58_v56, 0  ;;  %v702_v24 = vsub.f32 %v9807_v59, %v13232_v7  ;;  %v9865_v34 = vsub.f32 %v202_v27, %v9835_v13  ;;  %v712_v56 = vsub.f32 %v9826_v46, %v13234_v22  ;;  %v61_v7 = vld [vmem:[%s12633_s2 + $0x170] sm:$0xff]  ;;  %13237 = vst [vmem:[#allocation92_spill] sm:$0xff] %v9882_v23 }
  0x49   :  { %v9872_v4 = vand.u32 4294901760, %v211_v25  ;;  %v9879_v27 = vsub.f32 %v205_v18, %v9852_v50  ;;  %v9884_v59 = vand.u32 4294901760, %v214_v19  ;;  %v220_v18 = vsel %vm80_vm0, %v61_v7, 0 }
  0x4a   :  { %13233 = vst [vmem:[#allocation89_spill] sm:$0xff] %v9865_v34  ;;  %v703_v22 = vand.u32 4294901760, %v702_v24  ;;  %v713_v11 = vand.u32 4294901760, %v712_v56 }
  0x4b   :  { %7756 = vmatmul.mubr.f32.gmra.mrb[30].mxu0 %v653_v0  ;;  %13235 = vst [vmem:[#allocation90_spill] sm:$0xff] %v9872_v4  ;;  %v693_v0 = vand.u32 4294901760, %v692_v53  ;;  %13236 = vst [vmem:[#allocation91_spill] sm:$0xff] %v9879_v27  ;;  %v9900_v24 = vsub.f32 %v211_v25, %v9872_v4  ;;  %v9908_v50 = vsub.f32 %v214_v19, %v9884_v59 }
  0x4c   :  { %7758 = vmatprep.mubr.f32.mxu0 %v663_v20  ;;  %v217_v20 = vsel %vm80_vm0, %v60_v32, 0  ;;  %13238 = vst [vmem:[#allocation93_spill] sm:$0xff] %v9884_v59  ;;  %v722_v32 = vsub.f32 %v9833_v55, %v13239_v17  ;;  %v63_v17 = vld [vmem:[%s12633_s2 + $0x180] sm:$0xff]  ;;  %v13249_v59 = vand.u32 4294901760, %v9882_v23 }
  0x4d   :  { %v9893_v53 = vand.u32 4294901760, %v217_v20  ;;  %13242 = vst [vmem:[#allocation95_spill] sm:$0xff] %v9900_v24  ;;  %13243 = vst [vmem:[#allocation96_spill] sm:$0xff] %v9908_v50  ;;  %v226_v19 = vsel %vm80_vm0, %v63_v17, 0  ;;  %v12767_v17 = vand.u32 4294901760, %v9908_v50 }
  0x4e   :  { %v723_v7 = vand.u32 4294901760, %v722_v32 }
  0x4f   :  { %7759 = vmatmul.mubr.f32.gmra.mrb[32].mxu0 %v673_v43  ;;  %v62_v43 = vld [vmem:[%s12633_s2 + $0x178] sm:$0xff]  ;;  %13240 = vst [vmem:[#allocation94_spill] sm:$0xff] %v9893_v53  ;;  %v9920_v46 = vsub.f32 %v217_v20, %v9893_v53  ;;  %v762_v20 = vsub.f32 %v9882_v23, %v13249_v59  ;;  %v67_v59 = vld [vmem:[%s12633_s2 + $0x1a0] sm:$0xff]  ;;  %v782_v23 = vsub.f32 %v9908_v50, %v12767_v17 }
  0x50   :  { %7761 = vmatprep.mubr.f32.mxu0 %v683_v48  ;;  %v732_v48 = vsub.f32 %v9847_v31, %v13241_v33  ;;  %v223_v56 = vsel %vm80_vm0, %v62_v43, 0  ;;  %v13244_v33 = vand.u32 4294901760, %v9865_v34  ;;  %v9914_v31 = vand.u32 4294901760, %v220_v18 }
  0x51   :  { %13246 = vst [vmem:[#allocation98_spill] sm:$0xff] %v9920_v46  ;;  %v9927_v55 = vand.u32 4294901760, %v223_v56  ;;  %v9940_v43 = vand.u32 4294901760, %v226_v19  ;;  %v763_v13 = vand.u32 4294901760, %v762_v20  ;;  %v69_v20 = vld [vmem:[%s12633_s2 + $0x1b0] sm:$0xff]  ;;  %v13257_v17 = vand.u32 4294901760, %v9920_v46 }
  0x52   :  { %v742_v25 = vsub.f32 %v9865_v34, %v13244_v33  ;;  %13245 = vst [vmem:[#allocation97_spill] sm:$0xff] %v9914_v31  ;;  %v733_v32 = vand.u32 4294901760, %v732_v48  ;;  %v13248_v33 = vand.u32 4294901760, %v9879_v27  ;;  %v9938_v48 = vsub.f32 %v220_v18, %v9914_v31  ;;  %v68_v31 = vld [vmem:[%s12633_s2 + $0x1a8] sm:$0xff] }
  0x53   :  { %7762 = vmatmul.mubr.f32.gmra.mrb[34].mxu0 %v693_v0  ;;  %v64_v0 = vld [vmem:[%s12633_s2 + $0x188] sm:$0xff]  ;;  %13247 = vst [vmem:[#allocation99_spill] sm:$0xff] %v9927_v55  ;;  %13251 = vst [vmem:[#allocation101_spill] sm:$0xff] %v9940_v43  ;;  %v9954_v18 = vsub.f32 %v223_v56, %v9927_v55  ;;  %v9968_v56 = vsub.f32 %v226_v19, %v9940_v43  ;;  %v792_v50 = vsub.f32 %v9920_v46, %v13257_v17 }
  0x54   :  { %7764 = vmatprep.mubr.f32.mxu0 %v703_v22  ;;  %v65_v22 = vld [vmem:[%s12633_s2 + $0x190] sm:$0xff]  ;;  %v752_v34 = vsub.f32 %v9879_v27, %v13248_v33  ;;  %v229_v53 = vsel %vm80_vm0, %v64_v0, 0  ;;  %v743_v4 = vand.u32 4294901760, %v742_v25  ;;  %13250 = vst [vmem:[#allocation100_spill] sm:$0xff] %v9938_v48  ;;  %v66_v33 = vld [vmem:[%s12633_s2 + $0x198] sm:$0xff]  ;;  %v241_v19 = vsel %vm80_vm0, %v68_v31, 0 }
  0x55   :  { %13253 = vst [vmem:[#allocation102_spill] sm:$0xff] %v9954_v18  ;;  %v9956_v0 = vand.u32 4294901760, %v229_v53  ;;  %13256 = vst [vmem:[#allocation105_spill] sm:$0xff] %v9968_v56  ;;  %v244_v55 = vsel %vm80_vm0, %v69_v20, 0  ;;  %v783_v17 = vand.u32 4294901760, %v782_v23  ;;  %v70_v31 = vld [vmem:[%s12633_s2 + $0x1b8] sm:$0xff] }
  0x56   :  { %v10002_v20 = vand.u32 4294901760, %v241_v19  ;;  %v71_v23 = vld [vmem:[%s12633_s2 + $0x1c0] sm:$0xff] }
  0x57   :  { %7765 = vmatmul.mubr.f32.gmra.mrb[36].mxu0 %v713_v11  ;;  %v232_v11 = vsel %vm80_vm0, %v65_v22, 0  ;;  %13254 = vst [vmem:[#allocation103_spill] sm:$0xff] %v9956_v0  ;;  %v753_v22 = vand.u32 4294901760, %v752_v34  ;;  %v238_v34 = vsel %vm80_vm0, %v67_v59, 0 }
  0x58   :  { %7767 = vmatprep.mubr.f32.mxu0 %v723_v7  ;;  %v13252_v7 = vand.u32 4294901760, %v9900_v24  ;;  %v9961_v27 = vand.u32 4294901760, %v232_v11  ;;  %v9988_v43 = vand.u32 4294901760, %v238_v34  ;;  %13264 = vst [vmem:[#allocation110_spill] sm:$0xff] %v10002_v20 }
  0x5a   :  { %v772_v25 = vsub.f32 %v9900_v24, %v13252_v7  ;;  %13255 = vst [vmem:[#allocation104_spill] sm:$0xff] %v9961_v27  ;;  %v9980_v7 = vsub.f32 %v229_v53, %v9956_v0  ;;  %13261 = vst [vmem:[#allocation109_spill] sm:$0xff] %v9988_v43  ;;  %v250_v0 = vsel %vm80_vm0, %v71_v23, 0 }
  0x5b   :  { %7768 = vmatmul.mubr.f32.gmra.mrb[38].mxu0 %v733_v32  ;;  %v235_v32 = vsel %vm80_vm0, %v66_v33, 0  ;;  %v9984_v33 = vsub.f32 %v232_v11, %v9961_v27  ;;  %v793_v11 = vand.u32 4294901760, %v792_v50  ;;  %v10014_v50 = vsub.f32 %v238_v34, %v9988_v43 }
  0x5c   :  { %7770 = vmatprep.mubr.f32.mxu0 %v743_v4  ;;  %v773_v24 = vand.u32 4294901760, %v772_v25  ;;  %13258 = vst [vmem:[#allocation106_spill] sm:$0xff] %v9980_v7  ;;  %v9986_v59 = vand.u32 4294901760, %v235_v32  ;;  %v13262_v25 = vand.u32 4294901760, %v9938_v48 }
  0x5d   :  { %13259 = vst [vmem:[#allocation107_spill] sm:$0xff] %v9984_v33  ;;  %13267 = vst [vmem:[#allocation113_spill] sm:$0xff] %v10014_v50  ;;  %v13273_v23 = vand.u32 4294901760, %v9984_v33 }
  0x5e   :  { %13260 = vst [vmem:[#allocation108_spill] sm:$0xff] %v9986_v59  ;;  %v802_v4 = vsub.f32 %v9938_v48, %v13262_v25  ;;  %v10011_v53 = vsub.f32 %v235_v32, %v9986_v59  ;;  %v73_v32 = vld [vmem:[%s12633_s2 + $0x1d0] sm:$0xff]  ;;  %v10028_v25 = vsub.f32 %v241_v19, %v10002_v20  ;;  %v10043_v20 = vand.u32 4294901760, %v250_v0 }
  0x5f   :  { %7771 = vmatmul.mubr.f32.gmra.mrb[40].mxu0 %v753_v22  ;;  %v13263_v22 = vand.u32 4294901760, %v9954_v18 }
  0x60   :  { %7773 = vmatprep.mubr.f32.mxu0 %v763_v13  ;;  %v10004_v13 = vand.u32 4294901760, %v244_v55  ;;  %13266 = vst [vmem:[#allocation112_spill] sm:$0xff] %v10011_v53  ;;  %v803_v27 = vand.u32 4294901760, %v802_v4  ;;  %13269 = vst [vmem:[#allocation114_spill] sm:$0xff] %v10028_v25 }
  0x61   :  { %v812_v46 = vsub.f32 %v9954_v18, %v13263_v22  ;;  %v247_v22 = vsel %vm80_vm0, %v70_v31, 0  ;;  %v13268_v18 = vand.u32 4294901760, %v9968_v56  ;;  %13274 = vst [vmem:[#allocation117_spill] sm:$0xff] %v10043_v20 }
  0x62   :  { %13265 = vst [vmem:[#allocation111_spill] sm:$0xff] %v10004_v13  ;;  %v10031_v4 = vsub.f32 %v244_v55, %v10004_v13 }
  0x63   :  { %7774 = vmatmul.mubr.f32.gmra.mrb[42].mxu0 %v773_v24  ;;  %v822_v48 = vsub.f32 %v9968_v56, %v13268_v18  ;;  %v72_v24 = vld [vmem:[%s12633_s2 + $0x1c8] sm:$0xff]  ;;  %v813_v34 = vand.u32 4294901760, %v812_v46  ;;  %v13272_v18 = vand.u32 4294901760, %v9980_v7  ;;  %v842_v56 = vsub.f32 %v9984_v33, %v13273_v23 }
  0x64   :  { %7776 = vmatprep.mubr.f32.mxu0 %v783_v17  ;;  %13270 = vst [vmem:[#allocation115_spill] sm:$0xff] %v10031_v4  ;;  %v10033_v17 = vand.u32 4294901760, %v247_v22  ;;  %v253_v55 = vsel %vm80_vm0, %v72_v24, 0  ;;  %v13276_v24 = vand.u32 4294901760, %v10011_v53  ;;  %v13279_v23 = vand.u32 4294901760, %v10014_v50 }
  0x65   :  { %v832_v31 = vsub.f32 %v9980_v7, %v13272_v18  ;;  %v823_v19 = vand.u32 4294901760, %v822_v48  ;;  %v74_v18 = vld [vmem:[%s12633_s2 + $0x1d8] sm:$0xff]  ;;  %v10061_v46 = vand.u32 4294901760, %v253_v55  ;;  %v843_v7 = vand.u32 4294901760, %v842_v56 }
  0x66   :  { %13271 = vst [vmem:[#allocation116_spill] sm:$0xff] %v10033_v17  ;;  %v10053_v43 = vsub.f32 %v247_v22, %v10033_v17  ;;  %v862_v22 = vsub.f32 %v10014_v50, %v13279_v23  ;;  %v10069_v17 = vsub.f32 %v250_v0, %v10043_v20  ;;  %v13282_v56 = vand.u32 4294901760, %v10031_v4  ;;  %v77_v0 = vld [vmem:[%s12633_s2 + $0x1f0] sm:$0xff] }
  0x67   :  { %7777 = vmatmul.mubr.f32.gmra.mrb[44].mxu0 %v793_v11  ;;  %v256_v11 = vsel %vm80_vm0, %v73_v32, 0  ;;  %v833_v48 = vand.u32 4294901760, %v832_v31  ;;  %v852_v32 = vsub.f32 %v10011_v53, %v13276_v24  ;;  %13277 = vst [vmem:[#allocation119_spill] sm:$0xff] %v10061_v46  ;;  %v76_v24 = vld [vmem:[%s12633_s2 + $0x1e8] sm:$0xff]  ;;  %v13281_v53 = vand.u32 4294901760, %v10028_v25 }
  0x68   :  { %7779 = vmatprep.mubr.f32.mxu0 %v803_v27  ;;  %13275 = vst [vmem:[#allocation118_spill] sm:$0xff] %v10053_v43  ;;  %v75_v27 = vld [vmem:[%s12633_s2 + $0x1e0] sm:$0xff]  ;;  %v10063_v33 = vand.u32 4294901760, %v256_v11  ;;  %13280 = vst [vmem:[#allocation121_spill] sm:$0xff] %v10069_v17  ;;  %v882_v13 = vsub.f32 %v10031_v4, %v13282_v56  ;;  %v265_v23 = vsel %vm80_vm0, %v76_v24, 0 }
  0x69   :  { %v262_v31 = vsel %vm80_vm0, %v75_v27, 0  ;;  %v10087_v27 = vsub.f32 %v253_v55, %v10061_v46  ;;  %v78_v55 = vld [vmem:[%s12633_s2 + $0x1f8] sm:$0xff]  ;;  %v10110_v24 = vand.u32 4294901760, %v265_v23 }
  0x6a   :  { %13278 = vst [vmem:[#allocation120_spill] sm:$0xff] %v10063_v33  ;;  %v10090_v50 = vsub.f32 %v256_v11, %v10063_v33  ;;  %v10095_v4 = vand.u32 4294901760, %v262_v31  ;;  %v13286_v11 = vand.u32 4294901760, %v10053_v43 }
  0x6b   :  { %7780 = vmatmul.mubr.f32.gmra.mrb[46].mxu0 %v813_v34  ;;  %v259_v34 = vsel %vm80_vm0, %v74_v18, 0  ;;  %v853_v18 = vand.u32 4294901760, %v852_v32  ;;  %v883_v32 = vand.u32 4294901760, %v882_v13  ;;  %13288 = vst [vmem:[#allocation126_spill] sm:$0xff] %v10110_v24 }
  0x6c   :  { %7782 = vmatprep.mubr.f32.mxu0 %v823_v19  ;;  %v872_v19 = vsub.f32 %v10028_v25, %v13281_v53  ;;  %13283 = vst [vmem:[#allocation122_spill] sm:$0xff] %v10090_v50  ;;  %v10092_v20 = vand.u32 4294901760, %v259_v34  ;;  %v863_v53 = vand.u32 4294901760, %v862_v22  ;;  %13285 = vst [vmem:[#allocation124_spill] sm:$0xff] %v10095_v4  ;;  %v268_v25 = vsel %vm80_vm0, %v77_v0, 0 }
  0x6d   :  { %v892_v33 = vsub.f32 %v10053_v43, %v13286_v11  ;;  %v13289_v0 = vand.u32 4294901760, %v10069_v17  ;;  %v10116_v13 = vsub.f32 %v262_v31, %v10095_v4  ;;  %v10118_v46 = vand.u32 4294901760, %v268_v25 }
  0x6e   :  { %13284 = vst [vmem:[#allocation123_spill] sm:$0xff] %v10092_v20  ;;  %v10108_v56 = vsub.f32 %v259_v34, %v10092_v20 }
  0x6f   :  { %7783 = vmatmul.mubr.f32.gmra.mrb[48].mxu0 %v833_v48  ;;  %v873_v48 = vand.u32 4294901760, %v872_v19  ;;  %v902_v19 = vsub.f32 %v10069_v17, %v13289_v0  ;;  %13290 = vst [vmem:[#allocation127_spill] sm:$0xff] %v10116_v13  ;;  %13291 = vst [vmem:[#allocation128_spill] sm:$0xff] %v10118_v46  ;;  %v893_v11 = vand.u32 4294901760, %v892_v33  ;;  %v13293_v0 = vand.u32 4294901760, %v10090_v50 }
  0x70   :  { %7785 = vmatprep.mubr.f32.mxu0 %v843_v7  ;;  %v12818_v7 = vand.u32 4294901760, %v10087_v27  ;;  %13287 = vst [vmem:[#allocation125_spill] sm:$0xff] %v10108_v56  ;;  %v12819_v22 = vand.u32 4294901760, %v10108_v56  ;;  %v12825_v33 = vand.u32 4294901760, %v10116_v13 }
  0x71   :  { %v903_v31 = vand.u32 4294901760, %v902_v19  ;;  %v922_v17 = vsub.f32 %v10090_v50, %v13293_v0 }
  0x72   :  { %v912_v34 = vsub.f32 %v10087_v27, %v12818_v7  ;;  %v942_v0 = vsub.f32 %v10116_v13, %v12825_v33  ;;  %v13310_v33 = vld [vmem:[#allocation104_spill] sm:$0xff] }
  0x73   :  { %7786 = vmatmul.mubr.f32.gmra.mrb[50].mxu0 %v853_v18  ;;  %v271_v18 = vsel %vm80_vm0, %v78_v55, 0  ;;  %v10135_v55 = vsub.f32 %v268_v25, %v10118_v46  ;;  %v923_v19 = vand.u32 4294901760, %v922_v17 }
  0x74   :  { %7788 = vmatprep.mubr.f32.mxu0 %v863_v53  ;;  %v10126_v53 = vsub.f32 %v265_v23, %v10110_v24  ;;  %v10128_v43 = vand.u32 4294901760, %v271_v18  ;;  %v932_v23 = vsub.f32 %v10108_v56, %v12819_v22  ;;  %v943_v56 = vand.u32 4294901760, %v942_v0  ;;  %v13299_v0 = vld [vmem:[#allocation83_spill] sm:$0xff] }
  0x75   :  { %13294 = vst [vmem:[#allocation130_spill] sm:$0xff] %v10135_v55  ;;  %v12823_v25 = vand.u32 4294901760, %v10135_v55 }
  0x76   :  { %13292 = vst [vmem:[#allocation129_spill] sm:$0xff] %v10128_v43  ;;  %v12824_v7 = vand.u32 4294901760, %v10126_v53 }
  0x77   :  { %7789 = vmatmul.mubr.f32.gmra.mrb[52].mxu0 %v873_v48  ;;  %v913_v48 = vand.u32 4294901760, %v912_v34  ;;  %v962_v17 = vsub.f32 %v10135_v55, %v12823_v25  ;;  %v13308_v25 = vld [vmem:[#allocation101_spill] sm:$0xff] }
  0x78   :  { %7791 = vmatprep.mubr.f32.mxu0 %v883_v32  ;;  %v10142_v32 = vsub.f32 %v271_v18, %v10128_v43  ;;  %v952_v34 = vsub.f32 %v10126_v53, %v12824_v7  ;;  %v13309_v7 = vld [vmem:[#allocation103_spill] sm:$0xff] }
  0x7a   :  { %13295 = vst [vmem:[#allocation131_spill] sm:$0xff] %v10142_v32  ;;  %v12822_v22 = vand.u32 4294901760, %v10142_v32  ;;  %v953_v18 = vand.u32 4294901760, %v952_v34  ;;  %v13301_v34 = vld [vmem:[#allocation87_spill] sm:$0xff] }
  0x7b   :  { %7792 = vmatmul.mubr.f32.gmra.mrb[54].mxu0 %v893_v11  ;;  %v933_v11 = vand.u32 4294901760, %v932_v23 }
  0x7c   :  { %7794 = vmatprep.mubr.f32.mxu0 %v903_v31  ;;  %v972_v31 = vsub.f32 %v10142_v32, %v12822_v22  ;;  %v13307_v22 = vld [vmem:[#allocation99_spill] sm:$0xff] }
  0x7e   :  { %v973_v23 = vand.u32 4294901760, %v972_v31  ;;  %v13304_v31 = vld [vmem:[#allocation93_spill] sm:$0xff] }
  0x7f   :  { %7795 = vmatmul.mubr.f32.gmra.mrb[56].mxu0 %v913_v48  ;;  %v963_v48 = vand.u32 4294901760, %v962_v17  ;;  %v13302_v17 = vld [vmem:[#allocation88_spill] sm:$0xff] }
  0x80   :  { %7797 = vmatprep.mubr.f32.mxu0 %v923_v19  ;;  %v13298_v19 = vld [vmem:[#allocation81_spill] sm:$0xff] }
  0x83   :  { %7798 = vmatmul.mubr.f32.gmra.mrb[58].mxu0 %v933_v11  ;;  %v13300_v11 = vld [vmem:[#allocation85_spill] sm:$0xff] }
  0x84   :  { %7800 = vmatprep.mubr.f32.mxu0 %v943_v56  ;;  %v13297_v56 = vld [vmem:[#allocation77_spill] sm:$0xff] }
  0x87   :  { %7801 = vmatmul.mubr.f32.gmra.mrb[60].mxu0 %v953_v18  ;;  %v13303_v18 = vld [vmem:[#allocation90_spill] sm:$0xff] }
  0x88   :  { %7803 = vmatprep.mubr.f32.mxu0 %v963_v48  ;;  %v13305_v48 = vld [vmem:[#allocation94_spill] sm:$0xff] }
  0x8b   :  { %7804 = vmatmul.mubr.f32.gmra.mrb[62].mxu0 %v973_v23  ;;  %v13306_v23 = vld [vmem:[#allocation97_spill] sm:$0xff] }
  0x8c   :  { %7808 = vmatprep.mubr.f32.mxu0 %v9332_v9  ;;  %v13374_v9 = vld [vmem:[#allocation118_spill] sm:$0xff] }
  0x8f   :  { %7809 = vmatmul.mubr.f32.vlgmr.msra.gmra.mrb[0].mxu0 %v9334_v10  ;;  %v13373_v10 = vld [vmem:[#allocation115_spill] sm:$0xff] }
  0x90   :  { %7905 = vmatpush3.msra.mxu0 %v9343_v14  ;;  %7811 = vmatprep.mubr.f32.mxu0 %v9345_v15  ;;  %v13296_v14 = vld [vmem:[#allocation76_spill] sm:$0xff]  ;;  %v13372_v15 = vld [vmem:[#allocation114_spill] sm:$0xff] }
  0x91   :  { %8002 = vmatprep.subr.mxu0 %v9319_v3 }
  0x93   :  { %7812 = vmatmul.mubr.f32.gmra.mrb[2].mxu0 %v9347_v16  ;;  %v13371_v16 = vld [vmem:[#allocation113_spill] sm:$0xff] }
  0x94   :  { %7814 = vmatprep.mubr.f32.mxu0 %v9360_v21  ;;  %v13370_v21 = vld [vmem:[#allocation112_spill] sm:$0xff] }
  0x97   :  { %7815 = vmatmul.mubr.f32.gmra.mrb[4].mxu0 %v9372_v26  ;;  %v13369_v26 = vld [vmem:[#allocation107_spill] sm:$0xff] }
  0x98   :  { %7817 = vmatprep.mubr.f32.mxu0 %v9394_v38  ;;  %v13368_v38 = vld [vmem:[#allocation106_spill] sm:$0xff] }
  0x9b   :  { %7818 = vmatmul.mubr.f32.gmra.mrb[6].mxu0 %v9429_v58  ;;  %v13367_v58 = vld [vmem:[#allocation105_spill] sm:$0xff] }
  0x9c   :  { %7820 = vmatprep.mubr.f32.mxu0 %v9438_v63  ;;  %v13366_v63 = vld [vmem:[#allocation102_spill] sm:$0xff] }
  0x9f   :  { %7821 = vmatmul.mubr.f32.gmra.mrb[8].mxu0 %v9448_v5  ;;  %v13365_v5 = vld [vmem:[#allocation100_spill] sm:$0xff] }
  0xa0   :  { %7823 = vmatprep.mubr.f32.mxu0 %v9450_v6  ;;  %v13364_v6 = vld [vmem:[#allocation98_spill] sm:$0xff] }
  0xa3   :  { %7824 = vmatmul.mubr.f32.gmra.mrb[10].mxu0 %v9470_v35  ;;  %v13363_v35 = vld [vmem:[#allocation96_spill] sm:$0xff] }
  0xa4   :  { %7826 = vmatprep.mubr.f32.mxu0 %v9472_v36  ;;  %v13362_v36 = vld [vmem:[#allocation95_spill] sm:$0xff] }
  0xa7   :  { %7827 = vmatmul.mubr.f32.gmra.mrb[12].mxu0 %v9474_v39  ;;  %v13361_v39 = vld [vmem:[#allocation92_spill] sm:$0xff] }
  0xa8   :  { %7829 = vmatprep.mubr.f32.mxu0 %v9497_v52  ;;  %v13360_v52 = vld [vmem:[#allocation91_spill] sm:$0xff] }
  0xab   :  { %7830 = vmatmul.mubr.f32.gmra.mrb[14].mxu0 %v9521_v8  ;;  %v13359_v8 = vld [vmem:[#allocation89_spill] sm:$0xff] }
  0xac   :  { %7832 = vmatprep.mubr.f32.mxu0 %v9542_v61  ;;  %v13358_v61 = vld [vmem:[#allocation86_spill] sm:$0xff] }
  0xaf   :  { %7833 = vmatmul.mubr.f32.gmra.mrb[16].mxu0 %v9544_v42  ;;  %v13357_v42 = vld [vmem:[#allocation84_spill] sm:$0xff] }
  0xb0   :  { %7835 = vmatprep.mubr.f32.mxu0 %v9546_v41  ;;  %v13356_v41 = vld [vmem:[#allocation82_spill] sm:$0xff] }
  0xb3   :  { %7836 = vmatmul.mubr.f32.gmra.mrb[18].mxu0 %v9569_v44  ;;  %v13355_v44 = vld [vmem:[#allocation80_spill] sm:$0xff] }
  0xb4   :  { %7838 = vmatprep.mubr.f32.mxu0 %v9576_v2  ;;  %v13354_v2 = vld [vmem:[#allocation79_spill] sm:$0xff] }
  0xb7   :  { %7839 = vmatmul.mubr.f32.gmra.mrb[20].mxu0 %v9586_v51  ;;  %v13353_v51 = vld [vmem:[#allocation75_spill] sm:$0xff] }
  0xb8   :  { %7841 = vmatprep.mubr.f32.mxu0 %v9592_v62  ;;  %v13352_v62 = vld [vmem:[#allocation74_spill] sm:$0xff] }
  0xbb   :  { %7842 = vmatmul.mubr.f32.gmra.mrb[22].mxu0 %v9616_v12  ;;  %v13351_v12 = vld [vmem:[#allocation73_spill] sm:$0xff] }
  0xbc   :  { %7844 = vmatprep.mubr.f32.mxu0 %v9628_v57  ;;  %v13350_v57 = vld [vmem:[#allocation70_spill] sm:$0xff] }
  0xbf   :  { %7845 = vmatmul.mubr.f32.gmra.mrb[24].mxu0 %v9638_v40  ;;  %v13349_v40 = vld [vmem:[#allocation69_spill] sm:$0xff] }
  0xc0   :  { %7847 = vmatprep.mubr.f32.mxu0 %v9647_v37  ;;  %v13348_v37 = vld [vmem:[#allocation66_spill] sm:$0xff] }
  0xc3   :  { %7848 = vmatmul.mubr.f32.gmra.mrb[26].mxu0 %v9664_v45  ;;  %v13347_v45 = vld [vmem:[#allocation64_spill] sm:$0xff] }
  0xc4   :  { %7850 = vmatprep.mubr.f32.mxu0 %v9680_v30  ;;  %v13346_v30 = vld [vmem:[#allocation63_spill] sm:$0xff] }
  0xc7   :  { %7851 = vmatmul.mubr.f32.gmra.mrb[28].mxu0 %v9685_v54  ;;  %v13345_v54 = vld [vmem:[#allocation60_spill] sm:$0xff] }
  0xc8   :  { %7853 = vmatprep.mubr.f32.mxu0 %v9706_v28  ;;  %v13344_v28 = vld [vmem:[#allocation58_spill] sm:$0xff] }
  0xcb   :  { %7854 = vmatmul.mubr.f32.gmra.mrb[30].mxu0 %v9722_v60  ;;  %v13343_v60 = vld [vmem:[#allocation57_spill] sm:$0xff] }
  0xcc   :  { %7856 = vmatprep.mubr.f32.mxu0 %v9727_v47  ;;  %v13342_v47 = vld [vmem:[#allocation54_spill] sm:$0xff] }
  0xcf   :  { %7857 = vmatmul.mubr.f32.gmra.mrb[32].mxu0 %v9748_v49  ;;  %v13341_v49 = vld [vmem:[#allocation52_spill] sm:$0xff] }
  0xd0   :  { %7859 = vmatprep.mubr.f32.mxu0 %v9750_v1  ;;  %v13340_v1 = vld [vmem:[#allocation50_spill] sm:$0xff] }
  0xd3   :  { %7860 = vmatmul.mubr.f32.gmra.mrb[34].mxu0 %v13296_v14  ;;  %v13339_v14 = vld [vmem:[#allocation49_spill] sm:$0xff] }
  0xd4   :  { %7862 = vmatprep.mubr.f32.mxu0 %v13297_v56  ;;  %v13338_v56 = vld [vmem:[#allocation47_spill] sm:$0xff] }
  0xd7   :  { %7863 = vmatmul.mubr.f32.gmra.mrb[36].mxu0 %v9795_v29  ;;  %v13337_v29 = vld [vmem:[#allocation43_spill] sm:$0xff] }
  0xd8   :  { %7865 = vmatprep.mubr.f32.mxu0 %v13298_v19  ;;  %v13336_v19 = vld [vmem:[#allocation42_spill] sm:$0xff] }
  0xdb   :  { %7866 = vmatmul.mubr.f32.gmra.mrb[38].mxu0 %v13299_v0  ;;  %v13335_v0 = vld [vmem:[#allocation41_spill] sm:$0xff] }
  0xdc   :  { %7868 = vmatprep.mubr.f32.mxu0 %v13300_v11  ;;  %v13334_v11 = vld [vmem:[#allocation37_spill] sm:$0xff] }
  0xdf   :  { %7869 = vmatmul.mubr.f32.gmra.mrb[40].mxu0 %v13301_v34  ;;  %v13311_v34 = vld [vmem:[#allocation109_spill] sm:$0xff] }
  0xe0   :  { %7871 = vmatprep.mubr.f32.mxu0 %v13302_v17  ;;  %v13312_v17 = vld [vmem:[#allocation110_spill] sm:$0xff] }
  0xe3   :  { %7872 = vmatmul.mubr.f32.gmra.mrb[42].mxu0 %v13303_v18  ;;  %v13313_v18 = vld [vmem:[#allocation111_spill] sm:$0xff] }
  0xe4   :  { %7874 = vmatprep.mubr.f32.mxu0 %v13304_v31  ;;  %v13314_v31 = vld [vmem:[#allocation116_spill] sm:$0xff] }
  0xe7   :  { %7875 = vmatmul.mubr.f32.gmra.mrb[44].mxu0 %v13305_v48  ;;  %v13315_v48 = vld [vmem:[#allocation117_spill] sm:$0xff] }
  0xe8   :  { %7877 = vmatprep.mubr.f32.mxu0 %v13306_v23  ;;  %v13316_v23 = vld [vmem:[#allocation119_spill] sm:$0xff] }
  0xeb   :  { %7878 = vmatmul.mubr.f32.gmra.mrb[46].mxu0 %v13307_v22  ;;  %v13317_v22 = vld [vmem:[#allocation120_spill] sm:$0xff] }
  0xec   :  { %7880 = vmatprep.mubr.f32.mxu0 %v13308_v25  ;;  %v13333_v25 = vld [vmem:[#allocation35_spill] sm:$0xff] }
  0xef   :  { %7881 = vmatmul.mubr.f32.gmra.mrb[48].mxu0 %v13309_v7  ;;  %v13332_v7 = vld [vmem:[#allocation33_spill] sm:$0xff] }
  0xf0   :  { %7883 = vmatprep.mubr.f32.mxu0 %v13310_v33  ;;  %v13331_v33 = vld [vmem:[#allocation32_spill] sm:$0xff] }
  0xf3   :  { %7884 = vmatmul.mubr.f32.gmra.mrb[50].mxu0 %v9986_v59  ;;  %v13330_v59 = vld [vmem:[#allocation31_spill] sm:$0xff] }
  0xf4   :  { %7886 = vmatprep.mubr.f32.mxu0 %v13311_v34  ;;  %v13329_v34 = vld [vmem:[#allocation27_spill] sm:$0xff] }
  0xf7   :  { %7887 = vmatmul.mubr.f32.gmra.mrb[52].mxu0 %v13312_v17  ;;  %v13318_v17 = vld [vmem:[#allocation9_spill] sm:$0xff] }
  0xf8   :  { %7889 = vmatprep.mubr.f32.mxu0 %v13313_v18  ;;  %v13319_v18 = vld [vmem:[#allocation10_spill] sm:$0xff] }
  0xfb   :  { %7890 = vmatmul.mubr.f32.gmra.mrb[54].mxu0 %v13314_v31  ;;  %v13328_v31 = vld [vmem:[#allocation26_spill] sm:$0xff] }
  0xfc   :  { %7892 = vmatprep.mubr.f32.mxu0 %v13315_v48  ;;  %v13320_v48 = vld [vmem:[#allocation13_spill] sm:$0xff] }
  0xff   :  { %7893 = vmatmul.mubr.f32.gmra.mrb[56].mxu0 %v13316_v23  ;;  %v13321_v23 = vld [vmem:[#allocation12_spill] sm:$0xff] }
 0x100   :  { %7895 = vmatprep.mubr.f32.mxu0 %v13317_v22  ;;  %v13322_v22 = vld [vmem:[#allocation14_spill] sm:$0xff] }
 0x103   :  { %7896 = vmatmul.mubr.f32.gmra.mrb[58].mxu0 %v10092_v20  ;;  %v13323_v20 = vld [vmem:[#allocation16_spill] sm:$0xff] }
 0x104   :  { %7898 = vmatprep.mubr.f32.mxu0 %v10095_v4  ;;  %v13324_v4 = vld [vmem:[#allocation17_spill] sm:$0xff] }
 0x107   :  { %7899 = vmatmul.mubr.f32.gmra.mrb[60].mxu0 %v10110_v24  ;;  %v13325_v24 = vld [vmem:[#allocation19_spill] sm:$0xff] }
 0x108   :  { %7901 = vmatprep.mubr.f32.mxu0 %v10118_v46  ;;  %v13326_v46 = vld [vmem:[#allocation22_spill] sm:$0xff] }
 0x10b   :  { %7902 = vmatmul.mubr.f32.gmra.mrb[62].mxu0 %v10128_v43  ;;  %v13327_v43 = vld [vmem:[#allocation25_spill] sm:$0xff] }
 0x10c   :  { %7906 = vmatprep.mubr.f32.mxu0 %v13318_v17 }
 0x10f   :  { %7907 = vmatmul.mubr.f32.vlgmr.msra.gmra.mrb[0].mxu0 %v13319_v18 }
 0x110   :  { %8003 = vmatpush3.msra.mxu0 %v9319_v3  ;;  %7909 = vmatprep.mubr.f32.mxu0 %v13320_v48 }
 0x111   :  { %8100 = vmatprep.subr.mxu0 %v13321_v23 }
 0x113   :  { %7910 = vmatmul.mubr.f32.gmra.mrb[2].mxu0 %v13322_v22 }
 0x114   :  { %7912 = vmatprep.mubr.f32.mxu0 %v13323_v20 }
 0x117   :  { %7913 = vmatmul.mubr.f32.gmra.mrb[4].mxu0 %v13324_v4 }
 0x118   :  { %7915 = vmatprep.mubr.f32.mxu0 %v13325_v24 }
 0x11b   :  { %7916 = vmatmul.mubr.f32.gmra.mrb[6].mxu0 %v13326_v46 }
 0x11c   :  { %7918 = vmatprep.mubr.f32.mxu0 %v13327_v43 }
 0x11f   :  { %7919 = vmatmul.mubr.f32.gmra.mrb[8].mxu0 %v13328_v31 }
 0x120   :  { %7921 = vmatprep.mubr.f32.mxu0 %v13329_v34 }
 0x123   :  { %7922 = vmatmul.mubr.f32.gmra.mrb[10].mxu0 %v13330_v59 }
 0x124   :  { %7924 = vmatprep.mubr.f32.mxu0 %v13331_v33 }
 0x127   :  { %7925 = vmatmul.mubr.f32.gmra.mrb[12].mxu0 %v13332_v7 }
 0x128   :  { %7927 = vmatprep.mubr.f32.mxu0 %v13333_v25 }
 0x12b   :  { %7928 = vmatmul.mubr.f32.gmra.mrb[14].mxu0 %v13334_v11 }
 0x12c   :  { %7930 = vmatprep.mubr.f32.mxu0 %v13335_v0 }
 0x12f   :  { %7931 = vmatmul.mubr.f32.gmra.mrb[16].mxu0 %v13336_v19 }
 0x130   :  { %7933 = vmatprep.mubr.f32.mxu0 %v13337_v29 }
 0x133   :  { %7934 = vmatmul.mubr.f32.gmra.mrb[18].mxu0 %v13338_v56 }
 0x134   :  { %7936 = vmatprep.mubr.f32.mxu0 %v13339_v14 }
 0x137   :  { %7937 = vmatmul.mubr.f32.gmra.mrb[20].mxu0 %v13340_v1 }
 0x138   :  { %7939 = vmatprep.mubr.f32.mxu0 %v13341_v49 }
 0x13b   :  { %7940 = vmatmul.mubr.f32.gmra.mrb[22].mxu0 %v13342_v47 }
 0x13c   :  { %7942 = vmatprep.mubr.f32.mxu0 %v13343_v60 }
 0x13f   :  { %7943 = vmatmul.mubr.f32.gmra.mrb[24].mxu0 %v13344_v28 }
 0x140   :  { %7945 = vmatprep.mubr.f32.mxu0 %v13345_v54 }
 0x143   :  { %7946 = vmatmul.mubr.f32.gmra.mrb[26].mxu0 %v13346_v30 }
 0x144   :  { %7948 = vmatprep.mubr.f32.mxu0 %v13347_v45 }
 0x147   :  { %7949 = vmatmul.mubr.f32.gmra.mrb[28].mxu0 %v13348_v37 }
 0x148   :  { %7951 = vmatprep.mubr.f32.mxu0 %v13349_v40 }
 0x14b   :  { %7952 = vmatmul.mubr.f32.gmra.mrb[30].mxu0 %v13350_v57 }
 0x14c   :  { %7954 = vmatprep.mubr.f32.mxu0 %v13351_v12 }
 0x14f   :  { %7955 = vmatmul.mubr.f32.gmra.mrb[32].mxu0 %v13352_v62 }
 0x150   :  { %7957 = vmatprep.mubr.f32.mxu0 %v13353_v51 }
 0x153   :  { %7958 = vmatmul.mubr.f32.gmra.mrb[34].mxu0 %v13354_v2 }
 0x154   :  { %7960 = vmatprep.mubr.f32.mxu0 %v13355_v44 }
 0x157   :  { %7961 = vmatmul.mubr.f32.gmra.mrb[36].mxu0 %v13356_v41 }
 0x158   :  { %7963 = vmatprep.mubr.f32.mxu0 %v13357_v42 }
 0x15b   :  { %7964 = vmatmul.mubr.f32.gmra.mrb[38].mxu0 %v13358_v61 }
 0x15c   :  { %7966 = vmatprep.mubr.f32.mxu0 %v13359_v8 }
 0x15f   :  { %7967 = vmatmul.mubr.f32.gmra.mrb[40].mxu0 %v13360_v52 }
 0x160   :  { %7969 = vmatprep.mubr.f32.mxu0 %v13361_v39 }
 0x163   :  { %7970 = vmatmul.mubr.f32.gmra.mrb[42].mxu0 %v13362_v36 }
 0x164   :  { %7972 = vmatprep.mubr.f32.mxu0 %v13363_v35 }
 0x167   :  { %7973 = vmatmul.mubr.f32.gmra.mrb[44].mxu0 %v13364_v6  ;;  %v13375_v6 = vld [vmem:[#allocation121_spill] sm:$0xff] }
 0x168   :  { %7975 = vmatprep.mubr.f32.mxu0 %v13365_v5 }
 0x16b   :  { %7976 = vmatmul.mubr.f32.gmra.mrb[46].mxu0 %v13366_v63 }
 0x16c   :  { %7978 = vmatprep.mubr.f32.mxu0 %v13367_v58  ;;  %v13376_v58 = vld [vmem:[#allocation125_spill] sm:$0xff] }
 0x16f   :  { %7979 = vmatmul.mubr.f32.gmra.mrb[48].mxu0 %v13368_v38 }
 0x170   :  { %7981 = vmatprep.mubr.f32.mxu0 %v13369_v26 }
 0x173   :  { %7982 = vmatmul.mubr.f32.gmra.mrb[50].mxu0 %v13370_v21 }
 0x174   :  { %7984 = vmatprep.mubr.f32.mxu0 %v13371_v16 }
 0x177   :  { %7985 = vmatmul.mubr.f32.gmra.mrb[52].mxu0 %v13372_v15 }
 0x178   :  { %7987 = vmatprep.mubr.f32.mxu0 %v13373_v10  ;;  %v13377_v10 = vand.u32 4294901760, %v13318_v17  ;;  %v13385_v17 = vand.u32 4294901760, %v13327_v43  ;;  %v13392_v43 = vand.u32 4294901760, %v13334_v11 }
 0x17b   :  { %7988 = vmatmul.mubr.f32.gmra.mrb[54].mxu0 %v13374_v9  ;;  %v13378_v9 = vand.u32 4294901760, %v13319_v18  ;;  %v13431_v18 = vand.u32 4294901760, %v13371_v16  ;;  %v13441_v16 = vand.u32 4294901760, %v13376_v58 }
 0x17c   :  { %7990 = vmatprep.mubr.f32.mxu0 %v13375_v6 }
 0x17f   :  { %7991 = vmatmul.mubr.f32.gmra.mrb[56].mxu0 %v10087_v27 }
 0x180   :  { %7993 = vmatprep.mubr.f32.mxu0 %v10090_v50  ;;  %v13379_v50 = vand.u32 4294901760, %v13320_v48  ;;  %v13435_v48 = vld [vmem:[#allocation118_spill] sm:$0xff] }
 0x183   :  { %7994 = vmatmul.mubr.f32.gmra.mrb[58].mxu0 %v13376_v58  ;;  %v13451_v58 = vld [vmem:[#allocation7_spill] sm:$0xff] }
 0x184   :  { %7996 = vmatprep.mubr.f32.mxu0 %v10116_v13  ;;  %v13380_v13 = vand.u32 4294901760, %v13322_v22  ;;  %v13387_v22 = vand.u32 4294901760, %v13329_v34 }
 0x187   :  { %7997 = vmatmul.mubr.f32.gmra.mrb[60].mxu0 %v10126_v53 }
 0x188   :  { %7999 = vmatprep.mubr.f32.mxu0 %v10135_v55  ;;  %v13381_v55 = vand.u32 4294901760, %v13323_v20  ;;  %v13388_v20 = vand.u32 4294901760, %v13330_v59  ;;  %v13395_v59 = vand.u32 4294901760, %v13337_v29  ;;  %v13402_v29 = vand.u32 4294901760, %v13344_v28 }
 0x189   :  { %v13409_v28 = vand.u32 4294901760, %v13351_v12  ;;  %v13416_v12 = vand.u32 4294901760, %v13358_v61  ;;  %v13424_v61 = vand.u32 4294901760, %v13365_v5  ;;  %v13432_v5 = vand.u32 4294901760, %v13372_v15  ;;  %v13442_v15 = vld [vmem:[#allocation127_spill] sm:$0xff] }
 0x18b   :  { %8000 = vmatmul.mubr.f32.gmra.mrb[62].mxu0 %v10142_v32  ;;  %v13382_v32 = vand.u32 4294901760, %v13324_v4  ;;  %v13389_v4 = vand.u32 4294901760, %v13331_v33  ;;  %v13396_v33 = vand.u32 4294901760, %v13338_v56  ;;  %v13403_v56 = vand.u32 4294901760, %v13345_v54 }
 0x18c   :  { %8004 = vmatprep.mubr.f32.mxu0 %v13377_v10  ;;  %v13383_v10 = vand.u32 4294901760, %v13325_v24  ;;  %v13390_v24 = vand.u32 4294901760, %v13332_v7  ;;  %v13397_v7 = vand.u32 4294901760, %v13339_v14  ;;  %v13404_v14 = vand.u32 4294901760, %v13346_v30 }
 0x18d   :  { %v13410_v54 = vand.u32 4294901760, %v13352_v62  ;;  %v13411_v30 = vand.u32 4294901760, %v13353_v51  ;;  %v13417_v62 = vand.u32 4294901760, %v13359_v8  ;;  %v13418_v51 = vand.u32 4294901760, %v13360_v52  ;;  %v13426_v52 = vld [vmem:[#allocation105_spill] sm:$0xff] }
 0x18e   :  { %v13425_v8 = vand.u32 4294901760, %v13366_v63  ;;  %v13427_v34 = vand.u32 4294901760, %v13426_v52  ;;  %v13433_v63 = vld [vmem:[#allocation115_spill] sm:$0xff] }
 0x18f   :  { %8005 = vmatmul.mubr.f32.vlgmr.msra.gmra.mrb[0].mxu0 %v13378_v9  ;;  %v13384_v9 = vand.u32 4294901760, %v13326_v46  ;;  %v13391_v46 = vand.u32 4294901760, %v13333_v25  ;;  %v13399_v25 = vand.u32 4294901760, %v13341_v49  ;;  %v13406_v49 = vand.u32 4294901760, %v13348_v37  ;;  %v13490_v52 = vld [vmem:[#allocation87_spill] sm:$0xff] }
 0x190   :  { %8101 = vmatpush3.msra.mxu0 %v13321_v23  ;;  %8007 = vmatprep.mubr.f32.mxu0 %v13379_v50  ;;  %v13386_v50 = vand.u32 4294901760, %v13328_v31  ;;  %v13413_v37 = vand.u32 4294901760, %v13355_v44  ;;  %v13420_v44 = vand.u32 4294901760, %v13362_v36  ;;  %v13429_v36 = vand.u32 4294901760, %v13369_v26 }
 0x191   :  { %8198 = vmatprep.subr.mxu0 %v9319_v3  ;;  %v13434_v31 = vand.u32 4294901760, %v13433_v63  ;;  %v13436_v23 = vand.u32 4294901760, %v13435_v48  ;;  %v13438_v26 = vand.u32 4294901760, %v10087_v27  ;;  %v13449_v27 = vld [vmem:[#allocation5_spill] sm:$0xff]  ;;  %v13499_v48 = vld [vmem:[#allocation104_spill] sm:$0xff] }
 0x192   :  { %v13497_v63 = vld [vmem:[#allocation101_spill] sm:$0xff] }
 0x193   :  { %8008 = vmatmul.mubr.f32.gmra.mrb[2].mxu0 %v13380_v13  ;;  %v13393_v13 = vand.u32 4294901760, %v13335_v0  ;;  %v13400_v0 = vand.u32 4294901760, %v13342_v47  ;;  %v13407_v47 = vand.u32 4294901760, %v13349_v40  ;;  %v13414_v40 = vand.u32 4294901760, %v13356_v41 }
 0x194   :  { %8010 = vmatprep.mubr.f32.mxu0 %v13381_v55  ;;  %v13394_v55 = vand.u32 4294901760, %v13336_v19  ;;  %v13401_v19 = vand.u32 4294901760, %v13343_v60  ;;  %v13408_v60 = vand.u32 4294901760, %v13350_v57  ;;  %v13415_v57 = vand.u32 4294901760, %v13357_v42  ;;  %v13422_v42 = vld [vmem:[#allocation98_spill] sm:$0xff] }
 0x195   :  { %v13421_v41 = vand.u32 4294901760, %v13363_v35  ;;  %v13423_v11 = vand.u32 4294901760, %v13422_v42  ;;  %v13430_v35 = vand.u32 4294901760, %v13370_v21  ;;  %v13439_v21 = vld [vmem:[#allocation122_spill] sm:$0xff] }
 0x196   :  { %v13486_v42 = vld [vmem:[#allocation78_spill] sm:$0xff] }
 0x197   :  { %8011 = vmatmul.mubr.f32.gmra.mrb[4].mxu0 %v13382_v32  ;;  %v13398_v32 = vand.u32 4294901760, %v13340_v1  ;;  %v13405_v1 = vand.u32 4294901760, %v13347_v45  ;;  %v13412_v45 = vand.u32 4294901760, %v13354_v2  ;;  %v13419_v2 = vand.u32 4294901760, %v13361_v39 }
 0x198   :  { %8013 = vmatprep.mubr.f32.mxu0 %v13383_v10  ;;  %v13428_v39 = vand.u32 4294901760, %v13368_v38  ;;  %v13437_v38 = vand.u32 4294901760, %v13375_v6  ;;  %v13440_v10 = vand.u32 4294901760, %v13439_v21  ;;  %v13447_v6 = vld [vmem:[#allocation131_spill] sm:$0xff] }
 0x199   :  { %v13503_v21 = vld [vmem:[#allocation111_spill] sm:$0xff] }
 0x19b   :  { %8014 = vmatmul.mubr.f32.gmra.mrb[6].mxu0 %v13384_v9  ;;  %v13443_v9 = vand.u32 4294901760, %v13442_v15  ;;  %v13506_v15 = vld [vmem:[#allocation119_spill] sm:$0xff] }
 0x19c   :  { %8016 = vmatprep.mubr.f32.mxu0 %v13385_v17  ;;  %v13444_v17 = vand.u32 4294901760, %v10126_v53  ;;  %v13454_v53 = vld [vmem:[#allocation15_spill] sm:$0xff] }
 0x19f   :  { %8017 = vmatmul.mubr.f32.gmra.mrb[8].mxu0 %v13386_v50  ;;  %v13445_v50 = vld [vmem:[#allocation130_spill] sm:$0xff] }
 0x1a0   :  { %8019 = vmatprep.mubr.f32.mxu0 %v13387_v22  ;;  %v13446_v22 = vand.u32 4294901760, %v13445_v50  ;;  %v13509_v50 = vld [vmem:[#allocation124_spill] sm:$0xff] }
 0x1a3   :  { %8020 = vmatmul.mubr.f32.gmra.mrb[10].mxu0 %v13388_v20  ;;  %v13448_v20 = vand.u32 4294901760, %v13447_v6  ;;  %v13511_v6 = vld [vmem:[#allocation128_spill] sm:$0xff] }
 0x1a4   :  { %8022 = vmatprep.mubr.f32.mxu0 %v13389_v4  ;;  %v13450_v4 = vld [vmem:[#allocation6_spill] sm:$0xff] }
 0x1a7   :  { %8023 = vmatmul.mubr.f32.gmra.mrb[12].mxu0 %v13390_v24  ;;  %v13452_v24 = vld [vmem:[#allocation8_spill] sm:$0xff] }
 0x1a8   :  { %8025 = vmatprep.mubr.f32.mxu0 %v13391_v46  ;;  %v13453_v46 = vld [vmem:[#allocation11_spill] sm:$0xff] }
 0x1ab   :  { %8026 = vmatmul.mubr.f32.gmra.mrb[14].mxu0 %v13392_v43  ;;  %v13455_v43 = vld [vmem:[#allocation18_spill] sm:$0xff] }
 0x1ac   :  { %8028 = vmatprep.mubr.f32.mxu0 %v13393_v13  ;;  %v13456_v13 = vld [vmem:[#allocation20_spill] sm:$0xff] }
 0x1af   :  { %8029 = vmatmul.mubr.f32.gmra.mrb[16].mxu0 %v13394_v55  ;;  %v13457_v55 = vld [vmem:[#allocation21_spill] sm:$0xff] }
 0x1b0   :  { %8031 = vmatprep.mubr.f32.mxu0 %v13395_v59  ;;  %v13458_v59 = vld [vmem:[#allocation23_spill] sm:$0xff] }
 0x1b3   :  { %8032 = vmatmul.mubr.f32.gmra.mrb[18].mxu0 %v13396_v33  ;;  %v13459_v33 = vld [vmem:[#allocation24_spill] sm:$0xff] }
 0x1b4   :  { %8034 = vmatprep.mubr.f32.mxu0 %v13397_v7  ;;  %v13460_v7 = vld [vmem:[#allocation28_spill] sm:$0xff] }
 0x1b7   :  { %8035 = vmatmul.mubr.f32.gmra.mrb[20].mxu0 %v13398_v32  ;;  %v13462_v32 = vld [vmem:[#allocation30_spill] sm:$0xff] }
 0x1b8   :  { %8037 = vmatprep.mubr.f32.mxu0 %v13399_v25  ;;  %v13463_v25 = vld [vmem:[#allocation34_spill] sm:$0xff] }
 0x1bb   :  { %8038 = vmatmul.mubr.f32.gmra.mrb[22].mxu0 %v13400_v0  ;;  %v13464_v0 = vld [vmem:[#allocation36_spill] sm:$0xff] }
 0x1bc   :  { %8040 = vmatprep.mubr.f32.mxu0 %v13401_v19  ;;  %v13465_v19 = vld [vmem:[#allocation38_spill] sm:$0xff] }
 0x1bf   :  { %8041 = vmatmul.mubr.f32.gmra.mrb[24].mxu0 %v13402_v29  ;;  %v13466_v29 = vld [vmem:[#allocation39_spill] sm:$0xff] }
 0x1c0   :  { %8043 = vmatprep.mubr.f32.mxu0 %v13403_v56  ;;  %v13467_v56 = vld [vmem:[#allocation40_spill] sm:$0xff] }
 0x1c3   :  { %8044 = vmatmul.mubr.f32.gmra.mrb[26].mxu0 %v13404_v14  ;;  %v13468_v14 = vld [vmem:[#allocation44_spill] sm:$0xff] }
 0x1c4   :  { %8046 = vmatprep.mubr.f32.mxu0 %v13405_v1  ;;  %v13469_v1 = vld [vmem:[#allocation45_spill] sm:$0xff] }
 0x1c7   :  { %8047 = vmatmul.mubr.f32.gmra.mrb[28].mxu0 %v13406_v49  ;;  %v13470_v49 = vld [vmem:[#allocation46_spill] sm:$0xff] }
 0x1c8   :  { %8049 = vmatprep.mubr.f32.mxu0 %v13407_v47  ;;  %v13471_v47 = vld [vmem:[#allocation48_spill] sm:$0xff] }
 0x1cb   :  { %8050 = vmatmul.mubr.f32.gmra.mrb[30].mxu0 %v13408_v60  ;;  %v13472_v60 = vld [vmem:[#allocation51_spill] sm:$0xff] }
 0x1cc   :  { %8052 = vmatprep.mubr.f32.mxu0 %v13409_v28  ;;  %v13473_v28 = vld [vmem:[#allocation53_spill] sm:$0xff] }
 0x1cf   :  { %8053 = vmatmul.mubr.f32.gmra.mrb[32].mxu0 %v13410_v54  ;;  %v13474_v54 = vld [vmem:[#allocation55_spill] sm:$0xff] }
 0x1d0   :  { %8055 = vmatprep.mubr.f32.mxu0 %v13411_v30  ;;  %v13475_v30 = vld [vmem:[#allocation56_spill] sm:$0xff] }
 0x1d3   :  { %8056 = vmatmul.mubr.f32.gmra.mrb[34].mxu0 %v13412_v45  ;;  %v13476_v45 = vld [vmem:[#allocation59_spill] sm:$0xff] }
 0x1d4   :  { %8058 = vmatprep.mubr.f32.mxu0 %v13413_v37  ;;  %v13477_v37 = vld [vmem:[#allocation61_spill] sm:$0xff] }
 0x1d7   :  { %8059 = vmatmul.mubr.f32.gmra.mrb[36].mxu0 %v13414_v40  ;;  %v13478_v40 = vld [vmem:[#allocation62_spill] sm:$0xff] }
 0x1d8   :  { %8061 = vmatprep.mubr.f32.mxu0 %v13415_v57  ;;  %v13479_v57 = vld [vmem:[#allocation65_spill] sm:$0xff] }
 0x1db   :  { %8062 = vmatmul.mubr.f32.gmra.mrb[38].mxu0 %v13416_v12  ;;  %v13480_v12 = vld [vmem:[#allocation67_spill] sm:$0xff] }
 0x1dc   :  { %8064 = vmatprep.mubr.f32.mxu0 %v13417_v62  ;;  %v13481_v62 = vld [vmem:[#allocation68_spill] sm:$0xff] }
 0x1df   :  { %8065 = vmatmul.mubr.f32.gmra.mrb[40].mxu0 %v13418_v51  ;;  %v13482_v51 = vld [vmem:[#allocation71_spill] sm:$0xff] }
 0x1e0   :  { %8067 = vmatprep.mubr.f32.mxu0 %v13419_v2  ;;  %v13483_v2 = vld [vmem:[#allocation72_spill] sm:$0xff] }
 0x1e3   :  { %8068 = vmatmul.mubr.f32.gmra.mrb[42].mxu0 %v13420_v44  ;;  %v13484_v44 = vld [vmem:[#allocation76_spill] sm:$0xff] }
 0x1e4   :  { %8070 = vmatprep.mubr.f32.mxu0 %v13421_v41  ;;  %v13485_v41 = vld [vmem:[#allocation77_spill] sm:$0xff] }
 0x1e7   :  { %8071 = vmatmul.mubr.f32.gmra.mrb[44].mxu0 %v13423_v11  ;;  %v13487_v11 = vld [vmem:[#allocation81_spill] sm:$0xff] }
 0x1e8   :  { %8073 = vmatprep.mubr.f32.mxu0 %v13424_v61  ;;  %v13488_v61 = vld [vmem:[#allocation83_spill] sm:$0xff] }
 0x1eb   :  { %8074 = vmatmul.mubr.f32.gmra.mrb[46].mxu0 %v13425_v8  ;;  %v13489_v8 = vld [vmem:[#allocation85_spill] sm:$0xff] }
 0x1ec   :  { %8076 = vmatprep.mubr.f32.mxu0 %v13427_v34  ;;  %v13491_v34 = vld [vmem:[#allocation88_spill] sm:$0xff] }
 0x1ef   :  { %8077 = vmatmul.mubr.f32.gmra.mrb[48].mxu0 %v13428_v39  ;;  %v13492_v39 = vld [vmem:[#allocation90_spill] sm:$0xff] }
 0x1f0   :  { %8079 = vmatprep.mubr.f32.mxu0 %v13429_v36  ;;  %v13493_v36 = vld [vmem:[#allocation93_spill] sm:$0xff] }
 0x1f3   :  { %8080 = vmatmul.mubr.f32.gmra.mrb[50].mxu0 %v13430_v35  ;;  %v13494_v35 = vld [vmem:[#allocation94_spill] sm:$0xff] }
 0x1f4   :  { %8082 = vmatprep.mubr.f32.mxu0 %v13431_v18  ;;  %v13495_v18 = vld [vmem:[#allocation97_spill] sm:$0xff] }
 0x1f7   :  { %8083 = vmatmul.mubr.f32.gmra.mrb[52].mxu0 %v13432_v5  ;;  %v13496_v5 = vld [vmem:[#allocation99_spill] sm:$0xff] }
 0x1f8   :  { %8085 = vmatprep.mubr.f32.mxu0 %v13434_v31  ;;  %v13498_v31 = vld [vmem:[#allocation103_spill] sm:$0xff] }
 0x1fb   :  { %8086 = vmatmul.mubr.f32.gmra.mrb[54].mxu0 %v13436_v23  ;;  %v13500_v23 = vld [vmem:[#allocation108_spill] sm:$0xff] }
 0x1fc   :  { %8088 = vmatprep.mubr.f32.mxu0 %v13437_v38  ;;  %v13501_v38 = vld [vmem:[#allocation109_spill] sm:$0xff] }
 0x1ff   :  { %8089 = vmatmul.mubr.f32.gmra.mrb[56].mxu0 %v13438_v26  ;;  %v13502_v26 = vld [vmem:[#allocation110_spill] sm:$0xff] }
 0x200   :  { %8091 = vmatprep.mubr.f32.mxu0 %v13440_v10  ;;  %v13504_v10 = vld [vmem:[#allocation116_spill] sm:$0xff] }
 0x203   :  { %8092 = vmatmul.mubr.f32.gmra.mrb[58].mxu0 %v13441_v16  ;;  %v13505_v16 = vld [vmem:[#allocation117_spill] sm:$0xff] }
 0x204   :  { %8094 = vmatprep.mubr.f32.mxu0 %v13443_v9  ;;  %v13507_v9 = vld [vmem:[#allocation120_spill] sm:$0xff] }
 0x207   :  { %8095 = vmatmul.mubr.f32.gmra.mrb[60].mxu0 %v13444_v17  ;;  %v13508_v17 = vld [vmem:[#allocation123_spill] sm:$0xff] }
 0x208   :  { %8097 = vmatprep.mubr.f32.mxu0 %v13446_v22  ;;  %v13510_v22 = vld [vmem:[#allocation126_spill] sm:$0xff] }
 0x20b   :  { %8098 = vmatmul.mubr.f32.gmra.mrb[62].mxu0 %v13448_v20  ;;  %v13512_v20 = vld [vmem:[#allocation129_spill] sm:$0xff] }
 0x20c   :  { %8102 = vmatprep.mubr.f32.mxu0 %v13449_v27 }
 0x20f   :  { %8103 = vmatmul.mubr.f32.vlgmr.msra.gmra.mrb[0].mxu0 %v13450_v4 }
 0x210   :  { %8199 = vmatpush3.msra.mxu0 %v9319_v3  ;;  %8105 = vmatprep.mubr.f32.mxu0 %v13451_v58  ;;  %v13461_v3 = vld [vmem:[#allocation29_spill] sm:$0xff] }
 0x213   :  { %8106 = vmatmul.mubr.f32.gmra.mrb[2].mxu0 %v13452_v24 }
 0x214   :  { %8108 = vmatprep.mubr.f32.mxu0 %v13453_v46 }
 0x217   :  { %8109 = vmatmul.mubr.f32.gmra.mrb[4].mxu0 %v13454_v53 }
 0x218   :  { %8111 = vmatprep.mubr.f32.mxu0 %v13455_v43 }
 0x21b   :  { %8112 = vmatmul.mubr.f32.gmra.mrb[6].mxu0 %v13456_v13 }
 0x21c   :  { %8114 = vmatprep.mubr.f32.mxu0 %v13457_v55 }
 0x21f   :  { %8115 = vmatmul.mubr.f32.gmra.mrb[8].mxu0 %v13458_v59 }
 0x220   :  { %8117 = vmatprep.mubr.f32.mxu0 %v13459_v33 }
 0x223   :  { %8118 = vmatmul.mubr.f32.gmra.mrb[10].mxu0 %v13460_v7 }
 0x224   :  { %8120 = vmatprep.mubr.f32.mxu0 %v13461_v3 }
 0x227   :  { %8121 = vmatmul.mubr.f32.gmra.mrb[12].mxu0 %v13462_v32 }
 0x228   :  { %8123 = vmatprep.mubr.f32.mxu0 %v13463_v25 }
 0x22b   :  { %8124 = vmatmul.mubr.f32.gmra.mrb[14].mxu0 %v13464_v0 }
 0x22c   :  { %8126 = vmatprep.mubr.f32.mxu0 %v13465_v19 }
 0x22f   :  { %8127 = vmatmul.mubr.f32.gmra.mrb[16].mxu0 %v13466_v29 }
 0x230   :  { %8129 = vmatprep.mubr.f32.mxu0 %v13467_v56 }
 0x233   :  { %8130 = vmatmul.mubr.f32.gmra.mrb[18].mxu0 %v13468_v14 }
 0x234   :  { %8132 = vmatprep.mubr.f32.mxu0 %v13469_v1 }
 0x237   :  { %8133 = vmatmul.mubr.f32.gmra.mrb[20].mxu0 %v13470_v49 }
 0x238   :  { %8135 = vmatprep.mubr.f32.mxu0 %v13471_v47 }
 0x23b   :  { %8136 = vmatmul.mubr.f32.gmra.mrb[22].mxu0 %v13472_v60 }
 0x23c   :  { %8138 = vmatprep.mubr.f32.mxu0 %v13473_v28 }
 0x23f   :  { %8139 = vmatmul.mubr.f32.gmra.mrb[24].mxu0 %v13474_v54 }
 0x240   :  { %8141 = vmatprep.mubr.f32.mxu0 %v13475_v30 }
 0x243   :  { %8142 = vmatmul.mubr.f32.gmra.mrb[26].mxu0 %v13476_v45 }
 0x244   :  { %8144 = vmatprep.mubr.f32.mxu0 %v13477_v37 }
 0x247   :  { %8145 = vmatmul.mubr.f32.gmra.mrb[28].mxu0 %v13478_v40 }
 0x248   :  { %8147 = vmatprep.mubr.f32.mxu0 %v13479_v57 }
 0x24b   :  { %8148 = vmatmul.mubr.f32.gmra.mrb[30].mxu0 %v13480_v12 }
 0x24c   :  { %8150 = vmatprep.mubr.f32.mxu0 %v13481_v62 }
 0x24f   :  { %8151 = vmatmul.mubr.f32.gmra.mrb[32].mxu0 %v13482_v51 }
 0x250   :  { %8153 = vmatprep.mubr.f32.mxu0 %v13483_v2 }
 0x253   :  { %8154 = vmatmul.mubr.f32.gmra.mrb[34].mxu0 %v13484_v44 }
 0x254   :  { %8156 = vmatprep.mubr.f32.mxu0 %v13485_v41 }
 0x257   :  { %8157 = vmatmul.mubr.f32.gmra.mrb[36].mxu0 %v13486_v42 }
 0x258   :  { %8159 = vmatprep.mubr.f32.mxu0 %v13487_v11 }
 0x25b   :  { %8160 = vmatmul.mubr.f32.gmra.mrb[38].mxu0 %v13488_v61 }
 0x25c   :  { %8162 = vmatprep.mubr.f32.mxu0 %v13489_v8 }
 0x25f   :  { %8163 = vmatmul.mubr.f32.gmra.mrb[40].mxu0 %v13490_v52 }
 0x260   :  { %8165 = vmatprep.mubr.f32.mxu0 %v13491_v34 }
 0x263   :  { %8166 = vmatmul.mubr.f32.gmra.mrb[42].mxu0 %v13492_v39 }
 0x264   :  { %8168 = vmatprep.mubr.f32.mxu0 %v13493_v36 }
 0x267   :  { %8169 = vmatmul.mubr.f32.gmra.mrb[44].mxu0 %v13494_v35 }
 0x268   :  { %8171 = vmatprep.mubr.f32.mxu0 %v13495_v18 }
 0x26b   :  { %8172 = vmatmul.mubr.f32.gmra.mrb[46].mxu0 %v13496_v5 }
 0x26c   :  { %8174 = vmatprep.mubr.f32.mxu0 %v13497_v63 }
 0x26f   :  { %8175 = vmatmul.mubr.f32.gmra.mrb[48].mxu0 %v13498_v31 }
 0x270   :  { %8177 = vmatprep.mubr.f32.mxu0 %v13499_v48 }
 0x273   :  { %8178 = vmatmul.mubr.f32.gmra.mrb[50].mxu0 %v13500_v23 }
 0x274   :  { %8180 = vmatprep.mubr.f32.mxu0 %v13501_v38 }
 0x277   :  { %8181 = vmatmul.mubr.f32.gmra.mrb[52].mxu0 %v13502_v26 }
 0x278   :  { %8183 = vmatprep.mubr.f32.mxu0 %v13503_v21 }
 0x27b   :  { %8184 = vmatmul.mubr.f32.gmra.mrb[54].mxu0 %v13504_v10 }
 0x27c   :  { %8186 = vmatprep.mubr.f32.mxu0 %v13505_v16 }
 0x27f   :  { %8187 = vmatmul.mubr.f32.gmra.mrb[56].mxu0 %v13506_v15 }
 0x280   :  { %8189 = vmatprep.mubr.f32.mxu0 %v13507_v9 }
 0x283   :  { %8190 = vmatmul.mubr.f32.gmra.mrb[58].mxu0 %v13508_v17 }
 0x284   :  { %8192 = vmatprep.mubr.f32.mxu0 %v13509_v50 }
 0x287   :  { %8193 = vmatmul.mubr.f32.gmra.mrb[60].mxu0 %v13510_v22 }
 0x288   :  { %8195 = vmatprep.mubr.f32.mxu0 %v13511_v6 }
 0x28b   :  { %8196 = vmatmul.mubr.f32.gmra.mrb[62].mxu0 %v13512_v20 }
 0x28c   :  { %8200 = vmatprep.mubr.f32.mxu0 %v13449_v27  ;;  %v3429_v27 = vld [vmem:[%s12632_s1 + $0x8] sm:$0xff] }
 0x28f   :  { %8201 = vmatmul.mubr.f32.vlgmr.msra.gmra.mrb[0].mxu0 %v13450_v4  ;;  %v10536_v4 = vand.u32 4294901760, %v3429_v27 }
 0x290   :  { %8203 = vmatprep.mubr.f32.mxu0 %v13451_v58  ;;  %v3428_v58 = vld [vmem:[%s12632_s1] sm:$0xff]  ;;  %s9287_s1 = smov [#allocation2]  }
 0x291   :  { %13513 = vst [vmem:[#allocation9_spill] sm:$0xff] %v10536_v4  ;;  %3623 = vmatprep.subr.mxu0 %v10536_v4  ;;  %s7307_s5 = sshll.u32 %s9287_s1, 4  ;;  %s7308_s5 = int_to_ptr.vmem [resolvable:$true] %s7307_s5 }
 0x292   :  { %s9262_s6 = scalar_lea.vmem %s7308_s5, 16384  ;;  %p9267_p1 = scmp.lt.s32.totalorder %s7308_s5, %s7308_s5 }
 0x293   :  { %8204 = vmatmul.mubr.f32.gmra.mrb[2].mxu0 %v13452_v24  ;;  %v10542_v24 = vand.u32 4294901760, %v3428_v58  ;;  %p9263_p0 = scmp.ne.s32.totalorder %s7308_s5, %s9262_s6  ;;  %p9268_p2 = scmp.lt.s32.totalorder %s9262_s6, %s9262_s6 }
 0x294   :  { %8206 = vmatprep.mubr.f32.mxu0 %v13453_v46  ;;  %v12937_v46 = vmov 0.0  }
 0x295   :  { %13514 = vst [vmem:[#allocation10_spill] sm:$0xff] %v10542_v24  ;;  %3625 = vmatpush1.msra.mxu0 %v10542_v24  ;;  %4691 = vmatprep.mubr.f32.mxu1 %v12937_v46  ;;  %p9269_p3 = por %p9268_p2, %p9267_p1 }
 0x297   :  { %8207 = vmatmul.mubr.f32.gmra.mrb[4].mxu0 %v13454_v53  ;;  %v10564_v53 = vsub.f32 %v3429_v27, %v10536_v4  ;;  %p9270_p4 = pnand %p9269_p3, %p9263_p0 }
 0x298   :  { %8209 = vmatprep.mubr.f32.mxu0 %v13455_v43  ;;  %v10567_v43 = vsub.f32 %v3428_v58, %v10542_v24 }
 0x29a   :  { %13515 = vst [vmem:[#allocation13_spill] sm:$0xff] %v10567_v43 }
 0x29b   :  { %8210 = vmatmul.mubr.f32.gmra.mrb[6].mxu0 %v13456_v13  ;;  %v12929_v13 = vand.u32 4294901760, %v10564_v53 }
 0x29c   :  { %8212 = vmatprep.mubr.f32.mxu0 %v13457_v55  ;;  %v12926_v55 = vand.u32 4294901760, %v10567_v43 }
 0x29f   :  { %8213 = vmatmul.mubr.f32.gmra.mrb[8].mxu0 %v13458_v59  ;;  %v4396_v59 = vsub.f32 %v10564_v53, %v12929_v13 }
 0x2a0   :  { %8215 = vmatprep.mubr.f32.mxu0 %v13459_v33  ;;  %v4402_v33 = vsub.f32 %v10567_v43, %v12926_v55 }
 0x2a3   :  { %8216 = vmatmul.mubr.f32.gmra.mrb[10].mxu0 %v13460_v7  ;;  %v4397_v7 = vand.u32 4294901760, %v4396_v59 }
 0x2a4   :  { %8218 = vmatprep.mubr.f32.mxu0 %v13461_v3  ;;  %v4403_v3 = vand.u32 4294901760, %v4402_v33 }
 0x2a5   :  { %8296 = vmatprep.subr.mxu1 %v4397_v7  ;;  %4398 = vmatprep.subr.mxu0 %v4397_v7 }
 0x2a6   :  { %8297 = vmatpush1.msra.mxu1 %v4403_v3 }
 0x2a7   :  { %8219 = vmatmul.mubr.f32.gmra.mrb[12].mxu0 %v13462_v32  ;;  %4918 = vmatprep.subr.mxu1 %v10564_v53 }
 0x2a8   :  { %8221 = vmatprep.mubr.f32.mxu0 %v13463_v25 }
 0x2ab   :  { %8222 = vmatmul.mubr.f32.gmra.mrb[14].mxu0 %v13464_v0 }
 0x2ac   :  { %8224 = vmatprep.mubr.f32.mxu0 %v13465_v19 }
 0x2af   :  { %8225 = vmatmul.mubr.f32.gmra.mrb[16].mxu0 %v13466_v29 }
 0x2b0   :  { %8227 = vmatprep.mubr.f32.mxu0 %v13467_v56 }
 0x2b3   :  { %8228 = vmatmul.mubr.f32.gmra.mrb[18].mxu0 %v13468_v14 }
 0x2b4   :  { %8230 = vmatprep.mubr.f32.mxu0 %v13469_v1 }
 0x2b7   :  { %8231 = vmatmul.mubr.f32.gmra.mrb[20].mxu0 %v13470_v49 }
 0x2b8   :  { %8233 = vmatprep.mubr.f32.mxu0 %v13471_v47 }
 0x2bb   :  { %8234 = vmatmul.mubr.f32.gmra.mrb[22].mxu0 %v13472_v60 }
 0x2bc   :  { %8236 = vmatprep.mubr.f32.mxu0 %v13473_v28 }
 0x2bf   :  { %8237 = vmatmul.mubr.f32.gmra.mrb[24].mxu0 %v13474_v54 }
 0x2c0   :  { %8239 = vmatprep.mubr.f32.mxu0 %v13475_v30 }
 0x2c3   :  { %8240 = vmatmul.mubr.f32.gmra.mrb[26].mxu0 %v13476_v45 }
 0x2c4   :  { %8242 = vmatprep.mubr.f32.mxu0 %v13477_v37 }
 0x2c7   :  { %8243 = vmatmul.mubr.f32.gmra.mrb[28].mxu0 %v13478_v40 }
 0x2c8   :  { %8245 = vmatprep.mubr.f32.mxu0 %v13479_v57 }
 0x2cb   :  { %8246 = vmatmul.mubr.f32.gmra.mrb[30].mxu0 %v13480_v12 }
 0x2cc   :  { %8248 = vmatprep.mubr.f32.mxu0 %v13481_v62 }
 0x2cf   :  { %8249 = vmatmul.mubr.f32.gmra.mrb[32].mxu0 %v13482_v51 }
 0x2d0   :  { %8251 = vmatprep.mubr.f32.mxu0 %v13483_v2 }
 0x2d3   :  { %8252 = vmatmul.mubr.f32.gmra.mrb[34].mxu0 %v13484_v44 }
 0x2d4   :  { %8254 = vmatprep.mubr.f32.mxu0 %v13485_v41 }
 0x2d7   :  { %8255 = vmatmul.mubr.f32.gmra.mrb[36].mxu0 %v13486_v42 }
 0x2d8   :  { %8257 = vmatprep.mubr.f32.mxu0 %v13487_v11 }
 0x2db   :  { %8258 = vmatmul.mubr.f32.gmra.mrb[38].mxu0 %v13488_v61 }
 0x2dc   :  { %8260 = vmatprep.mubr.f32.mxu0 %v13489_v8 }
 0x2df   :  { %8261 = vmatmul.mubr.f32.gmra.mrb[40].mxu0 %v13490_v52 }
 0x2e0   :  { %8263 = vmatprep.mubr.f32.mxu0 %v13491_v34 }
 0x2e3   :  { %8264 = vmatmul.mubr.f32.gmra.mrb[42].mxu0 %v13492_v39 }
 0x2e4   :  { %8266 = vmatprep.mubr.f32.mxu0 %v13493_v36 }
 0x2e7   :  { %8267 = vmatmul.mubr.f32.gmra.mrb[44].mxu0 %v13494_v35 }
 0x2e8   :  { %8269 = vmatprep.mubr.f32.mxu0 %v13495_v18 }
 0x2eb   :  { %8270 = vmatmul.mubr.f32.gmra.mrb[46].mxu0 %v13496_v5 }
 0x2ec   :  { %8272 = vmatprep.mubr.f32.mxu0 %v13497_v63 }
 0x2ef   :  { %8273 = vmatmul.mubr.f32.gmra.mrb[48].mxu0 %v13498_v31 }
 0x2f0   :  { %8275 = vmatprep.mubr.f32.mxu0 %v13499_v48 }
 0x2f3   :  { %8276 = vmatmul.mubr.f32.gmra.mrb[50].mxu0 %v13500_v23 }
 0x2f4   :  { %8278 = vmatprep.mubr.f32.mxu0 %v13501_v38 }
 0x2f7   :  { %8279 = vmatmul.mubr.f32.gmra.mrb[52].mxu0 %v13502_v26 }
 0x2f8   :  { %8281 = vmatprep.mubr.f32.mxu0 %v13503_v21 }
 0x2fb   :  { %8282 = vmatmul.mubr.f32.gmra.mrb[54].mxu0 %v13504_v10 }
 0x2fc   :  { %8284 = vmatprep.mubr.f32.mxu0 %v13505_v16 }
 0x2ff   :  { %8285 = vmatmul.mubr.f32.gmra.mrb[56].mxu0 %v13506_v15 }
 0x300   :  { %8287 = vmatprep.mubr.f32.mxu0 %v13507_v9 }
 0x303   :  { %8288 = vmatmul.mubr.f32.gmra.mrb[58].mxu0 %v13508_v17 }
 0x304   :  { %8290 = vmatprep.mubr.f32.mxu0 %v13509_v50 }
 0x307   :  { %8291 = vmatmul.mubr.f32.gmra.mrb[60].mxu0 %v13510_v22 }
 0x308   :  { %8293 = vmatprep.mubr.f32.mxu0 %v13511_v6 }
 0x30b   :  { %8294 = vmatmul.mubr.f32.gmra.mrb[62].mxu0 %v13512_v20 }
 0x30c   :  { %3688 = vmatprep.mubr.f32.mxu0 %v12937_v46 }
 0x362   :  { %v8202_v32 = vpop.f32.mrb[0].mxu0 }
 0x363   :  { %v3434_v25 = vsel %vm80_vm0, %v8202_v32, 0  ;;  %v3046_v0 = vpop.f32.mrb[1].mxu0 }
 0x364   :  { %v10579_v19 = vand.u32 4294901760, %v3434_v25  ;;  %v3431_v29 = vsel %vm80_vm0, %v3046_v0, 0 }
 0x365   :  { %v10582_v56 = vand.u32 4294901760, %v3431_v29 }
 0x366   :  { %13516 = vst [vmem:[#allocation12_spill] sm:$0xff] %v10579_v19  ;;  %v10585_v14 = vsub.f32 %v3434_v25, %v10579_v19  ;;  %v8205_v1 = vpop.f32.mrb[2].mxu0 }
 0x367   :  { %13517 = vst [vmem:[#allocation14_spill] sm:$0xff] %v10582_v56  ;;  %v10588_v49 = vsub.f32 %v3431_v29, %v10582_v56  ;;  %v3440_v47 = vsel %vm80_vm0, %v8205_v1, 0  ;;  %v3058_v60 = vpop.f32.mrb[3].mxu0 }
 0x368   :  { %v12925_v28 = vand.u32 4294901760, %v10585_v14  ;;  %v10592_v54 = vand.u32 4294901760, %v3440_v47  ;;  %v3437_v30 = vsel %vm80_vm0, %v3058_v60, 0 }
 0x369   :  { %v12928_v45 = vand.u32 4294901760, %v10588_v49  ;;  %v10596_v37 = vand.u32 4294901760, %v3437_v30 }
 0x36a   :  { %13518 = vst [vmem:[#allocation16_spill] sm:$0xff] %v10592_v54  ;;  %v8208_v40 = vpop.f32.mrb[4].mxu0  ;;  %v10605_v51 = vsub.f32 %v3440_v47, %v10592_v54  ;;  %v3703_v44 = vsub.f32 %v10585_v14, %v12925_v28 }
 0x36b   :  { %13519 = vst [vmem:[#allocation17_spill] sm:$0xff] %v10596_v37  ;;  %v3692_v57 = vsub.f32 %v10588_v49, %v12928_v45  ;;  %v10602_v12 = vsub.f32 %v3437_v30, %v10596_v37  ;;  %v3070_v62 = vpop.f32.mrb[5].mxu0  ;;  %v3446_v11 = vsel %vm80_vm0, %v8208_v40, 0 }
 0x36c   :  { %v3443_v2 = vsel %vm80_vm0, %v3070_v62, 0  ;;  %v12922_v34 = vand.u32 4294901760, %v10605_v51  ;;  %v10616_v39 = vand.u32 4294901760, %v3446_v11  ;;  %v3704_v35 = vand.u32 4294901760, %v3703_v44 }
 0x36d   :  { %v3693_v41 = vand.u32 4294901760, %v3692_v57  ;;  %v12924_v42 = vand.u32 4294901760, %v10602_v12  ;;  %v10613_v61 = vand.u32 4294901760, %v3443_v2 }
 0x36e   :  { %v8211_v8 = vpop.f32.mrb[6].mxu0  ;;  %13521 = vst [vmem:[#allocation22_spill] sm:$0xff] %v10616_v39  ;;  %v10627_v48 = vsub.f32 %v3446_v11, %v10616_v39  ;;  %v3725_v23 = vsub.f32 %v10605_v51, %v12922_v34 }
 0x36f   :  { %13520 = vst [vmem:[#allocation19_spill] sm:$0xff] %v10613_v61  ;;  %v3082_v52 = vpop.f32.mrb[7].mxu0  ;;  %3694 = vmatmul.mubr.f32.vlgmr.msra.gmra.mrb[64].mxu0 %v3693_v41  ;;  %v10620_v36 = vsub.f32 %v3443_v2, %v10613_v61  ;;  %v3714_v18 = vsub.f32 %v10602_v12, %v12924_v42  ;;  %v3452_v26 = vsel %vm80_vm0, %v8211_v8, 0 }
 0x370   :  { %3699 = vmatprep.mubr.f32.mxu0 %v12937_v46  ;;  %4404 = vmatpush1.msra.mxu0 %v4403_v3  ;;  %v3449_v5 = vsel %vm80_vm0, %v3082_v52, 0  ;;  %13523 = vst [vmem:[#allocation26_spill] sm:$0xff] %v10627_v48  ;;  %v12920_v9 = vand.u32 4294901760, %v10627_v48  ;;  %v10638_v17 = vand.u32 4294901760, %v3452_v26  ;;  %v3726_v22 = vand.u32 4294901760, %v3725_v23 }
 0x371   :  { %13522 = vst [vmem:[#allocation25_spill] sm:$0xff] %v10620_v36  ;;  %v12921_v38 = vand.u32 4294901760, %v10620_v36  ;;  %v10635_v21 = vand.u32 4294901760, %v3449_v5  ;;  %v3715_v10 = vand.u32 4294901760, %v3714_v18 }
 0x372   :  { %v8214_v63 = vpop.f32.mrb[8].mxu0  ;;  %13525 = vst [vmem:[#allocation31_spill] sm:$0xff] %v10638_v17  ;;  %v10649_v59 = vsub.f32 %v3452_v26, %v10638_v17  ;;  %v3747_v33 = vsub.f32 %v10627_v48, %v12920_v9 }
 0x373   :  { %v3094_v31 = vpop.f32.mrb[9].mxu0  ;;  %3705 = vmatmul.mubr.f32.gmra.mrb[66].mxu0 %v3704_v35  ;;  %13524 = vst [vmem:[#allocation27_spill] sm:$0xff] %v10635_v21  ;;  %v10642_v50 = vsub.f32 %v3449_v5, %v10635_v21  ;;  %v3736_v6 = vsub.f32 %v10620_v36, %v12921_v38  ;;  %v3458_v3 = vsel %vm80_vm0, %v8214_v63, 0 }
 0x374   :  { %3710 = vmatprep.mubr.f32.mxu0 %v12937_v46  ;;  %v3455_v20 = vsel %vm80_vm0, %v3094_v31, 0  ;;  %13527 = vst [vmem:[#allocation33_spill] sm:$0xff] %v10649_v59  ;;  %v12917_v1 = vand.u32 4294901760, %v10649_v59  ;;  %v10660_v47 = vand.u32 4294901760, %v3458_v3  ;;  %v3748_v30 = vand.u32 4294901760, %v3747_v33 }
 0x375   :  { %13526 = vst [vmem:[#allocation32_spill] sm:$0xff] %v10642_v50  ;;  %v12918_v7 = vand.u32 4294901760, %v10642_v50  ;;  %v10657_v32 = vand.u32 4294901760, %v3455_v20  ;;  %v3737_v25 = vand.u32 4294901760, %v3736_v6 }
 0x376   :  { %v8217_v16 = vpop.f32.mrb[10].mxu0  ;;  %13529 = vst [vmem:[#allocation37_spill] sm:$0xff] %v10660_v47  ;;  %v10673_v44 = vsub.f32 %v3458_v3, %v10660_v47  ;;  %v3769_v41 = vsub.f32 %v10649_v59, %v12917_v1 }
 0x377   :  { %v3106_v15 = vpop.f32.mrb[11].mxu0  ;;  %3716 = vmatmul.mubr.f32.gmra.mrb[68].mxu0 %v3715_v10  ;;  %13528 = vst [vmem:[#allocation35_spill] sm:$0xff] %v10657_v32  ;;  %v10664_v60 = vsub.f32 %v3455_v20, %v10657_v32  ;;  %v3758_v40 = vsub.f32 %v10642_v50, %v12918_v7  ;;  %v3464_v8 = vsel %vm80_vm0, %v8217_v16, 0 }
 0x378   :  { %3721 = vmatprep.mubr.f32.mxu0 %v12937_v46  ;;  %v3461_v57 = vsel %vm80_vm0, %v3106_v15, 0  ;;  %13531 = vst [vmem:[#allocation42_spill] sm:$0xff] %v10673_v44  ;;  %v12914_v63 = vand.u32 4294901760, %v10673_v44  ;;  %v10688_v31 = vand.u32 4294901760, %v3464_v8  ;;  %v3770_v26 = vand.u32 4294901760, %v3769_v41 }
 0x379   :  { %13530 = vst [vmem:[#allocation41_spill] sm:$0xff] %v10664_v60  ;;  %v12916_v11 = vand.u32 4294901760, %v10664_v60  ;;  %v10681_v52 = vand.u32 4294901760, %v3461_v57  ;;  %v3759_v35 = vand.u32 4294901760, %v3758_v40 }
 0x37a   :  { %v8220_v27 = vpop.f32.mrb[12].mxu0  ;;  %13533 = vst [vmem:[#allocation47_spill] sm:$0xff] %v10688_v31  ;;  %v10703_v6 = vsub.f32 %v3464_v8, %v10688_v31  ;;  %v3791_v20 = vsub.f32 %v10673_v44, %v12914_v63 }
 0x37b   :  { %v3118_v58 = vpop.f32.mrb[13].mxu0  ;;  %3727 = vmatmul.mubr.f32.gmra.mrb[70].mxu0 %v3726_v22  ;;  %13532 = vst [vmem:[#allocation43_spill] sm:$0xff] %v10681_v52  ;;  %v10692_v23 = vsub.f32 %v3461_v57, %v10681_v52  ;;  %v3780_v10 = vsub.f32 %v10664_v60, %v12916_v11  ;;  %v3470_v3 = vsel %vm80_vm0, %v8220_v27, 0 }
 0x37c   :  { %3732 = vmatprep.mubr.f32.mxu0 %v12937_v46  ;;  %v3467_v16 = vsel %vm80_vm0, %v3118_v58, 0  ;;  %13535 = vst [vmem:[#allocation50_spill] sm:$0xff] %v10703_v6  ;;  %v12919_v57 = vand.u32 4294901760, %v10703_v6  ;;  %v10718_v41 = vand.u32 4294901760, %v3470_v3 }
 0x37d   :  { %13534 = vst [vmem:[#allocation49_spill] sm:$0xff] %v10692_v23  ;;  %v12915_v33 = vand.u32 4294901760, %v10692_v23  ;;  %v3781_v58 = vand.u32 4294901760, %v3780_v10 }
 0x37e   :  { %v8223_v0 = vpop.f32.mrb[14].mxu0  ;;  %13537 = vst [vmem:[#allocation54_spill] sm:$0xff] %v10718_v41 }
 0x37f   :  { %v3130_v29 = vpop.f32.mrb[15].mxu0  ;;  %3738 = vmatmul.mubr.f32.gmra.mrb[72].mxu0 %v3737_v25  ;;  %v10711_v25 = vand.u32 4294901760, %v3467_v16  ;;  %v3802_v27 = vsub.f32 %v10692_v23, %v12915_v33  ;;  %v3476_v33 = vsel %vm80_vm0, %v8223_v0, 0 }
 0x380   :  { %3743 = vmatprep.mubr.f32.mxu0 %v12937_v46 }
 0x381   :  { %13536 = vst [vmem:[#allocation52_spill] sm:$0xff] %v10711_v25  ;;  %v10722_v8 = vsub.f32 %v3467_v16, %v10711_v25  ;;  %v3813_v16 = vsub.f32 %v10703_v6, %v12919_v57 }
 0x382   :  { %v10670_v62 = vpop.f32.mrb[16].mxu0 }
 0x383   :  { %v3142_v2 = vpop.f32.mrb[17].mxu0  ;;  %3749 = vmatmul.mubr.f32.gmra.mrb[74].mxu0 %v3748_v30  ;;  %13538 = vst [vmem:[#allocation57_spill] sm:$0xff] %v10722_v8  ;;  %v3814_v9 = vand.u32 4294901760, %v3813_v16 }
 0x384   :  { %3754 = vmatprep.mubr.f32.mxu0 %v12937_v46 }
 0x386   :  { %v10683_v18 = vpop.f32.mrb[18].mxu0 }
 0x387   :  { %v10685_v5 = vpop.f32.mrb[19].mxu0  ;;  %3760 = vmatmul.mubr.f32.gmra.mrb[76].mxu0 %v3759_v35  ;;  %v3792_v35 = vand.u32 4294901760, %v3791_v20  ;;  %v12923_v20 = vand.u32 4294901760, %v10722_v8 }
 0x388   :  { %3765 = vmatprep.mubr.f32.mxu0 %v12937_v46 }
 0x389   :  { %v3824_v0 = vsub.f32 %v10722_v8, %v12923_v20  ;;  %v3482_v20 = vsel %vm80_vm0, %v10670_v62, 0 }
 0x38a   :  { %v10698_v15 = vpop.f32.mrb[20].mxu0  ;;  %v10779_v55 = vand.u32 4294901760, %v3482_v20 }
 0x38b   :  { %v10700_v22 = vpop.f32.mrb[21].mxu0  ;;  %3771 = vmatmul.mubr.f32.gmra.mrb[78].mxu0 %v3770_v26  ;;  %v3473_v26 = vsel %vm80_vm0, %v3130_v29, 0  ;;  %v3803_v29 = vand.u32 4294901760, %v3802_v27  ;;  %v3479_v27 = vsel %vm80_vm0, %v3142_v2, 0  ;;  %v3825_v42 = vand.u32 4294901760, %v3824_v0 }
 0x38c   :  { %3776 = vmatprep.mubr.f32.mxu0 %v12937_v46  ;;  %v10741_v11 = vand.u32 4294901760, %v3473_v26  ;;  %v10772_v2 = vand.u32 4294901760, %v3479_v27  ;;  %13545 = vst [vmem:[#allocation70_spill] sm:$0xff] %v10779_v55  ;;  %v3485_v0 = vsel %vm80_vm0, %v10685_v5, 0 }
 0x38e   :  { %v10713_v30 = vpop.f32.mrb[22].mxu0  ;;  %13540 = vst [vmem:[#allocation60_spill] sm:$0xff] %v10741_v11  ;;  %v10752_v57 = vsub.f32 %v3473_v26, %v10741_v11  ;;  %13544 = vst [vmem:[#allocation69_spill] sm:$0xff] %v10772_v2 }
 0x38f   :  { %v10715_v40 = vpop.f32.mrb[23].mxu0  ;;  %3782 = vmatmul.mubr.f32.gmra.mrb[80].mxu0 %v3781_v58  ;;  %v10733_v58 = vsub.f32 %v3470_v3, %v10718_v41 }
 0x390   :  { %3787 = vmatprep.mubr.f32.mxu0 %v12937_v46  ;;  %13542 = vst [vmem:[#allocation64_spill] sm:$0xff] %v10752_v57  ;;  %v12932_v16 = vand.u32 4294901760, %v10752_v57  ;;  %v3497_v52 = vsel %vm80_vm0, %v10715_v40, 0 }
 0x391   :  { %13539 = vst [vmem:[#allocation58_spill] sm:$0xff] %v10733_v58  ;;  %v12927_v3 = vand.u32 4294901760, %v10733_v58 }
 0x392   :  { %v10728_v10 = vpop.f32.mrb[24].mxu0  ;;  %v3846_v62 = vsub.f32 %v10752_v57, %v12932_v16 }
 0x393   :  { %v10730_v63 = vpop.f32.mrb[25].mxu0  ;;  %3793 = vmatmul.mubr.f32.gmra.mrb[82].mxu0 %v3792_v35  ;;  %v10748_v35 = vand.u32 4294901760, %v3476_v33  ;;  %v3835_v26 = vsub.f32 %v10733_v58, %v12927_v3  ;;  %v10783_v3 = vsub.f32 %v3479_v27, %v10772_v2  ;;  %v10803_v2 = vand.u32 4294901760, %v3485_v0 }
 0x394   :  { %3798 = vmatprep.mubr.f32.mxu0 %v12937_v46 }
 0x395   :  { %13541 = vst [vmem:[#allocation63_spill] sm:$0xff] %v10748_v35  ;;  %13546 = vst [vmem:[#allocation73_spill] sm:$0xff] %v10783_v3  ;;  %v3836_v45 = vand.u32 4294901760, %v3835_v26  ;;  %v10818_v5 = vsub.f32 %v3485_v0, %v10803_v2 }
 0x396   :  { %v10743_v1 = vpop.f32.mrb[26].mxu0  ;;  %13549 = vst [vmem:[#allocation75_spill] sm:$0xff] %v10803_v2 }
 0x397   :  { %v10745_v7 = vpop.f32.mrb[27].mxu0  ;;  %3804 = vmatmul.mubr.f32.gmra.mrb[84].mxu0 %v3803_v29  ;;  %v10763_v29 = vsub.f32 %v3476_v33, %v10748_v35  ;;  %v3488_v33 = vsel %vm80_vm0, %v10683_v18, 0  ;;  %13553 = vst [vmem:[#allocation82_spill] sm:$0xff] %v10818_v5 }
 0x398   :  { %3809 = vmatprep.mubr.f32.mxu0 %v12937_v46  ;;  %v10813_v11 = vand.u32 4294901760, %v3488_v33 }
 0x399   :  { %13543 = vst [vmem:[#allocation66_spill] sm:$0xff] %v10763_v29  ;;  %v13548_v26 = vand.u32 4294901760, %v10763_v29 }
 0x39a   :  { %v10758_v38 = vpop.f32.mrb[28].mxu0  ;;  %13551 = vst [vmem:[#allocation80_spill] sm:$0xff] %v10813_v11  ;;  %v10835_v25 = vsub.f32 %v3488_v33, %v10813_v11 }
 0x39b   :  { %v10760_v34 = vpop.f32.mrb[29].mxu0  ;;  %3815 = vmatmul.mubr.f32.gmra.mrb[86].mxu0 %v3814_v9  ;;  %v3857_v16 = vsub.f32 %v10763_v29, %v13548_v26  ;;  %v13552_v26 = vmov 0.0  }
 0x39c   :  { %3820 = vmatprep.mubr.f32.mxu0 %v12937_v46  ;;  %13556 = vst [vmem:[#allocation86_spill] sm:$0xff] %v10835_v25  ;;  %v13564_v40 = vand.u32 4294901760, %v10835_v25 }
 0x39e   :  { %v10774_v28 = vpop.f32.mrb[30].mxu0 }
 0x39f   :  { %v10776_v9 = vpop.f32.mrb[31].mxu0  ;;  %3826 = vmatmul.mubr.f32.gmra.mrb[88].mxu0 %v3825_v42  ;;  %v10791_v42 = vsub.f32 %v3482_v20, %v10779_v55  ;;  %v3847_v20 = vand.u32 4294901760, %v3846_v62 }
 0x3a0   :  { %3831 = vmatprep.mubr.f32.mxu0 %v12937_v46 }
 0x3a1   :  { %13547 = vst [vmem:[#allocation74_spill] sm:$0xff] %v10791_v42 }
 0x3a2   :  { %v8250_v13 = vpop.f32.mrb[32].mxu0 }
 0x3a3   :  { %v3238_v35 = vpop.f32.mrb[33].mxu0  ;;  %3837 = vmatmul.mubr.f32.gmra.mrb[90].mxu0 %v3836_v45  ;;  %v10809_v55 = vsel %vm80_vm0, %v8250_v13, 0  ;;  %v3858_v13 = vand.u32 4294901760, %v3857_v16  ;;  %v3494_v16 = vsel %vm80_vm0, %v10698_v15, 0 }
 0x3a4   :  { %v10796_v27 = vsel %vm80_vm0, %v3238_v35, 0  ;;  %3842 = vmatprep.mubr.f32.mxu0 %v12937_v46  ;;  %v10821_v62 = vand.u32 4294901760, %v10809_v55  ;;  %v3491_v46 = vsel %vm80_vm0, %v10700_v22, 0  ;;  %v13557_v22 = vand.u32 4294901760, %v10791_v42 }
 0x3a5   :  { %v10806_v45 = vand.u32 4294901760, %v10796_v27  ;;  %v10855_v47 = vand.u32 4294901760, %v3494_v16 }
 0x3a6   :  { %v8253_v18 = vpop.f32.mrb[34].mxu0  ;;  %13554 = vst [vmem:[#allocation84_spill] sm:$0xff] %v10821_v62 }
 0x3a7   :  { %13550 = vst [vmem:[#allocation79_spill] sm:$0xff] %v10806_v45  ;;  %v3250_v35 = vpop.f32.mrb[35].mxu0  ;;  %3848 = vmatmul.mubr.f32.gmra.mrb[92].mxu0 %v3847_v20  ;;  %4693 = vmatmul.mubr.f32.vlgmr.msra.gmra.mrb[0].mxu1 %v10806_v45  ;;  %v13555_v20 = vand.u32 4294901760, %v10783_v3  ;;  %v10851_v11 = vsel %vm80_vm0, %v8253_v18, 0  ;;  %13560 = vst [vmem:[#allocation92_spill] sm:$0xff] %v10855_v47 }
 0x3a8   :  { %4921 = vmatpush1.msra.mxu1 %v10567_v43  ;;  %3853 = vmatprep.mubr.f32.mxu0 %v13552_v26  ;;  %v10831_v43 = vsel %vm80_vm0, %v3250_v35, 0  ;;  %v3879_v35 = vsub.f32 %v10791_v42, %v13557_v22 }
 0x3a9   :  { %4698 = vmatprep.mubr.f32.mxu1 %v13552_v26  ;;  %v3868_v41 = vsub.f32 %v10783_v3, %v13555_v20  ;;  %5498 = vmatprep.subr.mxu1 %v10536_v4  ;;  %v12963_v20 = vand.u32 4294901760, %v10818_v5  ;;  %v10845_v4 = vand.u32 4294901760, %v3491_v46 }
 0x3aa   :  { %v8256_v0 = vpop.f32.mrb[36].mxu0  ;;  %v3880_v18 = vand.u32 4294901760, %v3879_v35  ;;  %v3500_v35 = vsel %vm80_vm0, %v10713_v30, 0 }
 0x3ab   :  { %v3262_v2 = vpop.f32.mrb[37].mxu0  ;;  %3859 = vmatmul.mubr.f32.gmra.mrb[94].mxu0 %v3858_v13  ;;  %4700 = vmatmul.mubr.f32.gmra.mrb[2].mxu1 %v10821_v62  ;;  %13558 = vst [vmem:[#allocation89_spill] sm:$0xff] %v10845_v4  ;;  %v10848_v13 = vand.u32 4294901760, %v10831_v43  ;;  %v3869_v33 = vand.u32 4294901760, %v3868_v41  ;;  %v10860_v22 = vsub.f32 %v3491_v46, %v10845_v4  ;;  %v10863_v41 = vand.u32 4294901760, %v10851_v11 }
 0x3ac   :  { %3864 = vmatprep.mubr.f32.mxu0 %v13552_v26  ;;  %4705 = vmatprep.mubr.f32.mxu1 %v13552_v26  ;;  %v10871_v32 = vsel %vm80_vm0, %v3262_v2, 0  ;;  %v10877_v46 = vsub.f32 %v3494_v16, %v10855_v47  ;;  %v3901_v2 = vsub.f32 %v10835_v25, %v13564_v40  ;;  %v10887_v4 = vand.u32 4294901760, %v3497_v52 }
 0x3ad   :  { %13559 = vst [vmem:[#allocation91_spill] sm:$0xff] %v10848_v13  ;;  %13561 = vst [vmem:[#allocation95_spill] sm:$0xff] %v10860_v22  ;;  %v10893_v47 = vsel %vm80_vm0, %v8256_v0, 0  ;;  %v10901_v61 = vand.u32 4294901760, %v3500_v35  ;;  %v13570_v54 = vand.u32 4294901760, %v10860_v22  ;;  %v3503_v40 = vsel %vm80_vm0, %v10730_v63, 0 }
 0x3ae   :  { %v8259_v15 = vpop.f32.mrb[38].mxu0  ;;  %13562 = vst [vmem:[#allocation96_spill] sm:$0xff] %v10863_v41  ;;  %13563 = vst [vmem:[#allocation100_spill] sm:$0xff] %v10877_v46  ;;  %v10909_v0 = vand.u32 4294901760, %v10893_v47 }
 0x3af   :  { %v3274_v31 = vpop.f32.mrb[39].mxu0  ;;  %3870 = vmatmul.mubr.f32.gmra.mrb[96].mxu0 %v3869_v33  ;;  %4707 = vmatmul.mubr.f32.gmra.mrb[4].mxu1 %v10848_v13  ;;  %v3890_v33 = vsub.f32 %v10818_v5, %v12963_v20  ;;  %13565 = vst [vmem:[#allocation102_spill] sm:$0xff] %v10887_v4  ;;  %13567 = vst [vmem:[#allocation107_spill] sm:$0xff] %v10901_v61  ;;  %v3902_v20 = vand.u32 4294901760, %v3901_v2  ;;  %v3506_v2 = vsel %vm80_vm0, %v10728_v10, 0 }
 0x3b0   :  { %3875 = vmatprep.mubr.f32.mxu0 %v13552_v26  ;;  %4712 = vmatprep.mubr.f32.mxu1 %v13552_v26  ;;  %13569 = vst [vmem:[#allocation113_spill] sm:$0xff] %v10909_v0  ;;  %v10917_v37 = vsel %vm80_vm0, %v3274_v31, 0 }
 0x3b1   :  { %v3891_v16 = vand.u32 4294901760, %v3890_v33  ;;  %v10906_v33 = vsub.f32 %v3497_v52, %v10887_v4  ;;  %v10925_v52 = vsub.f32 %v3500_v35, %v10901_v61  ;;  %v10935_v4 = vand.u32 4294901760, %v3503_v40 }
 0x3b2   :  { %v10873_v17 = vpop.f32.mrb[40].mxu0  ;;  %v10941_v61 = vsel %vm80_vm0, %v8259_v15, 0 }
 0x3b3   :  { %v3286_v21 = vpop.f32.mrb[41].mxu0  ;;  %3881 = vmatmul.mubr.f32.gmra.mrb[98].mxu0 %v3880_v18  ;;  %4714 = vmatmul.mubr.f32.gmra.mrb[6].mxu1 %v10863_v41  ;;  %v10890_v18 = vand.u32 4294901760, %v10871_v32  ;;  %13568 = vst [vmem:[#allocation112_spill] sm:$0xff] %v10906_v33  ;;  %13571 = vst [vmem:[#allocation114_spill] sm:$0xff] %v10925_v52  ;;  %v10957_v15 = vand.u32 4294901760, %v10941_v61  ;;  %v13578_v5 = vand.u32 4294901760, %v10906_v33 }
 0x3b4   :  { %3886 = vmatprep.mubr.f32.mxu0 %v13552_v26  ;;  %4719 = vmatprep.mubr.f32.mxu1 %v13552_v26  ;;  %13573 = vst [vmem:[#allocation121_spill] sm:$0xff] %v10935_v4  ;;  %v10965_v56 = vsel %vm80_vm0, %v3286_v21, 0  ;;  %v13580_v21 = vand.u32 4294901760, %v10925_v52 }
 0x3b5   :  { %13566 = vst [vmem:[#allocation106_spill] sm:$0xff] %v10890_v18  ;;  %13577 = vst [vmem:[#allocation115_spill] sm:$0xff] %v10957_v15 }
 0x3b6   :  { %v10895_v30 = vpop.f32.mrb[42].mxu0 }
 0x3b7   :  { %v10897_v39 = vpop.f32.mrb[43].mxu0  ;;  %3892 = vmatmul.mubr.f32.gmra.mrb[100].mxu0 %v3891_v16  ;;  %4721 = vmatmul.mubr.f32.gmra.mrb[8].mxu1 %v10890_v18  ;;  %v3912_v16 = vsub.f32 %v10860_v22, %v13570_v54  ;;  %v13572_v54 = vand.u32 4294901760, %v10877_v46 }
 0x3b8   :  { %3897 = vmatprep.mubr.f32.mxu0 %v13552_v26  ;;  %4726 = vmatprep.mubr.f32.mxu1 %v13552_v26  ;;  %v11015_v57 = vsel %vm80_vm0, %v10897_v39, 0 }
 0x3b9   :  { %v3923_v63 = vsub.f32 %v10877_v46, %v13572_v54  ;;  %v3913_v35 = vand.u32 4294901760, %v3912_v16  ;;  %v10949_v46 = vand.u32 4294901760, %v3506_v2  ;;  %v10954_v16 = vsub.f32 %v3503_v40, %v10935_v4 }
 0x3ba   :  { %v10919_v25 = vpop.f32.mrb[44].mxu0  ;;  %v3509_v54 = vsel %vm80_vm0, %v10745_v7, 0  ;;  %v3945_v7 = vsub.f32 %v10925_v52, %v13580_v21  ;;  %v3515_v21 = vsel %vm80_vm0, %v10760_v34, 0 }
 0x3bb   :  { %v10921_v19 = vpop.f32.mrb[45].mxu0  ;;  %3903 = vmatmul.mubr.f32.gmra.mrb[102].mxu0 %v3902_v20  ;;  %4728 = vmatmul.mubr.f32.gmra.mrb[10].mxu1 %v10909_v0  ;;  %v10938_v20 = vand.u32 4294901760, %v10917_v37  ;;  %13575 = vst [vmem:[#allocation98_spill] sm:$0xff] %v10949_v46  ;;  %13576 = vst [vmem:[#allocation105_spill] sm:$0xff] %v10954_v16  ;;  %v3924_v31 = vand.u32 4294901760, %v3923_v63  ;;  %v10973_v40 = vsub.f32 %v3506_v2, %v10949_v46  ;;  %v3512_v63 = vsel %vm80_vm0, %v10743_v1, 0 }
 0x3bc   :  { %3908 = vmatprep.mubr.f32.mxu0 %v13552_v26  ;;  %4733 = vmatprep.mubr.f32.mxu1 %v13552_v26  ;;  %v10983_v4 = vand.u32 4294901760, %v3509_v54  ;;  %v10990_v46 = vsel %vm80_vm0, %v10873_v17, 0  ;;  %v3946_v52 = vand.u32 4294901760, %v3945_v7  ;;  %v13586_v29 = vand.u32 4294901760, %v10954_v16 }
 0x3bd   :  { %13574 = vst [vmem:[#allocation125_spill] sm:$0xff] %v10938_v20  ;;  %13579 = vst [vmem:[#allocation118_spill] sm:$0xff] %v10973_v40  ;;  %v11006_v17 = vand.u32 4294901760, %v10990_v46  ;;  %v13588_v34 = vand.u32 4294901760, %v10973_v40  ;;  %v11065_v23 = vsel %vm80_vm0, %v10921_v19, 0 }
 0x3be   :  { %v10943_v10 = vpop.f32.mrb[46].mxu0  ;;  %13581 = vst [vmem:[#allocation122_spill] sm:$0xff] %v10983_v4 }
 0x3bf   :  { %v10945_v22 = vpop.f32.mrb[47].mxu0  ;;  %3914 = vmatmul.mubr.f32.gmra.mrb[104].mxu0 %v3913_v35  ;;  %4735 = vmatmul.mubr.f32.gmra.mrb[12].mxu1 %v10938_v20  ;;  %v3934_v35 = vsub.f32 %v10906_v33, %v13578_v5  ;;  %v10998_v5 = vand.u32 4294901760, %v3512_v63  ;;  %13585 = vst [vmem:[#allocation5_spill] sm:$0xff] %v11006_v17  ;;  %v3967_v39 = vsub.f32 %v10973_v40, %v13588_v34  ;;  %v3521_v34 = vsel %vm80_vm0, %v10776_v9, 0 }
 0x3c0   :  { %3919 = vmatprep.mubr.f32.mxu0 %v13552_v26  ;;  %4740 = vmatprep.mubr.f32.mxu1 %v13552_v26 }
 0x3c1   :  { %v3935_v2 = vand.u32 4294901760, %v3934_v35  ;;  %13583 = vst [vmem:[#allocation130_spill] sm:$0xff] %v10998_v5  ;;  %v11003_v35 = vsub.f32 %v3509_v54, %v10983_v4  ;;  %v11023_v54 = vsub.f32 %v3512_v63, %v10998_v5  ;;  %v11033_v4 = vand.u32 4294901760, %v3515_v21 }
 0x3c2   :  { %v10967_v42 = vpop.f32.mrb[48].mxu0  ;;  %v11040_v5 = vsel %vm80_vm0, %v10895_v30, 0  ;;  %v3968_v40 = vand.u32 4294901760, %v3967_v39 }
 0x3c3   :  { %v10969_v3 = vpop.f32.mrb[49].mxu0  ;;  %3925 = vmatmul.mubr.f32.gmra.mrb[106].mxu0 %v3924_v31  ;;  %4742 = vmatmul.mubr.f32.gmra.mrb[14].mxu1 %v10957_v15  ;;  %v10986_v31 = vand.u32 4294901760, %v10965_v56  ;;  %13584 = vst [vmem:[#allocation131_spill] sm:$0xff] %v11003_v35  ;;  %13587 = vst [vmem:[#allocation6_spill] sm:$0xff] %v11023_v54  ;;  %v11056_v30 = vand.u32 4294901760, %v11040_v5  ;;  %v13594_v6 = vand.u32 4294901760, %v11003_v35 }
 0x3c4   :  { %3930 = vmatprep.mubr.f32.mxu0 %v13552_v26  ;;  %4747 = vmatprep.mubr.f32.mxu1 %v13552_v26  ;;  %13589 = vst [vmem:[#allocation7_spill] sm:$0xff] %v11033_v4  ;;  %v13596_v19 = vand.u32 4294901760, %v11023_v54  ;;  %v11156_v36 = vsel %vm80_vm0, %v10969_v3, 0 }
 0x3c5   :  { %13582 = vst [vmem:[#allocation127_spill] sm:$0xff] %v10986_v31  ;;  %13593 = vst [vmem:[#allocation18_spill] sm:$0xff] %v11056_v30 }
 0x3c6   :  { %v10992_v1 = vpop.f32.mrb[50].mxu0  ;;  %v3989_v9 = vsub.f32 %v11023_v54, %v13596_v19  ;;  %v11113_v19 = vsel %vm80_vm0, %v10945_v22, 0 }
 0x3c7   :  { %v10994_v33 = vpop.f32.mrb[51].mxu0  ;;  %3936 = vmatmul.mubr.f32.gmra.mrb[108].mxu0 %v3935_v2  ;;  %4749 = vmatmul.mubr.f32.gmra.mrb[16].mxu1 %v10986_v31  ;;  %v3956_v2 = vsub.f32 %v10954_v16, %v13586_v29  ;;  %v3518_v29 = vsel %vm80_vm0, %v10758_v38, 0 }
 0x3c8   :  { %3941 = vmatprep.mubr.f32.mxu0 %v13552_v26  ;;  %4754 = vmatprep.mubr.f32.mxu1 %v13552_v26  ;;  %v11048_v7 = vand.u32 4294901760, %v3518_v29  ;;  %v3990_v54 = vand.u32 4294901760, %v3989_v9  ;;  %v11127_v9 = vand.u32 4294901760, %v11113_v19 }
 0x3c9   :  { %v3957_v63 = vand.u32 4294901760, %v3956_v2  ;;  %v11053_v2 = vsub.f32 %v3515_v21, %v11033_v4  ;;  %v11083_v4 = vand.u32 4294901760, %v3521_v34 }
 0x3ca   :  { %v11017_v58 = vpop.f32.mrb[52].mxu0  ;;  %13591 = vst [vmem:[#allocation11_spill] sm:$0xff] %v11048_v7  ;;  %v11073_v21 = vsub.f32 %v3518_v29, %v11048_v7  ;;  %v11090_v7 = vsel %vm80_vm0, %v10919_v25, 0  ;;  %13602 = vst [vmem:[#allocation29_spill] sm:$0xff] %v11127_v9 }
 0x3cb   :  { %v11019_v8 = vpop.f32.mrb[53].mxu0  ;;  %3947 = vmatmul.mubr.f32.gmra.mrb[110].mxu0 %v3946_v52  ;;  %4756 = vmatmul.mubr.f32.gmra.mrb[18].mxu1 %v11006_v17  ;;  %v11036_v52 = vand.u32 4294901760, %v11015_v57  ;;  %13592 = vst [vmem:[#allocation15_spill] sm:$0xff] %v11053_v2  ;;  %13597 = vst [vmem:[#allocation21_spill] sm:$0xff] %v11083_v4  ;;  %v11106_v25 = vand.u32 4294901760, %v11090_v7  ;;  %v13601_v59 = vand.u32 4294901760, %v11053_v2 }
 0x3cc   :  { %3952 = vmatprep.mubr.f32.mxu0 %v13552_v26  ;;  %4761 = vmatprep.mubr.f32.mxu1 %v13552_v26  ;;  %13595 = vst [vmem:[#allocation20_spill] sm:$0xff] %v11073_v21 }
 0x3cd   :  { %13590 = vst [vmem:[#allocation8_spill] sm:$0xff] %v11036_v52  ;;  %13600 = vst [vmem:[#allocation28_spill] sm:$0xff] %v11106_v25 }
 0x3ce   :  { %v11042_v38 = vpop.f32.mrb[54].mxu0 }
 0x3cf   :  { %v11044_v16 = vpop.f32.mrb[55].mxu0  ;;  %3958 = vmatmul.mubr.f32.gmra.mrb[112].mxu0 %v3957_v63  ;;  %4763 = vmatmul.mubr.f32.gmra.mrb[20].mxu1 %v11036_v52  ;;  %v3978_v63 = vsub.f32 %v11003_v35, %v13594_v6  ;;  %v3524_v6 = vsel %vm80_vm0, %v10774_v28, 0 }
 0x3d0   :  { %3963 = vmatprep.mubr.f32.mxu0 %v13552_v26  ;;  %4768 = vmatprep.mubr.f32.mxu1 %v13552_v26  ;;  %v11098_v39 = vand.u32 4294901760, %v3524_v6 }
 0x3d1   :  { %v3979_v29 = vand.u32 4294901760, %v3978_v63  ;;  %v11103_v63 = vsub.f32 %v3521_v34, %v11083_v4  ;;  %v13603_v4 = vand.u32 4294901760, %v11073_v21 }
 0x3d2   :  { %v11067_v44 = vpop.f32.mrb[56].mxu0  ;;  %13599 = vst [vmem:[#allocation24_spill] sm:$0xff] %v11098_v39  ;;  %v11121_v34 = vsub.f32 %v3524_v6, %v11098_v39 }
 0x3d3   :  { %v11069_v60 = vpop.f32.mrb[57].mxu0  ;;  %3969 = vmatmul.mubr.f32.gmra.mrb[114].mxu0 %v3968_v40  ;;  %4770 = vmatmul.mubr.f32.gmra.mrb[22].mxu1 %v11056_v30  ;;  %v11086_v40 = vand.u32 4294901760, %v11065_v23 }
 0x3d4   :  { %3974 = vmatprep.mubr.f32.mxu0 %v13552_v26  ;;  %4775 = vmatprep.mubr.f32.mxu1 %v13552_v26  ;;  %v13607_v3 = vand.u32 4294901760, %v11121_v34 }
 0x3d5   :  { %13598 = vst [vmem:[#allocation23_spill] sm:$0xff] %v11086_v40 }
 0x3d6   :  { %v11092_v28 = vpop.f32.mrb[58].mxu0 }
 0x3d7   :  { %v11094_v35 = vpop.f32.mrb[59].mxu0  ;;  %3980 = vmatmul.mubr.f32.gmra.mrb[116].mxu0 %v3979_v29  ;;  %4777 = vmatmul.mubr.f32.gmra.mrb[24].mxu1 %v11086_v40  ;;  %v4000_v29 = vsub.f32 %v11053_v2, %v13601_v59  ;;  %v4011_v2 = vsub.f32 %v11073_v21, %v13603_v4  ;;  %v11146_v4 = vsub.f32 %v10796_v27, %v10806_v45  ;;  %v13605_v21 = vand.u32 4294901760, %v11103_v63 }
 0x3d8   :  { %3985 = vmatprep.mubr.f32.mxu0 %v13552_v26  ;;  %4782 = vmatprep.mubr.f32.mxu1 %v13552_v26  ;;  %v11161_v59 = vsub.f32 %v10809_v55, %v10821_v62  ;;  %v11174_v45 = vsel %vm80_vm0, %v10967_v42, 0  ;;  %v11192_v62 = vsel %vm80_vm0, %v10994_v33, 0  ;;  %v11197_v55 = vsub.f32 %v10851_v11, %v10863_v41 }
 0x3d9   :  { %v4001_v22 = vand.u32 4294901760, %v4000_v29  ;;  %v4012_v29 = vand.u32 4294901760, %v4011_v2  ;;  %v11167_v2 = vand.u32 4294901760, %v11156_v36  ;;  %v11185_v27 = vand.u32 4294901760, %v11174_v45 }
 0x3da   :  { %v11115_v50 = vpop.f32.mrb[60].mxu0  ;;  %v13609_v42 = vand.u32 4294901760, %v11146_v4  ;;  %13610 = vst [vmem:[#allocation38_spill] sm:$0xff] %v11197_v55  ;;  %v13612_v33 = vand.u32 4294901760, %v11161_v59  ;;  %v11228_v41 = vsel %vm80_vm0, %v11019_v8, 0  ;;  %v11233_v11 = vsub.f32 %v10893_v47, %v10909_v0 }
 0x3db   :  { %v11117_v48 = vpop.f32.mrb[61].mxu0  ;;  %3991 = vmatmul.mubr.f32.gmra.mrb[118].mxu0 %v3990_v54  ;;  %4784 = vmatmul.mubr.f32.gmra.mrb[26].mxu1 %v11106_v25  ;;  %v11134_v54 = vsel %vm80_vm0, %v10943_v10, 0  ;;  %13606 = vst [vmem:[#allocation34_spill] sm:$0xff] %v11167_v2  ;;  %13608 = vst [vmem:[#allocation36_spill] sm:$0xff] %v11185_v27  ;;  %v13617_v8 = vand.u32 4294901760, %v11197_v55  ;;  %v11264_v0 = vsel %vm80_vm0, %v11044_v16, 0  ;;  %v11269_v47 = vsub.f32 %v10941_v61, %v10957_v15 }
 0x3dc   :  { %3996 = vmatprep.mubr.f32.mxu0 %v13552_v26  ;;  %4789 = vmatprep.mubr.f32.mxu1 %v13552_v26  ;;  %v11149_v10 = vand.u32 4294901760, %v11134_v54  ;;  %v13622_v16 = vand.u32 4294901760, %v11233_v11  ;;  %v11300_v15 = vsel %vm80_vm0, %v11069_v60, 0  ;;  %v11305_v61 = vsub.f32 %v10990_v46, %v11006_v17 }
 0x3dd   :  { %v13626_v60 = vand.u32 4294901760, %v11269_v47  ;;  %v11336_v17 = vsel %vm80_vm0, %v11094_v35, 0  ;;  %v11341_v46 = vsub.f32 %v11040_v5, %v11056_v30  ;;  %v11372_v30 = vsel %vm80_vm0, %v11117_v48, 0 }
 0x3de   :  { %v11136_v6 = vpop.f32.mrb[62].mxu0  ;;  %13604 = vst [vmem:[#allocation30_spill] sm:$0xff] %v11149_v10  ;;  %v13630_v35 = vand.u32 4294901760, %v11305_v61  ;;  %v11377_v5 = vsub.f32 %v11090_v7, %v11106_v25  ;;  %v11413_v7 = vsub.f32 %v11134_v54, %v11149_v10  ;;  %v11447_v54 = vsub.f32 %v11174_v45, %v11185_v27 }
 0x3df   :  { %v11138_v39 = vpop.f32.mrb[63].mxu0  ;;  %4002 = vmatmul.mubr.f32.gmra.mrb[120].mxu0 %v4001_v22  ;;  %4791 = vmatmul.mubr.f32.gmra.mrb[28].mxu1 %v11127_v9  ;;  %v4022_v22 = vsub.f32 %v11103_v63, %v13605_v21  ;;  %v13634_v48 = vand.u32 4294901760, %v11341_v46 }
 0x3e0   :  { %4007 = vmatprep.mubr.f32.mxu0 %v13552_v26  ;;  %4796 = vmatprep.mubr.f32.mxu1 %v13552_v26  ;;  %v11408_v25 = vsel %vm80_vm0, %v11138_v39, 0  ;;  %v13638_v39 = vand.u32 4294901760, %v11377_v5 }
 0x3e1   :  { %v4023_v21 = vand.u32 4294901760, %v4022_v22  ;;  %v11182_v22 = vsub.f32 %v10831_v43, %v10848_v13  ;;  %v11210_v13 = vsel %vm80_vm0, %v10992_v1, 0 }
 0x3e2   :  { %v11221_v43 = vand.u32 4294901760, %v11210_v13 }
 0x3e3   :  { %4013 = vmatmul.mubr.f32.gmra.mrb[122].mxu0 %v4012_v29  ;;  %4798 = vmatmul.mubr.f32.gmra.mrb[30].mxu1 %v11149_v10  ;;  %v4033_v29 = vsub.f32 %v11121_v34, %v13607_v3  ;;  %v13615_v1 = vand.u32 4294901760, %v11182_v22 }
 0x3e4   :  { %4018 = vmatprep.mubr.f32.mxu0 %v13552_v26  ;;  %4803 = vmatprep.mubr.f32.mxu1 %v13552_v26  ;;  %13614 = vst [vmem:[#allocation44_spill] sm:$0xff] %v11221_v43 }
 0x3e5   :  { %v4034_v3 = vand.u32 4294901760, %v4033_v29  ;;  %v11203_v29 = vand.u32 4294901760, %v11192_v62 }
 0x3e7   :  { %4024 = vmatmul.mubr.f32.gmra.mrb[124].mxu0 %v4023_v21  ;;  %4805 = vmatmul.mubr.f32.gmra.mrb[32].mxu1 %v11167_v2  ;;  %v4044_v21 = vsub.f32 %v11146_v4, %v13609_v42  ;;  %13611 = vst [vmem:[#allocation39_spill] sm:$0xff] %v11203_v29  ;;  %v11459_v45 = vsub.f32 %v11192_v62, %v11203_v29 }
 0x3e8   :  { %4029 = vmatprep.mubr.f32.mxu0 %v13552_v26  ;;  %4810 = vmatprep.mubr.f32.mxu1 %v13552_v26  ;;  %v11472_v62 = vsub.f32 %v11210_v13, %v11221_v43 }
 0x3e9   :  { %v4045_v42 = vand.u32 4294901760, %v4044_v21  ;;  %v11218_v21 = vsub.f32 %v10871_v32, %v10890_v18  ;;  %v11246_v18 = vsel %vm80_vm0, %v11017_v58, 0 }
 0x3ea   :  { %v11257_v32 = vand.u32 4294901760, %v11246_v18 }
 0x3eb   :  { %4035 = vmatmul.mubr.f32.gmra.mrb[126].mxu0 %v4034_v3  ;;  %4812 = vmatmul.mubr.f32.gmra.mrb[34].mxu1 %v11185_v27  ;;  %v4055_v3 = vsub.f32 %v11161_v59, %v13612_v33  ;;  %13613 = vst [vmem:[#allocation40_spill] sm:$0xff] %v11218_v21  ;;  %v13620_v58 = vand.u32 4294901760, %v11218_v21  ;;  %v13674_v27 = vld [vmem:[#allocation112_spill] sm:$0xff] }
 0x3ec   :  { %4040 = vmatprep.mubr.f32.mxu0 %v13552_v26  ;;  %4817 = vmatprep.mubr.f32.mxu1 %v13552_v26  ;;  %13619 = vst [vmem:[#allocation48_spill] sm:$0xff] %v11257_v32 }
 0x3ed   :  { %v4056_v33 = vand.u32 4294901760, %v4055_v3  ;;  %v11239_v3 = vand.u32 4294901760, %v11228_v41 }
 0x3ef   :  { %4046 = vmatmul.mubr.f32.gmra.mrb[128].mxu0 %v4045_v42  ;;  %4819 = vmatmul.mubr.f32.gmra.mrb[36].mxu1 %v11203_v29  ;;  %v4066_v42 = vsub.f32 %v11182_v22, %v13615_v1  ;;  %13616 = vst [vmem:[#allocation45_spill] sm:$0xff] %v11239_v3  ;;  %v11484_v13 = vsub.f32 %v11228_v41, %v11239_v3  ;;  %v13673_v29 = vld [vmem:[#allocation19_spill] sm:$0xff] }
 0x3f0   :  { %4051 = vmatprep.mubr.f32.mxu0 %v13552_v26  ;;  %4824 = vmatprep.mubr.f32.mxu1 %v13552_v26 }
 0x3f1   :  { %v4067_v1 = vand.u32 4294901760, %v4066_v42  ;;  %v11254_v42 = vsub.f32 %v10917_v37, %v10938_v20  ;;  %v11282_v20 = vsel %vm80_vm0, %v11042_v38, 0 }
 0x3f2   :  { %v11293_v37 = vand.u32 4294901760, %v11282_v20 }
 0x3f3   :  { %4057 = vmatmul.mubr.f32.gmra.mrb[130].mxu0 %v4056_v33  ;;  %4826 = vmatmul.mubr.f32.gmra.mrb[38].mxu1 %v11221_v43  ;;  %v4077_v33 = vsub.f32 %v11197_v55, %v13617_v8  ;;  %13618 = vst [vmem:[#allocation46_spill] sm:$0xff] %v11254_v42  ;;  %v13624_v38 = vand.u32 4294901760, %v11254_v42  ;;  %v13672_v43 = vld [vmem:[#allocation100_spill] sm:$0xff] }
 0x3f4   :  { %4062 = vmatprep.mubr.f32.mxu0 %v13552_v26  ;;  %4831 = vmatprep.mubr.f32.mxu1 %v13552_v26  ;;  %13623 = vst [vmem:[#allocation53_spill] sm:$0xff] %v11293_v37 }
 0x3f5   :  { %v4078_v8 = vand.u32 4294901760, %v4077_v33  ;;  %v11275_v33 = vand.u32 4294901760, %v11264_v0 }
 0x3f7   :  { %4068 = vmatmul.mubr.f32.gmra.mrb[132].mxu0 %v4067_v1  ;;  %4833 = vmatmul.mubr.f32.gmra.mrb[40].mxu1 %v11239_v3  ;;  %v4088_v1 = vsub.f32 %v11218_v21, %v13620_v58  ;;  %13621 = vst [vmem:[#allocation51_spill] sm:$0xff] %v11275_v33  ;;  %v13671_v3 = vld [vmem:[#allocation16_spill] sm:$0xff] }
 0x3f8   :  { %4073 = vmatprep.mubr.f32.mxu0 %v13552_v26  ;;  %4838 = vmatprep.mubr.f32.mxu1 %v13552_v26 }
 0x3f9   :  { %v4089_v58 = vand.u32 4294901760, %v4088_v1  ;;  %v11290_v1 = vsub.f32 %v10965_v56, %v10986_v31  ;;  %v11318_v31 = vsel %vm80_vm0, %v11067_v44, 0 }
 0x3fa   :  { %v11329_v56 = vand.u32 4294901760, %v11318_v31 }
 0x3fb   :  { %4079 = vmatmul.mubr.f32.gmra.mrb[134].mxu0 %v4078_v8  ;;  %4840 = vmatmul.mubr.f32.gmra.mrb[42].mxu1 %v11257_v32  ;;  %v4099_v8 = vsub.f32 %v11233_v11, %v13622_v16  ;;  %v13628_v44 = vand.u32 4294901760, %v11290_v1 }
 0x3fc   :  { %4084 = vmatprep.mubr.f32.mxu0 %v13552_v26  ;;  %4845 = vmatprep.mubr.f32.mxu1 %v13552_v26  ;;  %13627 = vst [vmem:[#allocation56_spill] sm:$0xff] %v11329_v56 }
 0x3fd   :  { %v4100_v16 = vand.u32 4294901760, %v4099_v8  ;;  %v11311_v8 = vand.u32 4294901760, %v11300_v15 }
 0x3ff   :  { %4090 = vmatmul.mubr.f32.gmra.mrb[136].mxu0 %v4089_v58  ;;  %4847 = vmatmul.mubr.f32.gmra.mrb[44].mxu1 %v11275_v33  ;;  %v4110_v58 = vsub.f32 %v11254_v42, %v13624_v38  ;;  %13625 = vst [vmem:[#allocation55_spill] sm:$0xff] %v11311_v8 }
 0x400   :  { %4095 = vmatprep.mubr.f32.mxu0 %v13552_v26  ;;  %4852 = vmatprep.mubr.f32.mxu1 %v13552_v26 }
 0x401   :  { %v4111_v38 = vand.u32 4294901760, %v4110_v58  ;;  %v11326_v58 = vsub.f32 %v11015_v57, %v11036_v52  ;;  %v11354_v52 = vsel %vm80_vm0, %v11092_v28, 0 }
 0x402   :  { %v11365_v57 = vand.u32 4294901760, %v11354_v52 }
 0x403   :  { %4101 = vmatmul.mubr.f32.gmra.mrb[138].mxu0 %v4100_v16  ;;  %4854 = vmatmul.mubr.f32.gmra.mrb[46].mxu1 %v11293_v37  ;;  %v4121_v16 = vsub.f32 %v11269_v47, %v13626_v60  ;;  %v13632_v28 = vand.u32 4294901760, %v11326_v58 }
 0x404   :  { %4106 = vmatprep.mubr.f32.mxu0 %v13552_v26  ;;  %4859 = vmatprep.mubr.f32.mxu1 %v13552_v26  ;;  %13631 = vst [vmem:[#allocation61_spill] sm:$0xff] %v11365_v57 }
 0x405   :  { %v4122_v60 = vand.u32 4294901760, %v4121_v16  ;;  %v11347_v16 = vand.u32 4294901760, %v11336_v17 }
 0x407   :  { %4112 = vmatmul.mubr.f32.gmra.mrb[140].mxu0 %v4111_v38  ;;  %4861 = vmatmul.mubr.f32.gmra.mrb[48].mxu1 %v11311_v8  ;;  %v4132_v38 = vsub.f32 %v11290_v1, %v13628_v44  ;;  %13629 = vst [vmem:[#allocation59_spill] sm:$0xff] %v11347_v16 }
 0x408   :  { %4117 = vmatprep.mubr.f32.mxu0 %v13552_v26  ;;  %4866 = vmatprep.mubr.f32.mxu1 %v13552_v26 }
 0x409   :  { %v4133_v44 = vand.u32 4294901760, %v4132_v38  ;;  %v11362_v38 = vsub.f32 %v11065_v23, %v11086_v40  ;;  %v11390_v40 = vsel %vm80_vm0, %v11115_v50, 0 }
 0x40a   :  { %v11401_v23 = vand.u32 4294901760, %v11390_v40 }
 0x40b   :  { %4123 = vmatmul.mubr.f32.gmra.mrb[142].mxu0 %v4122_v60  ;;  %4868 = vmatmul.mubr.f32.gmra.mrb[50].mxu1 %v11329_v56  ;;  %v4143_v60 = vsub.f32 %v11305_v61, %v13630_v35  ;;  %v13636_v50 = vand.u32 4294901760, %v11362_v38 }
 0x40c   :  { %4128 = vmatprep.mubr.f32.mxu0 %v13552_v26  ;;  %4873 = vmatprep.mubr.f32.mxu1 %v13552_v26  ;;  %13635 = vst [vmem:[#allocation65_spill] sm:$0xff] %v11401_v23 }
 0x40d   :  { %v4144_v35 = vand.u32 4294901760, %v4143_v60  ;;  %v11383_v60 = vand.u32 4294901760, %v11372_v30 }
 0x40f   :  { %4134 = vmatmul.mubr.f32.gmra.mrb[144].mxu0 %v4133_v44  ;;  %4875 = vmatmul.mubr.f32.gmra.mrb[52].mxu1 %v11347_v16  ;;  %v4154_v44 = vsub.f32 %v11326_v58, %v13632_v28  ;;  %13633 = vst [vmem:[#allocation62_spill] sm:$0xff] %v11383_v60 }
 0x410   :  { %4139 = vmatprep.mubr.f32.mxu0 %v13552_v26  ;;  %4880 = vmatprep.mubr.f32.mxu1 %v13552_v26 }
 0x411   :  { %v4155_v28 = vand.u32 4294901760, %v4154_v44  ;;  %v11398_v44 = vsub.f32 %v11113_v19, %v11127_v9  ;;  %v11426_v9 = vsel %vm80_vm0, %v11136_v6, 0 }
 0x412   :  { %v11437_v19 = vand.u32 4294901760, %v11426_v9 }
 0x413   :  { %4145 = vmatmul.mubr.f32.gmra.mrb[146].mxu0 %v4144_v35  ;;  %4882 = vmatmul.mubr.f32.gmra.mrb[54].mxu1 %v11365_v57  ;;  %v4165_v35 = vsub.f32 %v11341_v46, %v13634_v48  ;;  %v13641_v6 = vand.u32 4294901760, %v11398_v44 }
 0x414   :  { %4150 = vmatprep.mubr.f32.mxu0 %v13552_v26  ;;  %4887 = vmatprep.mubr.f32.mxu1 %v13552_v26  ;;  %13640 = vst [vmem:[#allocation71_spill] sm:$0xff] %v11437_v19 }
 0x415   :  { %v4166_v48 = vand.u32 4294901760, %v4165_v35  ;;  %v11419_v35 = vand.u32 4294901760, %v11408_v25 }
 0x417   :  { %4156 = vmatmul.mubr.f32.gmra.mrb[148].mxu0 %v4155_v28  ;;  %4889 = vmatmul.mubr.f32.gmra.mrb[56].mxu1 %v11383_v60  ;;  %v4176_v28 = vsub.f32 %v11362_v38, %v13636_v50  ;;  %13637 = vst [vmem:[#allocation67_spill] sm:$0xff] %v11419_v35 }
 0x418   :  { %4161 = vmatprep.mubr.f32.mxu0 %v13552_v26  ;;  %4894 = vmatprep.mubr.f32.mxu1 %v13552_v26 }
 0x419   :  { %v4177_v50 = vand.u32 4294901760, %v4176_v28  ;;  %v11434_v28 = vsub.f32 %v11156_v36, %v11167_v2 }
 0x41b   :  { %4167 = vmatmul.mubr.f32.gmra.mrb[150].mxu0 %v4166_v48  ;;  %4896 = vmatmul.mubr.f32.gmra.mrb[58].mxu1 %v11401_v23  ;;  %v4187_v48 = vsub.f32 %v11377_v5, %v13638_v39  ;;  %13639 = vst [vmem:[#allocation68_spill] sm:$0xff] %v11434_v28  ;;  %v13086_v36 = vand.u32 4294901760, %v11434_v28 }
 0x41c   :  { %4172 = vmatprep.mubr.f32.mxu0 %v13552_v26  ;;  %4901 = vmatprep.mubr.f32.mxu1 %v13552_v26 }
 0x41d   :  { %v4188_v39 = vand.u32 4294901760, %v4187_v48  ;;  %v13642_v48 = vand.u32 4294901760, %v11413_v7 }
 0x41f   :  { %4178 = vmatmul.mubr.f32.gmra.mrb[152].mxu0 %v4177_v50  ;;  %4903 = vmatmul.mubr.f32.gmra.mrb[60].mxu1 %v11419_v35  ;;  %v4198_v50 = vsub.f32 %v11398_v44, %v13641_v6  ;;  %v4209_v10 = vsub.f32 %v11413_v7, %v13642_v48 }
 0x420   :  { %4183 = vmatprep.mubr.f32.mxu0 %v13552_v26  ;;  %4908 = vmatprep.mubr.f32.mxu1 %v13552_v26 }
 0x421   :  { %v4199_v2 = vand.u32 4294901760, %v4198_v50  ;;  %v4210_v6 = vand.u32 4294901760, %v4209_v10  ;;  %v4220_v50 = vsub.f32 %v11434_v28, %v13086_v36  ;;  %v13087_v10 = vand.u32 4294901760, %v11459_v45 }
 0x423   :  { %4189 = vmatmul.mubr.f32.gmra.mrb[154].mxu0 %v4188_v39  ;;  %4910 = vmatmul.mubr.f32.gmra.mrb[62].mxu1 %v11437_v19  ;;  %v13088_v39 = vand.u32 4294901760, %v11447_v54  ;;  %v4221_v48 = vand.u32 4294901760, %v4220_v50  ;;  %v4242_v50 = vsub.f32 %v11459_v45, %v13087_v10  ;;  %v13644_v10 = vld [vmem:[#allocation25_spill] sm:$0xff] }
 0x424   :  { %4194 = vmatprep.mubr.f32.mxu0 %v13552_v26  ;;  %4984 = vmatprep.mubr.f32.mxu1 %v13552_v26 }
 0x425   :  { %v4231_v36 = vsub.f32 %v11447_v54, %v13088_v39  ;;  %v4243_v41 = vand.u32 4294901760, %v4242_v50 }
 0x427   :  { %4200 = vmatmul.mubr.f32.gmra.mrb[156].mxu0 %v4199_v2  ;;  %4987 = vmatmul.mubr.f32.vlgmr.msra.gmra.mrb[64].mxu1 %v10588_v49  ;;  %v13643_v2 = vand.u32 4294901760, %v10564_v53  ;;  %v13089_v53 = vand.u32 4294901760, %v11472_v62 }
 0x428   :  { %5500 = vmatpush1.msra.mxu1 %v10542_v24  ;;  %4205 = vmatprep.mubr.f32.mxu0 %v13552_v26  ;;  %v13678_v24 = vld [vmem:[#allocation105_spill] sm:$0xff] }
 0x429   :  { %4992 = vmatprep.mubr.f32.mxu1 %v13552_v26  ;;  %6143 = vmatprep.subr.mxu1 %v13643_v2  ;;  %v11494_v2 = vsub.f32 %v11246_v18, %v11257_v32  ;;  %v11506_v18 = vsub.f32 %v11264_v0, %v11275_v33 }
 0x42b   :  { %4211 = vmatmul.mubr.f32.gmra.mrb[158].mxu0 %v4210_v6  ;;  %4995 = vmatmul.mubr.f32.gmra.mrb[66].mxu1 %v10585_v14  ;;  %v4232_v6 = vand.u32 4294901760, %v4231_v36  ;;  %v4253_v36 = vsub.f32 %v11472_v62, %v13089_v53  ;;  %v13645_v53 = vld [vmem:[#allocation26_spill] sm:$0xff] }
 0x42c   :  { %4216 = vmatprep.mubr.f32.mxu0 %v13552_v26  ;;  %5000 = vmatprep.mubr.f32.mxu1 %v13552_v26 }
 0x42d   :  { %v4254_v39 = vand.u32 4294901760, %v4253_v36  ;;  %v13646_v36 = vand.u32 4294901760, %v11494_v2 }
 0x42f   :  { %4222 = vmatmul.mubr.f32.gmra.mrb[160].mxu0 %v4221_v48  ;;  %5003 = vmatmul.mubr.f32.gmra.mrb[68].mxu1 %v10602_v12  ;;  %v13092_v48 = vand.u32 4294901760, %v11484_v13  ;;  %v4275_v33 = vsub.f32 %v11494_v2, %v13646_v36  ;;  %v13648_v36 = vld [vmem:[#allocation33_spill] sm:$0xff] }
 0x430   :  { %4227 = vmatprep.mubr.f32.mxu0 %v13552_v26  ;;  %5008 = vmatprep.mubr.f32.mxu1 %v13552_v26 }
 0x431   :  { %v4264_v50 = vsub.f32 %v11484_v13, %v13092_v48  ;;  %v13647_v48 = vld [vmem:[#allocation32_spill] sm:$0xff] }
 0x433   :  { %4233 = vmatmul.mubr.f32.gmra.mrb[162].mxu0 %v4232_v6  ;;  %5011 = vmatmul.mubr.f32.gmra.mrb[70].mxu1 %v10605_v51  ;;  %v13097_v6 = vand.u32 4294901760, %v11506_v18  ;;  %v4265_v0 = vand.u32 4294901760, %v4264_v50 }
 0x434   :  { %4238 = vmatprep.mubr.f32.mxu0 %v13552_v26  ;;  %5016 = vmatprep.mubr.f32.mxu1 %v13552_v26 }
 0x435   :  { %v4286_v50 = vsub.f32 %v11506_v18, %v13097_v6  ;;  %v13650_v6 = vld [vmem:[#allocation41_spill] sm:$0xff] }
 0x437   :  { %4244 = vmatmul.mubr.f32.gmra.mrb[164].mxu0 %v4243_v41  ;;  %5019 = vmatmul.mubr.f32.gmra.mrb[72].mxu1 %v13644_v10  ;;  %v11516_v41 = vsub.f32 %v11282_v20, %v11293_v37  ;;  %v11528_v20 = vsub.f32 %v11300_v15, %v11311_v8  ;;  %v4276_v37 = vand.u32 4294901760, %v4275_v33  ;;  %v4287_v15 = vand.u32 4294901760, %v4286_v50 }
 0x438   :  { %4249 = vmatprep.mubr.f32.mxu0 %v13552_v26  ;;  %5024 = vmatprep.mubr.f32.mxu1 %v13552_v26 }
 0x439   :  { %v13649_v33 = vand.u32 4294901760, %v11516_v41 }
 0x43b   :  { %4255 = vmatmul.mubr.f32.gmra.mrb[166].mxu0 %v4254_v39  ;;  %5027 = vmatmul.mubr.f32.gmra.mrb[74].mxu1 %v13645_v53  ;;  %v13102_v39 = vand.u32 4294901760, %v11528_v20  ;;  %v4297_v8 = vsub.f32 %v11516_v41, %v13649_v33  ;;  %v13651_v33 = vld [vmem:[#allocation42_spill] sm:$0xff] }
 0x43c   :  { %4260 = vmatprep.mubr.f32.mxu0 %v13552_v26  ;;  %5032 = vmatprep.mubr.f32.mxu1 %v13552_v26 }
 0x43d   :  { %v4308_v50 = vsub.f32 %v11528_v20, %v13102_v39  ;;  %v13653_v39 = vld [vmem:[#allocation49_spill] sm:$0xff] }
 0x43f   :  { %4266 = vmatmul.mubr.f32.gmra.mrb[168].mxu0 %v4265_v0  ;;  %5035 = vmatmul.mubr.f32.gmra.mrb[76].mxu1 %v13647_v48  ;;  %v11538_v0 = vsub.f32 %v11318_v31, %v11329_v56  ;;  %v11550_v31 = vsub.f32 %v11336_v17, %v11347_v16  ;;  %v4298_v56 = vand.u32 4294901760, %v4297_v8  ;;  %v4309_v17 = vand.u32 4294901760, %v4308_v50 }
 0x440   :  { %4271 = vmatprep.mubr.f32.mxu0 %v13552_v26  ;;  %5040 = vmatprep.mubr.f32.mxu1 %v13552_v26 }
 0x441   :  { %v13652_v8 = vand.u32 4294901760, %v11538_v0 }
 0x443   :  { %4277 = vmatmul.mubr.f32.gmra.mrb[170].mxu0 %v4276_v37  ;;  %5043 = vmatmul.mubr.f32.gmra.mrb[78].mxu1 %v13648_v36  ;;  %v13107_v37 = vand.u32 4294901760, %v11550_v31  ;;  %v4319_v16 = vsub.f32 %v11538_v0, %v13652_v8  ;;  %v13654_v8 = vld [vmem:[#allocation50_spill] sm:$0xff] }
 0x444   :  { %4282 = vmatprep.mubr.f32.mxu0 %v13552_v26  ;;  %5048 = vmatprep.mubr.f32.mxu1 %v13552_v26 }
 0x445   :  { %v4330_v50 = vsub.f32 %v11550_v31, %v13107_v37  ;;  %v13656_v37 = vld [vmem:[#allocation57_spill] sm:$0xff] }
 0x447   :  { %4288 = vmatmul.mubr.f32.gmra.mrb[172].mxu0 %v4287_v15  ;;  %5051 = vmatmul.mubr.f32.gmra.mrb[80].mxu1 %v13650_v6  ;;  %v11560_v15 = vsub.f32 %v11354_v52, %v11365_v57  ;;  %v11572_v52 = vsub.f32 %v11372_v30, %v11383_v60  ;;  %v4320_v57 = vand.u32 4294901760, %v4319_v16  ;;  %v4331_v30 = vand.u32 4294901760, %v4330_v50 }
 0x448   :  { %4293 = vmatprep.mubr.f32.mxu0 %v13552_v26  ;;  %5056 = vmatprep.mubr.f32.mxu1 %v13552_v26 }
 0x449   :  { %v13655_v16 = vand.u32 4294901760, %v11560_v15 }
 0x44b   :  { %4299 = vmatmul.mubr.f32.gmra.mrb[174].mxu0 %v4298_v56  ;;  %5059 = vmatmul.mubr.f32.gmra.mrb[82].mxu1 %v13651_v33  ;;  %v13112_v56 = vand.u32 4294901760, %v11572_v52  ;;  %v4341_v60 = vsub.f32 %v11560_v15, %v13655_v16  ;;  %v13658_v16 = vld [vmem:[#allocation58_spill] sm:$0xff] }
 0x44c   :  { %4304 = vmatprep.mubr.f32.mxu0 %v13552_v26  ;;  %5064 = vmatprep.mubr.f32.mxu1 %v13552_v26 }
 0x44d   :  { %v4352_v50 = vsub.f32 %v11572_v52, %v13112_v56  ;;  %v13661_v56 = vld [vmem:[#allocation64_spill] sm:$0xff] }
 0x44f   :  { %4310 = vmatmul.mubr.f32.gmra.mrb[176].mxu0 %v4309_v17  ;;  %5067 = vmatmul.mubr.f32.gmra.mrb[84].mxu1 %v13653_v39  ;;  %v11582_v17 = vsub.f32 %v11390_v40, %v11401_v23  ;;  %v11594_v40 = vsub.f32 %v11408_v25, %v11419_v35  ;;  %v4342_v23 = vand.u32 4294901760, %v4341_v60  ;;  %v4353_v25 = vand.u32 4294901760, %v4352_v50  ;;  %v13662_v50 = vld [vmem:[#allocation66_spill] sm:$0xff] }
 0x450   :  { %4315 = vmatprep.mubr.f32.mxu0 %v13552_v26  ;;  %5072 = vmatprep.mubr.f32.mxu1 %v13552_v26 }
 0x451   :  { %13657 = vst [vmem:[#allocation72_spill] sm:$0xff] %v11594_v40  ;;  %v13660_v60 = vand.u32 4294901760, %v11582_v17 }
 0x453   :  { %4321 = vmatmul.mubr.f32.gmra.mrb[178].mxu0 %v4320_v57  ;;  %5075 = vmatmul.mubr.f32.gmra.mrb[86].mxu1 %v13654_v8  ;;  %v13117_v57 = vand.u32 4294901760, %v11594_v40  ;;  %v4363_v35 = vsub.f32 %v11582_v17, %v13660_v60 }
 0x454   :  { %4326 = vmatprep.mubr.f32.mxu0 %v13552_v26  ;;  %5080 = vmatprep.mubr.f32.mxu1 %v13552_v26 }
 0x455   :  { %v4364_v32 = vand.u32 4294901760, %v4363_v35 }
 0x457   :  { %4332 = vmatmul.mubr.f32.gmra.mrb[180].mxu0 %v4331_v30  ;;  %5083 = vmatmul.mubr.f32.gmra.mrb[88].mxu1 %v13656_v37  ;;  %v11604_v30 = vsub.f32 %v11426_v9, %v11437_v19  ;;  %v4374_v9 = vsub.f32 %v11594_v40, %v13117_v57  ;;  %v13663_v19 = vld [vmem:[#allocation73_spill] sm:$0xff]  ;;  %v13666_v57 = vld [vmem:[#allocation82_spill] sm:$0xff] }
 0x458   :  { %4337 = vmatprep.mubr.f32.mxu0 %v13552_v26  ;;  %5088 = vmatprep.mubr.f32.mxu1 %v13552_v26 }
 0x459   :  { %13659 = vst [vmem:[#allocation76_spill] sm:$0xff] %v11604_v30 }
 0x45b   :  { %4343 = vmatmul.mubr.f32.gmra.mrb[182].mxu0 %v4342_v23  ;;  %5091 = vmatmul.mubr.f32.gmra.mrb[90].mxu1 %v13658_v16  ;;  %v13118_v23 = vand.u32 4294901760, %v11604_v30 }
 0x45c   :  { %4348 = vmatprep.mubr.f32.mxu0 %v13552_v26  ;;  %5096 = vmatprep.mubr.f32.mxu1 %v13552_v26 }
 0x45d   :  { %v4385_v60 = vsub.f32 %v11604_v30, %v13118_v23  ;;  %v13668_v23 = vld [vmem:[#allocation86_spill] sm:$0xff] }
 0x45f   :  { %4354 = vmatmul.mubr.f32.gmra.mrb[184].mxu0 %v4353_v25  ;;  %5099 = vmatmul.mubr.f32.gmra.mrb[92].mxu1 %v13661_v56  ;;  %v4375_v25 = vand.u32 4294901760, %v4374_v9  ;;  %v4386_v35 = vand.u32 4294901760, %v4385_v60  ;;  %v13665_v9 = vld [vmem:[#allocation14_spill] sm:$0xff]  ;;  %v13669_v60 = vld [vmem:[#allocation17_spill] sm:$0xff] }
 0x460   :  { %4359 = vmatprep.mubr.f32.mxu0 %v13552_v26  ;;  %5104 = vmatprep.mubr.f32.mxu1 %v13552_v26 }
 0x463   :  { %4365 = vmatmul.mubr.f32.gmra.mrb[186].mxu0 %v4364_v32  ;;  %5107 = vmatmul.mubr.f32.gmra.mrb[94].mxu1 %v13662_v50  ;;  %v13664_v32 = vld [vmem:[#allocation74_spill] sm:$0xff] }
 0x464   :  { %4370 = vmatprep.mubr.f32.mxu0 %v13552_v26  ;;  %5112 = vmatprep.mubr.f32.mxu1 %v13552_v26 }
 0x467   :  { %4376 = vmatmul.mubr.f32.gmra.mrb[188].mxu0 %v4375_v25  ;;  %5115 = vmatmul.mubr.f32.gmra.mrb[96].mxu1 %v13663_v19  ;;  %v13667_v25 = vld [vmem:[#allocation12_spill] sm:$0xff] }
 0x468   :  { %4381 = vmatprep.mubr.f32.mxu0 %v13552_v26  ;;  %5120 = vmatprep.mubr.f32.mxu1 %v13552_v26 }
 0x46b   :  { %4387 = vmatmul.mubr.f32.gmra.mrb[190].mxu0 %v4386_v35  ;;  %5123 = vmatmul.mubr.f32.gmra.mrb[98].mxu1 %v13664_v32  ;;  %v13670_v35 = vld [vmem:[#allocation95_spill] sm:$0xff] }
 0x46c   :  { %4467 = vmatprep.mubr.f32.mxu0 %v13552_v26  ;;  %5128 = vmatprep.mubr.f32.mxu1 %v13552_v26 }
 0x46f   :  { %4469 = vmatmul.mubr.f32.vlgmr.msra.gmra.mrb[64].mxu0 %v13665_v9  ;;  %5131 = vmatmul.mubr.f32.gmra.mrb[100].mxu1 %v13666_v57  ;;  %v13680_v9 = vld [vmem:[#allocation118_spill] sm:$0xff] }
 0x470   :  { %4474 = vmatprep.mubr.f32.mxu0 %v13552_v26  ;;  %5136 = vmatprep.mubr.f32.mxu1 %v13552_v26 }
 0x473   :  { %4476 = vmatmul.mubr.f32.gmra.mrb[66].mxu0 %v13667_v25  ;;  %5139 = vmatmul.mubr.f32.gmra.mrb[102].mxu1 %v13668_v23  ;;  %v13676_v25 = vld [vmem:[#allocation114_spill] sm:$0xff] }
 0x474   :  { %4481 = vmatprep.mubr.f32.mxu0 %v13552_v26  ;;  %5144 = vmatprep.mubr.f32.mxu1 %v13552_v26 }
 0x477   :  { %4483 = vmatmul.mubr.f32.gmra.mrb[68].mxu0 %v13669_v60  ;;  %5147 = vmatmul.mubr.f32.gmra.mrb[104].mxu1 %v13670_v35  ;;  %v13675_v60 = vld [vmem:[#allocation22_spill] sm:$0xff] }
 0x478   :  { %4488 = vmatprep.mubr.f32.mxu0 %v13552_v26  ;;  %5152 = vmatprep.mubr.f32.mxu1 %v13552_v26 }
 0x47b   :  { %4490 = vmatmul.mubr.f32.gmra.mrb[70].mxu0 %v13671_v3  ;;  %5155 = vmatmul.mubr.f32.gmra.mrb[106].mxu1 %v13672_v43  ;;  %v13677_v3 = vld [vmem:[#allocation27_spill] sm:$0xff] }
 0x47c   :  { %4495 = vmatprep.mubr.f32.mxu0 %v13552_v26  ;;  %5160 = vmatprep.mubr.f32.mxu1 %v13552_v26 }
 0x47f   :  { %4497 = vmatmul.mubr.f32.gmra.mrb[72].mxu0 %v13673_v29  ;;  %5163 = vmatmul.mubr.f32.gmra.mrb[108].mxu1 %v13674_v27  ;;  %v13679_v29 = vld [vmem:[#allocation31_spill] sm:$0xff] }
 0x480   :  { %4502 = vmatprep.mubr.f32.mxu0 %v13552_v26  ;;  %5168 = vmatprep.mubr.f32.mxu1 %v13552_v26 }
 0x483   :  { %4504 = vmatmul.mubr.f32.gmra.mrb[74].mxu0 %v13675_v60  ;;  %5171 = vmatmul.mubr.f32.gmra.mrb[110].mxu1 %v13676_v25  ;;  %v13681_v60 = vld [vmem:[#allocation35_spill] sm:$0xff] }
 0x484   :  { %4509 = vmatprep.mubr.f32.mxu0 %v13552_v26  ;;  %5176 = vmatprep.mubr.f32.mxu1 %v13552_v26  ;;  %v13682_v25 = vld [vmem:[#allocation131_spill] sm:$0xff] }
 0x487   :  { %4511 = vmatmul.mubr.f32.gmra.mrb[76].mxu0 %v13677_v3  ;;  %5179 = vmatmul.mubr.f32.gmra.mrb[112].mxu1 %v13678_v24  ;;  %v13683_v3 = vld [vmem:[#allocation37_spill] sm:$0xff]  ;;  %v13684_v24 = vld [vmem:[#allocation6_spill] sm:$0xff] }
 0x488   :  { %4516 = vmatprep.mubr.f32.mxu0 %v13552_v26  ;;  %5184 = vmatprep.mubr.f32.mxu1 %v13552_v26 }
 0x48b   :  { %4518 = vmatmul.mubr.f32.gmra.mrb[78].mxu0 %v13679_v29  ;;  %5187 = vmatmul.mubr.f32.gmra.mrb[114].mxu1 %v13680_v9  ;;  %v13685_v29 = vld [vmem:[#allocation43_spill] sm:$0xff] }
 0x48c   :  { %4523 = vmatprep.mubr.f32.mxu0 %v13552_v26  ;;  %5192 = vmatprep.mubr.f32.mxu1 %v13552_v26  ;;  %v13686_v9 = vld [vmem:[#allocation15_spill] sm:$0xff] }
 0x48f   :  { %4525 = vmatmul.mubr.f32.gmra.mrb[80].mxu0 %v13681_v60  ;;  %5195 = vmatmul.mubr.f32.gmra.mrb[116].mxu1 %v13682_v25  ;;  %v13687_v60 = vld [vmem:[#allocation47_spill] sm:$0xff]  ;;  %v13688_v25 = vld [vmem:[#allocation20_spill] sm:$0xff] }
 0x490   :  { %4530 = vmatprep.mubr.f32.mxu0 %v13552_v26  ;;  %5200 = vmatprep.mubr.f32.mxu1 %v13552_v26 }
 0x493   :  { %4532 = vmatmul.mubr.f32.gmra.mrb[82].mxu0 %v13683_v3  ;;  %5203 = vmatmul.mubr.f32.gmra.mrb[118].mxu1 %v13684_v24  ;;  %v13689_v3 = vld [vmem:[#allocation52_spill] sm:$0xff] }
 0x494   :  { %4537 = vmatprep.mubr.f32.mxu0 %v13552_v26  ;;  %5208 = vmatprep.mubr.f32.mxu1 %v13552_v26 }
 0x497   :  { %4539 = vmatmul.mubr.f32.gmra.mrb[84].mxu0 %v13685_v29  ;;  %5211 = vmatmul.mubr.f32.gmra.mrb[120].mxu1 %v13686_v9  ;;  %v13690_v29 = vld [vmem:[#allocation54_spill] sm:$0xff] }
 0x498   :  { %4544 = vmatprep.mubr.f32.mxu0 %v13552_v26  ;;  %5216 = vmatprep.mubr.f32.mxu1 %v13552_v26 }
 0x49b   :  { %4546 = vmatmul.mubr.f32.gmra.mrb[86].mxu0 %v13687_v60  ;;  %5219 = vmatmul.mubr.f32.gmra.mrb[122].mxu1 %v13688_v25  ;;  %v13691_v60 = vld [vmem:[#allocation60_spill] sm:$0xff] }
 0x49c   :  { %4551 = vmatprep.mubr.f32.mxu0 %v13552_v26  ;;  %5224 = vmatprep.mubr.f32.mxu1 %v13552_v26 }
 0x49f   :  { %4553 = vmatmul.mubr.f32.gmra.mrb[88].mxu0 %v13689_v3  ;;  %5227 = vmatmul.mubr.f32.gmra.mrb[124].mxu1 %v11103_v63  ;;  %v13692_v3 = vld [vmem:[#allocation63_spill] sm:$0xff] }
 0x4a0   :  { %4558 = vmatprep.mubr.f32.mxu0 %v13552_v26  ;;  %5232 = vmatprep.mubr.f32.mxu1 %v13552_v26 }
 0x4a3   :  { %4560 = vmatmul.mubr.f32.gmra.mrb[90].mxu0 %v13690_v29  ;;  %5235 = vmatmul.mubr.f32.gmra.mrb[126].mxu1 %v11121_v34  ;;  %v13693_v29 = vld [vmem:[#allocation69_spill] sm:$0xff] }
 0x4a4   :  { %4565 = vmatprep.mubr.f32.mxu0 %v13552_v26  ;;  %5240 = vmatprep.mubr.f32.mxu1 %v13552_v26 }
 0x4a7   :  { %4567 = vmatmul.mubr.f32.gmra.mrb[92].mxu0 %v13691_v60  ;;  %5243 = vmatmul.mubr.f32.gmra.mrb[0].mxu1 %v11146_v4  ;;  %v13694_v60 = vld [vmem:[#allocation70_spill] sm:$0xff] }
 0x4a8   :  { %4572 = vmatprep.mubr.f32.mxu0 %v13552_v26  ;;  %5248 = vmatprep.mubr.f32.mxu1 %v13552_v26 }
 0x4ab   :  { %4574 = vmatmul.mubr.f32.gmra.mrb[94].mxu0 %v13692_v3  ;;  %5251 = vmatmul.mubr.f32.gmra.mrb[2].mxu1 %v11161_v59  ;;  %v13695_v3 = vld [vmem:[#allocation75_spill] sm:$0xff] }
 0x4ac   :  { %4579 = vmatprep.mubr.f32.mxu0 %v13552_v26  ;;  %5256 = vmatprep.mubr.f32.mxu1 %v13552_v26 }
 0x4af   :  { %4581 = vmatmul.mubr.f32.gmra.mrb[96].mxu0 %v13693_v29  ;;  %5259 = vmatmul.mubr.f32.gmra.mrb[4].mxu1 %v11182_v22  ;;  %v13696_v29 = vld [vmem:[#allocation80_spill] sm:$0xff] }
 0x4b0   :  { %4586 = vmatprep.mubr.f32.mxu0 %v13552_v26  ;;  %5264 = vmatprep.mubr.f32.mxu1 %v13552_v26 }
 0x4b3   :  { %4588 = vmatmul.mubr.f32.gmra.mrb[98].mxu0 %v13694_v60  ;;  %5267 = vmatmul.mubr.f32.gmra.mrb[6].mxu1 %v11197_v55  ;;  %v13697_v60 = vld [vmem:[#allocation89_spill] sm:$0xff]  ;;  %v13700_v55 = vld [vmem:[#allocation92_spill] sm:$0xff] }
 0x4b4   :  { %4593 = vmatprep.mubr.f32.mxu0 %v13552_v26  ;;  %5272 = vmatprep.mubr.f32.mxu1 %v13552_v26 }
 0x4b7   :  { %4595 = vmatmul.mubr.f32.gmra.mrb[100].mxu0 %v13695_v3  ;;  %5275 = vmatmul.mubr.f32.gmra.mrb[8].mxu1 %v11218_v21 }
 0x4b8   :  { %4600 = vmatprep.mubr.f32.mxu0 %v13552_v26  ;;  %5280 = vmatprep.mubr.f32.mxu1 %v13552_v26 }
 0x4bb   :  { %4602 = vmatmul.mubr.f32.gmra.mrb[102].mxu0 %v13696_v29  ;;  %5283 = vmatmul.mubr.f32.gmra.mrb[10].mxu1 %v11233_v11 }
 0x4bc   :  { %4607 = vmatprep.mubr.f32.mxu0 %v13552_v26  ;;  %5288 = vmatprep.mubr.f32.mxu1 %v13552_v26 }
 0x4bf   :  { %4609 = vmatmul.mubr.f32.gmra.mrb[104].mxu0 %v13697_v60  ;;  %5291 = vmatmul.mubr.f32.gmra.mrb[12].mxu1 %v11254_v42  ;;  %v13703_v42 = vld [vmem:[#allocation102_spill] sm:$0xff] }
 0x4c0   :  { %4614 = vmatprep.mubr.f32.mxu0 %v13552_v26  ;;  %5296 = vmatprep.mubr.f32.mxu1 %v13552_v26 }
 0x4c2   :  { %v11713_v3 = vpop.f32.mrb[128].mxu0 }
 0x4c3   :  { %13698 = vst [vmem:[#allocation77_spill] sm:$0xff] %v11713_v3  ;;  %v11715_v21 = vpop.f32.mrb[129].mxu0  ;;  %4616 = vmatmul.mubr.f32.gmra.mrb[106].mxu0 %v13700_v55  ;;  %5299 = vmatmul.mubr.f32.gmra.mrb[14].mxu1 %v11269_v47  ;;  %v13706_v55 = vld [vmem:[#allocation107_spill] sm:$0xff] }
 0x4c4   :  { %13699 = vst [vmem:[#allocation78_spill] sm:$0xff] %v11715_v21  ;;  %4621 = vmatprep.mubr.f32.mxu0 %v13552_v26  ;;  %5304 = vmatprep.mubr.f32.mxu1 %v13552_v26 }
 0x4c6   :  { %v11721_v29 = vpop.f32.mrb[130].mxu0 }
 0x4c7   :  { %13701 = vst [vmem:[#allocation81_spill] sm:$0xff] %v11721_v29  ;;  %v11723_v60 = vpop.f32.mrb[131].mxu0  ;;  %4623 = vmatmul.mubr.f32.gmra.mrb[108].mxu0 %v13703_v42  ;;  %5307 = vmatmul.mubr.f32.gmra.mrb[16].mxu1 %v11290_v1  ;;  %v13709_v42 = vld [vmem:[#allocation121_spill] sm:$0xff] }
 0x4c8   :  { %13702 = vst [vmem:[#allocation83_spill] sm:$0xff] %v11723_v60  ;;  %4628 = vmatprep.mubr.f32.mxu0 %v13552_v26  ;;  %5312 = vmatprep.mubr.f32.mxu1 %v13552_v26 }
 0x4ca   :  { %v11729_v21 = vpop.f32.mrb[132].mxu0 }
 0x4cb   :  { %13704 = vst [vmem:[#allocation85_spill] sm:$0xff] %v11729_v21  ;;  %v11731_v3 = vpop.f32.mrb[133].mxu0  ;;  %4630 = vmatmul.mubr.f32.gmra.mrb[110].mxu0 %v13706_v55  ;;  %5315 = vmatmul.mubr.f32.gmra.mrb[18].mxu1 %v11305_v61  ;;  %v13712_v55 = vld [vmem:[#allocation98_spill] sm:$0xff] }
 0x4cc   :  { %13705 = vst [vmem:[#allocation87_spill] sm:$0xff] %v11731_v3  ;;  %4635 = vmatprep.mubr.f32.mxu0 %v13552_v26  ;;  %5320 = vmatprep.mubr.f32.mxu1 %v13552_v26 }
 0x4ce   :  { %v11737_v60 = vpop.f32.mrb[134].mxu0 }
 0x4cf   :  { %13707 = vst [vmem:[#allocation88_spill] sm:$0xff] %v11737_v60  ;;  %v11739_v29 = vpop.f32.mrb[135].mxu0  ;;  %4637 = vmatmul.mubr.f32.gmra.mrb[112].mxu0 %v13709_v42  ;;  %5323 = vmatmul.mubr.f32.gmra.mrb[20].mxu1 %v11326_v58  ;;  %v13715_v42 = vld [vmem:[#allocation122_spill] sm:$0xff] }
 0x4d0   :  { %13708 = vst [vmem:[#allocation90_spill] sm:$0xff] %v11739_v29  ;;  %4642 = vmatprep.mubr.f32.mxu0 %v13552_v26  ;;  %5328 = vmatprep.mubr.f32.mxu1 %v13552_v26 }
 0x4d2   :  { %v11745_v3 = vpop.f32.mrb[136].mxu0 }
 0x4d3   :  { %13710 = vst [vmem:[#allocation93_spill] sm:$0xff] %v11745_v3  ;;  %v11747_v21 = vpop.f32.mrb[137].mxu0  ;;  %4644 = vmatmul.mubr.f32.gmra.mrb[114].mxu0 %v13712_v55  ;;  %5331 = vmatmul.mubr.f32.gmra.mrb[22].mxu1 %v11341_v46  ;;  %v13718_v55 = vld [vmem:[#allocation130_spill] sm:$0xff] }
 0x4d4   :  { %13711 = vst [vmem:[#allocation94_spill] sm:$0xff] %v11747_v21  ;;  %4649 = vmatprep.mubr.f32.mxu0 %v13552_v26  ;;  %5336 = vmatprep.mubr.f32.mxu1 %v13552_v26 }
 0x4d6   :  { %v11753_v29 = vpop.f32.mrb[138].mxu0 }
 0x4d7   :  { %13713 = vst [vmem:[#allocation97_spill] sm:$0xff] %v11753_v29  ;;  %v11755_v60 = vpop.f32.mrb[139].mxu0  ;;  %4651 = vmatmul.mubr.f32.gmra.mrb[116].mxu0 %v13715_v42  ;;  %5339 = vmatmul.mubr.f32.gmra.mrb[24].mxu1 %v11362_v38  ;;  %v13721_v42 = vld [vmem:[#allocation7_spill] sm:$0xff] }
 0x4d8   :  { %13714 = vst [vmem:[#allocation99_spill] sm:$0xff] %v11755_v60  ;;  %4656 = vmatprep.mubr.f32.mxu0 %v13552_v26  ;;  %5344 = vmatprep.mubr.f32.mxu1 %v13552_v26 }
 0x4da   :  { %v11761_v21 = vpop.f32.mrb[140].mxu0 }
 0x4db   :  { %13716 = vst [vmem:[#allocation101_spill] sm:$0xff] %v11761_v21  ;;  %v11763_v3 = vpop.f32.mrb[141].mxu0  ;;  %4658 = vmatmul.mubr.f32.gmra.mrb[118].mxu0 %v13718_v55  ;;  %5347 = vmatmul.mubr.f32.gmra.mrb[26].mxu1 %v11377_v5  ;;  %v13724_v55 = vld [vmem:[#allocation11_spill] sm:$0xff] }
 0x4dc   :  { %13717 = vst [vmem:[#allocation103_spill] sm:$0xff] %v11763_v3  ;;  %4663 = vmatprep.mubr.f32.mxu0 %v13552_v26  ;;  %5352 = vmatprep.mubr.f32.mxu1 %v13552_v26 }
 0x4de   :  { %v11769_v60 = vpop.f32.mrb[142].mxu0 }
 0x4df   :  { %13719 = vst [vmem:[#allocation104_spill] sm:$0xff] %v11769_v60  ;;  %v11771_v29 = vpop.f32.mrb[143].mxu0  ;;  %4665 = vmatmul.mubr.f32.gmra.mrb[120].mxu0 %v13721_v42  ;;  %5355 = vmatmul.mubr.f32.gmra.mrb[28].mxu1 %v11398_v44  ;;  %v13727_v42 = vld [vmem:[#allocation21_spill] sm:$0xff] }
 0x4e0   :  { %13720 = vst [vmem:[#allocation108_spill] sm:$0xff] %v11771_v29  ;;  %4670 = vmatprep.mubr.f32.mxu0 %v13552_v26  ;;  %5360 = vmatprep.mubr.f32.mxu1 %v13552_v26 }
 0x4e2   :  { %v11777_v3 = vpop.f32.mrb[144].mxu0 }
 0x4e3   :  { %13722 = vst [vmem:[#allocation109_spill] sm:$0xff] %v11777_v3  ;;  %v11779_v21 = vpop.f32.mrb[145].mxu0  ;;  %4672 = vmatmul.mubr.f32.gmra.mrb[122].mxu0 %v13724_v55  ;;  %5363 = vmatmul.mubr.f32.gmra.mrb[30].mxu1 %v11413_v7  ;;  %v13730_v55 = vld [vmem:[#allocation24_spill] sm:$0xff] }
 0x4e4   :  { %13723 = vst [vmem:[#allocation110_spill] sm:$0xff] %v11779_v21  ;;  %4677 = vmatprep.mubr.f32.mxu0 %v13552_v26  ;;  %5368 = vmatprep.mubr.f32.mxu1 %v13552_v26 }
 0x4e6   :  { %v11785_v29 = vpop.f32.mrb[146].mxu0 }
 0x4e7   :  { %13725 = vst [vmem:[#allocation111_spill] sm:$0xff] %v11785_v29  ;;  %v11787_v60 = vpop.f32.mrb[147].mxu0  ;;  %4679 = vmatmul.mubr.f32.gmra.mrb[124].mxu0 %v13727_v42  ;;  %5371 = vmatmul.mubr.f32.gmra.mrb[32].mxu1 %v11434_v28 }
 0x4e8   :  { %13726 = vst [vmem:[#allocation116_spill] sm:$0xff] %v11787_v60  ;;  %4684 = vmatprep.mubr.f32.mxu0 %v13552_v26  ;;  %5376 = vmatprep.mubr.f32.mxu1 %v13552_v26 }
 0x4ea   :  { %v11793_v21 = vpop.f32.mrb[148].mxu0 }
 0x4eb   :  { %13728 = vst [vmem:[#allocation117_spill] sm:$0xff] %v11793_v21  ;;  %v11795_v3 = vpop.f32.mrb[149].mxu0  ;;  %4686 = vmatmul.mubr.f32.gmra.mrb[126].mxu0 %v13730_v55  ;;  %5379 = vmatmul.mubr.f32.gmra.mrb[34].mxu1 %v11447_v54 }
 0x4ec   :  { %13729 = vst [vmem:[#allocation119_spill] sm:$0xff] %v11795_v3  ;;  %5384 = vmatprep.mubr.f32.mxu1 %v13552_v26 }
 0x4ee   :  { %v11800_v29 = vpop.f32.mrb[150].mxu0 }
 0x4ef   :  { %13731 = vst [vmem:[#allocation120_spill] sm:$0xff] %v11800_v29  ;;  %v11802_v60 = vpop.f32.mrb[151].mxu0  ;;  %5387 = vmatmul.mubr.f32.gmra.mrb[36].mxu1 %v11459_v45 }
 0x4f0   :  { %13732 = vst [vmem:[#allocation123_spill] sm:$0xff] %v11802_v60  ;;  %5392 = vmatprep.mubr.f32.mxu1 %v13552_v26 }
 0x4f2   :  { %v11806_v42 = vpop.f32.mrb[152].mxu0 }
 0x4f3   :  { %13733 = vst [vmem:[#allocation124_spill] sm:$0xff] %v11806_v42  ;;  %v11808_v28 = vpop.f32.mrb[153].mxu0  ;;  %5395 = vmatmul.mubr.f32.gmra.mrb[38].mxu1 %v11472_v62 }
 0x4f4   :  { %13734 = vst [vmem:[#allocation126_spill] sm:$0xff] %v11808_v28  ;;  %5400 = vmatprep.mubr.f32.mxu1 %v13552_v26 }
 0x4f6   :  { %v11812_v3 = vpop.f32.mrb[154].mxu0 }
 0x4f7   :  { %13735 = vst [vmem:[#allocation128_spill] sm:$0xff] %v11812_v3  ;;  %v11814_v21 = vpop.f32.mrb[155].mxu0  ;;  %5403 = vmatmul.mubr.f32.gmra.mrb[40].mxu1 %v11484_v13 }
 0x4f8   :  { %13736 = vst [vmem:[#allocation129_spill] sm:$0xff] %v11814_v21  ;;  %5408 = vmatprep.mubr.f32.mxu1 %v13552_v26 }
 0x4fa   :  { %v11818_v60 = vpop.f32.mrb[156].mxu0 }
 0x4fb   :  { %13737 = vst [vmem:[#allocation25_spill] sm:$0xff] %v11818_v60  ;;  %v11820_v29 = vpop.f32.mrb[157].mxu0  ;;  %5411 = vmatmul.mubr.f32.gmra.mrb[42].mxu1 %v11494_v2 }
 0x4fc   :  { %13738 = vst [vmem:[#allocation26_spill] sm:$0xff] %v11820_v29  ;;  %5416 = vmatprep.mubr.f32.mxu1 %v13552_v26 }
 0x4fe   :  { %v11824_v28 = vpop.f32.mrb[158].mxu0 }
 0x4ff   :  { %13739 = vst [vmem:[#allocation32_spill] sm:$0xff] %v11824_v28  ;;  %v11826_v42 = vpop.f32.mrb[159].mxu0  ;;  %5419 = vmatmul.mubr.f32.gmra.mrb[44].mxu1 %v11506_v18 }
 0x500   :  { %13740 = vst [vmem:[#allocation33_spill] sm:$0xff] %v11826_v42  ;;  %5424 = vmatprep.mubr.f32.mxu1 %v13552_v26 }
 0x502   :  { %v11830_v21 = vpop.f32.mrb[160].mxu0 }
 0x503   :  { %13741 = vst [vmem:[#allocation41_spill] sm:$0xff] %v11830_v21  ;;  %v11832_v3 = vpop.f32.mrb[161].mxu0  ;;  %5427 = vmatmul.mubr.f32.gmra.mrb[46].mxu1 %v11516_v41 }
 0x504   :  { %13742 = vst [vmem:[#allocation42_spill] sm:$0xff] %v11832_v3  ;;  %5432 = vmatprep.mubr.f32.mxu1 %v13552_v26 }
 0x506   :  { %v11836_v29 = vpop.f32.mrb[162].mxu0 }
 0x507   :  { %13743 = vst [vmem:[#allocation49_spill] sm:$0xff] %v11836_v29  ;;  %v11838_v60 = vpop.f32.mrb[163].mxu0  ;;  %5435 = vmatmul.mubr.f32.gmra.mrb[48].mxu1 %v11528_v20 }
 0x508   :  { %13744 = vst [vmem:[#allocation50_spill] sm:$0xff] %v11838_v60  ;;  %5440 = vmatprep.mubr.f32.mxu1 %v13552_v26 }
 0x50a   :  { %v11842_v42 = vpop.f32.mrb[164].mxu0 }
 0x50b   :  { %13745 = vst [vmem:[#allocation57_spill] sm:$0xff] %v11842_v42  ;;  %v11844_v28 = vpop.f32.mrb[165].mxu0  ;;  %5443 = vmatmul.mubr.f32.gmra.mrb[50].mxu1 %v11538_v0 }
 0x50c   :  { %13746 = vst [vmem:[#allocation58_spill] sm:$0xff] %v11844_v28  ;;  %5448 = vmatprep.mubr.f32.mxu1 %v13552_v26 }
 0x50e   :  { %v11848_v3 = vpop.f32.mrb[166].mxu0 }
 0x50f   :  { %13747 = vst [vmem:[#allocation64_spill] sm:$0xff] %v11848_v3  ;;  %v11850_v21 = vpop.f32.mrb[167].mxu0  ;;  %5451 = vmatmul.mubr.f32.gmra.mrb[52].mxu1 %v11550_v31 }
 0x510   :  { %13748 = vst [vmem:[#allocation66_spill] sm:$0xff] %v11850_v21  ;;  %5456 = vmatprep.mubr.f32.mxu1 %v13552_v26 }
 0x512   :  { %v11854_v60 = vpop.f32.mrb[168].mxu0 }
 0x513   :  { %13749 = vst [vmem:[#allocation73_spill] sm:$0xff] %v11854_v60  ;;  %v11856_v29 = vpop.f32.mrb[169].mxu0  ;;  %5459 = vmatmul.mubr.f32.gmra.mrb[54].mxu1 %v11560_v15 }
 0x514   :  { %13750 = vst [vmem:[#allocation74_spill] sm:$0xff] %v11856_v29  ;;  %5464 = vmatprep.mubr.f32.mxu1 %v13552_v26 }
 0x516   :  { %v11860_v28 = vpop.f32.mrb[170].mxu0 }
 0x517   :  { %13751 = vst [vmem:[#allocation82_spill] sm:$0xff] %v11860_v28  ;;  %v11862_v42 = vpop.f32.mrb[171].mxu0  ;;  %5467 = vmatmul.mubr.f32.gmra.mrb[56].mxu1 %v11572_v52 }
 0x518   :  { %13752 = vst [vmem:[#allocation86_spill] sm:$0xff] %v11862_v42  ;;  %5472 = vmatprep.mubr.f32.mxu1 %v13552_v26 }
 0x51a   :  { %v11866_v21 = vpop.f32.mrb[172].mxu0 }
 0x51b   :  { %13753 = vst [vmem:[#allocation95_spill] sm:$0xff] %v11866_v21  ;;  %v11868_v3 = vpop.f32.mrb[173].mxu0  ;;  %5475 = vmatmul.mubr.f32.gmra.mrb[58].mxu1 %v11582_v17 }
 0x51c   :  { %13754 = vst [vmem:[#allocation100_spill] sm:$0xff] %v11868_v3  ;;  %5480 = vmatprep.mubr.f32.mxu1 %v13552_v26 }
 0x51e   :  { %v11872_v29 = vpop.f32.mrb[174].mxu0 }
 0x51f   :  { %13755 = vst [vmem:[#allocation112_spill] sm:$0xff] %v11872_v29  ;;  %v11874_v60 = vpop.f32.mrb[175].mxu0  ;;  %5483 = vmatmul.mubr.f32.gmra.mrb[60].mxu1 %v11594_v40  ;;  %v13761_v29 = vand.u32 4294901760, %v10588_v49  ;;  %v13764_v40 = vld [vmem:[#allocation9_spill] sm:$0xff] }
 0x520   :  { %13756 = vst [vmem:[#allocation6_spill] sm:$0xff] %v11874_v60  ;;  %5488 = vmatprep.mubr.f32.mxu1 %v13552_v26  ;;  %v13762_v60 = vld [vmem:[#allocation13_spill] sm:$0xff] }
 0x521   :  { %v13763_v55 = vand.u32 4294901760, %v13762_v60  ;;  %v13773_v60 = vand.u32 4294901760, %v10605_v51 }
 0x522   :  { %v11878_v42 = vpop.f32.mrb[176].mxu0 }
 0x523   :  { %13757 = vst [vmem:[#allocation15_spill] sm:$0xff] %v11878_v42  ;;  %v11880_v28 = vpop.f32.mrb[177].mxu0  ;;  %5491 = vmatmul.mubr.f32.gmra.mrb[62].mxu1 %v11604_v30  ;;  %v13767_v30 = vand.u32 4294901760, %v10585_v14 }
 0x524   :  { %13758 = vst [vmem:[#allocation20_spill] sm:$0xff] %v11880_v28  ;;  %5563 = vmatprep.mubr.f32.mxu1 %v13552_v26 }
 0x526   :  { %v11884_v3 = vpop.f32.mrb[178].mxu0 }
 0x527   :  { %13759 = vst [vmem:[#allocation132_spill] sm:$0xff] %v11884_v3  ;;  %v11886_v21 = vpop.f32.mrb[179].mxu0  ;;  %5567 = vmatmul.mubr.f32.vlgmr.msra.gmra.mrb[64].mxu1 %v13761_v29  ;;  %v13770_v29 = vand.u32 4294901760, %v10602_v12  ;;  %v13809_v3 = vand.u32 4294901760, %v13663_v19 }
 0x528   :  { %13760 = vst [vmem:[#allocation133_spill] sm:$0xff] %v11886_v21  ;;  %6147 = vmatpush1.msra.mxu1 %v13763_v55  ;;  %5572 = vmatprep.mubr.f32.mxu1 %v13552_v26 }
 0x529   :  { %6660 = vmatprep.subr.mxu1 %v13764_v40 }
 0x52a   :  { %v11894_v42 = vpop.f32.mrb[180].mxu0 }
 0x52b   :  { %13765 = vst [vmem:[#allocation13_spill] sm:$0xff] %v11894_v42  ;;  %v11896_v28 = vpop.f32.mrb[181].mxu0  ;;  %5576 = vmatmul.mubr.f32.gmra.mrb[66].mxu1 %v13767_v30  ;;  %v13806_v42 = vand.u32 4294901760, %v13662_v50 }
 0x52c   :  { %13766 = vst [vmem:[#allocation9_spill] sm:$0xff] %v11896_v28  ;;  %5581 = vmatprep.mubr.f32.mxu1 %v13552_v26  ;;  %v13803_v28 = vand.u32 4294901760, %v13661_v56 }
 0x52e   :  { %v11901_v21 = vpop.f32.mrb[182].mxu0 }
 0x52f   :  { %13768 = vst [vmem:[#allocation134_spill] sm:$0xff] %v11901_v21  ;;  %v11903_v49 = vpop.f32.mrb[183].mxu0  ;;  %5585 = vmatmul.mubr.f32.gmra.mrb[68].mxu1 %v13770_v29  ;;  %v13800_v21 = vand.u32 4294901760, %v13658_v16 }
 0x530   :  { %13769 = vst [vmem:[#allocation135_spill] sm:$0xff] %v11903_v49  ;;  %5590 = vmatprep.mubr.f32.mxu1 %v13552_v26  ;;  %v13776_v49 = vand.u32 4294901760, %v13644_v10 }
 0x532   :  { %v11908_v55 = vpop.f32.mrb[184].mxu0 }
 0x533   :  { %13771 = vst [vmem:[#allocation136_spill] sm:$0xff] %v11908_v55  ;;  %v11910_v40 = vpop.f32.mrb[185].mxu0  ;;  %5594 = vmatmul.mubr.f32.gmra.mrb[70].mxu1 %v13773_v60  ;;  %v13797_v55 = vand.u32 4294901760, %v13656_v37 }
 0x534   :  { %13772 = vst [vmem:[#allocation137_spill] sm:$0xff] %v11910_v40  ;;  %5599 = vmatprep.mubr.f32.mxu1 %v13552_v26  ;;  %v13779_v40 = vand.u32 4294901760, %v13645_v53 }
 0x536   :  { %v11915_v14 = vpop.f32.mrb[186].mxu0 }
 0x537   :  { %13774 = vst [vmem:[#allocation138_spill] sm:$0xff] %v11915_v14  ;;  %v11917_v30 = vpop.f32.mrb[187].mxu0  ;;  %5603 = vmatmul.mubr.f32.gmra.mrb[72].mxu1 %v13776_v49  ;;  %v13794_v14 = vand.u32 4294901760, %v13654_v8 }
 0x538   :  { %13775 = vst [vmem:[#allocation139_spill] sm:$0xff] %v11917_v30  ;;  %5608 = vmatprep.mubr.f32.mxu1 %v13552_v26  ;;  %v13782_v30 = vand.u32 4294901760, %v13647_v48 }
 0x53a   :  { %v11922_v12 = vpop.f32.mrb[188].mxu0 }
 0x53b   :  { %13777 = vst [vmem:[#allocation140_spill] sm:$0xff] %v11922_v12  ;;  %v11924_v29 = vpop.f32.mrb[189].mxu0  ;;  %5612 = vmatmul.mubr.f32.gmra.mrb[74].mxu1 %v13779_v40  ;;  %v13791_v12 = vand.u32 4294901760, %v13653_v39 }
 0x53c   :  { %13778 = vst [vmem:[#allocation141_spill] sm:$0xff] %v11924_v29  ;;  %5617 = vmatprep.mubr.f32.mxu1 %v13552_v26  ;;  %v13783_v29 = vand.u32 4294901760, %v13648_v36 }
 0x53e   :  { %v11929_v51 = vpop.f32.mrb[190].mxu0 }
 0x53f   :  { %13780 = vst [vmem:[#allocation142_spill] sm:$0xff] %v11929_v51  ;;  %v11931_v60 = vpop.f32.mrb[191].mxu0  ;;  %5621 = vmatmul.mubr.f32.gmra.mrb[76].mxu1 %v13782_v30  ;;  %v13788_v51 = vand.u32 4294901760, %v13651_v33 }
 0x540   :  { %13781 = vst [vmem:[#allocation143_spill] sm:$0xff] %v11931_v60  ;;  %5626 = vmatprep.mubr.f32.mxu1 %v13552_v26  ;;  %v13785_v60 = vand.u32 4294901760, %v13650_v6 }
 0x542   :  { %v11936_v10 = vpop.f32.mrb[64].mxu0 }
 0x543   :  { %v11938_v49 = vpop.f32.mrb[65].mxu0  ;;  %5630 = vmatmul.mubr.f32.gmra.mrb[78].mxu1 %v13783_v29 }
 0x544   :  { %5635 = vmatprep.mubr.f32.mxu1 %v13552_v26 }
 0x546   :  { %v11943_v53 = vpop.f32.mrb[66].mxu0 }
 0x547   :  { %v11945_v40 = vpop.f32.mrb[67].mxu0  ;;  %5639 = vmatmul.mubr.f32.gmra.mrb[80].mxu1 %v13785_v60 }
 0x548   :  { %13784 = vst [vmem:[#allocation144_spill] sm:$0xff] %v11945_v40  ;;  %5644 = vmatprep.mubr.f32.mxu1 %v13552_v26  ;;  %v13971_v40 = vld [vmem:[#allocation61_spill] sm:$0xff] }
 0x54a   :  { %v11950_v48 = vpop.f32.mrb[68].mxu0 }
 0x54b   :  { %13786 = vst [vmem:[#allocation145_spill] sm:$0xff] %v11950_v48  ;;  %v11952_v30 = vpop.f32.mrb[69].mxu0  ;;  %5648 = vmatmul.mubr.f32.gmra.mrb[82].mxu1 %v13788_v51  ;;  %v13970_v48 = vld [vmem:[#allocation59_spill] sm:$0xff] }
 0x54c   :  { %13787 = vst [vmem:[#allocation146_spill] sm:$0xff] %v11952_v30  ;;  %5653 = vmatprep.mubr.f32.mxu1 %v13552_v26  ;;  %v13969_v30 = vld [vmem:[#allocation56_spill] sm:$0xff] }
 0x54e   :  { %v11957_v36 = vpop.f32.mrb[70].mxu0 }
 0x54f   :  { %13789 = vst [vmem:[#allocation147_spill] sm:$0xff] %v11957_v36  ;;  %v11959_v29 = vpop.f32.mrb[71].mxu0  ;;  %5657 = vmatmul.mubr.f32.gmra.mrb[84].mxu1 %v13791_v12  ;;  %v13968_v36 = vld [vmem:[#allocation55_spill] sm:$0xff] }
 0x550   :  { %13790 = vst [vmem:[#allocation148_spill] sm:$0xff] %v11959_v29  ;;  %5662 = vmatprep.mubr.f32.mxu1 %v13552_v26  ;;  %v13967_v29 = vld [vmem:[#allocation53_spill] sm:$0xff] }
 0x552   :  { %v11964_v6 = vpop.f32.mrb[72].mxu0 }
 0x553   :  { %13792 = vst [vmem:[#allocation149_spill] sm:$0xff] %v11964_v6  ;;  %v11966_v60 = vpop.f32.mrb[73].mxu0  ;;  %5666 = vmatmul.mubr.f32.gmra.mrb[86].mxu1 %v13794_v14  ;;  %v13966_v6 = vld [vmem:[#allocation51_spill] sm:$0xff] }
 0x554   :  { %13793 = vst [vmem:[#allocation150_spill] sm:$0xff] %v11966_v60  ;;  %5671 = vmatprep.mubr.f32.mxu1 %v13552_v26  ;;  %v13965_v60 = vld [vmem:[#allocation48_spill] sm:$0xff] }
 0x556   :  { %v11971_v33 = vpop.f32.mrb[74].mxu0 }
 0x557   :  { %13795 = vst [vmem:[#allocation151_spill] sm:$0xff] %v11971_v33  ;;  %v11973_v51 = vpop.f32.mrb[75].mxu0  ;;  %5675 = vmatmul.mubr.f32.gmra.mrb[88].mxu1 %v13797_v55  ;;  %v13964_v33 = vld [vmem:[#allocation45_spill] sm:$0xff] }
 0x558   :  { %13796 = vst [vmem:[#allocation152_spill] sm:$0xff] %v11973_v51  ;;  %5680 = vmatprep.mubr.f32.mxu1 %v13552_v26  ;;  %v13963_v51 = vld [vmem:[#allocation44_spill] sm:$0xff] }
 0x55a   :  { %v11978_v39 = vpop.f32.mrb[76].mxu0 }
 0x55b   :  { %13798 = vst [vmem:[#allocation153_spill] sm:$0xff] %v11978_v39  ;;  %v11980_v12 = vpop.f32.mrb[77].mxu0  ;;  %5684 = vmatmul.mubr.f32.gmra.mrb[90].mxu1 %v13800_v21  ;;  %v13962_v39 = vld [vmem:[#allocation39_spill] sm:$0xff] }
 0x55c   :  { %13799 = vst [vmem:[#allocation154_spill] sm:$0xff] %v11980_v12  ;;  %5689 = vmatprep.mubr.f32.mxu1 %v13552_v26  ;;  %v13961_v12 = vld [vmem:[#allocation36_spill] sm:$0xff] }
 0x55e   :  { %v11985_v8 = vpop.f32.mrb[78].mxu0 }
 0x55f   :  { %13801 = vst [vmem:[#allocation155_spill] sm:$0xff] %v11985_v8  ;;  %v11987_v14 = vpop.f32.mrb[79].mxu0  ;;  %5693 = vmatmul.mubr.f32.gmra.mrb[92].mxu1 %v13803_v28  ;;  %v13960_v8 = vld [vmem:[#allocation34_spill] sm:$0xff] }
 0x560   :  { %13802 = vst [vmem:[#allocation156_spill] sm:$0xff] %v11987_v14  ;;  %5698 = vmatprep.mubr.f32.mxu1 %v13552_v26  ;;  %v13959_v14 = vld [vmem:[#allocation30_spill] sm:$0xff] }
 0x562   :  { %v11992_v37 = vpop.f32.mrb[80].mxu0 }
 0x563   :  { %13804 = vst [vmem:[#allocation157_spill] sm:$0xff] %v11992_v37  ;;  %v11994_v55 = vpop.f32.mrb[81].mxu0  ;;  %5702 = vmatmul.mubr.f32.gmra.mrb[94].mxu1 %v13806_v42  ;;  %v13958_v37 = vld [vmem:[#allocation29_spill] sm:$0xff] }
 0x564   :  { %13805 = vst [vmem:[#allocation158_spill] sm:$0xff] %v11994_v55  ;;  %5707 = vmatprep.mubr.f32.mxu1 %v13552_v26  ;;  %v13812_v55 = vand.u32 4294901760, %v13664_v32 }
 0x566   :  { %v11999_v21 = vpop.f32.mrb[82].mxu0 }
 0x567   :  { %13807 = vst [vmem:[#allocation159_spill] sm:$0xff] %v11999_v21  ;;  %v12001_v16 = vpop.f32.mrb[83].mxu0  ;;  %5711 = vmatmul.mubr.f32.gmra.mrb[96].mxu1 %v13809_v3  ;;  %v13957_v21 = vld [vmem:[#allocation28_spill] sm:$0xff] }
 0x568   :  { %13808 = vst [vmem:[#allocation160_spill] sm:$0xff] %v12001_v16  ;;  %5716 = vmatprep.mubr.f32.mxu1 %v13552_v26  ;;  %v13815_v16 = vand.u32 4294901760, %v13666_v57 }
 0x56a   :  { %v12006_v28 = vpop.f32.mrb[84].mxu0 }
 0x56b   :  { %13810 = vst [vmem:[#allocation161_spill] sm:$0xff] %v12006_v28  ;;  %v12008_v56 = vpop.f32.mrb[85].mxu0  ;;  %5720 = vmatmul.mubr.f32.gmra.mrb[98].mxu1 %v13812_v55  ;;  %v13956_v28 = vld [vmem:[#allocation23_spill] sm:$0xff] }
 0x56c   :  { %13811 = vst [vmem:[#allocation162_spill] sm:$0xff] %v12008_v56  ;;  %5725 = vmatprep.mubr.f32.mxu1 %v13552_v26  ;;  %v13818_v56 = vand.u32 4294901760, %v13668_v23 }
 0x56e   :  { %v12013_v42 = vpop.f32.mrb[86].mxu0 }
 0x56f   :  { %13813 = vst [vmem:[#allocation163_spill] sm:$0xff] %v12013_v42  ;;  %v12015_v50 = vpop.f32.mrb[87].mxu0  ;;  %5729 = vmatmul.mubr.f32.gmra.mrb[100].mxu1 %v13815_v16  ;;  %v13955_v42 = vld [vmem:[#allocation18_spill] sm:$0xff] }
 0x570   :  { %13814 = vst [vmem:[#allocation164_spill] sm:$0xff] %v12015_v50  ;;  %5734 = vmatprep.mubr.f32.mxu1 %v13552_v26  ;;  %v13821_v50 = vand.u32 4294901760, %v13670_v35 }
 0x572   :  { %v12020_v3 = vpop.f32.mrb[88].mxu0 }
 0x573   :  { %13816 = vst [vmem:[#allocation165_spill] sm:$0xff] %v12020_v3  ;;  %v12022_v19 = vpop.f32.mrb[89].mxu0  ;;  %5738 = vmatmul.mubr.f32.gmra.mrb[102].mxu1 %v13818_v56  ;;  %v13954_v3 = vld [vmem:[#allocation8_spill] sm:$0xff] }
 0x574   :  { %13817 = vst [vmem:[#allocation166_spill] sm:$0xff] %v12022_v19  ;;  %5743 = vmatprep.mubr.f32.mxu1 %v13552_v26  ;;  %v13824_v19 = vand.u32 4294901760, %v13672_v43 }
 0x576   :  { %v12027_v32 = vpop.f32.mrb[90].mxu0 }
 0x577   :  { %13819 = vst [vmem:[#allocation167_spill] sm:$0xff] %v12027_v32  ;;  %v12029_v55 = vpop.f32.mrb[91].mxu0  ;;  %5747 = vmatmul.mubr.f32.gmra.mrb[104].mxu1 %v13821_v50  ;;  %v13953_v32 = vld [vmem:[#allocation5_spill] sm:$0xff] }
 0x578   :  { %13820 = vst [vmem:[#allocation168_spill] sm:$0xff] %v12029_v55  ;;  %5752 = vmatprep.mubr.f32.mxu1 %v13552_v26  ;;  %v13827_v55 = vand.u32 4294901760, %v13674_v27 }
 0x57a   :  { %v12034_v57 = vpop.f32.mrb[92].mxu0 }
 0x57b   :  { %13822 = vst [vmem:[#allocation169_spill] sm:$0xff] %v12034_v57  ;;  %v12036_v16 = vpop.f32.mrb[93].mxu0  ;;  %5756 = vmatmul.mubr.f32.gmra.mrb[106].mxu1 %v13824_v19  ;;  %v13830_v57 = vld [vmem:[#allocation114_spill] sm:$0xff] }
 0x57c   :  { %13823 = vst [vmem:[#allocation170_spill] sm:$0xff] %v12036_v16  ;;  %5761 = vmatprep.mubr.f32.mxu1 %v13552_v26  ;;  %v13831_v16 = vand.u32 4294901760, %v13830_v57 }
 0x57e   :  { %v12041_v23 = vpop.f32.mrb[94].mxu0 }
 0x57f   :  { %13825 = vst [vmem:[#allocation171_spill] sm:$0xff] %v12041_v23  ;;  %v12043_v56 = vpop.f32.mrb[95].mxu0  ;;  %5765 = vmatmul.mubr.f32.gmra.mrb[108].mxu1 %v13827_v55  ;;  %v13834_v23 = vld [vmem:[#allocation105_spill] sm:$0xff] }
 0x580   :  { %13826 = vst [vmem:[#allocation172_spill] sm:$0xff] %v12043_v56  ;;  %5770 = vmatprep.mubr.f32.mxu1 %v13552_v26  ;;  %v13835_v56 = vand.u32 4294901760, %v13834_v23 }
 0x582   :  { %v12048_v35 = vpop.f32.mrb[96].mxu0 }
 0x583   :  { %13828 = vst [vmem:[#allocation173_spill] sm:$0xff] %v12048_v35  ;;  %v12050_v50 = vpop.f32.mrb[97].mxu0  ;;  %5774 = vmatmul.mubr.f32.gmra.mrb[110].mxu1 %v13831_v16  ;;  %v13838_v35 = vld [vmem:[#allocation118_spill] sm:$0xff] }
 0x584   :  { %13829 = vst [vmem:[#allocation174_spill] sm:$0xff] %v12050_v50  ;;  %5779 = vmatprep.mubr.f32.mxu1 %v13552_v26  ;;  %v13839_v50 = vand.u32 4294901760, %v13838_v35 }
 0x586   :  { %v12055_v43 = vpop.f32.mrb[98].mxu0 }
 0x587   :  { %13832 = vst [vmem:[#allocation114_spill] sm:$0xff] %v12055_v43  ;;  %v12057_v19 = vpop.f32.mrb[99].mxu0  ;;  %5783 = vmatmul.mubr.f32.gmra.mrb[112].mxu1 %v13835_v56  ;;  %v13842_v43 = vld [vmem:[#allocation131_spill] sm:$0xff] }
 0x588   :  { %13833 = vst [vmem:[#allocation175_spill] sm:$0xff] %v12057_v19  ;;  %5788 = vmatprep.mubr.f32.mxu1 %v13552_v26  ;;  %v13843_v19 = vand.u32 4294901760, %v13842_v43 }
 0x58a   :  { %v12062_v27 = vpop.f32.mrb[100].mxu0 }
 0x58b   :  { %13836 = vst [vmem:[#allocation105_spill] sm:$0xff] %v12062_v27  ;;  %v12064_v55 = vpop.f32.mrb[101].mxu0  ;;  %5792 = vmatmul.mubr.f32.gmra.mrb[114].mxu1 %v13839_v50  ;;  %v13952_v27 = vld [vmem:[#allocation127_spill] sm:$0xff] }
 0x58c   :  { %13837 = vst [vmem:[#allocation176_spill] sm:$0xff] %v12064_v55  ;;  %5797 = vmatprep.mubr.f32.mxu1 %v13552_v26  ;;  %v13846_v55 = vand.u32 4294901760, %v13684_v24 }
 0x58e   :  { %v12069_v57 = vpop.f32.mrb[102].mxu0 }
 0x58f   :  { %13840 = vst [vmem:[#allocation118_spill] sm:$0xff] %v12069_v57  ;;  %v12071_v16 = vpop.f32.mrb[103].mxu0  ;;  %5801 = vmatmul.mubr.f32.gmra.mrb[116].mxu1 %v13843_v19  ;;  %v13951_v57 = vld [vmem:[#allocation115_spill] sm:$0xff] }
 0x590   :  { %13841 = vst [vmem:[#allocation177_spill] sm:$0xff] %v12071_v16  ;;  %5806 = vmatprep.mubr.f32.mxu1 %v13552_v26  ;;  %v13849_v16 = vand.u32 4294901760, %v13686_v9 }
 0x592   :  { %v12076_v23 = vpop.f32.mrb[104].mxu0 }
 0x593   :  { %13844 = vst [vmem:[#allocation131_spill] sm:$0xff] %v12076_v23  ;;  %v12078_v56 = vpop.f32.mrb[105].mxu0  ;;  %5810 = vmatmul.mubr.f32.gmra.mrb[118].mxu1 %v13846_v55  ;;  %v13950_v23 = vld [vmem:[#allocation125_spill] sm:$0xff] }
 0x594   :  { %13845 = vst [vmem:[#allocation178_spill] sm:$0xff] %v12078_v56  ;;  %5815 = vmatprep.mubr.f32.mxu1 %v13552_v26  ;;  %v13852_v56 = vand.u32 4294901760, %v13688_v25 }
 0x596   :  { %v12083_v35 = vpop.f32.mrb[106].mxu0 }
 0x597   :  { %13847 = vst [vmem:[#allocation179_spill] sm:$0xff] %v12083_v35  ;;  %v12085_v50 = vpop.f32.mrb[107].mxu0  ;;  %5819 = vmatmul.mubr.f32.gmra.mrb[120].mxu1 %v13849_v16  ;;  %v13949_v35 = vld [vmem:[#allocation113_spill] sm:$0xff] }
 0x598   :  { %13848 = vst [vmem:[#allocation180_spill] sm:$0xff] %v12085_v50  ;;  %5824 = vmatprep.mubr.f32.mxu1 %v13552_v26  ;;  %v13855_v50 = vand.u32 4294901760, %v11103_v63 }
 0x59a   :  { %v12090_v43 = vpop.f32.mrb[108].mxu0 }
 0x59b   :  { %13850 = vst [vmem:[#allocation181_spill] sm:$0xff] %v12090_v43  ;;  %v12092_v19 = vpop.f32.mrb[109].mxu0  ;;  %5828 = vmatmul.mubr.f32.gmra.mrb[122].mxu1 %v13852_v56  ;;  %v13948_v43 = vld [vmem:[#allocation106_spill] sm:$0xff] }
 0x59c   :  { %13851 = vst [vmem:[#allocation182_spill] sm:$0xff] %v12092_v19  ;;  %5833 = vmatprep.mubr.f32.mxu1 %v13552_v26  ;;  %v13858_v19 = vand.u32 4294901760, %v11121_v34 }
 0x59e   :  { %v12097_v24 = vpop.f32.mrb[110].mxu0 }
 0x59f   :  { %13853 = vst [vmem:[#allocation183_spill] sm:$0xff] %v12097_v24  ;;  %v12099_v55 = vpop.f32.mrb[111].mxu0  ;;  %5837 = vmatmul.mubr.f32.gmra.mrb[124].mxu1 %v13855_v50  ;;  %v13947_v24 = vld [vmem:[#allocation96_spill] sm:$0xff] }
 0x5a0   :  { %13854 = vst [vmem:[#allocation184_spill] sm:$0xff] %v12099_v55  ;;  %5842 = vmatprep.mubr.f32.mxu1 %v13552_v26  ;;  %v13861_v55 = vand.u32 4294901760, %v11146_v4 }
 0x5a2   :  { %v12104_v9 = vpop.f32.mrb[112].mxu0 }
 0x5a3   :  { %13856 = vst [vmem:[#allocation185_spill] sm:$0xff] %v12104_v9  ;;  %v12106_v16 = vpop.f32.mrb[113].mxu0  ;;  %5846 = vmatmul.mubr.f32.gmra.mrb[126].mxu1 %v13858_v19  ;;  %v13946_v9 = vld [vmem:[#allocation91_spill] sm:$0xff] }
 0x5a4   :  { %13857 = vst [vmem:[#allocation186_spill] sm:$0xff] %v12106_v16  ;;  %5851 = vmatprep.mubr.f32.mxu1 %v13552_v26  ;;  %v13864_v16 = vand.u32 4294901760, %v11161_v59 }
 0x5a6   :  { %v12111_v25 = vpop.f32.mrb[114].mxu0 }
 0x5a7   :  { %13859 = vst [vmem:[#allocation187_spill] sm:$0xff] %v12111_v25  ;;  %v12113_v56 = vpop.f32.mrb[115].mxu0  ;;  %5855 = vmatmul.mubr.f32.gmra.mrb[0].mxu1 %v13861_v55  ;;  %v13945_v25 = vld [vmem:[#allocation84_spill] sm:$0xff] }
 0x5a8   :  { %13860 = vst [vmem:[#allocation188_spill] sm:$0xff] %v12113_v56  ;;  %5860 = vmatprep.mubr.f32.mxu1 %v13552_v26  ;;  %v13867_v56 = vand.u32 4294901760, %v11182_v22 }
 0x5aa   :  { %v12118_v63 = vpop.f32.mrb[116].mxu0 }
 0x5ab   :  { %13862 = vst [vmem:[#allocation189_spill] sm:$0xff] %v12118_v63  ;;  %v12120_v50 = vpop.f32.mrb[117].mxu0  ;;  %5864 = vmatmul.mubr.f32.gmra.mrb[2].mxu1 %v13864_v16  ;;  %v13870_v63 = vld [vmem:[#allocation38_spill] sm:$0xff] }
 0x5ac   :  { %13863 = vst [vmem:[#allocation190_spill] sm:$0xff] %v12120_v50  ;;  %5869 = vmatprep.mubr.f32.mxu1 %v13552_v26  ;;  %v13871_v50 = vand.u32 4294901760, %v13870_v63 }
 0x5ae   :  { %v12125_v34 = vpop.f32.mrb[118].mxu0 }
 0x5af   :  { %13865 = vst [vmem:[#allocation191_spill] sm:$0xff] %v12125_v34  ;;  %v12127_v19 = vpop.f32.mrb[119].mxu0  ;;  %5873 = vmatmul.mubr.f32.gmra.mrb[4].mxu1 %v13867_v56  ;;  %v13874_v34 = vld [vmem:[#allocation40_spill] sm:$0xff] }
 0x5b0   :  { %13866 = vst [vmem:[#allocation192_spill] sm:$0xff] %v12127_v19  ;;  %5878 = vmatprep.mubr.f32.mxu1 %v13552_v26  ;;  %v13875_v19 = vand.u32 4294901760, %v13874_v34  ;;  %v13883_v34 = vand.u32 4294901760, %v11269_v47  ;;  %v13887_v47 = vand.u32 4294901760, %v11341_v46  ;;  %v13891_v46 = vand.u32 4294901760, %v11413_v7 }
 0x5b1   :  { %v13896_v7 = vand.u32 4294901760, %v11472_v62  ;;  %v13900_v62 = vand.u32 4294901760, %v11516_v41  ;;  %v13904_v41 = vand.u32 4294901760, %v11560_v15 }
 0x5b2   :  { %v12132_v4 = vpop.f32.mrb[120].mxu0 }
 0x5b3   :  { %13868 = vst [vmem:[#allocation193_spill] sm:$0xff] %v12132_v4  ;;  %v12134_v55 = vpop.f32.mrb[121].mxu0  ;;  %5882 = vmatmul.mubr.f32.gmra.mrb[6].mxu1 %v13871_v50  ;;  %v13944_v4 = vld [vmem:[#allocation79_spill] sm:$0xff] }
 0x5b4   :  { %13869 = vst [vmem:[#allocation194_spill] sm:$0xff] %v12134_v55  ;;  %5887 = vmatprep.mubr.f32.mxu1 %v13552_v26  ;;  %v13878_v55 = vand.u32 4294901760, %v11233_v11  ;;  %v13885_v11 = vand.u32 4294901760, %v11305_v61  ;;  %v13889_v61 = vand.u32 4294901760, %v11377_v5  ;;  %v13894_v5 = vand.u32 4294901760, %v11447_v54 }
 0x5b5   :  { %v13898_v54 = vand.u32 4294901760, %v11494_v2  ;;  %v13902_v2 = vand.u32 4294901760, %v11538_v0  ;;  %v13906_v0 = vand.u32 4294901760, %v11582_v17  ;;  %v13913_v17 = vld [vmem:[#allocation12_spill] sm:$0xff] }
 0x5b6   :  { %v12139_v59 = vpop.f32.mrb[122].mxu0 }
 0x5b7   :  { %13872 = vst [vmem:[#allocation38_spill] sm:$0xff] %v12139_v59  ;;  %v12141_v16 = vpop.f32.mrb[123].mxu0  ;;  %5891 = vmatmul.mubr.f32.gmra.mrb[8].mxu1 %v13875_v19  ;;  %v13881_v59 = vld [vmem:[#allocation46_spill] sm:$0xff]  ;;  %v13884_v19 = vand.u32 4294901760, %v11290_v1  ;;  %v13888_v1 = vand.u32 4294901760, %v11362_v38 }
 0x5b8   :  { %13873 = vst [vmem:[#allocation195_spill] sm:$0xff] %v12141_v16  ;;  %5896 = vmatprep.mubr.f32.mxu1 %v13552_v26  ;;  %v13882_v16 = vand.u32 4294901760, %v13881_v59  ;;  %v13892_v59 = vld [vmem:[#allocation68_spill] sm:$0xff] }
 0x5b9   :  { %v13893_v38 = vand.u32 4294901760, %v13892_v59  ;;  %v13920_v59 = vld [vmem:[#allocation35_spill] sm:$0xff] }
 0x5ba   :  { %v12146_v22 = vpop.f32.mrb[124].mxu0 }
 0x5bb   :  { %13876 = vst [vmem:[#allocation40_spill] sm:$0xff] %v12146_v22  ;;  %v12148_v56 = vpop.f32.mrb[125].mxu0  ;;  %5900 = vmatmul.mubr.f32.gmra.mrb[10].mxu1 %v13878_v55  ;;  %v13886_v55 = vand.u32 4294901760, %v11326_v58  ;;  %v13890_v58 = vand.u32 4294901760, %v11398_v44  ;;  %v13895_v44 = vand.u32 4294901760, %v11459_v45  ;;  %v13899_v45 = vand.u32 4294901760, %v11506_v18 }
 0x5bc   :  { %13877 = vst [vmem:[#allocation196_spill] sm:$0xff] %v12148_v56  ;;  %5905 = vmatprep.mubr.f32.mxu1 %v13552_v26  ;;  %v13903_v18 = vand.u32 4294901760, %v11550_v31  ;;  %v13942_v56 = vld [vmem:[#allocation21_spill] sm:$0xff]  ;;  %v13943_v22 = vld [vmem:[#allocation24_spill] sm:$0xff] }
 0x5be   :  { %v12153_v63 = vpop.f32.mrb[126].mxu0 }
 0x5bf   :  { %13879 = vst [vmem:[#allocation197_spill] sm:$0xff] %v12153_v63  ;;  %v12155_v50 = vpop.f32.mrb[127].mxu0  ;;  %5909 = vmatmul.mubr.f32.gmra.mrb[12].mxu1 %v13882_v16  ;;  %v13897_v16 = vand.u32 4294901760, %v11484_v13  ;;  %v13901_v13 = vand.u32 4294901760, %v11528_v20  ;;  %v13905_v20 = vand.u32 4294901760, %v11572_v52  ;;  %v13912_v52 = vld [vmem:[#allocation10_spill] sm:$0xff] }
 0x5c0   :  { %13880 = vst [vmem:[#allocation198_spill] sm:$0xff] %v12155_v50  ;;  %5914 = vmatprep.mubr.f32.mxu1 %v13552_v26  ;;  %v13940_v50 = vld [vmem:[#allocation7_spill] sm:$0xff] }
 0x5c1   :  { %v13941_v63 = vld [vmem:[#allocation11_spill] sm:$0xff] }
 0x5c3   :  { %5918 = vmatmul.mubr.f32.gmra.mrb[14].mxu1 %v13883_v34  ;;  %v13907_v34 = vld [vmem:[#allocation72_spill] sm:$0xff] }
 0x5c4   :  { %5923 = vmatprep.mubr.f32.mxu1 %v13552_v26  ;;  %v13908_v31 = vand.u32 4294901760, %v13907_v34  ;;  %v13935_v34 = vld [vmem:[#allocation107_spill] sm:$0xff] }
 0x5c7   :  { %5927 = vmatmul.mubr.f32.gmra.mrb[16].mxu1 %v13884_v19  ;;  %v13909_v19 = vld [vmem:[#allocation76_spill] sm:$0xff] }
 0x5c8   :  { %5932 = vmatprep.mubr.f32.mxu1 %v13552_v26  ;;  %v13910_v15 = vand.u32 4294901760, %v13909_v19  ;;  %v13937_v19 = vld [vmem:[#allocation98_spill] sm:$0xff] }
 0x5cb   :  { %5936 = vmatmul.mubr.f32.gmra.mrb[18].mxu1 %v13885_v11  ;;  %v13911_v11 = vld [vmem:[#allocation14_spill] sm:$0xff] }
 0x5cc   :  { %5941 = vmatprep.mubr.f32.mxu1 %v13552_v26 }
 0x5cf   :  { %5945 = vmatmul.mubr.f32.gmra.mrb[20].mxu1 %v13886_v55  ;;  %v13914_v55 = vld [vmem:[#allocation17_spill] sm:$0xff] }
 0x5d0   :  { %5950 = vmatprep.mubr.f32.mxu1 %v13552_v26 }
 0x5d3   :  { %5954 = vmatmul.mubr.f32.gmra.mrb[22].mxu1 %v13887_v47  ;;  %v13915_v47 = vld [vmem:[#allocation16_spill] sm:$0xff] }
 0x5d4   :  { %5959 = vmatprep.mubr.f32.mxu1 %v13552_v26 }
 0x5d7   :  { %5963 = vmatmul.mubr.f32.gmra.mrb[24].mxu1 %v13888_v1  ;;  %v13916_v1 = vld [vmem:[#allocation19_spill] sm:$0xff] }
 0x5d8   :  { %5968 = vmatprep.mubr.f32.mxu1 %v13552_v26 }
 0x5db   :  { %5972 = vmatmul.mubr.f32.gmra.mrb[26].mxu1 %v13889_v61  ;;  %v13917_v61 = vld [vmem:[#allocation22_spill] sm:$0xff] }
 0x5dc   :  { %5977 = vmatprep.mubr.f32.mxu1 %v13552_v26 }
 0x5df   :  { %5981 = vmatmul.mubr.f32.gmra.mrb[28].mxu1 %v13890_v58  ;;  %v13918_v58 = vld [vmem:[#allocation27_spill] sm:$0xff] }
 0x5e0   :  { %5986 = vmatprep.mubr.f32.mxu1 %v13552_v26 }
 0x5e3   :  { %5990 = vmatmul.mubr.f32.gmra.mrb[30].mxu1 %v13891_v46  ;;  %v13919_v46 = vld [vmem:[#allocation31_spill] sm:$0xff] }
 0x5e4   :  { %5995 = vmatprep.mubr.f32.mxu1 %v13552_v26 }
 0x5e7   :  { %5999 = vmatmul.mubr.f32.gmra.mrb[32].mxu1 %v13893_v38  ;;  %v13921_v38 = vld [vmem:[#allocation37_spill] sm:$0xff] }
 0x5e8   :  { %6004 = vmatprep.mubr.f32.mxu1 %v13552_v26 }
 0x5eb   :  { %6008 = vmatmul.mubr.f32.gmra.mrb[34].mxu1 %v13894_v5  ;;  %v13922_v5 = vld [vmem:[#allocation43_spill] sm:$0xff] }
 0x5ec   :  { %6013 = vmatprep.mubr.f32.mxu1 %v13552_v26 }
 0x5ef   :  { %6017 = vmatmul.mubr.f32.gmra.mrb[36].mxu1 %v13895_v44  ;;  %v13923_v44 = vld [vmem:[#allocation47_spill] sm:$0xff] }
 0x5f0   :  { %6022 = vmatprep.mubr.f32.mxu1 %v13552_v26 }
 0x5f3   :  { %6026 = vmatmul.mubr.f32.gmra.mrb[38].mxu1 %v13896_v7  ;;  %v13924_v7 = vld [vmem:[#allocation52_spill] sm:$0xff] }
 0x5f4   :  { %6031 = vmatprep.mubr.f32.mxu1 %v13552_v26 }
 0x5f7   :  { %6035 = vmatmul.mubr.f32.gmra.mrb[40].mxu1 %v13897_v16  ;;  %v13925_v16 = vld [vmem:[#allocation54_spill] sm:$0xff] }
 0x5f8   :  { %6040 = vmatprep.mubr.f32.mxu1 %v13552_v26 }
 0x5fb   :  { %6044 = vmatmul.mubr.f32.gmra.mrb[42].mxu1 %v13898_v54  ;;  %v13926_v54 = vld [vmem:[#allocation60_spill] sm:$0xff] }
 0x5fc   :  { %6049 = vmatprep.mubr.f32.mxu1 %v13552_v26 }
 0x5ff   :  { %6053 = vmatmul.mubr.f32.gmra.mrb[44].mxu1 %v13899_v45  ;;  %v13927_v45 = vld [vmem:[#allocation63_spill] sm:$0xff] }
 0x600   :  { %6058 = vmatprep.mubr.f32.mxu1 %v13552_v26 }
 0x603   :  { %6062 = vmatmul.mubr.f32.gmra.mrb[46].mxu1 %v13900_v62  ;;  %v13928_v62 = vld [vmem:[#allocation69_spill] sm:$0xff] }
 0x604   :  { %6067 = vmatprep.mubr.f32.mxu1 %v13552_v26 }
 0x607   :  { %6071 = vmatmul.mubr.f32.gmra.mrb[48].mxu1 %v13901_v13  ;;  %v13929_v13 = vld [vmem:[#allocation70_spill] sm:$0xff] }
 0x608   :  { %6076 = vmatprep.mubr.f32.mxu1 %v13552_v26 }
 0x60b   :  { %6080 = vmatmul.mubr.f32.gmra.mrb[50].mxu1 %v13902_v2  ;;  %v13930_v2 = vld [vmem:[#allocation75_spill] sm:$0xff] }
 0x60c   :  { %6085 = vmatprep.mubr.f32.mxu1 %v13552_v26 }
 0x60f   :  { %6089 = vmatmul.mubr.f32.gmra.mrb[52].mxu1 %v13903_v18  ;;  %v13931_v18 = vld [vmem:[#allocation80_spill] sm:$0xff] }
 0x610   :  { %6094 = vmatprep.mubr.f32.mxu1 %v13552_v26 }
 0x613   :  { %6098 = vmatmul.mubr.f32.gmra.mrb[54].mxu1 %v13904_v41  ;;  %v13932_v41 = vld [vmem:[#allocation89_spill] sm:$0xff] }
 0x614   :  { %6103 = vmatprep.mubr.f32.mxu1 %v13552_v26 }
 0x617   :  { %6107 = vmatmul.mubr.f32.gmra.mrb[56].mxu1 %v13905_v20  ;;  %v13933_v20 = vld [vmem:[#allocation92_spill] sm:$0xff] }
 0x618   :  { %6112 = vmatprep.mubr.f32.mxu1 %v13552_v26 }
 0x61b   :  { %6116 = vmatmul.mubr.f32.gmra.mrb[58].mxu1 %v13906_v0  ;;  %v13934_v0 = vld [vmem:[#allocation102_spill] sm:$0xff] }
 0x61c   :  { %6121 = vmatprep.mubr.f32.mxu1 %v13552_v26 }
 0x61f   :  { %6125 = vmatmul.mubr.f32.gmra.mrb[60].mxu1 %v13908_v31  ;;  %v13936_v31 = vld [vmem:[#allocation121_spill] sm:$0xff] }
 0x620   :  { %6130 = vmatprep.mubr.f32.mxu1 %v13552_v26 }
 0x623   :  { %6134 = vmatmul.mubr.f32.gmra.mrb[62].mxu1 %v13910_v15  ;;  %v13938_v15 = vld [vmem:[#allocation122_spill] sm:$0xff] }
 0x624   :  { %6210 = vmatprep.mubr.f32.mxu1 %v13552_v26 }
 0x627   :  { %6212 = vmatmul.mubr.f32.vlgmr.msra.gmra.mrb[64].mxu1 %v13911_v11 }
 0x628   :  { %6662 = vmatpush1.msra.mxu1 %v13912_v52  ;;  %6217 = vmatprep.mubr.f32.mxu1 %v13552_v26  ;;  %v13939_v52 = vld [vmem:[#allocation130_spill] sm:$0xff] }
 0x62b   :  { %6219 = vmatmul.mubr.f32.gmra.mrb[66].mxu1 %v13913_v17 }
 0x62c   :  { %6224 = vmatprep.mubr.f32.mxu1 %v13552_v26 }
 0x62f   :  { %6226 = vmatmul.mubr.f32.gmra.mrb[68].mxu1 %v13914_v55 }
 0x630   :  { %6231 = vmatprep.mubr.f32.mxu1 %v13552_v26 }
 0x633   :  { %6233 = vmatmul.mubr.f32.gmra.mrb[70].mxu1 %v13915_v47 }
 0x634   :  { %6238 = vmatprep.mubr.f32.mxu1 %v13552_v26 }
 0x637   :  { %6240 = vmatmul.mubr.f32.gmra.mrb[72].mxu1 %v13916_v1 }
 0x638   :  { %6245 = vmatprep.mubr.f32.mxu1 %v13552_v26 }
 0x63b   :  { %6247 = vmatmul.mubr.f32.gmra.mrb[74].mxu1 %v13917_v61 }
 0x63c   :  { %6252 = vmatprep.mubr.f32.mxu1 %v13552_v26 }
 0x63f   :  { %6254 = vmatmul.mubr.f32.gmra.mrb[76].mxu1 %v13918_v58 }
 0x640   :  { %6259 = vmatprep.mubr.f32.mxu1 %v13552_v26 }
 0x643   :  { %6261 = vmatmul.mubr.f32.gmra.mrb[78].mxu1 %v13919_v46 }
 0x644   :  { %6266 = vmatprep.mubr.f32.mxu1 %v13552_v26 }
 0x647   :  { %6268 = vmatmul.mubr.f32.gmra.mrb[80].mxu1 %v13920_v59 }
 0x648   :  { %6273 = vmatprep.mubr.f32.mxu1 %v13552_v26 }
 0x64b   :  { %6275 = vmatmul.mubr.f32.gmra.mrb[82].mxu1 %v13921_v38 }
 0x64c   :  { %6280 = vmatprep.mubr.f32.mxu1 %v13552_v26 }
 0x64f   :  { %6282 = vmatmul.mubr.f32.gmra.mrb[84].mxu1 %v13922_v5 }
 0x650   :  { %6287 = vmatprep.mubr.f32.mxu1 %v13552_v26 }
 0x653   :  { %6289 = vmatmul.mubr.f32.gmra.mrb[86].mxu1 %v13923_v44 }
 0x654   :  { %6294 = vmatprep.mubr.f32.mxu1 %v13552_v26 }
 0x657   :  { %6296 = vmatmul.mubr.f32.gmra.mrb[88].mxu1 %v13924_v7 }
 0x658   :  { %6301 = vmatprep.mubr.f32.mxu1 %v13552_v26 }
 0x65b   :  { %6303 = vmatmul.mubr.f32.gmra.mrb[90].mxu1 %v13925_v16 }
 0x65c   :  { %6308 = vmatprep.mubr.f32.mxu1 %v13552_v26 }
 0x65f   :  { %6310 = vmatmul.mubr.f32.gmra.mrb[92].mxu1 %v13926_v54 }
 0x660   :  { %6315 = vmatprep.mubr.f32.mxu1 %v13552_v26 }
 0x663   :  { %6317 = vmatmul.mubr.f32.gmra.mrb[94].mxu1 %v13927_v45 }
 0x664   :  { %6322 = vmatprep.mubr.f32.mxu1 %v13552_v26 }
 0x667   :  { %6324 = vmatmul.mubr.f32.gmra.mrb[96].mxu1 %v13928_v62 }
 0x668   :  { %6329 = vmatprep.mubr.f32.mxu1 %v13552_v26 }
 0x66b   :  { %6331 = vmatmul.mubr.f32.gmra.mrb[98].mxu1 %v13929_v13 }
 0x66c   :  { %6336 = vmatprep.mubr.f32.mxu1 %v13552_v26 }
 0x66f   :  { %6338 = vmatmul.mubr.f32.gmra.mrb[100].mxu1 %v13930_v2 }
 0x670   :  { %6343 = vmatprep.mubr.f32.mxu1 %v13552_v26 }
 0x673   :  { %6345 = vmatmul.mubr.f32.gmra.mrb[102].mxu1 %v13931_v18 }
 0x674   :  { %6350 = vmatprep.mubr.f32.mxu1 %v13552_v26 }
 0x677   :  { %6352 = vmatmul.mubr.f32.gmra.mrb[104].mxu1 %v13932_v41 }
 0x678   :  { %6357 = vmatprep.mubr.f32.mxu1 %v13552_v26 }
 0x67b   :  { %6359 = vmatmul.mubr.f32.gmra.mrb[106].mxu1 %v13933_v20 }
 0x67c   :  { %6364 = vmatprep.mubr.f32.mxu1 %v13552_v26 }
 0x67f   :  { %6366 = vmatmul.mubr.f32.gmra.mrb[108].mxu1 %v13934_v0 }
 0x680   :  { %6371 = vmatprep.mubr.f32.mxu1 %v13552_v26 }
 0x683   :  { %6373 = vmatmul.mubr.f32.gmra.mrb[110].mxu1 %v13935_v34 }
 0x684   :  { %6378 = vmatprep.mubr.f32.mxu1 %v13552_v26 }
 0x687   :  { %6380 = vmatmul.mubr.f32.gmra.mrb[112].mxu1 %v13936_v31 }
 0x688   :  { %6385 = vmatprep.mubr.f32.mxu1 %v13552_v26 }
 0x68b   :  { %6387 = vmatmul.mubr.f32.gmra.mrb[114].mxu1 %v13937_v19 }
 0x68c   :  { %6392 = vmatprep.mubr.f32.mxu1 %v13552_v26 }
 0x68f   :  { %6394 = vmatmul.mubr.f32.gmra.mrb[116].mxu1 %v13938_v15 }
 0x690   :  { %6399 = vmatprep.mubr.f32.mxu1 %v13552_v26 }
 0x693   :  { %6401 = vmatmul.mubr.f32.gmra.mrb[118].mxu1 %v13939_v52 }
 0x694   :  { %6406 = vmatprep.mubr.f32.mxu1 %v13552_v26 }
 0x697   :  { %6408 = vmatmul.mubr.f32.gmra.mrb[120].mxu1 %v13940_v50 }
 0x698   :  { %6413 = vmatprep.mubr.f32.mxu1 %v13552_v26 }
 0x69b   :  { %6415 = vmatmul.mubr.f32.gmra.mrb[122].mxu1 %v13941_v63 }
 0x69c   :  { %6420 = vmatprep.mubr.f32.mxu1 %v13552_v26 }
 0x69f   :  { %6422 = vmatmul.mubr.f32.gmra.mrb[124].mxu1 %v13942_v56 }
 0x6a0   :  { %6427 = vmatprep.mubr.f32.mxu1 %v13552_v26 }
 0x6a3   :  { %6429 = vmatmul.mubr.f32.gmra.mrb[126].mxu1 %v13943_v22 }
 0x6a4   :  { %6434 = vmatprep.mubr.f32.mxu1 %v13552_v26 }
 0x6a7   :  { %6436 = vmatmul.mubr.f32.gmra.mrb[0].mxu1 %v13944_v4 }
 0x6a8   :  { %6441 = vmatprep.mubr.f32.mxu1 %v13552_v26 }
 0x6ab   :  { %6443 = vmatmul.mubr.f32.gmra.mrb[2].mxu1 %v13945_v25 }
 0x6ac   :  { %6448 = vmatprep.mubr.f32.mxu1 %v13552_v26 }
 0x6af   :  { %6450 = vmatmul.mubr.f32.gmra.mrb[4].mxu1 %v13946_v9 }
 0x6b0   :  { %6455 = vmatprep.mubr.f32.mxu1 %v13552_v26 }
 0x6b3   :  { %6457 = vmatmul.mubr.f32.gmra.mrb[6].mxu1 %v13947_v24 }
 0x6b4   :  { %6462 = vmatprep.mubr.f32.mxu1 %v13552_v26 }
 0x6b7   :  { %6464 = vmatmul.mubr.f32.gmra.mrb[8].mxu1 %v13948_v43 }
 0x6b8   :  { %6469 = vmatprep.mubr.f32.mxu1 %v13552_v26 }
 0x6bb   :  { %6471 = vmatmul.mubr.f32.gmra.mrb[10].mxu1 %v13949_v35 }
 0x6bc   :  { %6476 = vmatprep.mubr.f32.mxu1 %v13552_v26 }
 0x6bf   :  { %6478 = vmatmul.mubr.f32.gmra.mrb[12].mxu1 %v13950_v23 }
 0x6c0   :  { %6483 = vmatprep.mubr.f32.mxu1 %v13552_v26 }
 0x6c3   :  { %6485 = vmatmul.mubr.f32.gmra.mrb[14].mxu1 %v13951_v57 }
 0x6c4   :  { %6490 = vmatprep.mubr.f32.mxu1 %v13552_v26 }
 0x6c7   :  { %6492 = vmatmul.mubr.f32.gmra.mrb[16].mxu1 %v13952_v27 }
 0x6c8   :  { %6497 = vmatprep.mubr.f32.mxu1 %v13552_v26 }
 0x6cb   :  { %6499 = vmatmul.mubr.f32.gmra.mrb[18].mxu1 %v13953_v32 }
 0x6cc   :  { %6504 = vmatprep.mubr.f32.mxu1 %v13552_v26 }
 0x6cf   :  { %6506 = vmatmul.mubr.f32.gmra.mrb[20].mxu1 %v13954_v3 }
 0x6d0   :  { %6511 = vmatprep.mubr.f32.mxu1 %v13552_v26 }
 0x6d3   :  { %6513 = vmatmul.mubr.f32.gmra.mrb[22].mxu1 %v13955_v42 }
 0x6d4   :  { %6518 = vmatprep.mubr.f32.mxu1 %v13552_v26 }
 0x6d7   :  { %6520 = vmatmul.mubr.f32.gmra.mrb[24].mxu1 %v13956_v28 }
 0x6d8   :  { %6525 = vmatprep.mubr.f32.mxu1 %v13552_v26 }
 0x6db   :  { %6527 = vmatmul.mubr.f32.gmra.mrb[26].mxu1 %v13957_v21 }
 0x6dc   :  { %6532 = vmatprep.mubr.f32.mxu1 %v13552_v26 }
 0x6df   :  { %6534 = vmatmul.mubr.f32.gmra.mrb[28].mxu1 %v13958_v37 }
 0x6e0   :  { %6539 = vmatprep.mubr.f32.mxu1 %v13552_v26 }
 0x6e3   :  { %6541 = vmatmul.mubr.f32.gmra.mrb[30].mxu1 %v13959_v14 }
 0x6e4   :  { %6546 = vmatprep.mubr.f32.mxu1 %v13552_v26 }
 0x6e7   :  { %6548 = vmatmul.mubr.f32.gmra.mrb[32].mxu1 %v13960_v8 }
 0x6e8   :  { %6553 = vmatprep.mubr.f32.mxu1 %v13552_v26 }
 0x6eb   :  { %6555 = vmatmul.mubr.f32.gmra.mrb[34].mxu1 %v13961_v12 }
 0x6ec   :  { %6560 = vmatprep.mubr.f32.mxu1 %v13552_v26 }
 0x6ef   :  { %6562 = vmatmul.mubr.f32.gmra.mrb[36].mxu1 %v13962_v39 }
 0x6f0   :  { %6567 = vmatprep.mubr.f32.mxu1 %v13552_v26 }
 0x6f3   :  { %6569 = vmatmul.mubr.f32.gmra.mrb[38].mxu1 %v13963_v51 }
 0x6f4   :  { %6574 = vmatprep.mubr.f32.mxu1 %v13552_v26 }
 0x6f7   :  { %6576 = vmatmul.mubr.f32.gmra.mrb[40].mxu1 %v13964_v33 }
 0x6f8   :  { %6581 = vmatprep.mubr.f32.mxu1 %v13552_v26 }
 0x6fb   :  { %6583 = vmatmul.mubr.f32.gmra.mrb[42].mxu1 %v13965_v60 }
 0x6fc   :  { %6588 = vmatprep.mubr.f32.mxu1 %v13552_v26 }
 0x6ff   :  { %6590 = vmatmul.mubr.f32.gmra.mrb[44].mxu1 %v13966_v6  ;;  %v13972_v6 = vld [vmem:[#allocation62_spill] sm:$0xff] }
 0x700   :  { %6595 = vmatprep.mubr.f32.mxu1 %v13552_v26 }
 0x703   :  { %6597 = vmatmul.mubr.f32.gmra.mrb[46].mxu1 %v13967_v29  ;;  %v13973_v29 = vld [vmem:[#allocation65_spill] sm:$0xff] }
 0x704   :  { %6602 = vmatprep.mubr.f32.mxu1 %v13552_v26 }
 0x707   :  { %6604 = vmatmul.mubr.f32.gmra.mrb[48].mxu1 %v13968_v36  ;;  %v13974_v36 = vld [vmem:[#allocation67_spill] sm:$0xff] }
 0x708   :  { %6609 = vmatprep.mubr.f32.mxu1 %v13552_v26 }
 0x70b   :  { %6611 = vmatmul.mubr.f32.gmra.mrb[50].mxu1 %v13969_v30  ;;  %v13975_v30 = vld [vmem:[#allocation71_spill] sm:$0xff] }
 0x70c   :  { %6616 = vmatprep.mubr.f32.mxu1 %v13552_v26 }
 0x70f   :  { %6618 = vmatmul.mubr.f32.gmra.mrb[52].mxu1 %v13970_v48 }
 0x710   :  { %6623 = vmatprep.mubr.f32.mxu1 %v13552_v26 }
 0x713   :  { %6625 = vmatmul.mubr.f32.gmra.mrb[54].mxu1 %v13971_v40 }
 0x714   :  { %6630 = vmatprep.mubr.f32.mxu1 %v13552_v26 }
 0x717   :  { %6632 = vmatmul.mubr.f32.gmra.mrb[56].mxu1 %v13972_v6 }
 0x718   :  { %6637 = vmatprep.mubr.f32.mxu1 %v13552_v26 }
 0x71b   :  { %6639 = vmatmul.mubr.f32.gmra.mrb[58].mxu1 %v13973_v29 }
 0x71c   :  { %6644 = vmatprep.mubr.f32.mxu1 %v13552_v26 }
 0x71f   :  { %6646 = vmatmul.mubr.f32.gmra.mrb[60].mxu1 %v13974_v36 }
 0x720   :  { %6651 = vmatprep.mubr.f32.mxu1 %v13552_v26 }
 0x723   :  { %6653 = vmatmul.mubr.f32.gmra.mrb[62].mxu1 %v13975_v30 }
 0x724   :  { %6725 = vmatprep.mubr.f32.mxu1 %v13552_v26 }
 0x727   :  { %6727 = vmatmul.mubr.f32.vlgmr.msra.gmra.mrb[64].mxu1 %v13911_v11  ;;  %v13986_v11 = vld [vmem:[#allocation150_spill] sm:$0xff] }
 0x728   :  { %6732 = vmatprep.mubr.f32.mxu1 %v13552_v26 }
 0x72b   :  { %6734 = vmatmul.mubr.f32.gmra.mrb[66].mxu1 %v13913_v17 }
 0x72c   :  { %6739 = vmatprep.mubr.f32.mxu1 %v13552_v26 }
 0x72f   :  { %6741 = vmatmul.mubr.f32.gmra.mrb[68].mxu1 %v13914_v55 }
 0x730   :  { %6746 = vmatprep.mubr.f32.mxu1 %v13552_v26 }
 0x733   :  { %6748 = vmatmul.mubr.f32.gmra.mrb[70].mxu1 %v13915_v47  ;;  %v13987_v47 = vld [vmem:[#allocation151_spill] sm:$0xff] }
 0x734   :  { %6753 = vmatprep.mubr.f32.mxu1 %v13552_v26 }
 0x737   :  { %6755 = vmatmul.mubr.f32.gmra.mrb[72].mxu1 %v13916_v1 }
 0x738   :  { %6760 = vmatprep.mubr.f32.mxu1 %v13552_v26 }
 0x73b   :  { %6762 = vmatmul.mubr.f32.gmra.mrb[74].mxu1 %v13917_v61 }
 0x73c   :  { %6767 = vmatprep.mubr.f32.mxu1 %v13552_v26 }
 0x73f   :  { %6769 = vmatmul.mubr.f32.gmra.mrb[76].mxu1 %v13918_v58  ;;  %v13988_v58 = vld [vmem:[#allocation152_spill] sm:$0xff] }
 0x740   :  { %6774 = vmatprep.mubr.f32.mxu1 %v13552_v26 }
 0x743   :  { %6776 = vmatmul.mubr.f32.gmra.mrb[78].mxu1 %v13919_v46 }
 0x744   :  { %6781 = vmatprep.mubr.f32.mxu1 %v13552_v26 }
 0x747   :  { %6783 = vmatmul.mubr.f32.gmra.mrb[80].mxu1 %v13920_v59 }
 0x748   :  { %6788 = vmatprep.mubr.f32.mxu1 %v13552_v26 }
 0x74b   :  { %6790 = vmatmul.mubr.f32.gmra.mrb[82].mxu1 %v13921_v38  ;;  %v13989_v38 = vld [vmem:[#allocation153_spill] sm:$0xff] }
 0x74c   :  { %6795 = vmatprep.mubr.f32.mxu1 %v13552_v26 }
 0x74f   :  { %6797 = vmatmul.mubr.f32.gmra.mrb[84].mxu1 %v13922_v5 }
 0x750   :  { %6802 = vmatprep.mubr.f32.mxu1 %v13552_v26 }
 0x753   :  { %6804 = vmatmul.mubr.f32.gmra.mrb[86].mxu1 %v13923_v44 }
 0x754   :  { %6809 = vmatprep.mubr.f32.mxu1 %v13552_v26 }
 0x757   :  { %6811 = vmatmul.mubr.f32.gmra.mrb[88].mxu1 %v13924_v7  ;;  %v13990_v7 = vld [vmem:[#allocation154_spill] sm:$0xff] }
 0x758   :  { %6816 = vmatprep.mubr.f32.mxu1 %v13552_v26 }
 0x75b   :  { %6818 = vmatmul.mubr.f32.gmra.mrb[90].mxu1 %v13925_v16 }
 0x75c   :  { %6823 = vmatprep.mubr.f32.mxu1 %v13552_v26 }
 0x75f   :  { %6825 = vmatmul.mubr.f32.gmra.mrb[92].mxu1 %v13926_v54 }
 0x760   :  { %6830 = vmatprep.mubr.f32.mxu1 %v13552_v26 }
 0x763   :  { %6832 = vmatmul.mubr.f32.gmra.mrb[94].mxu1 %v13927_v45 }
 0x764   :  { %6837 = vmatprep.mubr.f32.mxu1 %v13552_v26 }
 0x767   :  { %6839 = vmatmul.mubr.f32.gmra.mrb[96].mxu1 %v13928_v62 }
 0x768   :  { %6844 = vmatprep.mubr.f32.mxu1 %v13552_v26 }
 0x76b   :  { %6846 = vmatmul.mubr.f32.gmra.mrb[98].mxu1 %v13929_v13  ;;  %v13992_v13 = vld [vmem:[#allocation156_spill] sm:$0xff] }
 0x76c   :  { %6851 = vmatprep.mubr.f32.mxu1 %v13552_v26 }
 0x76f   :  { %6853 = vmatmul.mubr.f32.gmra.mrb[100].mxu1 %v13930_v2 }
 0x770   :  { %6858 = vmatprep.mubr.f32.mxu1 %v13552_v26 }
 0x773   :  { %6860 = vmatmul.mubr.f32.gmra.mrb[102].mxu1 %v13931_v18 }
 0x774   :  { %6865 = vmatprep.mubr.f32.mxu1 %v13552_v26 }
 0x777   :  { %6867 = vmatmul.mubr.f32.gmra.mrb[104].mxu1 %v13932_v41 }
 0x778   :  { %6872 = vmatprep.mubr.f32.mxu1 %v13552_v26 }
 0x77b   :  { %6874 = vmatmul.mubr.f32.gmra.mrb[106].mxu1 %v13933_v20 }
 0x77c   :  { %6879 = vmatprep.mubr.f32.mxu1 %v13552_v26 }
 0x77f   :  { %6881 = vmatmul.mubr.f32.gmra.mrb[108].mxu1 %v13934_v0  ;;  %v13994_v0 = vld [vmem:[#allocation158_spill] sm:$0xff] }
 0x780   :  { %6886 = vmatprep.mubr.f32.mxu1 %v13552_v26 }
 0x783   :  { %6888 = vmatmul.mubr.f32.gmra.mrb[110].mxu1 %v13935_v34 }
 0x784   :  { %6893 = vmatprep.mubr.f32.mxu1 %v13552_v26 }
 0x787   :  { %6895 = vmatmul.mubr.f32.gmra.mrb[112].mxu1 %v13936_v31 }
 0x788   :  { %6900 = vmatprep.mubr.f32.mxu1 %v13552_v26 }
 0x78b   :  { %6902 = vmatmul.mubr.f32.gmra.mrb[114].mxu1 %v13937_v19 }
 0x78c   :  { %6907 = vmatprep.mubr.f32.mxu1 %v13552_v26 }
 0x78f   :  { %6909 = vmatmul.mubr.f32.gmra.mrb[116].mxu1 %v13938_v15 }
 0x790   :  { %6914 = vmatprep.mubr.f32.mxu1 %v13552_v26 }
 0x793   :  { %6916 = vmatmul.mubr.f32.gmra.mrb[118].mxu1 %v13939_v52  ;;  %v13996_v52 = vld [vmem:[#allocation160_spill] sm:$0xff] }
 0x794   :  { %6921 = vmatprep.mubr.f32.mxu1 %v13552_v26 }
 0x797   :  { %6923 = vmatmul.mubr.f32.gmra.mrb[120].mxu1 %v13940_v50  ;;  %v13985_v50 = vld [vmem:[#allocation56_spill] sm:$0xff] }
 0x798   :  { %6928 = vmatprep.mubr.f32.mxu1 %v13552_v26 }
 0x79b   :  { %6930 = vmatmul.mubr.f32.gmra.mrb[122].mxu1 %v13941_v63 }
 0x79c   :  { %6935 = vmatprep.mubr.f32.mxu1 %v13552_v26 }
 0x79f   :  { %6937 = vmatmul.mubr.f32.gmra.mrb[124].mxu1 %v13942_v56 }
 0x7a0   :  { %6942 = vmatprep.mubr.f32.mxu1 %v13552_v26 }
 0x7a3   :  { %6944 = vmatmul.mubr.f32.gmra.mrb[126].mxu1 %v13943_v22  ;;  %v13984_v22 = vld [vmem:[#allocation149_spill] sm:$0xff] }
 0x7a4   :  { %6949 = vmatprep.mubr.f32.mxu1 %v13552_v26 }
 0x7a7   :  { %6951 = vmatmul.mubr.f32.gmra.mrb[0].mxu1 %v13944_v4 }
 0x7a8   :  { %6956 = vmatprep.mubr.f32.mxu1 %v13552_v26 }
 0x7ab   :  { %6958 = vmatmul.mubr.f32.gmra.mrb[2].mxu1 %v13945_v25 }
 0x7ac   :  { %6963 = vmatprep.mubr.f32.mxu1 %v13552_v26 }
 0x7af   :  { %6965 = vmatmul.mubr.f32.gmra.mrb[4].mxu1 %v13946_v9  ;;  %v13983_v9 = vld [vmem:[#allocation148_spill] sm:$0xff] }
 0x7b0   :  { %6970 = vmatprep.mubr.f32.mxu1 %v13552_v26 }
 0x7b3   :  { %6972 = vmatmul.mubr.f32.gmra.mrb[6].mxu1 %v13947_v24  ;;  %v13982_v24 = vld [vmem:[#allocation55_spill] sm:$0xff] }
 0x7b4   :  { %6977 = vmatprep.mubr.f32.mxu1 %v13552_v26 }
 0x7b7   :  { %6979 = vmatmul.mubr.f32.gmra.mrb[8].mxu1 %v13948_v43 }
 0x7b8   :  { %6984 = vmatprep.mubr.f32.mxu1 %v13552_v26 }
 0x7bb   :  { %6986 = vmatmul.mubr.f32.gmra.mrb[10].mxu1 %v13949_v35 }
 0x7bc   :  { %6991 = vmatprep.mubr.f32.mxu1 %v13552_v26 }
 0x7bf   :  { %6993 = vmatmul.mubr.f32.gmra.mrb[12].mxu1 %v13950_v23  ;;  %v13981_v23 = vld [vmem:[#allocation147_spill] sm:$0xff] }
 0x7c0   :  { %6998 = vmatprep.mubr.f32.mxu1 %v13552_v26 }
 0x7c3   :  { %7000 = vmatmul.mubr.f32.gmra.mrb[14].mxu1 %v13951_v57 }
 0x7c4   :  { %7005 = vmatprep.mubr.f32.mxu1 %v13552_v26 }
 0x7c7   :  { %7007 = vmatmul.mubr.f32.gmra.mrb[16].mxu1 %v13952_v27  ;;  %v13980_v27 = vld [vmem:[#allocation146_spill] sm:$0xff] }
 0x7c8   :  { %7012 = vmatprep.mubr.f32.mxu1 %v13552_v26 }
 0x7cb   :  { %7014 = vmatmul.mubr.f32.gmra.mrb[18].mxu1 %v13953_v32  ;;  %v13979_v32 = vld [vmem:[#allocation53_spill] sm:$0xff] }
 0x7cc   :  { %7019 = vmatprep.mubr.f32.mxu1 %v13552_v26 }
 0x7cf   :  { %7021 = vmatmul.mubr.f32.gmra.mrb[20].mxu1 %v13954_v3 }
 0x7d0   :  { %7026 = vmatprep.mubr.f32.mxu1 %v13552_v26 }
 0x7d3   :  { %7028 = vmatmul.mubr.f32.gmra.mrb[22].mxu1 %v13955_v42 }
 0x7d4   :  { %7033 = vmatprep.mubr.f32.mxu1 %v13552_v26 }
 0x7d7   :  { %7035 = vmatmul.mubr.f32.gmra.mrb[24].mxu1 %v13956_v28  ;;  %v13976_v28 = vld [vmem:[#allocation51_spill] sm:$0xff] }
 0x7d8   :  { %7040 = vmatprep.mubr.f32.mxu1 %v13552_v26 }
 0x7db   :  { %7042 = vmatmul.mubr.f32.gmra.mrb[26].mxu1 %v13957_v21 }
 0x7dc   :  { %7047 = vmatprep.mubr.f32.mxu1 %v13552_v26 }
 0x7df   :  { %7049 = vmatmul.mubr.f32.gmra.mrb[28].mxu1 %v13958_v37 }
 0x7e0   :  { %7054 = vmatprep.mubr.f32.mxu1 %v13552_v26 }
 0x7e3   :  { %7056 = vmatmul.mubr.f32.gmra.mrb[30].mxu1 %v13959_v14 }
 0x7e4   :  { %7061 = vmatprep.mubr.f32.mxu1 %v13552_v26 }
 0x7e7   :  { %7063 = vmatmul.mubr.f32.gmra.mrb[32].mxu1 %v13960_v8 }
 0x7e8   :  { %7068 = vmatprep.mubr.f32.mxu1 %v13552_v26 }
 0x7eb   :  { %7070 = vmatmul.mubr.f32.gmra.mrb[34].mxu1 %v13961_v12 }
 0x7ec   :  { %7075 = vmatprep.mubr.f32.mxu1 %v13552_v26 }
 0x7ef   :  { %7077 = vmatmul.mubr.f32.gmra.mrb[36].mxu1 %v13962_v39 }
 0x7f0   :  { %7082 = vmatprep.mubr.f32.mxu1 %v13552_v26 }
 0x7f3   :  { %7084 = vmatmul.mubr.f32.gmra.mrb[38].mxu1 %v13963_v51 }
 0x7f4   :  { %7089 = vmatprep.mubr.f32.mxu1 %v13552_v26 }
 0x7f7   :  { %7091 = vmatmul.mubr.f32.gmra.mrb[40].mxu1 %v13964_v33  ;;  %v13977_v33 = vld [vmem:[#allocation144_spill] sm:$0xff] }
 0x7f8   :  { %7096 = vmatprep.mubr.f32.mxu1 %v13552_v26 }
 0x7fa   :  { %v6728_v14 = vpop.f32.mrb[64].mxu1 }
 0x7fb   :  { %v8298_v8 = vadd.f32 %v6728_v14, %v11936_v10  ;;  %v6730_v37 = vpop.f32.mrb[65].mxu1  ;;  %7098 = vmatmul.mubr.f32.gmra.mrb[42].mxu1 %v13965_v60  ;;  %v13978_v60 = vld [vmem:[#allocation145_spill] sm:$0xff] }
 0x7fc   :  { %v8299_v12 = vadd.f32 %v6730_v37, %v11938_v49  ;;  %7103 = vmatprep.mubr.f32.mxu1 %v13552_v26 }
 0x7fd   :  { %7174 = vst [vmem:[#allocation2] sm:$0xff] %v8298_v8 }
 0x7fe   :  { %7175 = vst [vmem:[#allocation2 + $0x8] sm:$0xff] %v8299_v12  ;;  %v6735_v39 = vpop.f32.mrb[66].mxu1 }
 0x7ff   :  { %v8300_v51 = vadd.f32 %v6735_v39, %v11943_v53  ;;  %v6737_v21 = vpop.f32.mrb[67].mxu1  ;;  %7105 = vmatmul.mubr.f32.gmra.mrb[44].mxu1 %v13976_v28  ;;  %v13998_v39 = vld [vmem:[#allocation162_spill] sm:$0xff]  ;;  %v13999_v28 = vld [vmem:[#allocation163_spill] sm:$0xff] }
 0x800   :  { %v8301_v42 = vadd.f32 %v6737_v21, %v13977_v33  ;;  %7110 = vmatprep.mubr.f32.mxu1 %v13552_v26 }
 0x801   :  { %7176 = vst [vmem:[#allocation2 + $0x10] sm:$0xff] %v8300_v51 }
 0x802   :  { %7177 = vst [vmem:[#allocation2 + $0x18] sm:$0xff] %v8301_v42  ;;  %v6742_v10 = vpop.f32.mrb[68].mxu1  ;;  %v14000_v42 = vld [vmem:[#allocation164_spill] sm:$0xff] }
 0x803   :  { %v8302_v3 = vadd.f32 %v6742_v10, %v13978_v60  ;;  %v6744_v49 = vpop.f32.mrb[69].mxu1  ;;  %7112 = vmatmul.mubr.f32.gmra.mrb[46].mxu1 %v13979_v32  ;;  %v14001_v60 = vld [vmem:[#allocation165_spill] sm:$0xff]  ;;  %v14002_v32 = vld [vmem:[#allocation166_spill] sm:$0xff] }
 0x804   :  { %v8303_v57 = vadd.f32 %v6744_v49, %v13980_v27  ;;  %7117 = vmatprep.mubr.f32.mxu1 %v13552_v26 }
 0x805   :  { %7178 = vst [vmem:[#allocation2 + $0x20] sm:$0xff] %v8302_v3 }
 0x806   :  { %7179 = vst [vmem:[#allocation2 + $0x28] sm:$0xff] %v8303_v57  ;;  %v6749_v53 = vpop.f32.mrb[70].mxu1  ;;  %v14003_v57 = vld [vmem:[#allocation167_spill] sm:$0xff] }
 0x807   :  { %v8304_v35 = vadd.f32 %v6749_v53, %v13981_v23  ;;  %v6751_v43 = vpop.f32.mrb[71].mxu1  ;;  %7119 = vmatmul.mubr.f32.gmra.mrb[48].mxu1 %v13982_v24 }
 0x808   :  { %v8305_v25 = vadd.f32 %v6751_v43, %v13983_v9  ;;  %7124 = vmatprep.mubr.f32.mxu1 %v13552_v26  ;;  %v14005_v9 = vld [vmem:[#allocation169_spill] sm:$0xff] }
 0x809   :  { %7180 = vst [vmem:[#allocation2 + $0x30] sm:$0xff] %v8304_v35  ;;  %v14004_v35 = vld [vmem:[#allocation168_spill] sm:$0xff] }
 0x80a   :  { %7181 = vst [vmem:[#allocation2 + $0x38] sm:$0xff] %v8305_v25  ;;  %v6756_v4 = vpop.f32.mrb[72].mxu1 }
 0x80b   :  { %v8306_v56 = vadd.f32 %v6756_v4, %v13984_v22  ;;  %v6758_v63 = vpop.f32.mrb[73].mxu1  ;;  %7126 = vmatmul.mubr.f32.gmra.mrb[50].mxu1 %v13985_v50  ;;  %v14006_v22 = vld [vmem:[#allocation170_spill] sm:$0xff]  ;;  %v14007_v50 = vld [vmem:[#allocation171_spill] sm:$0xff] }
 0x80c   :  { %v8307_v17 = vadd.f32 %v6758_v63, %v13986_v11  ;;  %7131 = vmatprep.mubr.f32.mxu1 %v13552_v26 }
 0x80d   :  { %7182 = vst [vmem:[#allocation2 + $0x40] sm:$0xff] %v8306_v56 }
 0x80e   :  { %7183 = vst [vmem:[#allocation2 + $0x48] sm:$0xff] %v8307_v17  ;;  %v6763_v55 = vpop.f32.mrb[74].mxu1 }
 0x80f   :  { %v8308_v1 = vadd.f32 %v6763_v55, %v13987_v47  ;;  %v6765_v61 = vpop.f32.mrb[75].mxu1  ;;  %7133 = vmatmul.mubr.f32.gmra.mrb[52].mxu1 %v13970_v48  ;;  %v13991_v48 = vld [vmem:[#allocation155_spill] sm:$0xff]  ;;  %v14008_v55 = vld [vmem:[#allocation172_spill] sm:$0xff] }
 0x810   :  { %v8309_v46 = vadd.f32 %v6765_v61, %v13988_v58  ;;  %7138 = vmatprep.mubr.f32.mxu1 %v13552_v26  ;;  %v14009_v61 = vld [vmem:[#allocation173_spill] sm:$0xff] }
 0x811   :  { %7184 = vst [vmem:[#allocation2 + $0x50] sm:$0xff] %v8308_v1 }
 0x812   :  { %7185 = vst [vmem:[#allocation2 + $0x58] sm:$0xff] %v8309_v46  ;;  %v6770_v59 = vpop.f32.mrb[76].mxu1 }
 0x813   :  { %v8310_v5 = vadd.f32 %v6770_v59, %v13989_v38  ;;  %v6772_v44 = vpop.f32.mrb[77].mxu1  ;;  %7140 = vmatmul.mubr.f32.gmra.mrb[54].mxu1 %v13971_v40  ;;  %v13993_v40 = vld [vmem:[#allocation157_spill] sm:$0xff]  ;;  %v14010_v59 = vld [vmem:[#allocation174_spill] sm:$0xff] }
 0x814   :  { %v8311_v16 = vadd.f32 %v6772_v44, %v13990_v7  ;;  %7145 = vmatprep.mubr.f32.mxu1 %v13552_v26  ;;  %v14011_v44 = vld [vmem:[#allocation114_spill] sm:$0xff] }
 0x815   :  { %7186 = vst [vmem:[#allocation2 + $0x60] sm:$0xff] %v8310_v5 }
 0x816   :  { %7187 = vst [vmem:[#allocation2 + $0x68] sm:$0xff] %v8311_v16  ;;  %v6777_v54 = vpop.f32.mrb[78].mxu1 }
 0x817   :  { %v8312_v45 = vadd.f32 %v6777_v54, %v13991_v48  ;;  %v6779_v62 = vpop.f32.mrb[79].mxu1  ;;  %7147 = vmatmul.mubr.f32.gmra.mrb[56].mxu1 %v13972_v6  ;;  %v13995_v6 = vld [vmem:[#allocation159_spill] sm:$0xff] }
 0x818   :  { %v8313_v2 = vadd.f32 %v6779_v62, %v13992_v13  ;;  %7152 = vmatprep.mubr.f32.mxu1 %v13552_v26  ;;  %v14012_v54 = vld [vmem:[#allocation175_spill] sm:$0xff]  ;;  %v14013_v62 = vld [vmem:[#allocation105_spill] sm:$0xff] }
 0x819   :  { %7188 = vst [vmem:[#allocation2 + $0x70] sm:$0xff] %v8312_v45 }
 0x81a   :  { %7189 = vst [vmem:[#allocation2 + $0x78] sm:$0xff] %v8313_v2  ;;  %v6784_v18 = vpop.f32.mrb[80].mxu1 }
 0x81b   :  { %v8314_v41 = vadd.f32 %v6784_v18, %v13993_v40  ;;  %v6786_v20 = vpop.f32.mrb[81].mxu1  ;;  %7154 = vmatmul.mubr.f32.gmra.mrb[58].mxu1 %v13973_v29  ;;  %v13997_v29 = vld [vmem:[#allocation161_spill] sm:$0xff]  ;;  %v14014_v18 = vld [vmem:[#allocation176_spill] sm:$0xff] }
 0x81c   :  { %v8315_v34 = vadd.f32 %v6786_v20, %v13994_v0  ;;  %7159 = vmatprep.mubr.f32.mxu1 %v13552_v26  ;;  %v14015_v20 = vld [vmem:[#allocation118_spill] sm:$0xff] }
 0x81d   :  { %7190 = vst [vmem:[#allocation2 + $0x80] sm:$0xff] %v8314_v41 }
 0x81e   :  { %7191 = vst [vmem:[#allocation2 + $0x88] sm:$0xff] %v8315_v34  ;;  %v6791_v31 = vpop.f32.mrb[82].mxu1 }
 0x81f   :  { %v8316_v19 = vadd.f32 %v6791_v31, %v13995_v6  ;;  %v6793_v15 = vpop.f32.mrb[83].mxu1  ;;  %7161 = vmatmul.mubr.f32.gmra.mrb[60].mxu1 %v13974_v36  ;;  %v14016_v31 = vld [vmem:[#allocation177_spill] sm:$0xff] }
 0x820   :  { %v8317_v14 = vadd.f32 %v6793_v15, %v13996_v52  ;;  %7166 = vmatprep.mubr.f32.mxu1 %v13552_v26  ;;  %v14017_v15 = vld [vmem:[#allocation131_spill] sm:$0xff] }
 0x821   :  { %7192 = vst [vmem:[#allocation2 + $0x90] sm:$0xff] %v8316_v19 }
 0x822   :  { %7193 = vst [vmem:[#allocation2 + $0x98] sm:$0xff] %v8317_v14  ;;  %v6798_v8 = vpop.f32.mrb[84].mxu1 }
 0x823   :  { %v8318_v37 = vadd.f32 %v6798_v8, %v13997_v29  ;;  %v6800_v12 = vpop.f32.mrb[85].mxu1  ;;  %7168 = vmatmul.mubr.f32.gmra.mrb[62].mxu1 %v13975_v30  ;;  %v14018_v8 = vld [vmem:[#allocation178_spill] sm:$0xff] }
 0x824   :  { %v8319_v51 = vadd.f32 %v6800_v12, %v13998_v39  ;;  %v14019_v12 = vld [vmem:[#allocation179_spill] sm:$0xff] }
 0x825   :  { %7194 = vst [vmem:[#allocation2 + $0xa0] sm:$0xff] %v8318_v37 }
 0x826   :  { %7195 = vst [vmem:[#allocation2 + $0xa8] sm:$0xff] %v8319_v51  ;;  %v6805_v21 = vpop.f32.mrb[86].mxu1 }
 0x827   :  { %v8320_v33 = vadd.f32 %v6805_v21, %v13999_v28  ;;  %v6807_v36 = vpop.f32.mrb[87].mxu1  ;;  %v14020_v21 = vld [vmem:[#allocation180_spill] sm:$0xff] }
 0x828   :  { %v8321_v10 = vadd.f32 %v6807_v36, %v14000_v42  ;;  %v14021_v36 = vld [vmem:[#allocation181_spill] sm:$0xff] }
 0x829   :  { %7196 = vst [vmem:[#allocation2 + $0xb0] sm:$0xff] %v8320_v33 }
 0x82a   :  { %7197 = vst [vmem:[#allocation2 + $0xb8] sm:$0xff] %v8321_v10  ;;  %v6812_v26 = vpop.f32.mrb[88].mxu1 }
 0x82b   :  { %v8322_v3 = vadd.f32 %v6812_v26, %v14001_v60  ;;  %v6814_v49 = vpop.f32.mrb[89].mxu1  ;;  %v14022_v26 = vld [vmem:[#allocation182_spill] sm:$0xff] }
 0x82c   :  { %v8323_v27 = vadd.f32 %v6814_v49, %v14002_v32  ;;  %v14023_v49 = vld [vmem:[#allocation183_spill] sm:$0xff] }
 0x82d   :  { %7198 = vst [vmem:[#allocation2 + $0xc0] sm:$0xff] %v8322_v3 }
 0x82e   :  { %7199 = vst [vmem:[#allocation2 + $0xc8] sm:$0xff] %v8323_v27  ;;  %v6819_v30 = vpop.f32.mrb[90].mxu1 }
 0x82f   :  { %v8324_v53 = vadd.f32 %v6819_v30, %v14003_v57  ;;  %v6821_v23 = vpop.f32.mrb[91].mxu1  ;;  %v14024_v30 = vld [vmem:[#allocation184_spill] sm:$0xff] }
 0x830   :  { %v8325_v43 = vadd.f32 %v6821_v23, %v14004_v35  ;;  %v14025_v23 = vld [vmem:[#allocation185_spill] sm:$0xff] }
 0x831   :  { %7200 = vst [vmem:[#allocation2 + $0xd0] sm:$0xff] %v8324_v53 }
 0x832   :  { %7201 = vst [vmem:[#allocation2 + $0xd8] sm:$0xff] %v8325_v43  ;;  %v6826_v24 = vpop.f32.mrb[92].mxu1 }
 0x833   :  { %v8326_v25 = vadd.f32 %v6826_v24, %v14005_v9  ;;  %v6828_v4 = vpop.f32.mrb[93].mxu1  ;;  %v14026_v24 = vld [vmem:[#allocation186_spill] sm:$0xff] }
 0x834   :  { %v8327_v56 = vadd.f32 %v6828_v4, %v14006_v22  ;;  %v14027_v4 = vld [vmem:[#allocation187_spill] sm:$0xff] }
 0x835   :  { %7202 = vst [vmem:[#allocation2 + $0xe0] sm:$0xff] %v8326_v25 }
 0x836   :  { %7203 = vst [vmem:[#allocation2 + $0xe8] sm:$0xff] %v8327_v56  ;;  %v6833_v63 = vpop.f32.mrb[94].mxu1 }
 0x837   :  { %v8328_v11 = vadd.f32 %v6833_v63, %v14007_v50  ;;  %v6835_v17 = vpop.f32.mrb[95].mxu1  ;;  %v14028_v63 = vld [vmem:[#allocation188_spill] sm:$0xff] }
 0x838   :  { %v8329_v47 = vadd.f32 %v6835_v17, %v14008_v55  ;;  %v14029_v17 = vld [vmem:[#allocation189_spill] sm:$0xff] }
 0x839   :  { %7204 = vst [vmem:[#allocation2 + $0xf0] sm:$0xff] %v8328_v11 }
 0x83a   :  { %7205 = vst [vmem:[#allocation2 + $0xf8] sm:$0xff] %v8329_v47  ;;  %v6840_v1 = vpop.f32.mrb[96].mxu1 }
 0x83b   :  { %v8330_v58 = vadd.f32 %v6840_v1, %v14009_v61  ;;  %v6842_v46 = vpop.f32.mrb[97].mxu1  ;;  %v14030_v1 = vld [vmem:[#allocation190_spill] sm:$0xff] }
 0x83c   :  { %v8331_v38 = vadd.f32 %v6842_v46, %v14010_v59  ;;  %v14031_v46 = vld [vmem:[#allocation191_spill] sm:$0xff] }
 0x83d   :  { %7206 = vst [vmem:[#allocation2 + $0x100] sm:$0xff] %v8330_v58 }
 0x83e   :  { %7207 = vst [vmem:[#allocation2 + $0x108] sm:$0xff] %v8331_v38  ;;  %v6847_v5 = vpop.f32.mrb[98].mxu1 }
 0x83f   :  { %v8332_v7 = vadd.f32 %v6847_v5, %v14011_v44  ;;  %v6849_v16 = vpop.f32.mrb[99].mxu1  ;;  %v14032_v5 = vld [vmem:[#allocation192_spill] sm:$0xff] }
 0x840   :  { %v8333_v48 = vadd.f32 %v6849_v16, %v14012_v54  ;;  %v14033_v16 = vld [vmem:[#allocation193_spill] sm:$0xff] }
 0x841   :  { %7208 = vst [vmem:[#allocation2 + $0x110] sm:$0xff] %v8332_v7 }
 0x842   :  { %7209 = vst [vmem:[#allocation2 + $0x118] sm:$0xff] %v8333_v48  ;;  %v6854_v45 = vpop.f32.mrb[100].mxu1 }
 0x843   :  { %v8334_v13 = vadd.f32 %v6854_v45, %v14013_v62  ;;  %v6856_v2 = vpop.f32.mrb[101].mxu1  ;;  %v14034_v45 = vld [vmem:[#allocation194_spill] sm:$0xff] }
 0x844   :  { %v8335_v40 = vadd.f32 %v6856_v2, %v14014_v18  ;;  %v14035_v2 = vld [vmem:[#allocation38_spill] sm:$0xff] }
 0x845   :  { %7210 = vst [vmem:[#allocation2 + $0x120] sm:$0xff] %v8334_v13 }
 0x846   :  { %7211 = vst [vmem:[#allocation2 + $0x128] sm:$0xff] %v8335_v40  ;;  %v6861_v41 = vpop.f32.mrb[102].mxu1 }
 0x847   :  { %v8336_v0 = vadd.f32 %v6861_v41, %v14015_v20  ;;  %v6863_v34 = vpop.f32.mrb[103].mxu1  ;;  %v14036_v41 = vld [vmem:[#allocation195_spill] sm:$0xff] }
 0x848   :  { %v8337_v6 = vadd.f32 %v6863_v34, %v14016_v31  ;;  %v14037_v34 = vld [vmem:[#allocation40_spill] sm:$0xff] }
 0x849   :  { %7212 = vst [vmem:[#allocation2 + $0x130] sm:$0xff] %v8336_v0 }
 0x84a   :  { %7213 = vst [vmem:[#allocation2 + $0x138] sm:$0xff] %v8337_v6  ;;  %v6868_v19 = vpop.f32.mrb[104].mxu1 }
 0x84b   :  { %v8338_v52 = vadd.f32 %v6868_v19, %v14017_v15  ;;  %v6870_v14 = vpop.f32.mrb[105].mxu1  ;;  %v14038_v19 = vld [vmem:[#allocation196_spill] sm:$0xff] }
 0x84c   :  { %v8339_v29 = vadd.f32 %v6870_v14, %v14018_v8  ;;  %v14039_v14 = vld [vmem:[#allocation197_spill] sm:$0xff] }
 0x84d   :  { %7214 = vst [vmem:[#allocation2 + $0x140] sm:$0xff] %v8338_v52 }
 0x84e   :  { %7215 = vst [vmem:[#allocation2 + $0x148] sm:$0xff] %v8339_v29  ;;  %v6875_v37 = vpop.f32.mrb[106].mxu1 }
 0x84f   :  { %v8340_v39 = vadd.f32 %v6875_v37, %v14019_v12  ;;  %v6877_v51 = vpop.f32.mrb[107].mxu1  ;;  %v14040_v37 = vld [vmem:[#allocation198_spill] sm:$0xff] }
 0x850   :  { %v8341_v28 = vadd.f32 %v6877_v51, %v14020_v21  ;;  %v14041_v51 = vld [vmem:[#allocation77_spill] sm:$0xff] }
 0x851   :  { %7216 = vst [vmem:[#allocation2 + $0x150] sm:$0xff] %v8340_v39 }
 0x852   :  { %7217 = vst [vmem:[#allocation2 + $0x158] sm:$0xff] %v8341_v28  ;;  %v6882_v33 = vpop.f32.mrb[108].mxu1 }
 0x853   :  { %v8342_v42 = vadd.f32 %v6882_v33, %v14021_v36  ;;  %v6884_v10 = vpop.f32.mrb[109].mxu1  ;;  %v14042_v33 = vld [vmem:[#allocation78_spill] sm:$0xff] }
 0x854   :  { %v8343_v60 = vadd.f32 %v6884_v10, %v14022_v26  ;;  %v14043_v10 = vld [vmem:[#allocation81_spill] sm:$0xff] }
 0x855   :  { %7218 = vst [vmem:[#allocation2 + $0x160] sm:$0xff] %v8342_v42 }
 0x856   :  { %7219 = vst [vmem:[#allocation2 + $0x168] sm:$0xff] %v8343_v60  ;;  %v6889_v3 = vpop.f32.mrb[110].mxu1 }
 0x857   :  { %v8344_v32 = vadd.f32 %v6889_v3, %v14023_v49  ;;  %v6891_v27 = vpop.f32.mrb[111].mxu1  ;;  %v14044_v3 = vld [vmem:[#allocation83_spill] sm:$0xff] }
 0x858   :  { %v8345_v57 = vadd.f32 %v6891_v27, %v14024_v30  ;;  %v14045_v27 = vld [vmem:[#allocation85_spill] sm:$0xff] }
 0x859   :  { %7220 = vst [vmem:[#allocation2 + $0x170] sm:$0xff] %v8344_v32 }
 0x85a   :  { %7221 = vst [vmem:[#allocation2 + $0x178] sm:$0xff] %v8345_v57  ;;  %v6896_v53 = vpop.f32.mrb[112].mxu1 }
 0x85b   :  { %v8346_v35 = vadd.f32 %v6896_v53, %v14025_v23  ;;  %v6898_v43 = vpop.f32.mrb[113].mxu1  ;;  %v14046_v53 = vld [vmem:[#allocation87_spill] sm:$0xff] }
 0x85c   :  { %v8347_v9 = vadd.f32 %v6898_v43, %v14026_v24  ;;  %v14047_v43 = vld [vmem:[#allocation88_spill] sm:$0xff] }
 0x85d   :  { %7222 = vst [vmem:[#allocation2 + $0x180] sm:$0xff] %v8346_v35 }
 0x85e   :  { %7223 = vst [vmem:[#allocation2 + $0x188] sm:$0xff] %v8347_v9  ;;  %v6903_v25 = vpop.f32.mrb[114].mxu1 }
 0x85f   :  { %v8348_v22 = vadd.f32 %v6903_v25, %v14027_v4  ;;  %v6905_v56 = vpop.f32.mrb[115].mxu1  ;;  %v14048_v25 = vld [vmem:[#allocation90_spill] sm:$0xff] }
 0x860   :  { %v8349_v50 = vadd.f32 %v6905_v56, %v14028_v63  ;;  %v14049_v56 = vld [vmem:[#allocation93_spill] sm:$0xff] }
 0x861   :  { %7224 = vst [vmem:[#allocation2 + $0x190] sm:$0xff] %v8348_v22 }
 0x862   :  { %7225 = vst [vmem:[#allocation2 + $0x198] sm:$0xff] %v8349_v50  ;;  %v6910_v11 = vpop.f32.mrb[116].mxu1 }
 0x863   :  { %v8350_v55 = vadd.f32 %v6910_v11, %v14029_v17  ;;  %v6912_v47 = vpop.f32.mrb[117].mxu1  ;;  %v14050_v11 = vld [vmem:[#allocation94_spill] sm:$0xff] }
 0x864   :  { %v8351_v61 = vadd.f32 %v6912_v47, %v14030_v1  ;;  %v14051_v47 = vld [vmem:[#allocation97_spill] sm:$0xff] }
 0x865   :  { %7226 = vst [vmem:[#allocation2 + $0x1a0] sm:$0xff] %v8350_v55 }
 0x866   :  { %7227 = vst [vmem:[#allocation2 + $0x1a8] sm:$0xff] %v8351_v61  ;;  %v6917_v58 = vpop.f32.mrb[118].mxu1 }
 0x867   :  { %v8352_v59 = vadd.f32 %v6917_v58, %v14031_v46  ;;  %v6919_v38 = vpop.f32.mrb[119].mxu1  ;;  %v14052_v58 = vld [vmem:[#allocation99_spill] sm:$0xff] }
 0x868   :  { %v8353_v44 = vadd.f32 %v6919_v38, %v14032_v5  ;;  %v14053_v38 = vld [vmem:[#allocation101_spill] sm:$0xff] }
 0x869   :  { %7228 = vst [vmem:[#allocation2 + $0x1b0] sm:$0xff] %v8352_v59 }
 0x86a   :  { %7229 = vst [vmem:[#allocation2 + $0x1b8] sm:$0xff] %v8353_v44  ;;  %v6924_v7 = vpop.f32.mrb[120].mxu1 }
 0x86b   :  { %v8354_v54 = vadd.f32 %v6924_v7, %v14033_v16  ;;  %v6926_v48 = vpop.f32.mrb[121].mxu1  ;;  %v14054_v7 = vld [vmem:[#allocation103_spill] sm:$0xff] }
 0x86c   :  { %v8355_v62 = vadd.f32 %v6926_v48, %v14034_v45  ;;  %v14055_v48 = vld [vmem:[#allocation104_spill] sm:$0xff] }
 0x86d   :  { %7230 = vst [vmem:[#allocation2 + $0x1c0] sm:$0xff] %v8354_v54 }
 0x86e   :  { %7231 = vst [vmem:[#allocation2 + $0x1c8] sm:$0xff] %v8355_v62  ;;  %v6931_v13 = vpop.f32.mrb[122].mxu1 }
 0x86f   :  { %v8356_v18 = vadd.f32 %v6931_v13, %v14035_v2  ;;  %v6933_v40 = vpop.f32.mrb[123].mxu1  ;;  %v14056_v13 = vld [vmem:[#allocation108_spill] sm:$0xff] }
 0x870   :  { %v8357_v20 = vadd.f32 %v6933_v40, %v14036_v41  ;;  %v14057_v40 = vld [vmem:[#allocation109_spill] sm:$0xff] }
 0x871   :  { %7232 = vst [vmem:[#allocation2 + $0x1d0] sm:$0xff] %v8356_v18 }
 0x872   :  { %7233 = vst [vmem:[#allocation2 + $0x1d8] sm:$0xff] %v8357_v20  ;;  %v6938_v0 = vpop.f32.mrb[124].mxu1 }
 0x873   :  { %v8358_v31 = vadd.f32 %v6938_v0, %v14037_v34  ;;  %v6940_v6 = vpop.f32.mrb[125].mxu1  ;;  %v14058_v0 = vld [vmem:[#allocation110_spill] sm:$0xff] }
 0x874   :  { %v8359_v15 = vadd.f32 %v6940_v6, %v14038_v19  ;;  %v14059_v6 = vld [vmem:[#allocation111_spill] sm:$0xff] }
 0x875   :  { %7234 = vst [vmem:[#allocation2 + $0x1e0] sm:$0xff] %v8358_v31 }
 0x876   :  { %7235 = vst [vmem:[#allocation2 + $0x1e8] sm:$0xff] %v8359_v15  ;;  %v6945_v52 = vpop.f32.mrb[126].mxu1 }
 0x877   :  { %v8360_v8 = vadd.f32 %v6945_v52, %v14039_v14  ;;  %v6947_v29 = vpop.f32.mrb[127].mxu1  ;;  %v14060_v52 = vld [vmem:[#allocation116_spill] sm:$0xff] }
 0x878   :  { %v8361_v12 = vadd.f32 %v6947_v29, %v14040_v37  ;;  %v14061_v29 = vld [vmem:[#allocation117_spill] sm:$0xff] }
 0x879   :  { %7236 = vst [vmem:[#allocation2 + $0x1f0] sm:$0xff] %v8360_v8 }
 0x87a   :  { %7237 = vst [vmem:[#allocation2 + $0x1f8] sm:$0xff] %v8361_v12  ;;  %v6952_v39 = vpop.f32.mrb[0].mxu1 }
 0x87b   :  { %v8362_v21 = vadd.f32 %v6952_v39, %v14041_v51  ;;  %v6954_v28 = vpop.f32.mrb[1].mxu1  ;;  %v14062_v39 = vld [vmem:[#allocation119_spill] sm:$0xff] }
 0x87c   :  { %v8363_v36 = vadd.f32 %v6954_v28, %v14042_v33  ;;  %v14063_v28 = vld [vmem:[#allocation120_spill] sm:$0xff] }
 0x87d   :  { %7238 = vst [vmem:[#allocation2 + $0x200] sm:$0xff] %v8362_v21 }
 0x87e   :  { %7239 = vst [vmem:[#allocation2 + $0x208] sm:$0xff] %v8363_v36  ;;  %v6959_v42 = vpop.f32.mrb[2].mxu1 }
 0x87f   :  { %v8364_v26 = vadd.f32 %v6959_v42, %v14043_v10  ;;  %v6961_v60 = vpop.f32.mrb[3].mxu1  ;;  %v14064_v42 = vld [vmem:[#allocation123_spill] sm:$0xff] }
 0x880   :  { %v8365_v49 = vadd.f32 %v6961_v60, %v14044_v3  ;;  %v14065_v60 = vld [vmem:[#allocation124_spill] sm:$0xff] }
 0x881   :  { %7240 = vst [vmem:[#allocation2 + $0x210] sm:$0xff] %v8364_v26 }
 0x882   :  { %7241 = vst [vmem:[#allocation2 + $0x218] sm:$0xff] %v8365_v49  ;;  %v6966_v32 = vpop.f32.mrb[4].mxu1 }
 0x883   :  { %v8366_v30 = vadd.f32 %v6966_v32, %v14045_v27  ;;  %v6968_v57 = vpop.f32.mrb[5].mxu1  ;;  %v14066_v32 = vld [vmem:[#allocation126_spill] sm:$0xff] }
 0x884   :  { %v8367_v23 = vadd.f32 %v6968_v57, %v14046_v53  ;;  %v14067_v57 = vld [vmem:[#allocation128_spill] sm:$0xff] }
 0x885   :  { %7242 = vst [vmem:[#allocation2 + $0x220] sm:$0xff] %v8366_v30 }
 0x886   :  { %7243 = vst [vmem:[#allocation2 + $0x228] sm:$0xff] %v8367_v23  ;;  %v6973_v35 = vpop.f32.mrb[6].mxu1 }
 0x887   :  { %v8368_v24 = vadd.f32 %v6973_v35, %v14047_v43  ;;  %v6975_v9 = vpop.f32.mrb[7].mxu1  ;;  %v14068_v35 = vld [vmem:[#allocation129_spill] sm:$0xff] }
 0x888   :  { %v8369_v4 = vadd.f32 %v6975_v9, %v14048_v25  ;;  %v14069_v9 = vld [vmem:[#allocation25_spill] sm:$0xff] }
 0x889   :  { %7244 = vst [vmem:[#allocation2 + $0x230] sm:$0xff] %v8368_v24 }
 0x88a   :  { %7245 = vst [vmem:[#allocation2 + $0x238] sm:$0xff] %v8369_v4  ;;  %v6980_v22 = vpop.f32.mrb[8].mxu1 }
 0x88b   :  { %v8370_v63 = vadd.f32 %v6980_v22, %v14049_v56  ;;  %v6982_v50 = vpop.f32.mrb[9].mxu1  ;;  %v14070_v22 = vld [vmem:[#allocation26_spill] sm:$0xff] }
 0x88c   :  { %v8371_v17 = vadd.f32 %v6982_v50, %v14050_v11  ;;  %v14071_v50 = vld [vmem:[#allocation32_spill] sm:$0xff] }
 0x88d   :  { %7246 = vst [vmem:[#allocation2 + $0x240] sm:$0xff] %v8370_v63 }
 0x88e   :  { %7247 = vst [vmem:[#allocation2 + $0x248] sm:$0xff] %v8371_v17  ;;  %v6987_v55 = vpop.f32.mrb[10].mxu1 }
 0x88f   :  { %v8372_v1 = vadd.f32 %v6987_v55, %v14051_v47  ;;  %v6989_v61 = vpop.f32.mrb[11].mxu1  ;;  %v14072_v55 = vld [vmem:[#allocation33_spill] sm:$0xff] }
 0x890   :  { %v8373_v46 = vadd.f32 %v6989_v61, %v14052_v58  ;;  %v14073_v61 = vld [vmem:[#allocation41_spill] sm:$0xff] }
 0x891   :  { %7248 = vst [vmem:[#allocation2 + $0x250] sm:$0xff] %v8372_v1 }
 0x892   :  { %7249 = vst [vmem:[#allocation2 + $0x258] sm:$0xff] %v8373_v46  ;;  %v6994_v59 = vpop.f32.mrb[12].mxu1 }
 0x893   :  { %v8374_v5 = vadd.f32 %v6994_v59, %v14053_v38  ;;  %v6996_v44 = vpop.f32.mrb[13].mxu1  ;;  %v14074_v59 = vld [vmem:[#allocation42_spill] sm:$0xff] }
 0x894   :  { %v8375_v16 = vadd.f32 %v6996_v44, %v14054_v7  ;;  %v14075_v44 = vld [vmem:[#allocation49_spill] sm:$0xff] }
 0x895   :  { %7250 = vst [vmem:[#allocation2 + $0x260] sm:$0xff] %v8374_v5 }
 0x896   :  { %7251 = vst [vmem:[#allocation2 + $0x268] sm:$0xff] %v8375_v16  ;;  %v7001_v54 = vpop.f32.mrb[14].mxu1 }
 0x897   :  { %v8376_v45 = vadd.f32 %v7001_v54, %v14055_v48  ;;  %v7003_v62 = vpop.f32.mrb[15].mxu1  ;;  %v14076_v54 = vld [vmem:[#allocation50_spill] sm:$0xff] }
 0x898   :  { %v8377_v2 = vadd.f32 %v7003_v62, %v14056_v13  ;;  %v14077_v62 = vld [vmem:[#allocation57_spill] sm:$0xff] }
 0x899   :  { %7252 = vst [vmem:[#allocation2 + $0x270] sm:$0xff] %v8376_v45 }
 0x89a   :  { %7253 = vst [vmem:[#allocation2 + $0x278] sm:$0xff] %v8377_v2  ;;  %v7008_v18 = vpop.f32.mrb[16].mxu1 }
 0x89b   :  { %v8378_v41 = vadd.f32 %v7008_v18, %v14057_v40  ;;  %v7010_v20 = vpop.f32.mrb[17].mxu1  ;;  %v14078_v18 = vld [vmem:[#allocation58_spill] sm:$0xff] }
 0x89c   :  { %v8379_v34 = vadd.f32 %v7010_v20, %v14058_v0  ;;  %v14079_v20 = vld [vmem:[#allocation64_spill] sm:$0xff] }
 0x89d   :  { %7254 = vst [vmem:[#allocation2 + $0x280] sm:$0xff] %v8378_v41 }
 0x89e   :  { %7255 = vst [vmem:[#allocation2 + $0x288] sm:$0xff] %v8379_v34  ;;  %v7015_v31 = vpop.f32.mrb[18].mxu1 }
 0x89f   :  { %v8380_v19 = vadd.f32 %v7015_v31, %v14059_v6  ;;  %v7017_v15 = vpop.f32.mrb[19].mxu1  ;;  %v14080_v31 = vld [vmem:[#allocation66_spill] sm:$0xff] }
 0x8a0   :  { %v8381_v14 = vadd.f32 %v7017_v15, %v14060_v52  ;;  %v14081_v15 = vld [vmem:[#allocation73_spill] sm:$0xff] }
 0x8a1   :  { %7256 = vst [vmem:[#allocation2 + $0x290] sm:$0xff] %v8380_v19 }
 0x8a2   :  { %7257 = vst [vmem:[#allocation2 + $0x298] sm:$0xff] %v8381_v14  ;;  %v7022_v8 = vpop.f32.mrb[20].mxu1 }
 0x8a3   :  { %v8382_v37 = vadd.f32 %v7022_v8, %v14061_v29  ;;  %v7024_v12 = vpop.f32.mrb[21].mxu1  ;;  %v14082_v8 = vld [vmem:[#allocation74_spill] sm:$0xff] }
 0x8a4   :  { %v8383_v51 = vadd.f32 %v7024_v12, %v14062_v39  ;;  %v14083_v12 = vld [vmem:[#allocation82_spill] sm:$0xff] }
 0x8a5   :  { %7258 = vst [vmem:[#allocation2 + $0x2a0] sm:$0xff] %v8382_v37 }
 0x8a6   :  { %7259 = vst [vmem:[#allocation2 + $0x2a8] sm:$0xff] %v8383_v51  ;;  %v7029_v21 = vpop.f32.mrb[22].mxu1 }
 0x8a7   :  { %v8384_v33 = vadd.f32 %v7029_v21, %v14063_v28  ;;  %v7031_v36 = vpop.f32.mrb[23].mxu1  ;;  %v14084_v21 = vld [vmem:[#allocation86_spill] sm:$0xff] }
 0x8a8   :  { %v8385_v10 = vadd.f32 %v7031_v36, %v14064_v42  ;;  %v14085_v36 = vld [vmem:[#allocation95_spill] sm:$0xff] }
 0x8a9   :  { %7260 = vst [vmem:[#allocation2 + $0x2b0] sm:$0xff] %v8384_v33 }
 0x8aa   :  { %7261 = vst [vmem:[#allocation2 + $0x2b8] sm:$0xff] %v8385_v10  ;;  %v7036_v26 = vpop.f32.mrb[24].mxu1 }
 0x8ab   :  { %v8386_v3 = vadd.f32 %v7036_v26, %v14065_v60  ;;  %v7038_v49 = vpop.f32.mrb[25].mxu1  ;;  %v14086_v26 = vld [vmem:[#allocation100_spill] sm:$0xff] }
 0x8ac   :  { %v8387_v27 = vadd.f32 %v7038_v49, %v14066_v32  ;;  %v14087_v49 = vld [vmem:[#allocation112_spill] sm:$0xff] }
 0x8ad   :  { %7262 = vst [vmem:[#allocation2 + $0x2c0] sm:$0xff] %v8386_v3 }
 0x8ae   :  { %7263 = vst [vmem:[#allocation2 + $0x2c8] sm:$0xff] %v8387_v27  ;;  %v7043_v30 = vpop.f32.mrb[26].mxu1 }
 0x8af   :  { %v8388_v53 = vadd.f32 %v7043_v30, %v14067_v57  ;;  %v7045_v23 = vpop.f32.mrb[27].mxu1  ;;  %v14088_v30 = vld [vmem:[#allocation6_spill] sm:$0xff] }
 0x8b0   :  { %v8389_v43 = vadd.f32 %v7045_v23, %v14068_v35  ;;  %v14089_v23 = vld [vmem:[#allocation15_spill] sm:$0xff] }
 0x8b1   :  { %7264 = vst [vmem:[#allocation2 + $0x2d0] sm:$0xff] %v8388_v53 }
 0x8b2   :  { %7265 = vst [vmem:[#allocation2 + $0x2d8] sm:$0xff] %v8389_v43  ;;  %v7050_v24 = vpop.f32.mrb[28].mxu1 }
 0x8b3   :  { %v8390_v25 = vadd.f32 %v7050_v24, %v14069_v9  ;;  %v7052_v4 = vpop.f32.mrb[29].mxu1  ;;  %v14090_v24 = vld [vmem:[#allocation20_spill] sm:$0xff] }
 0x8b4   :  { %v8391_v56 = vadd.f32 %v7052_v4, %v14070_v22  ;;  %v14091_v4 = vld [vmem:[#allocation132_spill] sm:$0xff] }
 0x8b5   :  { %7266 = vst [vmem:[#allocation2 + $0x2e0] sm:$0xff] %v8390_v25 }
 0x8b6   :  { %7267 = vst [vmem:[#allocation2 + $0x2e8] sm:$0xff] %v8391_v56  ;;  %v7057_v63 = vpop.f32.mrb[30].mxu1 }
 0x8b7   :  { %v8392_v11 = vadd.f32 %v7057_v63, %v14071_v50  ;;  %v7059_v17 = vpop.f32.mrb[31].mxu1  ;;  %v14092_v63 = vld [vmem:[#allocation133_spill] sm:$0xff] }
 0x8b8   :  { %v8393_v47 = vadd.f32 %v7059_v17, %v14072_v55  ;;  %v14093_v17 = vld [vmem:[#allocation13_spill] sm:$0xff] }
 0x8b9   :  { %7268 = vst [vmem:[#allocation2 + $0x2f0] sm:$0xff] %v8392_v11 }
 0x8ba   :  { %7269 = vst [vmem:[#allocation2 + $0x2f8] sm:$0xff] %v8393_v47  ;;  %v7064_v1 = vpop.f32.mrb[32].mxu1 }
 0x8bb   :  { %v8394_v58 = vadd.f32 %v7064_v1, %v14073_v61  ;;  %v7066_v46 = vpop.f32.mrb[33].mxu1  ;;  %v14094_v1 = vld [vmem:[#allocation9_spill] sm:$0xff] }
 0x8bc   :  { %v8395_v38 = vadd.f32 %v7066_v46, %v14074_v59  ;;  %v14095_v46 = vld [vmem:[#allocation134_spill] sm:$0xff] }
 0x8bd   :  { %7270 = vst [vmem:[#allocation2 + $0x300] sm:$0xff] %v8394_v58 }
 0x8be   :  { %7271 = vst [vmem:[#allocation2 + $0x308] sm:$0xff] %v8395_v38  ;;  %v7071_v5 = vpop.f32.mrb[34].mxu1 }
 0x8bf   :  { %v8396_v7 = vadd.f32 %v7071_v5, %v14075_v44  ;;  %v7073_v16 = vpop.f32.mrb[35].mxu1  ;;  %v14096_v5 = vld [vmem:[#allocation135_spill] sm:$0xff] }
 0x8c0   :  { %v8397_v48 = vadd.f32 %v7073_v16, %v14076_v54  ;;  %v14097_v16 = vld [vmem:[#allocation136_spill] sm:$0xff] }
 0x8c1   :  { %7272 = vst [vmem:[#allocation2 + $0x310] sm:$0xff] %v8396_v7 }
 0x8c2   :  { %7273 = vst [vmem:[#allocation2 + $0x318] sm:$0xff] %v8397_v48  ;;  %v7078_v45 = vpop.f32.mrb[36].mxu1 }
 0x8c3   :  { %v8398_v13 = vadd.f32 %v7078_v45, %v14077_v62  ;;  %v7080_v2 = vpop.f32.mrb[37].mxu1  ;;  %v14098_v45 = vld [vmem:[#allocation137_spill] sm:$0xff] }
 0x8c4   :  { %v8399_v40 = vadd.f32 %v7080_v2, %v14078_v18  ;;  %v14099_v2 = vld [vmem:[#allocation138_spill] sm:$0xff] }
 0x8c5   :  { %7274 = vst [vmem:[#allocation2 + $0x320] sm:$0xff] %v8398_v13 }
 0x8c6   :  { %7275 = vst [vmem:[#allocation2 + $0x328] sm:$0xff] %v8399_v40  ;;  %v7085_v41 = vpop.f32.mrb[38].mxu1 }
 0x8c7   :  { %v8400_v0 = vadd.f32 %v7085_v41, %v14079_v20  ;;  %v7087_v34 = vpop.f32.mrb[39].mxu1  ;;  %v14100_v41 = vld [vmem:[#allocation139_spill] sm:$0xff] }
 0x8c8   :  { %v8401_v6 = vadd.f32 %v7087_v34, %v14080_v31  ;;  %v14101_v34 = vld [vmem:[#allocation140_spill] sm:$0xff] }
 0x8c9   :  { %7276 = vst [vmem:[#allocation2 + $0x330] sm:$0xff] %v8400_v0 }
 0x8ca   :  { %7277 = vst [vmem:[#allocation2 + $0x338] sm:$0xff] %v8401_v6  ;;  %v7092_v19 = vpop.f32.mrb[40].mxu1 }
 0x8cb   :  { %v8402_v52 = vadd.f32 %v7092_v19, %v14081_v15  ;;  %v7094_v14 = vpop.f32.mrb[41].mxu1  ;;  %v14102_v19 = vld [vmem:[#allocation141_spill] sm:$0xff] }
 0x8cc   :  { %v8403_v29 = vadd.f32 %v7094_v14, %v14082_v8  ;;  %v14103_v14 = vld [vmem:[#allocation142_spill] sm:$0xff] }
 0x8cd   :  { %7278 = vst [vmem:[#allocation2 + $0x340] sm:$0xff] %v8402_v52 }
 0x8ce   :  { %7279 = vst [vmem:[#allocation2 + $0x348] sm:$0xff] %v8403_v29  ;;  %v7099_v37 = vpop.f32.mrb[42].mxu1 }
 0x8cf   :  { %v8404_v39 = vadd.f32 %v7099_v37, %v14083_v12  ;;  %v7101_v51 = vpop.f32.mrb[43].mxu1  ;;  %v14104_v37 = vld [vmem:[#allocation143_spill] sm:$0xff] }
 0x8d0   :  { %v8405_v28 = vadd.f32 %v7101_v51, %v14084_v21 }
 0x8d1   :  { %7280 = vst [vmem:[#allocation2 + $0x350] sm:$0xff] %v8404_v39 }
 0x8d2   :  { %7281 = vst [vmem:[#allocation2 + $0x358] sm:$0xff] %v8405_v28  ;;  %v7106_v33 = vpop.f32.mrb[44].mxu1 }
 0x8d3   :  { %v8406_v42 = vadd.f32 %v7106_v33, %v14085_v36  ;;  %v7108_v10 = vpop.f32.mrb[45].mxu1 }
 0x8d4   :  { %v8407_v60 = vadd.f32 %v7108_v10, %v14086_v26 }
 0x8d5   :  { %7282 = vst [vmem:[#allocation2 + $0x360] sm:$0xff] %v8406_v42 }
 0x8d6   :  { %7283 = vst [vmem:[#allocation2 + $0x368] sm:$0xff] %v8407_v60  ;;  %v7113_v3 = vpop.f32.mrb[46].mxu1 }
 0x8d7   :  { %v8408_v32 = vadd.f32 %v7113_v3, %v14087_v49  ;;  %v7115_v27 = vpop.f32.mrb[47].mxu1 }
 0x8d8   :  { %v8409_v57 = vadd.f32 %v7115_v27, %v14088_v30 }
 0x8d9   :  { %7284 = vst [vmem:[#allocation2 + $0x370] sm:$0xff] %v8408_v32 }
 0x8da   :  { %7285 = vst [vmem:[#allocation2 + $0x378] sm:$0xff] %v8409_v57  ;;  %v7120_v53 = vpop.f32.mrb[48].mxu1 }
 0x8db   :  { %v8410_v35 = vadd.f32 %v7120_v53, %v14089_v23  ;;  %v7122_v43 = vpop.f32.mrb[49].mxu1 }
 0x8dc   :  { %v8411_v9 = vadd.f32 %v7122_v43, %v14090_v24 }
 0x8dd   :  { %7286 = vst [vmem:[#allocation2 + $0x380] sm:$0xff] %v8410_v35 }
 0x8de   :  { %7287 = vst [vmem:[#allocation2 + $0x388] sm:$0xff] %v8411_v9  ;;  %v7127_v25 = vpop.f32.mrb[50].mxu1 }
 0x8df   :  { %v8412_v22 = vadd.f32 %v7127_v25, %v14091_v4  ;;  %v7129_v56 = vpop.f32.mrb[51].mxu1 }
 0x8e0   :  { %v8413_v50 = vadd.f32 %v7129_v56, %v14092_v63 }
 0x8e1   :  { %7288 = vst [vmem:[#allocation2 + $0x390] sm:$0xff] %v8412_v22 }
 0x8e2   :  { %7289 = vst [vmem:[#allocation2 + $0x398] sm:$0xff] %v8413_v50  ;;  %v7134_v11 = vpop.f32.mrb[52].mxu1 }
 0x8e3   :  { %v8414_v55 = vadd.f32 %v7134_v11, %v14093_v17  ;;  %v7136_v47 = vpop.f32.mrb[53].mxu1 }
 0x8e4   :  { %v8415_v61 = vadd.f32 %v7136_v47, %v14094_v1 }
 0x8e5   :  { %7290 = vst [vmem:[#allocation2 + $0x3a0] sm:$0xff] %v8414_v55 }
 0x8e6   :  { %7291 = vst [vmem:[#allocation2 + $0x3a8] sm:$0xff] %v8415_v61  ;;  %v7141_v58 = vpop.f32.mrb[54].mxu1 }
 0x8e7   :  { %v8416_v59 = vadd.f32 %v7141_v58, %v14095_v46  ;;  %v7143_v38 = vpop.f32.mrb[55].mxu1 }
 0x8e8   :  { %v8417_v44 = vadd.f32 %v7143_v38, %v14096_v5 }
 0x8e9   :  { %7292 = vst [vmem:[#allocation2 + $0x3b0] sm:$0xff] %v8416_v59 }
 0x8ea   :  { %7293 = vst [vmem:[#allocation2 + $0x3b8] sm:$0xff] %v8417_v44  ;;  %v7148_v7 = vpop.f32.mrb[56].mxu1 }
 0x8eb   :  { %v8418_v54 = vadd.f32 %v7148_v7, %v14097_v16  ;;  %v7150_v48 = vpop.f32.mrb[57].mxu1 }
 0x8ec   :  { %v8419_v62 = vadd.f32 %v7150_v48, %v14098_v45 }
 0x8ed   :  { %7294 = vst [vmem:[#allocation2 + $0x3c0] sm:$0xff] %v8418_v54 }
 0x8ee   :  { %7295 = vst [vmem:[#allocation2 + $0x3c8] sm:$0xff] %v8419_v62  ;;  %v7155_v13 = vpop.f32.mrb[58].mxu1 }
 0x8ef   :  { %v8420_v18 = vadd.f32 %v7155_v13, %v14099_v2  ;;  %v7157_v40 = vpop.f32.mrb[59].mxu1 }
 0x8f0   :  { %v8421_v20 = vadd.f32 %v7157_v40, %v14100_v41 }
 0x8f1   :  { %7296 = vst [vmem:[#allocation2 + $0x3d0] sm:$0xff] %v8420_v18 }
 0x8f2   :  { %7297 = vst [vmem:[#allocation2 + $0x3d8] sm:$0xff] %v8421_v20  ;;  %v7162_v0 = vpop.f32.mrb[60].mxu1 }
 0x8f3   :  { %v8422_v31 = vadd.f32 %v7162_v0, %v14101_v34  ;;  %v7164_v6 = vpop.f32.mrb[61].mxu1 }
 0x8f4   :  { %v8423_v15 = vadd.f32 %v7164_v6, %v14102_v19 }
 0x8f5   :  { %7298 = vst [vmem:[#allocation2 + $0x3e0] sm:$0xff] %v8422_v31 }
 0x8f6   :  { %7299 = vst [vmem:[#allocation2 + $0x3e8] sm:$0xff] %v8423_v15  ;;  %v7169_v52 = vpop.f32.mrb[62].mxu1 }
 0x8f7   :  { %v8424_v8 = vadd.f32 %v7169_v52, %v14103_v14  ;;  %v7171_v29 = vpop.f32.mrb[63].mxu1 }
 0x8f8   :  { %v8425_v12 = vadd.f32 %v7171_v29, %v14104_v37 }
 0x8f9   :  { %7300 = vst [vmem:[#allocation2 + $0x3f0] sm:$0xff] %v8424_v8 }
 0x8fa   :  { %7301 = vst [vmem:[#allocation2 + $0x3f8] sm:$0xff] %v8425_v12 }
 0x8fb   :  { %9273 = shalt.err (!%p9270_p4)
}
 0x8fc   :  { %s9274_s9 = scalar_lea.hbm %s12634_s3, 16384 }
 0x8fd   :  { %p9275_p5 = scmp.ne.s32.totalorder %s12634_s3, %s9274_s9  ;;  %p9278_p6 = scmp.lt.u32.totalorder %s9274_s9, %s12634_s3 }
 0x8ff   :  { %p9280_p7 = pnand %p9278_p6, %p9275_p5 }
 0x901   :  { %9283 = shalt.err (!%p9280_p7)
}
 0x902   :  { %s9288_s14 = smov 256   ;;  %s9289_s15 = smov 16  }
 0x903   :  { %7313 = dma.vmem_to_hbm [thread:$0]  %s7308_s5, 16384, %s12634_s3, [#allocation3], %s9288_s14, %s9288_s14, %s9289_s15  }
 0x904   :  { %9284 = dma.done.wait [#allocation3], 16384  }
 0x905   :  { %9285 = vsyncadd [#allocation3], 4294950912 }
 0x906   :  { %7317 = vsyncpa [#allocation3], 1 }

// kernel: tpu_custom_call.1
= control target key start
LH: loop header
LB: loop body
LE: loop exit
PB: predicated region body
PF: predicated region fallthrough
CT: control target
= control target key end

     0   :  { %vm80_vm0 = vcmask 64512   ;;  %s12631_s0 = inlined_call_operand.vmem [shape: f32[8,8], index: 0, kind: input, shape index: {}]   ;;  %s12632_s1 = inlined_call_operand.vmem [shape: f32[8,256], index: 1, kind: input, shape index: {}]   ;;  %s12633_s2 = inlined_call_operand.vmem [shape: f32[512,8], index: 2, kind: input, shape index: {}]   ;;  %s12634_s3 = inlined_call_operand.hbm [shape: f32[512,256], index: 3, kind: output, shape index: {}]  }
   0x1   :  { %v79_v0 = vld [vmem:[%s12631_s0] sm:$0xff]  ;;  %v16_v2 = vld [vmem:[%s12633_s2 + $0x8] sm:$0xff]  ;;  %v17_v6 = vld [vmem:[%s12633_s2 + $0x10] sm:$0xff] }
   0x2   :  { %v15_v1 = vld [vmem:[%s12633_s2] sm:$0xff]  ;;  %v9319_v3 = vand.u32 4294901760, %v79_v0  ;;  %v85_v5 = vsel %vm80_vm0, %v16_v2, 0  ;;  %v18_v7 = vld [vmem:[%s12633_s2 + $0x18] sm:$0xff]  ;;  %v88_v11 = vsel %vm80_vm0, %v17_v6, 0  ;;  %v20_v13 = vld [vmem:[%s12633_s2 + $0x28] sm:$0xff] }
   0x3   :  { %v82_v4 = vsel %vm80_vm0, %v15_v1, 0  ;;  %v19_v8 = vld [vmem:[%s12633_s2 + $0x20] sm:$0xff]  ;;  %v9334_v10 = vand.u32 4294901760, %v85_v5  ;;  %v91_v12 = vsel %vm80_vm0, %v18_v7, 0  ;;  %v9345_v15 = vand.u32 4294901760, %v88_v11  ;;  %v21_v18 = vld [vmem:[%s12633_s2 + $0x30] sm:$0xff] }
   0x4   :  { %v9332_v9 = vand.u32 4294901760, %v82_v4  ;;  %7708 = vmatprep.subr.mxu0 %v9319_v3  ;;  %v9343_v14 = vsub.f32 %v79_v0, %v9319_v3  ;;  %v9347_v16 = vand.u32 4294901760, %v91_v12  ;;  %v94_v17 = vsel %vm80_vm0, %v19_v8, 0  ;;  %v22_v39 = vld [vmem:[%s12633_s2 + $0x38] sm:$0xff]  ;;  %v23_v44 = vld [vmem:[%s12633_s2 + $0x40] sm:$0xff]  ;;  %v24_v49 = vld [vmem:[%s12633_s2 + $0x48] sm:$0xff] }
   0x5   :  { %13135 = vst [vmem:[#allocation6_spill] sm:$0xff] %v9334_v10  ;;  %13136 = vst [vmem:[#allocation7_spill] sm:$0xff] %v9345_v15  ;;  %7709 = vmatpush3.msra.mxu0 %v9319_v3  ;;  %v9358_v20 = vsub.f32 %v85_v5, %v9334_v10  ;;  %v9360_v21 = vand.u32 4294901760, %v94_v17  ;;  %v97_v22 = vsel %vm80_vm0, %v20_v13, 0  ;;  %v9367_v24 = vsub.f32 %v88_v11, %v9345_v15  ;;  %v25_v50 = vld [vmem:[%s12633_s2 + $0x50] sm:$0xff]  ;;  %v26_v55 = vld [vmem:[%s12633_s2 + $0x58] sm:$0xff] }
   0x6   :  { %13134 = vst [vmem:[#allocation5_spill] sm:$0xff] %v9332_v9  ;;  %13137 = vst [vmem:[#allocation8_spill] sm:$0xff] %v9347_v16  ;;  %v9355_v19 = vsub.f32 %v82_v4, %v9332_v9  ;;  %v9364_v23 = vand.u32 4294901760, %v9343_v14  ;;  %v9370_v25 = vsub.f32 %v91_v12, %v9347_v16  ;;  %v9372_v26 = vand.u32 4294901760, %v97_v22  ;;  %v27_v60 = vld [vmem:[%s12633_s2 + $0x60] sm:$0xff]  ;;  %v28_v61 = vld [vmem:[%s12633_s2 + $0x68] sm:$0xff] }
   0x7   :  { %13139 = vst [vmem:[#allocation10_spill] sm:$0xff] %v9358_v20  ;;  %13140 = vst [vmem:[#allocation11_spill] sm:$0xff] %v9360_v21  ;;  %v12648_v28 = vand.u32 4294901760, %v9358_v20  ;;  %v9377_v29 = vsub.f32 %v94_v17, %v9360_v21  ;;  %v100_v30 = vsel %vm80_vm0, %v21_v18, 0  ;;  %v12647_v32 = vand.u32 4294901760, %v9367_v24  ;;  %v29_v13 = vld [vmem:[%s12633_s2 + $0x70] sm:$0xff] }
   0x8   :  { %13138 = vst [vmem:[#allocation9_spill] sm:$0xff] %v9355_v19  ;;  %13141 = vst [vmem:[#allocation12_spill] sm:$0xff] %v9364_v23  ;;  %v12650_v27 = vand.u32 4294901760, %v9355_v19  ;;  %v983_v31 = vsub.f32 %v9343_v14, %v9364_v23  ;;  %v12646_v33 = vand.u32 4294901760, %v9370_v25  ;;  %v9385_v34 = vsub.f32 %v97_v22, %v9372_v26 }
   0x9   :  { %13142 = vst [vmem:[#allocation13_spill] sm:$0xff] %v9367_v24  ;;  %13143 = vst [vmem:[#allocation14_spill] sm:$0xff] %v9370_v25  ;;  %v352_v36 = vsub.f32 %v9358_v20, %v12648_v28  ;;  %v12643_v37 = vand.u32 4294901760, %v9377_v29  ;;  %v9394_v38 = vand.u32 4294901760, %v100_v30  ;;  %v362_v41 = vsub.f32 %v9367_v24, %v12647_v32 }
   0xa   :  { %13144 = vst [vmem:[#allocation15_spill] sm:$0xff] %v9372_v26  ;;  %13145 = vst [vmem:[#allocation16_spill] sm:$0xff] %v9377_v29  ;;  %v342_v35 = vsub.f32 %v9355_v19, %v12650_v27  ;;  %v984_v40 = vand.u32 4294901760, %v983_v31  ;;  %v372_v42 = vsub.f32 %v9370_v25, %v12646_v33  ;;  %v12642_v43 = vand.u32 4294901760, %v9385_v34 }
   0xb   :  { %13146 = vst [vmem:[#allocation17_spill] sm:$0xff] %v9385_v34  ;;  %13147 = vst [vmem:[#allocation18_spill] sm:$0xff] %v9394_v38  ;;  %v353_v46 = vand.u32 4294901760, %v352_v36  ;;  %v382_v47 = vsub.f32 %v9377_v29, %v12643_v37  ;;  %v9413_v48 = vsub.f32 %v100_v30, %v9394_v38  ;;  %v363_v51 = vand.u32 4294901760, %v362_v41 }
   0xc   :  { %v343_v45 = vand.u32 4294901760, %v342_v35  ;;  %7806 = vmatprep.subr.mxu0 %v984_v40  ;;  %v373_v52 = vand.u32 4294901760, %v372_v42  ;;  %v392_v53 = vsub.f32 %v9385_v34, %v12642_v43  ;;  %v103_v54 = vsel %vm80_vm0, %v22_v39, 0 }
   0xd   :  { %13148 = vst [vmem:[#allocation19_spill] sm:$0xff] %v9413_v48  ;;  %v383_v56 = vand.u32 4294901760, %v382_v47  ;;  %v12641_v57 = vand.u32 4294901760, %v9413_v48  ;;  %v9429_v58 = vand.u32 4294901760, %v103_v54  ;;  %v106_v59 = vsel %vm80_vm0, %v23_v44, 0 }
   0xe   :  { %7710 = vmatprep.mubr.f32.mxu0 %v343_v45  ;;  %v393_v62 = vand.u32 4294901760, %v392_v53  ;;  %v9438_v63 = vand.u32 4294901760, %v106_v59  ;;  %v109_v0 = vsel %vm80_vm0, %v24_v49, 0  ;;  %v112_v1 = vsel %vm80_vm0, %v25_v50, 0  ;;  %v30_v50 = vld [vmem:[%s12633_s2 + $0x78] sm:$0xff] }
   0xf   :  { %13149 = vst [vmem:[#allocation20_spill] sm:$0xff] %v9429_v58  ;;  %7711 = vmatmul.mubr.f32.vlgmr.msra.gmra.mrb[0].mxu0 %v353_v46  ;;  %v402_v2 = vsub.f32 %v9413_v48, %v12641_v57  ;;  %v9446_v4 = vsub.f32 %v103_v54, %v9429_v58  ;;  %v9448_v5 = vand.u32 4294901760, %v109_v0  ;;  %v9450_v6 = vand.u32 4294901760, %v112_v1 }
  0x10   :  { %13150 = vst [vmem:[#allocation21_spill] sm:$0xff] %v9438_v63  ;;  %7807 = vmatpush3.msra.mxu0 %v984_v40  ;;  %7713 = vmatprep.mubr.f32.mxu0 %v363_v51  ;;  %v9453_v7 = vsub.f32 %v106_v59, %v9438_v63  ;;  %v115_v8 = vsel %vm80_vm0, %v26_v55, 0  ;;  %v118_v11 = vsel %vm80_vm0, %v27_v60, 0  ;;  %v121_v12 = vsel %vm80_vm0, %v28_v61, 0  ;;  %v31_v59 = vld [vmem:[%s12633_s2 + $0x80] sm:$0xff]  ;;  %v32_v60 = vld [vmem:[%s12633_s2 + $0x88] sm:$0xff] }
  0x11   :  { %13151 = vst [vmem:[#allocation22_spill] sm:$0xff] %v9446_v4  ;;  %13152 = vst [vmem:[#allocation23_spill] sm:$0xff] %v9448_v5  ;;  %7904 = vmatprep.subr.mxu0 %v9343_v14  ;;  %v403_v17 = vand.u32 4294901760, %v402_v2  ;;  %v12640_v18 = vand.u32 4294901760, %v9446_v4  ;;  %v9464_v22 = vsub.f32 %v109_v0, %v9448_v5  ;;  %v9467_v30 = vsub.f32 %v112_v1, %v9450_v6  ;;  %v33_v61 = vld [vmem:[%s12633_s2 + $0x90] sm:$0xff] }
  0x12   :  { %13153 = vst [vmem:[#allocation24_spill] sm:$0xff] %v9450_v6  ;;  %13154 = vst [vmem:[#allocation25_spill] sm:$0xff] %v9453_v7  ;;  %v12639_v31 = vand.u32 4294901760, %v9453_v7  ;;  %v9470_v35 = vand.u32 4294901760, %v115_v8  ;;  %v9472_v36 = vand.u32 4294901760, %v118_v11  ;;  %v9474_v39 = vand.u32 4294901760, %v121_v12 }
  0x13   :  { %13155 = vst [vmem:[#allocation26_spill] sm:$0xff] %v9464_v22  ;;  %13156 = vst [vmem:[#allocation27_spill] sm:$0xff] %v9467_v30  ;;  %7714 = vmatmul.mubr.f32.gmra.mrb[2].mxu0 %v373_v52  ;;  %v412_v40 = vsub.f32 %v9446_v4, %v12640_v18  ;;  %v12637_v41 = vand.u32 4294901760, %v9464_v22  ;;  %v12636_v42 = vand.u32 4294901760, %v9467_v30  ;;  %v124_v44 = vsel %vm80_vm0, %v29_v13, 0 }
  0x14   :  { %13157 = vst [vmem:[#allocation28_spill] sm:$0xff] %v9470_v35  ;;  %13158 = vst [vmem:[#allocation29_spill] sm:$0xff] %v9472_v36  ;;  %7716 = vmatprep.mubr.f32.mxu0 %v383_v56  ;;  %v422_v45 = vsub.f32 %v9453_v7, %v12639_v31  ;;  %v9486_v46 = vsub.f32 %v115_v8, %v9470_v35  ;;  %v9489_v47 = vsub.f32 %v118_v11, %v9472_v36 }
  0x15   :  { %13159 = vst [vmem:[#allocation30_spill] sm:$0xff] %v9474_v39  ;;  %v9492_v49 = vsub.f32 %v121_v12, %v9474_v39  ;;  %v413_v51 = vand.u32 4294901760, %v412_v40  ;;  %v9497_v52 = vand.u32 4294901760, %v124_v44  ;;  %v432_v53 = vsub.f32 %v9464_v22, %v12637_v41 }
  0x16   :  { %13160 = vst [vmem:[#allocation31_spill] sm:$0xff] %v9486_v46  ;;  %13161 = vst [vmem:[#allocation32_spill] sm:$0xff] %v9489_v47  ;;  %v442_v54 = vsub.f32 %v9467_v30, %v12636_v42  ;;  %v12635_v55 = vand.u32 4294901760, %v9486_v46  ;;  %v12638_v56 = vand.u32 4294901760, %v9489_v47  ;;  %v127_v1 = vsel %vm80_vm0, %v30_v50, 0 }
  0x17   :  { %13162 = vst [vmem:[#allocation33_spill] sm:$0xff] %v9492_v49  ;;  %13163 = vst [vmem:[#allocation34_spill] sm:$0xff] %v9497_v52  ;;  %7717 = vmatmul.mubr.f32.gmra.mrb[4].mxu0 %v393_v62  ;;  %v423_v62 = vand.u32 4294901760, %v422_v45  ;;  %v9517_v0 = vsub.f32 %v124_v44, %v9497_v52  ;;  %v12644_v2 = vand.u32 4294901760, %v9492_v49  ;;  %v9521_v8 = vand.u32 4294901760, %v127_v1 }
  0x18   :  { %7719 = vmatprep.mubr.f32.mxu0 %v403_v17 }
  0x19   :  { %13164 = vst [vmem:[#allocation35_spill] sm:$0xff] %v9517_v0  ;;  %13165 = vst [vmem:[#allocation36_spill] sm:$0xff] %v9521_v8 }
  0x1a   :  { %8 = vsyncpa [#allocation3], 0  ;;  %v452_v11 = vsub.f32 %v9486_v46, %v12635_v55  ;;  %v130_v12 = vsel %vm80_vm0, %v31_v59, 0  ;;  %v133_v13 = vsel %vm80_vm0, %v32_v60, 0  ;;  %v136_v17 = vsel %vm80_vm0, %v33_v61, 0  ;;  %v34_v40 = vld [vmem:[%s12633_s2 + $0x98] sm:$0xff] }
  0x1b   :  { %v35_v44 = vld [vmem:[%s12633_s2 + $0xa0] sm:$0xff]  ;;  %7720 = vmatmul.mubr.f32.gmra.mrb[6].mxu0 %v413_v51  ;;  %v433_v45 = vand.u32 4294901760, %v432_v53  ;;  %v443_v50 = vand.u32 4294901760, %v442_v54  ;;  %v462_v55 = vsub.f32 %v9489_v47, %v12638_v56  ;;  %v9539_v59 = vsub.f32 %v127_v1, %v9521_v8  ;;  %v36_v51 = vld [vmem:[%s12633_s2 + $0xa8] sm:$0xff] }
  0x1c   :  { %7722 = vmatprep.mubr.f32.mxu0 %v423_v62  ;;  %v12645_v60 = vand.u32 4294901760, %v9517_v0  ;;  %v9542_v61 = vand.u32 4294901760, %v130_v12  ;;  %v9544_v42 = vand.u32 4294901760, %v133_v13  ;;  %v9546_v41 = vand.u32 4294901760, %v136_v17  ;;  %v37_v62 = vld [vmem:[%s12633_s2 + $0xb0] sm:$0xff]  ;;  %v39_v28 = vld [vmem:[%s12633_s2 + $0xc0] sm:$0xff] }
  0x1d   :  { %13166 = vst [vmem:[#allocation37_spill] sm:$0xff] %v9539_v59  ;;  %v12649_v53 = vand.u32 4294901760, %v9539_v59  ;;  %v139_v54 = vsel %vm80_vm0, %v34_v40, 0  ;;  %v142_v1 = vsel %vm80_vm0, %v35_v44, 0  ;;  %v453_v56 = vand.u32 4294901760, %v452_v11 }
  0x1e   :  { %13167 = vst [vmem:[#allocation38_spill] sm:$0xff] %v9542_v61  ;;  %13168 = vst [vmem:[#allocation39_spill] sm:$0xff] %v9544_v42  ;;  %v472_v31 = vsub.f32 %v9492_v49, %v12644_v2  ;;  %v9561_v18 = vsub.f32 %v130_v12, %v9542_v61  ;;  %v9564_v57 = vsub.f32 %v133_v13, %v9544_v42  ;;  %v463_v43 = vand.u32 4294901760, %v462_v55  ;;  %v38_v55 = vld [vmem:[%s12633_s2 + $0xb8] sm:$0xff] }
  0x1f   :  { %13169 = vst [vmem:[#allocation40_spill] sm:$0xff] %v9546_v41  ;;  %7723 = vmatmul.mubr.f32.gmra.mrb[8].mxu0 %v433_v45  ;;  %v9567_v40 = vsub.f32 %v136_v17, %v9546_v41  ;;  %v9569_v44 = vand.u32 4294901760, %v139_v54  ;;  %v145_v37 = vsel %vm80_vm0, %v36_v51, 0  ;;  %v482_v11 = vsub.f32 %v9517_v0, %v12645_v60 }
  0x20   :  { %13170 = vst [vmem:[#allocation41_spill] sm:$0xff] %v9561_v18  ;;  %13171 = vst [vmem:[#allocation42_spill] sm:$0xff] %v9564_v57  ;;  %7725 = vmatprep.mubr.f32.mxu0 %v443_v50  ;;  %v12651_v12 = vand.u32 4294901760, %v9561_v18  ;;  %v9576_v2 = vand.u32 4294901760, %v142_v1  ;;  %v148_v13 = vsel %vm80_vm0, %v37_v62, 0  ;;  %v492_v17 = vsub.f32 %v9539_v59, %v12649_v53 }
  0x21   :  { %13172 = vst [vmem:[#allocation43_spill] sm:$0xff] %v9567_v40  ;;  %13173 = vst [vmem:[#allocation44_spill] sm:$0xff] %v9569_v44  ;;  %v473_v45 = vand.u32 4294901760, %v472_v31  ;;  %v12658_v50 = vand.u32 4294901760, %v9564_v57  ;;  %v9586_v51 = vand.u32 4294901760, %v145_v37  ;;  %v12661_v60 = vand.u32 4294901760, %v9567_v40 }
  0x22   :  { %13174 = vst [vmem:[#allocation45_spill] sm:$0xff] %v9576_v2  ;;  %v9590_v33 = vsub.f32 %v139_v54, %v9569_v44  ;;  %v9592_v62 = vand.u32 4294901760, %v148_v13  ;;  %v151_v32 = vsel %vm80_vm0, %v38_v55, 0  ;;  %v483_v31 = vand.u32 4294901760, %v482_v11  ;;  %v40_v54 = vld [vmem:[%s12633_s2 + $0xc8] sm:$0xff]  ;;  %v41_v55 = vld [vmem:[%s12633_s2 + $0xd0] sm:$0xff] }
  0x23   :  { %13175 = vst [vmem:[#allocation46_spill] sm:$0xff] %v9586_v51  ;;  %7726 = vmatmul.mubr.f32.gmra.mrb[10].mxu0 %v453_v56  ;;  %v502_v53 = vsub.f32 %v9561_v18, %v12651_v12  ;;  %v9602_v56 = vsub.f32 %v142_v1, %v9576_v2  ;;  %v493_v27 = vand.u32 4294901760, %v492_v17  ;;  %v9614_v11 = vsub.f32 %v145_v37, %v9586_v51 }
  0x24   :  { %13176 = vst [vmem:[#allocation47_spill] sm:$0xff] %v9590_v33  ;;  %13177 = vst [vmem:[#allocation48_spill] sm:$0xff] %v9592_v62  ;;  %7728 = vmatprep.mubr.f32.mxu0 %v463_v43  ;;  %v512_v43 = vsub.f32 %v9564_v57, %v12658_v50  ;;  %v9616_v12 = vand.u32 4294901760, %v151_v32  ;;  %v154_v1 = vsel %vm80_vm0, %v39_v28, 0  ;;  %v522_v17 = vsub.f32 %v9567_v40, %v12661_v60 }
  0x25   :  { %13178 = vst [vmem:[#allocation49_spill] sm:$0xff] %v9602_v56  ;;  %13179 = vst [vmem:[#allocation50_spill] sm:$0xff] %v9614_v11  ;;  %v9624_v59 = vsub.f32 %v148_v13, %v9592_v62  ;;  %v157_v0 = vsel %vm80_vm0, %v40_v54, 0  ;;  %v503_v50 = vand.u32 4294901760, %v502_v53  ;;  %v9628_v57 = vand.u32 4294901760, %v154_v1  ;;  %v43_v53 = vld [vmem:[%s12633_s2 + $0xe0] sm:$0xff] }
  0x26   :  { %13180 = vst [vmem:[#allocation51_spill] sm:$0xff] %v9616_v12  ;;  %v160_v28 = vsel %vm80_vm0, %v41_v55, 0  ;;  %v513_v60 = vand.u32 4294901760, %v512_v43  ;;  %v9636_v13 = vsub.f32 %v151_v32, %v9616_v12  ;;  %v9638_v40 = vand.u32 4294901760, %v157_v0  ;;  %v44_v32 = vld [vmem:[%s12633_s2 + $0xe8] sm:$0xff] }
  0x27   :  { %7729 = vmatmul.mubr.f32.gmra.mrb[12].mxu0 %v473_v45  ;;  %13181 = vst [vmem:[#allocation52_spill] sm:$0xff] %v9624_v59  ;;  %13182 = vst [vmem:[#allocation53_spill] sm:$0xff] %v9628_v57  ;;  %v42_v45 = vld [vmem:[%s12633_s2 + $0xd8] sm:$0xff]  ;;  %v9647_v37 = vand.u32 4294901760, %v160_v28  ;;  %v523_v18 = vand.u32 4294901760, %v522_v17  ;;  %v13187_v49 = vand.u32 4294901760, %v9602_v56  ;;  %v9657_v47 = vsub.f32 %v154_v1, %v9628_v57 }
  0x28   :  { %7731 = vmatprep.mubr.f32.mxu0 %v483_v31  ;;  %13183 = vst [vmem:[#allocation54_spill] sm:$0xff] %v9636_v13  ;;  %13184 = vst [vmem:[#allocation55_spill] sm:$0xff] %v9638_v40  ;;  %v13185_v31 = vand.u32 4294901760, %v9590_v33  ;;  %v163_v43 = vsel %vm80_vm0, %v42_v45, 0  ;;  %v169_v46 = vsel %vm80_vm0, %v44_v32, 0  ;;  %v13191_v1 = vand.u32 4294901760, %v9614_v11 }
  0x29   :  { %13186 = vst [vmem:[#allocation56_spill] sm:$0xff] %v9647_v37  ;;  %13188 = vst [vmem:[#allocation57_spill] sm:$0xff] %v9657_v47  ;;  %v9664_v45 = vand.u32 4294901760, %v163_v43  ;;  %v13198_v7 = vand.u32 4294901760, %v9657_v47 }
  0x2a   :  { %v532_v54 = vsub.f32 %v9590_v33, %v13185_v31  ;;  %v166_v31 = vsel %vm80_vm0, %v43_v53, 0  ;;  %v9662_v33 = vsub.f32 %v157_v0, %v9638_v40  ;;  %v552_v17 = vsub.f32 %v9614_v11, %v13191_v1 }
  0x2b   :  { %7732 = vmatmul.mubr.f32.gmra.mrb[14].mxu0 %v493_v27  ;;  %v542_v27 = vsub.f32 %v9602_v56, %v13187_v49  ;;  %13190 = vst [vmem:[#allocation59_spill] sm:$0xff] %v9664_v45  ;;  %v13192_v53 = vand.u32 4294901760, %v9624_v59  ;;  %v9677_v0 = vsub.f32 %v160_v28, %v9647_v37  ;;  %v9680_v30 = vand.u32 4294901760, %v166_v31 }
  0x2c   :  { %7734 = vmatprep.mubr.f32.mxu0 %v503_v50  ;;  %13189 = vst [vmem:[#allocation58_spill] sm:$0xff] %v9662_v33  ;;  %v45_v50 = vld [vmem:[%s12633_s2 + $0xf0] sm:$0xff]  ;;  %v533_v49 = vand.u32 4294901760, %v532_v54  ;;  %v9685_v54 = vand.u32 4294901760, %v169_v46  ;;  %v13196_v28 = vand.u32 4294901760, %v9636_v13  ;;  %v9696_v32 = vsub.f32 %v163_v43, %v9664_v45 }
  0x2d   :  { %v562_v55 = vsub.f32 %v9624_v59, %v13192_v53  ;;  %13193 = vst [vmem:[#allocation60_spill] sm:$0xff] %v9677_v0  ;;  %v543_v56 = vand.u32 4294901760, %v542_v27  ;;  %13194 = vst [vmem:[#allocation61_spill] sm:$0xff] %v9680_v30  ;;  %v172_v1 = vsel %vm80_vm0, %v45_v50, 0  ;;  %v47_v53 = vld [vmem:[%s12633_s2 + $0x100] sm:$0xff]  ;;  %v12694_v27 = vand.u32 4294901760, %v9662_v33 }
  0x2e   :  { %13195 = vst [vmem:[#allocation62_spill] sm:$0xff] %v9685_v54  ;;  %13197 = vst [vmem:[#allocation63_spill] sm:$0xff] %v9696_v32  ;;  %v553_v59 = vand.u32 4294901760, %v552_v17  ;;  %v12695_v22 = vand.u32 4294901760, %v9677_v0  ;;  %v582_v4 = vsub.f32 %v9657_v47, %v13198_v7  ;;  %v9704_v48 = vsub.f32 %v166_v31, %v9680_v30 }
  0x2f   :  { %7735 = vmatmul.mubr.f32.gmra.mrb[16].mxu0 %v513_v60  ;;  %v46_v60 = vld [vmem:[%s12633_s2 + $0xf8] sm:$0xff]  ;;  %v563_v11 = vand.u32 4294901760, %v562_v55  ;;  %v178_v43 = vsel %vm80_vm0, %v47_v53, 0  ;;  %v48_v55 = vld [vmem:[%s12633_s2 + $0x108] sm:$0xff]  ;;  %v592_v7 = vsub.f32 %v9662_v33, %v12694_v27 }
  0x30   :  { %7737 = vmatprep.mubr.f32.mxu0 %v523_v18  ;;  %v572_v18 = vsub.f32 %v9636_v13, %v13196_v28  ;;  %v175_v50 = vsel %vm80_vm0, %v46_v60, 0  ;;  %13199 = vst [vmem:[#allocation64_spill] sm:$0xff] %v9704_v48  ;;  %v9706_v28 = vand.u32 4294901760, %v172_v1  ;;  %v602_v53 = vsub.f32 %v9677_v0, %v12695_v22  ;;  %v51_v22 = vld [vmem:[%s12633_s2 + $0x120] sm:$0xff] }
  0x31   :  { %v9722_v60 = vand.u32 4294901760, %v175_v50  ;;  %v9727_v47 = vand.u32 4294901760, %v178_v43  ;;  %v181_v13 = vsel %vm80_vm0, %v48_v55, 0  ;;  %v13205_v55 = vand.u32 4294901760, %v9696_v32 }
  0x32   :  { %13200 = vst [vmem:[#allocation65_spill] sm:$0xff] %v9706_v28  ;;  %v573_v17 = vand.u32 4294901760, %v572_v18  ;;  %v583_v18 = vand.u32 4294901760, %v582_v4  ;;  %v9733_v27 = vsub.f32 %v172_v1, %v9706_v28  ;;  %v593_v31 = vand.u32 4294901760, %v592_v7 }
  0x33   :  { %7738 = vmatmul.mubr.f32.gmra.mrb[18].mxu0 %v533_v49  ;;  %v49_v49 = vld [vmem:[%s12633_s2 + $0x110] sm:$0xff]  ;;  %13202 = vst [vmem:[#allocation67_spill] sm:$0xff] %v9722_v60  ;;  %13203 = vst [vmem:[#allocation68_spill] sm:$0xff] %v9727_v47  ;;  %v9746_v4 = vsub.f32 %v175_v50, %v9722_v60  ;;  %v603_v34 = vand.u32 4294901760, %v602_v53  ;;  %v9753_v0 = vsub.f32 %v178_v43, %v9727_v47  ;;  %v13210_v33 = vand.u32 4294901760, %v9704_v48 }
  0x34   :  { %7740 = vmatprep.mubr.f32.mxu0 %v543_v56  ;;  %v9716_v56 = vsub.f32 %v169_v46, %v9685_v54  ;;  %v184_v46 = vsel %vm80_vm0, %v49_v49, 0  ;;  %13204 = vst [vmem:[#allocation69_spill] sm:$0xff] %v9733_v27  ;;  %v9748_v49 = vand.u32 4294901760, %v181_v13 }
  0x35   :  { %13206 = vst [vmem:[#allocation70_spill] sm:$0xff] %v9746_v4  ;;  %v9750_v1 = vand.u32 4294901760, %v184_v46  ;;  %13209 = vst [vmem:[#allocation73_spill] sm:$0xff] %v9753_v0  ;;  %v622_v29 = vsub.f32 %v9704_v48, %v13210_v33 }
  0x36   :  { %13201 = vst [vmem:[#allocation66_spill] sm:$0xff] %v9716_v56  ;;  %13207 = vst [vmem:[#allocation71_spill] sm:$0xff] %v9748_v49  ;;  %v13211_v7 = vand.u32 4294901760, %v9716_v56  ;;  %v9769_v25 = vsub.f32 %v181_v13, %v9748_v49  ;;  %v13216_v13 = vand.u32 4294901760, %v9733_v27 }
  0x37   :  { %7741 = vmatmul.mubr.f32.gmra.mrb[20].mxu0 %v553_v59  ;;  %v50_v59 = vld [vmem:[%s12633_s2 + $0x118] sm:$0xff]  ;;  %13208 = vst [vmem:[#allocation72_spill] sm:$0xff] %v9750_v1  ;;  %v9772_v33 = vsub.f32 %v184_v46, %v9750_v1 }
  0x38   :  { %7743 = vmatprep.mubr.f32.mxu0 %v563_v11  ;;  %v612_v11 = vsub.f32 %v9696_v32, %v13205_v55  ;;  %v187_v50 = vsel %vm80_vm0, %v50_v59, 0  ;;  %v190_v32 = vsel %vm80_vm0, %v51_v22, 0  ;;  %v632_v43 = vsub.f32 %v9716_v56, %v13211_v7  ;;  %13212 = vst [vmem:[#allocation74_spill] sm:$0xff] %v9769_v25  ;;  %v53_v22 = vld [vmem:[%s12633_s2 + $0x130] sm:$0xff] }
  0x39   :  { %13213 = vst [vmem:[#allocation75_spill] sm:$0xff] %v9772_v33  ;;  %v9778_v55 = vand.u32 4294901760, %v187_v50  ;;  %v9780_v48 = vand.u32 4294901760, %v190_v32  ;;  %v623_v7 = vand.u32 4294901760, %v622_v29  ;;  %v642_v46 = vsub.f32 %v9733_v27, %v13216_v13 }
  0x3a   :  { %v613_v53 = vand.u32 4294901760, %v612_v11  ;;  %v633_v56 = vand.u32 4294901760, %v632_v43  ;;  %v13217_v59 = vand.u32 4294901760, %v9746_v4  ;;  %v13219_v13 = vand.u32 4294901760, %v9753_v0 }
  0x3b   :  { %7744 = vmatmul.mubr.f32.gmra.mrb[22].mxu0 %v573_v17  ;;  %v52_v17 = vld [vmem:[%s12633_s2 + $0x128] sm:$0xff]  ;;  %13214 = vst [vmem:[#allocation76_spill] sm:$0xff] %v9778_v55  ;;  %13215 = vst [vmem:[#allocation77_spill] sm:$0xff] %v9780_v48 }
  0x3c   :  { %7746 = vmatprep.mubr.f32.mxu0 %v583_v18  ;;  %v193_v11 = vsel %vm80_vm0, %v52_v17, 0  ;;  %v54_v18 = vld [vmem:[%s12633_s2 + $0x138] sm:$0xff]  ;;  %v652_v23 = vsub.f32 %v9746_v4, %v13217_v59  ;;  %v55_v17 = vld [vmem:[%s12633_s2 + $0x140] sm:$0xff]  ;;  %v662_v43 = vsub.f32 %v9753_v0, %v13219_v13  ;;  %v9807_v59 = vsub.f32 %v190_v32, %v9780_v48 }
  0x3d   :  { %v9795_v29 = vand.u32 4294901760, %v193_v11  ;;  %v199_v24 = vsel %vm80_vm0, %v54_v18, 0  ;;  %v202_v27 = vsel %vm80_vm0, %v55_v17, 0  ;;  %v13223_v13 = vand.u32 4294901760, %v9769_v25 }
  0x3e   :  { %13221 = vst [vmem:[#allocation80_spill] sm:$0xff] %v9807_v59  ;;  %v13224_v18 = vand.u32 4294901760, %v9772_v33  ;;  %v9828_v17 = vand.u32 4294901760, %v199_v24  ;;  %v653_v0 = vand.u32 4294901760, %v652_v23  ;;  %v663_v20 = vand.u32 4294901760, %v662_v43  ;;  %v59_v23 = vld [vmem:[%s12633_s2 + $0x160] sm:$0xff] }
  0x3f   :  { %7747 = vmatmul.mubr.f32.gmra.mrb[24].mxu0 %v593_v31  ;;  %v196_v31 = vsel %vm80_vm0, %v53_v22, 0  ;;  %13218 = vst [vmem:[#allocation78_spill] sm:$0xff] %v9795_v29  ;;  %v9804_v22 = vsub.f32 %v187_v50, %v9778_v55  ;;  %v57_v50 = vld [vmem:[%s12633_s2 + $0x150] sm:$0xff]  ;;  %v672_v32 = vsub.f32 %v9769_v25, %v13223_v13  ;;  %v9835_v13 = vand.u32 4294901760, %v202_v27 }
  0x40   :  { %7749 = vmatprep.mubr.f32.mxu0 %v603_v34  ;;  %v643_v34 = vand.u32 4294901760, %v642_v46  ;;  %v9810_v4 = vand.u32 4294901760, %v196_v31  ;;  %v9826_v46 = vsub.f32 %v193_v11, %v9795_v29  ;;  %13226 = vst [vmem:[#allocation83_spill] sm:$0xff] %v9828_v17  ;;  %v208_v11 = vsel %vm80_vm0, %v57_v50, 0 }
  0x41   :  { %13220 = vst [vmem:[#allocation79_spill] sm:$0xff] %v9804_v22  ;;  %v12732_v19 = vand.u32 4294901760, %v9804_v22  ;;  %13228 = vst [vmem:[#allocation85_spill] sm:$0xff] %v9835_v13  ;;  %v673_v43 = vand.u32 4294901760, %v672_v32  ;;  %v60_v32 = vld [vmem:[%s12633_s2 + $0x168] sm:$0xff] }
  0x42   :  { %13222 = vst [vmem:[#allocation81_spill] sm:$0xff] %v9810_v4  ;;  %13225 = vst [vmem:[#allocation82_spill] sm:$0xff] %v9826_v46  ;;  %v9833_v55 = vsub.f32 %v196_v31, %v9810_v4  ;;  %v9847_v31 = vsub.f32 %v199_v24, %v9828_v17 }
  0x43   :  { %7750 = vmatmul.mubr.f32.gmra.mrb[26].mxu0 %v613_v53  ;;  %v56_v53 = vld [vmem:[%s12633_s2 + $0x148] sm:$0xff] }
  0x44   :  { %7752 = vmatprep.mubr.f32.mxu0 %v623_v7  ;;  %v682_v7 = vsub.f32 %v9772_v33, %v13224_v18  ;;  %13227 = vst [vmem:[#allocation84_spill] sm:$0xff] %v9833_v55  ;;  %v205_v18 = vsel %vm80_vm0, %v56_v53, 0  ;;  %13229 = vst [vmem:[#allocation86_spill] sm:$0xff] %v9847_v31  ;;  %v692_v53 = vsub.f32 %v9804_v22, %v12732_v19  ;;  %v9854_v33 = vand.u32 4294901760, %v208_v11 }
  0x45   :  { %v9852_v50 = vand.u32 4294901760, %v205_v18  ;;  %v214_v19 = vsel %vm80_vm0, %v59_v23, 0  ;;  %v13234_v22 = vand.u32 4294901760, %v9826_v46  ;;  %v13239_v17 = vand.u32 4294901760, %v9833_v55 }
  0x46   :  { %v683_v48 = vand.u32 4294901760, %v682_v7  ;;  %13231 = vst [vmem:[#allocation88_spill] sm:$0xff] %v9854_v33  ;;  %v13232_v7 = vand.u32 4294901760, %v9807_v59  ;;  %v9882_v23 = vsub.f32 %v208_v11, %v9854_v33  ;;  %v13241_v33 = vand.u32 4294901760, %v9847_v31 }
  0x47   :  { %7753 = vmatmul.mubr.f32.gmra.mrb[28].mxu0 %v633_v56  ;;  %v58_v56 = vld [vmem:[%s12633_s2 + $0x158] sm:$0xff]  ;;  %13230 = vst [vmem:[#allocation87_spill] sm:$0xff] %v9852_v50 }
  0x48   :  { %7755 = vmatprep.mubr.f32.mxu0 %v643_v34  ;;  %v211_v25 = vsel %vm80_vm0, %v58_v56, 0  ;;  %v702_v24 = vsub.f32 %v9807_v59, %v13232_v7  ;;  %v9865_v34 = vsub.f32 %v202_v27, %v9835_v13  ;;  %v712_v56 = vsub.f32 %v9826_v46, %v13234_v22  ;;  %v61_v7 = vld [vmem:[%s12633_s2 + $0x170] sm:$0xff]  ;;  %13237 = vst [vmem:[#allocation92_spill] sm:$0xff] %v9882_v23 }
  0x49   :  { %v9872_v4 = vand.u32 4294901760, %v211_v25  ;;  %v9879_v27 = vsub.f32 %v205_v18, %v9852_v50  ;;  %v9884_v59 = vand.u32 4294901760, %v214_v19  ;;  %v220_v18 = vsel %vm80_vm0, %v61_v7, 0 }
  0x4a   :  { %13233 = vst [vmem:[#allocation89_spill] sm:$0xff] %v9865_v34  ;;  %v703_v22 = vand.u32 4294901760, %v702_v24  ;;  %v713_v11 = vand.u32 4294901760, %v712_v56 }
  0x4b   :  { %7756 = vmatmul.mubr.f32.gmra.mrb[30].mxu0 %v653_v0  ;;  %13235 = vst [vmem:[#allocation90_spill] sm:$0xff] %v9872_v4  ;;  %v693_v0 = vand.u32 4294901760, %v692_v53  ;;  %13236 = vst [vmem:[#allocation91_spill] sm:$0xff] %v9879_v27  ;;  %v9900_v24 = vsub.f32 %v211_v25, %v9872_v4  ;;  %v9908_v50 = vsub.f32 %v214_v19, %v9884_v59 }
  0x4c   :  { %7758 = vmatprep.mubr.f32.mxu0 %v663_v20  ;;  %v217_v20 = vsel %vm80_vm0, %v60_v32, 0  ;;  %13238 = vst [vmem:[#allocation93_spill] sm:$0xff] %v9884_v59  ;;  %v722_v32 = vsub.f32 %v9833_v55, %v13239_v17  ;;  %v63_v17 = vld [vmem:[%s12633_s2 + $0x180] sm:$0xff]  ;;  %v13249_v59 = vand.u32 4294901760, %v9882_v23 }
  0x4d   :  { %v9893_v53 = vand.u32 4294901760, %v217_v20  ;;  %13242 = vst [vmem:[#allocation95_spill] sm:$0xff] %v9900_v24  ;;  %13243 = vst [vmem:[#allocation96_spill] sm:$0xff] %v9908_v50  ;;  %v226_v19 = vsel %vm80_vm0, %v63_v17, 0  ;;  %v12767_v17 = vand.u32 4294901760, %v9908_v50 }
  0x4e   :  { %v723_v7 = vand.u32 4294901760, %v722_v32 }
  0x4f   :  { %7759 = vmatmul.mubr.f32.gmra.mrb[32].mxu0 %v673_v43  ;;  %v62_v43 = vld [vmem:[%s12633_s2 + $0x178] sm:$0xff]  ;;  %13240 = vst [vmem:[#allocation94_spill] sm:$0xff] %v9893_v53  ;;  %v9920_v46 = vsub.f32 %v217_v20, %v9893_v53  ;;  %v762_v20 = vsub.f32 %v9882_v23, %v13249_v59  ;;  %v67_v59 = vld [vmem:[%s12633_s2 + $0x1a0] sm:$0xff]  ;;  %v782_v23 = vsub.f32 %v9908_v50, %v12767_v17 }
  0x50   :  { %7761 = vmatprep.mubr.f32.mxu0 %v683_v48  ;;  %v732_v48 = vsub.f32 %v9847_v31, %v13241_v33  ;;  %v223_v56 = vsel %vm80_vm0, %v62_v43, 0  ;;  %v13244_v33 = vand.u32 4294901760, %v9865_v34  ;;  %v9914_v31 = vand.u32 4294901760, %v220_v18 }
  0x51   :  { %13246 = vst [vmem:[#allocation98_spill] sm:$0xff] %v9920_v46  ;;  %v9927_v55 = vand.u32 4294901760, %v223_v56  ;;  %v9940_v43 = vand.u32 4294901760, %v226_v19  ;;  %v763_v13 = vand.u32 4294901760, %v762_v20  ;;  %v69_v20 = vld [vmem:[%s12633_s2 + $0x1b0] sm:$0xff]  ;;  %v13257_v17 = vand.u32 4294901760, %v9920_v46 }
  0x52   :  { %v742_v25 = vsub.f32 %v9865_v34, %v13244_v33  ;;  %13245 = vst [vmem:[#allocation97_spill] sm:$0xff] %v9914_v31  ;;  %v733_v32 = vand.u32 4294901760, %v732_v48  ;;  %v13248_v33 = vand.u32 4294901760, %v9879_v27  ;;  %v9938_v48 = vsub.f32 %v220_v18, %v9914_v31  ;;  %v68_v31 = vld [vmem:[%s12633_s2 + $0x1a8] sm:$0xff] }
  0x53   :  { %7762 = vmatmul.mubr.f32.gmra.mrb[34].mxu0 %v693_v0  ;;  %v64_v0 = vld [vmem:[%s12633_s2 + $0x188] sm:$0xff]  ;;  %13247 = vst [vmem:[#allocation99_spill] sm:$0xff] %v9927_v55  ;;  %13251 = vst [vmem:[#allocation101_spill] sm:$0xff] %v9940_v43  ;;  %v9954_v18 = vsub.f32 %v223_v56, %v9927_v55  ;;  %v9968_v56 = vsub.f32 %v226_v19, %v9940_v43  ;;  %v792_v50 = vsub.f32 %v9920_v46, %v13257_v17 }
  0x54   :  { %7764 = vmatprep.mubr.f32.mxu0 %v703_v22  ;;  %v65_v22 = vld [vmem:[%s12633_s2 + $0x190] sm:$0xff]  ;;  %v752_v34 = vsub.f32 %v9879_v27, %v13248_v33  ;;  %v229_v53 = vsel %vm80_vm0, %v64_v0, 0  ;;  %v743_v4 = vand.u32 4294901760, %v742_v25  ;;  %13250 = vst [vmem:[#allocation100_spill] sm:$0xff] %v9938_v48  ;;  %v66_v33 = vld [vmem:[%s12633_s2 + $0x198] sm:$0xff]  ;;  %v241_v19 = vsel %vm80_vm0, %v68_v31, 0 }
  0x55   :  { %13253 = vst [vmem:[#allocation102_spill] sm:$0xff] %v9954_v18  ;;  %v9956_v0 = vand.u32 4294901760, %v229_v53  ;;  %13256 = vst [vmem:[#allocation105_spill] sm:$0xff] %v9968_v56  ;;  %v244_v55 = vsel %vm80_vm0, %v69_v20, 0  ;;  %v783_v17 = vand.u32 4294901760, %v782_v23  ;;  %v70_v31 = vld [vmem:[%s12633_s2 + $0x1b8] sm:$0xff] }
  0x56   :  { %v10002_v20 = vand.u32 4294901760, %v241_v19  ;;  %v71_v23 = vld [vmem:[%s12633_s2 + $0x1c0] sm:$0xff] }
  0x57   :  { %7765 = vmatmul.mubr.f32.gmra.mrb[36].mxu0 %v713_v11  ;;  %v232_v11 = vsel %vm80_vm0, %v65_v22, 0  ;;  %13254 = vst [vmem:[#allocation103_spill] sm:$0xff] %v9956_v0  ;;  %v753_v22 = vand.u32 4294901760, %v752_v34  ;;  %v238_v34 = vsel %vm80_vm0, %v67_v59, 0 }
  0x58   :  { %7767 = vmatprep.mubr.f32.mxu0 %v723_v7  ;;  %v13252_v7 = vand.u32 4294901760, %v9900_v24  ;;  %v9961_v27 = vand.u32 4294901760, %v232_v11  ;;  %v9988_v43 = vand.u32 4294901760, %v238_v34  ;;  %13264 = vst [vmem:[#allocation110_spill] sm:$0xff] %v10002_v20 }
  0x5a   :  { %v772_v25 = vsub.f32 %v9900_v24, %v13252_v7  ;;  %13255 = vst [vmem:[#allocation104_spill] sm:$0xff] %v9961_v27  ;;  %v9980_v7 = vsub.f32 %v229_v53, %v9956_v0  ;;  %13261 = vst [vmem:[#allocation109_spill] sm:$0xff] %v9988_v43  ;;  %v250_v0 = vsel %vm80_vm0, %v71_v23, 0 }
  0x5b   :  { %7768 = vmatmul.mubr.f32.gmra.mrb[38].mxu0 %v733_v32  ;;  %v235_v32 = vsel %vm80_vm0, %v66_v33, 0  ;;  %v9984_v33 = vsub.f32 %v232_v11, %v9961_v27  ;;  %v793_v11 = vand.u32 4294901760, %v792_v50  ;;  %v10014_v50 = vsub.f32 %v238_v34, %v9988_v43 }
  0x5c   :  { %7770 = vmatprep.mubr.f32.mxu0 %v743_v4  ;;  %v773_v24 = vand.u32 4294901760, %v772_v25  ;;  %13258 = vst [vmem:[#allocation106_spill] sm:$0xff] %v9980_v7  ;;  %v9986_v59 = vand.u32 4294901760, %v235_v32  ;;  %v13262_v25 = vand.u32 4294901760, %v9938_v48 }
  0x5d   :  { %13259 = vst [vmem:[#allocation107_spill] sm:$0xff] %v9984_v33  ;;  %13267 = vst [vmem:[#allocation113_spill] sm:$0xff] %v10014_v50  ;;  %v13273_v23 = vand.u32 4294901760, %v9984_v33 }
  0x5e   :  { %13260 = vst [vmem:[#allocation108_spill] sm:$0xff] %v9986_v59  ;;  %v802_v4 = vsub.f32 %v9938_v48, %v13262_v25  ;;  %v10011_v53 = vsub.f32 %v235_v32, %v9986_v59  ;;  %v73_v32 = vld [vmem:[%s12633_s2 + $0x1d0] sm:$0xff]  ;;  %v10028_v25 = vsub.f32 %v241_v19, %v10002_v20  ;;  %v10043_v20 = vand.u32 4294901760, %v250_v0 }
  0x5f   :  { %7771 = vmatmul.mubr.f32.gmra.mrb[40].mxu0 %v753_v22  ;;  %v13263_v22 = vand.u32 4294901760, %v9954_v18 }
  0x60   :  { %7773 = vmatprep.mubr.f32.mxu0 %v763_v13  ;;  %v10004_v13 = vand.u32 4294901760, %v244_v55  ;;  %13266 = vst [vmem:[#allocation112_spill] sm:$0xff] %v10011_v53  ;;  %v803_v27 = vand.u32 4294901760, %v802_v4  ;;  %13269 = vst [vmem:[#allocation114_spill] sm:$0xff] %v10028_v25 }
  0x61   :  { %v812_v46 = vsub.f32 %v9954_v18, %v13263_v22  ;;  %v247_v22 = vsel %vm80_vm0, %v70_v31, 0  ;;  %v13268_v18 = vand.u32 4294901760, %v9968_v56  ;;  %13274 = vst [vmem:[#allocation117_spill] sm:$0xff] %v10043_v20 }
  0x62   :  { %13265 = vst [vmem:[#allocation111_spill] sm:$0xff] %v10004_v13  ;;  %v10031_v4 = vsub.f32 %v244_v55, %v10004_v13 }
  0x63   :  { %7774 = vmatmul.mubr.f32.gmra.mrb[42].mxu0 %v773_v24  ;;  %v822_v48 = vsub.f32 %v9968_v56, %v13268_v18  ;;  %v72_v24 = vld [vmem:[%s12633_s2 + $0x1c8] sm:$0xff]  ;;  %v813_v34 = vand.u32 4294901760, %v812_v46  ;;  %v13272_v18 = vand.u32 4294901760, %v9980_v7  ;;  %v842_v56 = vsub.f32 %v9984_v33, %v13273_v23 }
  0x64   :  { %7776 = vmatprep.mubr.f32.mxu0 %v783_v17  ;;  %13270 = vst [vmem:[#allocation115_spill] sm:$0xff] %v10031_v4  ;;  %v10033_v17 = vand.u32 4294901760, %v247_v22  ;;  %v253_v55 = vsel %vm80_vm0, %v72_v24, 0  ;;  %v13276_v24 = vand.u32 4294901760, %v10011_v53  ;;  %v13279_v23 = vand.u32 4294901760, %v10014_v50 }
  0x65   :  { %v832_v31 = vsub.f32 %v9980_v7, %v13272_v18  ;;  %v823_v19 = vand.u32 4294901760, %v822_v48  ;;  %v74_v18 = vld [vmem:[%s12633_s2 + $0x1d8] sm:$0xff]  ;;  %v10061_v46 = vand.u32 4294901760, %v253_v55  ;;  %v843_v7 = vand.u32 4294901760, %v842_v56 }
  0x66   :  { %13271 = vst [vmem:[#allocation116_spill] sm:$0xff] %v10033_v17  ;;  %v10053_v43 = vsub.f32 %v247_v22, %v10033_v17  ;;  %v862_v22 = vsub.f32 %v10014_v50, %v13279_v23  ;;  %v10069_v17 = vsub.f32 %v250_v0, %v10043_v20  ;;  %v13282_v56 = vand.u32 4294901760, %v10031_v4  ;;  %v77_v0 = vld [vmem:[%s12633_s2 + $0x1f0] sm:$0xff] }
  0x67   :  { %7777 = vmatmul.mubr.f32.gmra.mrb[44].mxu0 %v793_v11  ;;  %v256_v11 = vsel %vm80_vm0, %v73_v32, 0  ;;  %v833_v48 = vand.u32 4294901760, %v832_v31  ;;  %v852_v32 = vsub.f32 %v10011_v53, %v13276_v24  ;;  %13277 = vst [vmem:[#allocation119_spill] sm:$0xff] %v10061_v46  ;;  %v76_v24 = vld [vmem:[%s12633_s2 + $0x1e8] sm:$0xff]  ;;  %v13281_v53 = vand.u32 4294901760, %v10028_v25 }
  0x68   :  { %7779 = vmatprep.mubr.f32.mxu0 %v803_v27  ;;  %13275 = vst [vmem:[#allocation118_spill] sm:$0xff] %v10053_v43  ;;  %v75_v27 = vld [vmem:[%s12633_s2 + $0x1e0] sm:$0xff]  ;;  %v10063_v33 = vand.u32 4294901760, %v256_v11  ;;  %13280 = vst [vmem:[#allocation121_spill] sm:$0xff] %v10069_v17  ;;  %v882_v13 = vsub.f32 %v10031_v4, %v13282_v56  ;;  %v265_v23 = vsel %vm80_vm0, %v76_v24, 0 }
  0x69   :  { %v262_v31 = vsel %vm80_vm0, %v75_v27, 0  ;;  %v10087_v27 = vsub.f32 %v253_v55, %v10061_v46  ;;  %v78_v55 = vld [vmem:[%s12633_s2 + $0x1f8] sm:$0xff]  ;;  %v10110_v24 = vand.u32 4294901760, %v265_v23 }
  0x6a   :  { %13278 = vst [vmem:[#allocation120_spill] sm:$0xff] %v10063_v33  ;;  %v10090_v50 = vsub.f32 %v256_v11, %v10063_v33  ;;  %v10095_v4 = vand.u32 4294901760, %v262_v31  ;;  %v13286_v11 = vand.u32 4294901760, %v10053_v43 }
  0x6b   :  { %7780 = vmatmul.mubr.f32.gmra.mrb[46].mxu0 %v813_v34  ;;  %v259_v34 = vsel %vm80_vm0, %v74_v18, 0  ;;  %v853_v18 = vand.u32 4294901760, %v852_v32  ;;  %v883_v32 = vand.u32 4294901760, %v882_v13  ;;  %13288 = vst [vmem:[#allocation126_spill] sm:$0xff] %v10110_v24 }
  0x6c   :  { %7782 = vmatprep.mubr.f32.mxu0 %v823_v19  ;;  %v872_v19 = vsub.f32 %v10028_v25, %v13281_v53  ;;  %13283 = vst [vmem:[#allocation122_spill] sm:$0xff] %v10090_v50  ;;  %v10092_v20 = vand.u32 4294901760, %v259_v34  ;;  %v863_v53 = vand.u32 4294901760, %v862_v22  ;;  %13285 = vst [vmem:[#allocation124_spill] sm:$0xff] %v10095_v4  ;;  %v268_v25 = vsel %vm80_vm0, %v77_v0, 0 }
  0x6d   :  { %v892_v33 = vsub.f32 %v10053_v43, %v13286_v11  ;;  %v13289_v0 = vand.u32 4294901760, %v10069_v17  ;;  %v10116_v13 = vsub.f32 %v262_v31, %v10095_v4  ;;  %v10118_v46 = vand.u32 4294901760, %v268_v25 }
  0x6e   :  { %13284 = vst [vmem:[#allocation123_spill] sm:$0xff] %v10092_v20  ;;  %v10108_v56 = vsub.f32 %v259_v34, %v10092_v20 }
  0x6f   :  { %7783 = vmatmul.mubr.f32.gmra.mrb[48].mxu0 %v833_v48  ;;  %v873_v48 = vand.u32 4294901760, %v872_v19  ;;  %v902_v19 = vsub.f32 %v10069_v17, %v13289_v0  ;;  %13290 = vst [vmem:[#allocation127_spill] sm:$0xff] %v10116_v13  ;;  %13291 = vst [vmem:[#allocation128_spill] sm:$0xff] %v10118_v46  ;;  %v893_v11 = vand.u32 4294901760, %v892_v33  ;;  %v13293_v0 = vand.u32 4294901760, %v10090_v50 }
  0x70   :  { %7785 = vmatprep.mubr.f32.mxu0 %v843_v7  ;;  %v12818_v7 = vand.u32 4294901760, %v10087_v27  ;;  %13287 = vst [vmem:[#allocation125_spill] sm:$0xff] %v10108_v56  ;;  %v12819_v22 = vand.u32 4294901760, %v10108_v56  ;;  %v12825_v33 = vand.u32 4294901760, %v10116_v13 }
  0x71   :  { %v903_v31 = vand.u32 4294901760, %v902_v19  ;;  %v922_v17 = vsub.f32 %v10090_v50, %v13293_v0 }
  0x72   :  { %v912_v34 = vsub.f32 %v10087_v27, %v12818_v7  ;;  %v942_v0 = vsub.f32 %v10116_v13, %v12825_v33  ;;  %v13310_v33 = vld [vmem:[#allocation104_spill] sm:$0xff] }
  0x73   :  { %7786 = vmatmul.mubr.f32.gmra.mrb[50].mxu0 %v853_v18  ;;  %v271_v18 = vsel %vm80_vm0, %v78_v55, 0  ;;  %v10135_v55 = vsub.f32 %v268_v25, %v10118_v46  ;;  %v923_v19 = vand.u32 4294901760, %v922_v17 }
  0x74   :  { %7788 = vmatprep.mubr.f32.mxu0 %v863_v53  ;;  %v10126_v53 = vsub.f32 %v265_v23, %v10110_v24  ;;  %v10128_v43 = vand.u32 4294901760, %v271_v18  ;;  %v932_v23 = vsub.f32 %v10108_v56, %v12819_v22  ;;  %v943_v56 = vand.u32 4294901760, %v942_v0  ;;  %v13299_v0 = vld [vmem:[#allocation83_spill] sm:$0xff] }
  0x75   :  { %13294 = vst [vmem:[#allocation130_spill] sm:$0xff] %v10135_v55  ;;  %v12823_v25 = vand.u32 4294901760, %v10135_v55 }
  0x76   :  { %13292 = vst [vmem:[#allocation129_spill] sm:$0xff] %v10128_v43  ;;  %v12824_v7 = vand.u32 4294901760, %v10126_v53 }
  0x77   :  { %7789 = vmatmul.mubr.f32.gmra.mrb[52].mxu0 %v873_v48  ;;  %v913_v48 = vand.u32 4294901760, %v912_v34  ;;  %v962_v17 = vsub.f32 %v10135_v55, %v12823_v25  ;;  %v13308_v25 = vld [vmem:[#allocation101_spill] sm:$0xff] }
  0x78   :  { %7791 = vmatprep.mubr.f32.mxu0 %v883_v32  ;;  %v10142_v32 = vsub.f32 %v271_v18, %v10128_v43  ;;  %v952_v34 = vsub.f32 %v10126_v53, %v12824_v7  ;;  %v13309_v7 = vld [vmem:[#allocation103_spill] sm:$0xff] }
  0x7a   :  { %13295 = vst [vmem:[#allocation131_spill] sm:$0xff] %v10142_v32  ;;  %v12822_v22 = vand.u32 4294901760, %v10142_v32  ;;  %v953_v18 = vand.u32 4294901760, %v952_v34  ;;  %v13301_v34 = vld [vmem:[#allocation87_spill] sm:$0xff] }
  0x7b   :  { %7792 = vmatmul.mubr.f32.gmra.mrb[54].mxu0 %v893_v11  ;;  %v933_v11 = vand.u32 4294901760, %v932_v23 }
  0x7c   :  { %7794 = vmatprep.mubr.f32.mxu0 %v903_v31  ;;  %v972_v31 = vsub.f32 %v10142_v32, %v12822_v22  ;;  %v13307_v22 = vld [vmem:[#allocation99_spill] sm:$0xff] }
  0x7e   :  { %v973_v23 = vand.u32 4294901760, %v972_v31  ;;  %v13304_v31 = vld [vmem:[#allocation93_spill] sm:$0xff] }
  0x7f   :  { %7795 = vmatmul.mubr.f32.gmra.mrb[56].mxu0 %v913_v48  ;;  %v963_v48 = vand.u32 4294901760, %v962_v17  ;;  %v13302_v17 = vld [vmem:[#allocation88_spill] sm:$0xff] }
  0x80   :  { %7797 = vmatprep.mubr.f32.mxu0 %v923_v19  ;;  %v13298_v19 = vld [vmem:[#allocation81_spill] sm:$0xff] }
  0x83   :  { %7798 = vmatmul.mubr.f32.gmra.mrb[58].mxu0 %v933_v11  ;;  %v13300_v11 = vld [vmem:[#allocation85_spill] sm:$0xff] }
  0x84   :  { %7800 = vmatprep.mubr.f32.mxu0 %v943_v56  ;;  %v13297_v56 = vld [vmem:[#allocation77_spill] sm:$0xff] }
  0x87   :  { %7801 = vmatmul.mubr.f32.gmra.mrb[60].mxu0 %v953_v18  ;;  %v13303_v18 = vld [vmem:[#allocation90_spill] sm:$0xff] }
  0x88   :  { %7803 = vmatprep.mubr.f32.mxu0 %v963_v48  ;;  %v13305_v48 = vld [vmem:[#allocation94_spill] sm:$0xff] }
  0x8b   :  { %7804 = vmatmul.mubr.f32.gmra.mrb[62].mxu0 %v973_v23  ;;  %v13306_v23 = vld [vmem:[#allocation97_spill] sm:$0xff] }
  0x8c   :  { %7808 = vmatprep.mubr.f32.mxu0 %v9332_v9  ;;  %v13374_v9 = vld [vmem:[#allocation118_spill] sm:$0xff] }
  0x8f   :  { %7809 = vmatmul.mubr.f32.vlgmr.msra.gmra.mrb[0].mxu0 %v9334_v10  ;;  %v13373_v10 = vld [vmem:[#allocation115_spill] sm:$0xff] }
  0x90   :  { %7905 = vmatpush3.msra.mxu0 %v9343_v14  ;;  %7811 = vmatprep.mubr.f32.mxu0 %v9345_v15  ;;  %v13296_v14 = vld [vmem:[#allocation76_spill] sm:$0xff]  ;;  %v13372_v15 = vld [vmem:[#allocation114_spill] sm:$0xff] }
  0x91   :  { %8002 = vmatprep.subr.mxu0 %v9319_v3 }
  0x93   :  { %7812 = vmatmul.mubr.f32.gmra.mrb[2].mxu0 %v9347_v16  ;;  %v13371_v16 = vld [vmem:[#allocation113_spill] sm:$0xff] }
  0x94   :  { %7814 = vmatprep.mubr.f32.mxu0 %v9360_v21  ;;  %v13370_v21 = vld [vmem:[#allocation112_spill] sm:$0xff] }
  0x97   :  { %7815 = vmatmul.mubr.f32.gmra.mrb[4].mxu0 %v9372_v26  ;;  %v13369_v26 = vld [vmem:[#allocation107_spill] sm:$0xff] }
  0x98   :  { %7817 = vmatprep.mubr.f32.mxu0 %v9394_v38  ;;  %v13368_v38 = vld [vmem:[#allocation106_spill] sm:$0xff] }
  0x9b   :  { %7818 = vmatmul.mubr.f32.gmra.mrb[6].mxu0 %v9429_v58  ;;  %v13367_v58 = vld [vmem:[#allocation105_spill] sm:$0xff] }
  0x9c   :  { %7820 = vmatprep.mubr.f32.mxu0 %v9438_v63  ;;  %v13366_v63 = vld [vmem:[#allocation102_spill] sm:$0xff] }
  0x9f   :  { %7821 = vmatmul.mubr.f32.gmra.mrb[8].mxu0 %v9448_v5  ;;  %v13365_v5 = vld [vmem:[#allocation100_spill] sm:$0xff] }
  0xa0   :  { %7823 = vmatprep.mubr.f32.mxu0 %v9450_v6  ;;  %v13364_v6 = vld [vmem:[#allocation98_spill] sm:$0xff] }
  0xa3   :  { %7824 = vmatmul.mubr.f32.gmra.mrb[10].mxu0 %v9470_v35  ;;  %v13363_v35 = vld [vmem:[#allocation96_spill] sm:$0xff] }
  0xa4   :  { %7826 = vmatprep.mubr.f32.mxu0 %v9472_v36  ;;  %v13362_v36 = vld [vmem:[#allocation95_spill] sm:$0xff] }
  0xa7   :  { %7827 = vmatmul.mubr.f32.gmra.mrb[12].mxu0 %v9474_v39  ;;  %v13361_v39 = vld [vmem:[#allocation92_spill] sm:$0xff] }
  0xa8   :  { %7829 = vmatprep.mubr.f32.mxu0 %v9497_v52  ;;  %v13360_v52 = vld [vmem:[#allocation91_spill] sm:$0xff] }
  0xab   :  { %7830 = vmatmul.mubr.f32.gmra.mrb[14].mxu0 %v9521_v8  ;;  %v13359_v8 = vld [vmem:[#allocation89_spill] sm:$0xff] }
  0xac   :  { %7832 = vmatprep.mubr.f32.mxu0 %v9542_v61  ;;  %v13358_v61 = vld [vmem:[#allocation86_spill] sm:$0xff] }
  0xaf   :  { %7833 = vmatmul.mubr.f32.gmra.mrb[16].mxu0 %v9544_v42  ;;  %v13357_v42 = vld [vmem:[#allocation84_spill] sm:$0xff] }
  0xb0   :  { %7835 = vmatprep.mubr.f32.mxu0 %v9546_v41  ;;  %v13356_v41 = vld [vmem:[#allocation82_spill] sm:$0xff] }
  0xb3   :  { %7836 = vmatmul.mubr.f32.gmra.mrb[18].mxu0 %v9569_v44  ;;  %v13355_v44 = vld [vmem:[#allocation80_spill] sm:$0xff] }
  0xb4   :  { %7838 = vmatprep.mubr.f32.mxu0 %v9576_v2  ;;  %v13354_v2 = vld [vmem:[#allocation79_spill] sm:$0xff] }
  0xb7   :  { %7839 = vmatmul.mubr.f32.gmra.mrb[20].mxu0 %v9586_v51  ;;  %v13353_v51 = vld [vmem:[#allocation75_spill] sm:$0xff] }
  0xb8   :  { %7841 = vmatprep.mubr.f32.mxu0 %v9592_v62  ;;  %v13352_v62 = vld [vmem:[#allocation74_spill] sm:$0xff] }
  0xbb   :  { %7842 = vmatmul.mubr.f32.gmra.mrb[22].mxu0 %v9616_v12  ;;  %v13351_v12 = vld [vmem:[#allocation73_spill] sm:$0xff] }
  0xbc   :  { %7844 = vmatprep.mubr.f32.mxu0 %v9628_v57  ;;  %v13350_v57 = vld [vmem:[#allocation70_spill] sm:$0xff] }
  0xbf   :  { %7845 = vmatmul.mubr.f32.gmra.mrb[24].mxu0 %v9638_v40  ;;  %v13349_v40 = vld [vmem:[#allocation69_spill] sm:$0xff] }
  0xc0   :  { %7847 = vmatprep.mubr.f32.mxu0 %v9647_v37  ;;  %v13348_v37 = vld [vmem:[#allocation66_spill] sm:$0xff] }
  0xc3   :  { %7848 = vmatmul.mubr.f32.gmra.mrb[26].mxu0 %v9664_v45  ;;  %v13347_v45 = vld [vmem:[#allocation64_spill] sm:$0xff] }
  0xc4   :  { %7850 = vmatprep.mubr.f32.mxu0 %v9680_v30  ;;  %v13346_v30 = vld [vmem:[#allocation63_spill] sm:$0xff] }
  0xc7   :  { %7851 = vmatmul.mubr.f32.gmra.mrb[28].mxu0 %v9685_v54  ;;  %v13345_v54 = vld [vmem:[#allocation60_spill] sm:$0xff] }
  0xc8   :  { %7853 = vmatprep.mubr.f32.mxu0 %v9706_v28  ;;  %v13344_v28 = vld [vmem:[#allocation58_spill] sm:$0xff] }
  0xcb   :  { %7854 = vmatmul.mubr.f32.gmra.mrb[30].mxu0 %v9722_v60  ;;  %v13343_v60 = vld [vmem:[#allocation57_spill] sm:$0xff] }
  0xcc   :  { %7856 = vmatprep.mubr.f32.mxu0 %v9727_v47  ;;  %v13342_v47 = vld [vmem:[#allocation54_spill] sm:$0xff] }
  0xcf   :  { %7857 = vmatmul.mubr.f32.gmra.mrb[32].mxu0 %v9748_v49  ;;  %v13341_v49 = vld [vmem:[#allocation52_spill] sm:$0xff] }
  0xd0   :  { %7859 = vmatprep.mubr.f32.mxu0 %v9750_v1  ;;  %v13340_v1 = vld [vmem:[#allocation50_spill] sm:$0xff] }
  0xd3   :  { %7860 = vmatmul.mubr.f32.gmra.mrb[34].mxu0 %v13296_v14  ;;  %v13339_v14 = vld [vmem:[#allocation49_spill] sm:$0xff] }
  0xd4   :  { %7862 = vmatprep.mubr.f32.mxu0 %v13297_v56  ;;  %v13338_v56 = vld [vmem:[#allocation47_spill] sm:$0xff] }
  0xd7   :  { %7863 = vmatmul.mubr.f32.gmra.mrb[36].mxu0 %v9795_v29  ;;  %v13337_v29 = vld [vmem:[#allocation43_spill] sm:$0xff] }
  0xd8   :  { %7865 = vmatprep.mubr.f32.mxu0 %v13298_v19  ;;  %v13336_v19 = vld [vmem:[#allocation42_spill] sm:$0xff] }
  0xdb   :  { %7866 = vmatmul.mubr.f32.gmra.mrb[38].mxu0 %v13299_v0  ;;  %v13335_v0 = vld [vmem:[#allocation41_spill] sm:$0xff] }
  0xdc   :  { %7868 = vmatprep.mubr.f32.mxu0 %v13300_v11  ;;  %v13334_v11 = vld [vmem:[#allocation37_spill] sm:$0xff] }
  0xdf   :  { %7869 = vmatmul.mubr.f32.gmra.mrb[40].mxu0 %v13301_v34  ;;  %v13311_v34 = vld [vmem:[#allocation109_spill] sm:$0xff] }
  0xe0   :  { %7871 = vmatprep.mubr.f32.mxu0 %v13302_v17  ;;  %v13312_v17 = vld [vmem:[#allocation110_spill] sm:$0xff] }
  0xe3   :  { %7872 = vmatmul.mubr.f32.gmra.mrb[42].mxu0 %v13303_v18  ;;  %v13313_v18 = vld [vmem:[#allocation111_spill] sm:$0xff] }
  0xe4   :  { %7874 = vmatprep.mubr.f32.mxu0 %v13304_v31  ;;  %v13314_v31 = vld [vmem:[#allocation116_spill] sm:$0xff] }
  0xe7   :  { %7875 = vmatmul.mubr.f32.gmra.mrb[44].mxu0 %v13305_v48  ;;  %v13315_v48 = vld [vmem:[#allocation117_spill] sm:$0xff] }
  0xe8   :  { %7877 = vmatprep.mubr.f32.mxu0 %v13306_v23  ;;  %v13316_v23 = vld [vmem:[#allocation119_spill] sm:$0xff] }
  0xeb   :  { %7878 = vmatmul.mubr.f32.gmra.mrb[46].mxu0 %v13307_v22  ;;  %v13317_v22 = vld [vmem:[#allocation120_spill] sm:$0xff] }
  0xec   :  { %7880 = vmatprep.mubr.f32.mxu0 %v13308_v25  ;;  %v13333_v25 = vld [vmem:[#allocation35_spill] sm:$0xff] }
  0xef   :  { %7881 = vmatmul.mubr.f32.gmra.mrb[48].mxu0 %v13309_v7  ;;  %v13332_v7 = vld [vmem:[#allocation33_spill] sm:$0xff] }
  0xf0   :  { %7883 = vmatprep.mubr.f32.mxu0 %v13310_v33  ;;  %v13331_v33 = vld [vmem:[#allocation32_spill] sm:$0xff] }
  0xf3   :  { %7884 = vmatmul.mubr.f32.gmra.mrb[50].mxu0 %v9986_v59  ;;  %v13330_v59 = vld [vmem:[#allocation31_spill] sm:$0xff] }
  0xf4   :  { %7886 = vmatprep.mubr.f32.mxu0 %v13311_v34  ;;  %v13329_v34 = vld [vmem:[#allocation27_spill] sm:$0xff] }
  0xf7   :  { %7887 = vmatmul.mubr.f32.gmra.mrb[52].mxu0 %v13312_v17  ;;  %v13318_v17 = vld [vmem:[#allocation9_spill] sm:$0xff] }
  0xf8   :  { %7889 = vmatprep.mubr.f32.mxu0 %v13313_v18  ;;  %v13319_v18 = vld [vmem:[#allocation10_spill] sm:$0xff] }
  0xfb   :  { %7890 = vmatmul.mubr.f32.gmra.mrb[54].mxu0 %v13314_v31  ;;  %v13328_v31 = vld [vmem:[#allocation26_spill] sm:$0xff] }
  0xfc   :  { %7892 = vmatprep.mubr.f32.mxu0 %v13315_v48  ;;  %v13320_v48 = vld [vmem:[#allocation13_spill] sm:$0xff] }
  0xff   :  { %7893 = vmatmul.mubr.f32.gmra.mrb[56].mxu0 %v13316_v23  ;;  %v13321_v23 = vld [vmem:[#allocation12_spill] sm:$0xff] }
 0x100   :  { %7895 = vmatprep.mubr.f32.mxu0 %v13317_v22  ;;  %v13322_v22 = vld [vmem:[#allocation14_spill] sm:$0xff] }
 0x103   :  { %7896 = vmatmul.mubr.f32.gmra.mrb[58].mxu0 %v10092_v20  ;;  %v13323_v20 = vld [vmem:[#allocation16_spill] sm:$0xff] }
 0x104   :  { %7898 = vmatprep.mubr.f32.mxu0 %v10095_v4  ;;  %v13324_v4 = vld [vmem:[#allocation17_spill] sm:$0xff] }
 0x107   :  { %7899 = vmatmul.mubr.f32.gmra.mrb[60].mxu0 %v10110_v24  ;;  %v13325_v24 = vld [vmem:[#allocation19_spill] sm:$0xff] }
 0x108   :  { %7901 = vmatprep.mubr.f32.mxu0 %v10118_v46  ;;  %v13326_v46 = vld [vmem:[#allocation22_spill] sm:$0xff] }
 0x10b   :  { %7902 = vmatmul.mubr.f32.gmra.mrb[62].mxu0 %v10128_v43  ;;  %v13327_v43 = vld [vmem:[#allocation25_spill] sm:$0xff] }
 0x10c   :  { %7906 = vmatprep.mubr.f32.mxu0 %v13318_v17 }
 0x10f   :  { %7907 = vmatmul.mubr.f32.vlgmr.msra.gmra.mrb[0].mxu0 %v13319_v18 }
 0x110   :  { %8003 = vmatpush3.msra.mxu0 %v9319_v3  ;;  %7909 = vmatprep.mubr.f32.mxu0 %v13320_v48 }
 0x111   :  { %8100 = vmatprep.subr.mxu0 %v13321_v23 }
 0x113   :  { %7910 = vmatmul.mubr.f32.gmra.mrb[2].mxu0 %v13322_v22 }
 0x114   :  { %7912 = vmatprep.mubr.f32.mxu0 %v13323_v20 }
 0x117   :  { %7913 = vmatmul.mubr.f32.gmra.mrb[4].mxu0 %v13324_v4 }
 0x118   :  { %7915 = vmatprep.mubr.f32.mxu0 %v13325_v24 }
 0x11b   :  { %7916 = vmatmul.mubr.f32.gmra.mrb[6].mxu0 %v13326_v46 }
 0x11c   :  { %7918 = vmatprep.mubr.f32.mxu0 %v13327_v43 }
 0x11f   :  { %7919 = vmatmul.mubr.f32.gmra.mrb[8].mxu0 %v13328_v31 }
 0x120   :  { %7921 = vmatprep.mubr.f32.mxu0 %v13329_v34 }
 0x123   :  { %7922 = vmatmul.mubr.f32.gmra.mrb[10].mxu0 %v13330_v59 }
 0x124   :  { %7924 = vmatprep.mubr.f32.mxu0 %v13331_v33 }
 0x127   :  { %7925 = vmatmul.mubr.f32.gmra.mrb[12].mxu0 %v13332_v7 }
 0x128   :  { %7927 = vmatprep.mubr.f32.mxu0 %v13333_v25 }
 0x12b   :  { %7928 = vmatmul.mubr.f32.gmra.mrb[14].mxu0 %v13334_v11 }
 0x12c   :  { %7930 = vmatprep.mubr.f32.mxu0 %v13335_v0 }
 0x12f   :  { %7931 = vmatmul.mubr.f32.gmra.mrb[16].mxu0 %v13336_v19 }
 0x130   :  { %7933 = vmatprep.mubr.f32.mxu0 %v13337_v29 }
 0x133   :  { %7934 = vmatmul.mubr.f32.gmra.mrb[18].mxu0 %v13338_v56 }
 0x134   :  { %7936 = vmatprep.mubr.f32.mxu0 %v13339_v14 }
 0x137   :  { %7937 = vmatmul.mubr.f32.gmra.mrb[20].mxu0 %v13340_v1 }
 0x138   :  { %7939 = vmatprep.mubr.f32.mxu0 %v13341_v49 }
 0x13b   :  { %7940 = vmatmul.mubr.f32.gmra.mrb[22].mxu0 %v13342_v47 }
 0x13c   :  { %7942 = vmatprep.mubr.f32.mxu0 %v13343_v60 }
 0x13f   :  { %7943 = vmatmul.mubr.f32.gmra.mrb[24].mxu0 %v13344_v28 }
 0x140   :  { %7945 = vmatprep.mubr.f32.mxu0 %v13345_v54 }
 0x143   :  { %7946 = vmatmul.mubr.f32.gmra.mrb[26].mxu0 %v13346_v30 }
 0x144   :  { %7948 = vmatprep.mubr.f32.mxu0 %v13347_v45 }
 0x147   :  { %7949 = vmatmul.mubr.f32.gmra.mrb[28].mxu0 %v13348_v37 }
 0x148   :  { %7951 = vmatprep.mubr.f32.mxu0 %v13349_v40 }
 0x14b   :  { %7952 = vmatmul.mubr.f32.gmra.mrb[30].mxu0 %v13350_v57 }
 0x14c   :  { %7954 = vmatprep.mubr.f32.mxu0 %v13351_v12 }
 0x14f   :  { %7955 = vmatmul.mubr.f32.gmra.mrb[32].mxu0 %v13352_v62 }
 0x150   :  { %7957 = vmatprep.mubr.f32.mxu0 %v13353_v51 }
 0x153   :  { %7958 = vmatmul.mubr.f32.gmra.mrb[34].mxu0 %v13354_v2 }
 0x154   :  { %7960 = vmatprep.mubr.f32.mxu0 %v13355_v44 }
 0x157   :  { %7961 = vmatmul.mubr.f32.gmra.mrb[36].mxu0 %v13356_v41 }
 0x158   :  { %7963 = vmatprep.mubr.f32.mxu0 %v13357_v42 }
 0x15b   :  { %7964 = vmatmul.mubr.f32.gmra.mrb[38].mxu0 %v13358_v61 }
 0x15c   :  { %7966 = vmatprep.mubr.f32.mxu0 %v13359_v8 }
 0x15f   :  { %7967 = vmatmul.mubr.f32.gmra.mrb[40].mxu0 %v13360_v52 }
 0x160   :  { %7969 = vmatprep.mubr.f32.mxu0 %v13361_v39 }
 0x163   :  { %7970 = vmatmul.mubr.f32.gmra.mrb[42].mxu0 %v13362_v36 }
 0x164   :  { %7972 = vmatprep.mubr.f32.mxu0 %v13363_v35 }
 0x167   :  { %7973 = vmatmul.mubr.f32.gmra.mrb[44].mxu0 %v13364_v6  ;;  %v13375_v6 = vld [vmem:[#allocation121_spill] sm:$0xff] }
 0x168   :  { %7975 = vmatprep.mubr.f32.mxu0 %v13365_v5 }
 0x16b   :  { %7976 = vmatmul.mubr.f32.gmra.mrb[46].mxu0 %v13366_v63 }
 0x16c   :  { %7978 = vmatprep.mubr.f32.mxu0 %v13367_v58  ;;  %v13376_v58 = vld [vmem:[#allocation125_spill] sm:$0xff] }
 0x16f   :  { %7979 = vmatmul.mubr.f32.gmra.mrb[48].mxu0 %v13368_v38 }
 0x170   :  { %7981 = vmatprep.mubr.f32.mxu0 %v13369_v26 }
 0x173   :  { %7982 = vmatmul.mubr.f32.gmra.mrb[50].mxu0 %v13370_v21 }
 0x174   :  { %7984 = vmatprep.mubr.f32.mxu0 %v13371_v16 }
 0x177   :  { %7985 = vmatmul.mubr.f32.gmra.mrb[52].mxu0 %v13372_v15 }
 0x178   :  { %7987 = vmatprep.mubr.f32.mxu0 %v13373_v10  ;;  %v13377_v10 = vand.u32 4294901760, %v13318_v17  ;;  %v13385_v17 = vand.u32 4294901760, %v13327_v43  ;;  %v13392_v43 = vand.u32 4294901760, %v13334_v11 }
 0x17b   :  { %7988 = vmatmul.mubr.f32.gmra.mrb[54].mxu0 %v13374_v9  ;;  %v13378_v9 = vand.u32 4294901760, %v13319_v18  ;;  %v13431_v18 = vand.u32 4294901760, %v13371_v16  ;;  %v13441_v16 = vand.u32 4294901760, %v13376_v58 }
 0x17c   :  { %7990 = vmatprep.mubr.f32.mxu0 %v13375_v6 }
 0x17f   :  { %7991 = vmatmul.mubr.f32.gmra.mrb[56].mxu0 %v10087_v27 }
 0x180   :  { %7993 = vmatprep.mubr.f32.mxu0 %v10090_v50  ;;  %v13379_v50 = vand.u32 4294901760, %v13320_v48  ;;  %v13435_v48 = vld [vmem:[#allocation118_spill] sm:$0xff] }
 0x183   :  { %7994 = vmatmul.mubr.f32.gmra.mrb[58].mxu0 %v13376_v58  ;;  %v13451_v58 = vld [vmem:[#allocation7_spill] sm:$0xff] }
 0x184   :  { %7996 = vmatprep.mubr.f32.mxu0 %v10116_v13  ;;  %v13380_v13 = vand.u32 4294901760, %v13322_v22  ;;  %v13387_v22 = vand.u32 4294901760, %v13329_v34 }
 0x187   :  { %7997 = vmatmul.mubr.f32.gmra.mrb[60].mxu0 %v10126_v53 }
 0x188   :  { %7999 = vmatprep.mubr.f32.mxu0 %v10135_v55  ;;  %v13381_v55 = vand.u32 4294901760, %v13323_v20  ;;  %v13388_v20 = vand.u32 4294901760, %v13330_v59  ;;  %v13395_v59 = vand.u32 4294901760, %v13337_v29  ;;  %v13402_v29 = vand.u32 4294901760, %v13344_v28 }
 0x189   :  { %v13409_v28 = vand.u32 4294901760, %v13351_v12  ;;  %v13416_v12 = vand.u32 4294901760, %v13358_v61  ;;  %v13424_v61 = vand.u32 4294901760, %v13365_v5  ;;  %v13432_v5 = vand.u32 4294901760, %v13372_v15  ;;  %v13442_v15 = vld [vmem:[#allocation127_spill] sm:$0xff] }
 0x18b   :  { %8000 = vmatmul.mubr.f32.gmra.mrb[62].mxu0 %v10142_v32  ;;  %v13382_v32 = vand.u32 4294901760, %v13324_v4  ;;  %v13389_v4 = vand.u32 4294901760, %v13331_v33  ;;  %v13396_v33 = vand.u32 4294901760, %v13338_v56  ;;  %v13403_v56 = vand.u32 4294901760, %v13345_v54 }
 0x18c   :  { %8004 = vmatprep.mubr.f32.mxu0 %v13377_v10  ;;  %v13383_v10 = vand.u32 4294901760, %v13325_v24  ;;  %v13390_v24 = vand.u32 4294901760, %v13332_v7  ;;  %v13397_v7 = vand.u32 4294901760, %v13339_v14  ;;  %v13404_v14 = vand.u32 4294901760, %v13346_v30 }
 0x18d   :  { %v13410_v54 = vand.u32 4294901760, %v13352_v62  ;;  %v13411_v30 = vand.u32 4294901760, %v13353_v51  ;;  %v13417_v62 = vand.u32 4294901760, %v13359_v8  ;;  %v13418_v51 = vand.u32 4294901760, %v13360_v52  ;;  %v13426_v52 = vld [vmem:[#allocation105_spill] sm:$0xff] }
 0x18e   :  { %v13425_v8 = vand.u32 4294901760, %v13366_v63  ;;  %v13427_v34 = vand.u32 4294901760, %v13426_v52  ;;  %v13433_v63 = vld [vmem:[#allocation115_spill] sm:$0xff] }
 0x18f   :  { %8005 = vmatmul.mubr.f32.vlgmr.msra.gmra.mrb[0].mxu0 %v13378_v9  ;;  %v13384_v9 = vand.u32 4294901760, %v13326_v46  ;;  %v13391_v46 = vand.u32 4294901760, %v13333_v25  ;;  %v13399_v25 = vand.u32 4294901760, %v13341_v49  ;;  %v13406_v49 = vand.u32 4294901760, %v13348_v37  ;;  %v13490_v52 = vld [vmem:[#allocation87_spill] sm:$0xff] }
 0x190   :  { %8101 = vmatpush3.msra.mxu0 %v13321_v23  ;;  %8007 = vmatprep.mubr.f32.mxu0 %v13379_v50  ;;  %v13386_v50 = vand.u32 4294901760, %v13328_v31  ;;  %v13413_v37 = vand.u32 4294901760, %v13355_v44  ;;  %v13420_v44 = vand.u32 4294901760, %v13362_v36  ;;  %v13429_v36 = vand.u32 4294901760, %v13369_v26 }
 0x191   :  { %8198 = vmatprep.subr.mxu0 %v9319_v3  ;;  %v13434_v31 = vand.u32 4294901760, %v13433_v63  ;;  %v13436_v23 = vand.u32 4294901760, %v13435_v48  ;;  %v13438_v26 = vand.u32 4294901760, %v10087_v27  ;;  %v13449_v27 = vld [vmem:[#allocation5_spill] sm:$0xff]  ;;  %v13499_v48 = vld [vmem:[#allocation104_spill] sm:$0xff] }
 0x192   :  { %v13497_v63 = vld [vmem:[#allocation101_spill] sm:$0xff] }
 0x193   :  { %8008 = vmatmul.mubr.f32.gmra.mrb[2].mxu0 %v13380_v13  ;;  %v13393_v13 = vand.u32 4294901760, %v13335_v0  ;;  %v13400_v0 = vand.u32 4294901760, %v13342_v47  ;;  %v13407_v47 = vand.u32 4294901760, %v13349_v40  ;;  %v13414_v40 = vand.u32 4294901760, %v13356_v41 }
 0x194   :  { %8010 = vmatprep.mubr.f32.mxu0 %v13381_v55  ;;  %v13394_v55 = vand.u32 4294901760, %v13336_v19  ;;  %v13401_v19 = vand.u32 4294901760, %v13343_v60  ;;  %v13408_v60 = vand.u32 4294901760, %v13350_v57  ;;  %v13415_v57 = vand.u32 4294901760, %v13357_v42  ;;  %v13422_v42 = vld [vmem:[#allocation98_spill] sm:$0xff] }
 0x195   :  { %v13421_v41 = vand.u32 4294901760, %v13363_v35  ;;  %v13423_v11 = vand.u32 4294901760, %v13422_v42  ;;  %v13430_v35 = vand.u32 4294901760, %v13370_v21  ;;  %v13439_v21 = vld [vmem:[#allocation122_spill] sm:$0xff] }
 0x196   :  { %v13486_v42 = vld [vmem:[#allocation78_spill] sm:$0xff] }
 0x197   :  { %8011 = vmatmul.mubr.f32.gmra.mrb[4].mxu0 %v13382_v32  ;;  %v13398_v32 = vand.u32 4294901760, %v13340_v1  ;;  %v13405_v1 = vand.u32 4294901760, %v13347_v45  ;;  %v13412_v45 = vand.u32 4294901760, %v13354_v2  ;;  %v13419_v2 = vand.u32 4294901760, %v13361_v39 }
 0x198   :  { %8013 = vmatprep.mubr.f32.mxu0 %v13383_v10  ;;  %v13428_v39 = vand.u32 4294901760, %v13368_v38  ;;  %v13437_v38 = vand.u32 4294901760, %v13375_v6  ;;  %v13440_v10 = vand.u32 4294901760, %v13439_v21  ;;  %v13447_v6 = vld [vmem:[#allocation131_spill] sm:$0xff] }
 0x199   :  { %v13503_v21 = vld [vmem:[#allocation111_spill] sm:$0xff] }
 0x19b   :  { %8014 = vmatmul.mubr.f32.gmra.mrb[6].mxu0 %v13384_v9  ;;  %v13443_v9 = vand.u32 4294901760, %v13442_v15  ;;  %v13506_v15 = vld [vmem:[#allocation119_spill] sm:$0xff] }
 0x19c   :  { %8016 = vmatprep.mubr.f32.mxu0 %v13385_v17  ;;  %v13444_v17 = vand.u32 4294901760, %v10126_v53  ;;  %v13454_v53 = vld [vmem:[#allocation15_spill] sm:$0xff] }
 0x19f   :  { %8017 = vmatmul.mubr.f32.gmra.mrb[8].mxu0 %v13386_v50  ;;  %v13445_v50 = vld [vmem:[#allocation130_spill] sm:$0xff] }
 0x1a0   :  { %8019 = vmatprep.mubr.f32.mxu0 %v13387_v22  ;;  %v13446_v22 = vand.u32 4294901760, %v13445_v50  ;;  %v13509_v50 = vld [vmem:[#allocation124_spill] sm:$0xff] }
 0x1a3   :  { %8020 = vmatmul.mubr.f32.gmra.mrb[10].mxu0 %v13388_v20  ;;  %v13448_v20 = vand.u32 4294901760, %v13447_v6  ;;  %v13511_v6 = vld [vmem:[#allocation128_spill] sm:$0xff] }
 0x1a4   :  { %8022 = vmatprep.mubr.f32.mxu0 %v13389_v4  ;;  %v13450_v4 = vld [vmem:[#allocation6_spill] sm:$0xff] }
 0x1a7   :  { %8023 = vmatmul.mubr.f32.gmra.mrb[12].mxu0 %v13390_v24  ;;  %v13452_v24 = vld [vmem:[#allocation8_spill] sm:$0xff] }
 0x1a8   :  { %8025 = vmatprep.mubr.f32.mxu0 %v13391_v46  ;;  %v13453_v46 = vld [vmem:[#allocation11_spill] sm:$0xff] }
 0x1ab   :  { %8026 = vmatmul.mubr.f32.gmra.mrb[14].mxu0 %v13392_v43  ;;  %v13455_v43 = vld [vmem:[#allocation18_spill] sm:$0xff] }
 0x1ac   :  { %8028 = vmatprep.mubr.f32.mxu0 %v13393_v13  ;;  %v13456_v13 = vld [vmem:[#allocation20_spill] sm:$0xff] }
 0x1af   :  { %8029 = vmatmul.mubr.f32.gmra.mrb[16].mxu0 %v13394_v55  ;;  %v13457_v55 = vld [vmem:[#allocation21_spill] sm:$0xff] }
 0x1b0   :  { %8031 = vmatprep.mubr.f32.mxu0 %v13395_v59  ;;  %v13458_v59 = vld [vmem:[#allocation23_spill] sm:$0xff] }
 0x1b3   :  { %8032 = vmatmul.mubr.f32.gmra.mrb[18].mxu0 %v13396_v33  ;;  %v13459_v33 = vld [vmem:[#allocation24_spill] sm:$0xff] }
 0x1b4   :  { %8034 = vmatprep.mubr.f32.mxu0 %v13397_v7  ;;  %v13460_v7 = vld [vmem:[#allocation28_spill] sm:$0xff] }
 0x1b7   :  { %8035 = vmatmul.mubr.f32.gmra.mrb[20].mxu0 %v13398_v32  ;;  %v13462_v32 = vld [vmem:[#allocation30_spill] sm:$0xff] }
 0x1b8   :  { %8037 = vmatprep.mubr.f32.mxu0 %v13399_v25  ;;  %v13463_v25 = vld [vmem:[#allocation34_spill] sm:$0xff] }
 0x1bb   :  { %8038 = vmatmul.mubr.f32.gmra.mrb[22].mxu0 %v13400_v0  ;;  %v13464_v0 = vld [vmem:[#allocation36_spill] sm:$0xff] }
 0x1bc   :  { %8040 = vmatprep.mubr.f32.mxu0 %v13401_v19  ;;  %v13465_v19 = vld [vmem:[#allocation38_spill] sm:$0xff] }
 0x1bf   :  { %8041 = vmatmul.mubr.f32.gmra.mrb[24].mxu0 %v13402_v29  ;;  %v13466_v29 = vld [vmem:[#allocation39_spill] sm:$0xff] }
 0x1c0   :  { %8043 = vmatprep.mubr.f32.mxu0 %v13403_v56  ;;  %v13467_v56 = vld [vmem:[#allocation40_spill] sm:$0xff] }
 0x1c3   :  { %8044 = vmatmul.mubr.f32.gmra.mrb[26].mxu0 %v13404_v14  ;;  %v13468_v14 = vld [vmem:[#allocation44_spill] sm:$0xff] }
 0x1c4   :  { %8046 = vmatprep.mubr.f32.mxu0 %v13405_v1  ;;  %v13469_v1 = vld [vmem:[#allocation45_spill] sm:$0xff] }
 0x1c7   :  { %8047 = vmatmul.mubr.f32.gmra.mrb[28].mxu0 %v13406_v49  ;;  %v13470_v49 = vld [vmem:[#allocation46_spill] sm:$0xff] }
 0x1c8   :  { %8049 = vmatprep.mubr.f32.mxu0 %v13407_v47  ;;  %v13471_v47 = vld [vmem:[#allocation48_spill] sm:$0xff] }
 0x1cb   :  { %8050 = vmatmul.mubr.f32.gmra.mrb[30].mxu0 %v13408_v60  ;;  %v13472_v60 = vld [vmem:[#allocation51_spill] sm:$0xff] }
 0x1cc   :  { %8052 = vmatprep.mubr.f32.mxu0 %v13409_v28  ;;  %v13473_v28 = vld [vmem:[#allocation53_spill] sm:$0xff] }
 0x1cf   :  { %8053 = vmatmul.mubr.f32.gmra.mrb[32].mxu0 %v13410_v54  ;;  %v13474_v54 = vld [vmem:[#allocation55_spill] sm:$0xff] }
 0x1d0   :  { %8055 = vmatprep.mubr.f32.mxu0 %v13411_v30  ;;  %v13475_v30 = vld [vmem:[#allocation56_spill] sm:$0xff] }
 0x1d3   :  { %8056 = vmatmul.mubr.f32.gmra.mrb[34].mxu0 %v13412_v45  ;;  %v13476_v45 = vld [vmem:[#allocation59_spill] sm:$0xff] }
 0x1d4   :  { %8058 = vmatprep.mubr.f32.mxu0 %v13413_v37  ;;  %v13477_v37 = vld [vmem:[#allocation61_spill] sm:$0xff] }
 0x1d7   :  { %8059 = vmatmul.mubr.f32.gmra.mrb[36].mxu0 %v13414_v40  ;;  %v13478_v40 = vld [vmem:[#allocation62_spill] sm:$0xff] }
 0x1d8   :  { %8061 = vmatprep.mubr.f32.mxu0 %v13415_v57  ;;  %v13479_v57 = vld [vmem:[#allocation65_spill] sm:$0xff] }
 0x1db   :  { %8062 = vmatmul.mubr.f32.gmra.mrb[38].mxu0 %v13416_v12  ;;  %v13480_v12 = vld [vmem:[#allocation67_spill] sm:$0xff] }
 0x1dc   :  { %8064 = vmatprep.mubr.f32.mxu0 %v13417_v62  ;;  %v13481_v62 = vld [vmem:[#allocation68_spill] sm:$0xff] }
 0x1df   :  { %8065 = vmatmul.mubr.f32.gmra.mrb[40].mxu0 %v13418_v51  ;;  %v13482_v51 = vld [vmem:[#allocation71_spill] sm:$0xff] }
 0x1e0   :  { %8067 = vmatprep.mubr.f32.mxu0 %v13419_v2  ;;  %v13483_v2 = vld [vmem:[#allocation72_spill] sm:$0xff] }
 0x1e3   :  { %8068 = vmatmul.mubr.f32.gmra.mrb[42].mxu0 %v13420_v44  ;;  %v13484_v44 = vld [vmem:[#allocation76_spill] sm:$0xff] }
 0x1e4   :  { %8070 = vmatprep.mubr.f32.mxu0 %v13421_v41  ;;  %v13485_v41 = vld [vmem:[#allocation77_spill] sm:$0xff] }
 0x1e7   :  { %8071 = vmatmul.mubr.f32.gmra.mrb[44].mxu0 %v13423_v11  ;;  %v13487_v11 = vld [vmem:[#allocation81_spill] sm:$0xff] }
 0x1e8   :  { %8073 = vmatprep.mubr.f32.mxu0 %v13424_v61  ;;  %v13488_v61 = vld [vmem:[#allocation83_spill] sm:$0xff] }
 0x1eb   :  { %8074 = vmatmul.mubr.f32.gmra.mrb[46].mxu0 %v13425_v8  ;;  %v13489_v8 = vld [vmem:[#allocation85_spill] sm:$0xff] }
 0x1ec   :  { %8076 = vmatprep.mubr.f32.mxu0 %v13427_v34  ;;  %v13491_v34 = vld [vmem:[#allocation88_spill] sm:$0xff] }
 0x1ef   :  { %8077 = vmatmul.mubr.f32.gmra.mrb[48].mxu0 %v13428_v39  ;;  %v13492_v39 = vld [vmem:[#allocation90_spill] sm:$0xff] }
 0x1f0   :  { %8079 = vmatprep.mubr.f32.mxu0 %v13429_v36  ;;  %v13493_v36 = vld [vmem:[#allocation93_spill] sm:$0xff] }
 0x1f3   :  { %8080 = vmatmul.mubr.f32.gmra.mrb[50].mxu0 %v13430_v35  ;;  %v13494_v35 = vld [vmem:[#allocation94_spill] sm:$0xff] }
 0x1f4   :  { %8082 = vmatprep.mubr.f32.mxu0 %v13431_v18  ;;  %v13495_v18 = vld [vmem:[#allocation97_spill] sm:$0xff] }
 0x1f7   :  { %8083 = vmatmul.mubr.f32.gmra.mrb[52].mxu0 %v13432_v5  ;;  %v13496_v5 = vld [vmem:[#allocation99_spill] sm:$0xff] }
 0x1f8   :  { %8085 = vmatprep.mubr.f32.mxu0 %v13434_v31  ;;  %v13498_v31 = vld [vmem:[#allocation103_spill] sm:$0xff] }
 0x1fb   :  { %8086 = vmatmul.mubr.f32.gmra.mrb[54].mxu0 %v13436_v23  ;;  %v13500_v23 = vld [vmem:[#allocation108_spill] sm:$0xff] }
 0x1fc   :  { %8088 = vmatprep.mubr.f32.mxu0 %v13437_v38  ;;  %v13501_v38 = vld [vmem:[#allocation109_spill] sm:$0xff] }
 0x1ff   :  { %8089 = vmatmul.mubr.f32.gmra.mrb[56].mxu0 %v13438_v26  ;;  %v13502_v26 = vld [vmem:[#allocation110_spill] sm:$0xff] }
 0x200   :  { %8091 = vmatprep.mubr.f32.mxu0 %v13440_v10  ;;  %v13504_v10 = vld [vmem:[#allocation116_spill] sm:$0xff] }
 0x203   :  { %8092 = vmatmul.mubr.f32.gmra.mrb[58].mxu0 %v13441_v16  ;;  %v13505_v16 = vld [vmem:[#allocation117_spill] sm:$0xff] }
 0x204   :  { %8094 = vmatprep.mubr.f32.mxu0 %v13443_v9  ;;  %v13507_v9 = vld [vmem:[#allocation120_spill] sm:$0xff] }
 0x207   :  { %8095 = vmatmul.mubr.f32.gmra.mrb[60].mxu0 %v13444_v17  ;;  %v13508_v17 = vld [vmem:[#allocation123_spill] sm:$0xff] }
 0x208   :  { %8097 = vmatprep.mubr.f32.mxu0 %v13446_v22  ;;  %v13510_v22 = vld [vmem:[#allocation126_spill] sm:$0xff] }
 0x20b   :  { %8098 = vmatmul.mubr.f32.gmra.mrb[62].mxu0 %v13448_v20  ;;  %v13512_v20 = vld [vmem:[#allocation129_spill] sm:$0xff] }
 0x20c   :  { %8102 = vmatprep.mubr.f32.mxu0 %v13449_v27 }
 0x20f   :  { %8103 = vmatmul.mubr.f32.vlgmr.msra.gmra.mrb[0].mxu0 %v13450_v4 }
 0x210   :  { %8199 = vmatpush3.msra.mxu0 %v9319_v3  ;;  %8105 = vmatprep.mubr.f32.mxu0 %v13451_v58  ;;  %v13461_v3 = vld [vmem:[#allocation29_spill] sm:$0xff] }
 0x213   :  { %8106 = vmatmul.mubr.f32.gmra.mrb[2].mxu0 %v13452_v24 }
 0x214   :  { %8108 = vmatprep.mubr.f32.mxu0 %v13453_v46 }
 0x217   :  { %8109 = vmatmul.mubr.f32.gmra.mrb[4].mxu0 %v13454_v53 }
 0x218   :  { %8111 = vmatprep.mubr.f32.mxu0 %v13455_v43 }
 0x21b   :  { %8112 = vmatmul.mubr.f32.gmra.mrb[6].mxu0 %v13456_v13 }
 0x21c   :  { %8114 = vmatprep.mubr.f32.mxu0 %v13457_v55 }
 0x21f   :  { %8115 = vmatmul.mubr.f32.gmra.mrb[8].mxu0 %v13458_v59 }
 0x220   :  { %8117 = vmatprep.mubr.f32.mxu0 %v13459_v33 }
 0x223   :  { %8118 = vmatmul.mubr.f32.gmra.mrb[10].mxu0 %v13460_v7 }
 0x224   :  { %8120 = vmatprep.mubr.f32.mxu0 %v13461_v3 }
 0x227   :  { %8121 = vmatmul.mubr.f32.gmra.mrb[12].mxu0 %v13462_v32 }
 0x228   :  { %8123 = vmatprep.mubr.f32.mxu0 %v13463_v25 }
 0x22b   :  { %8124 = vmatmul.mubr.f32.gmra.mrb[14].mxu0 %v13464_v0 }
 0x22c   :  { %8126 = vmatprep.mubr.f32.mxu0 %v13465_v19 }
 0x22f   :  { %8127 = vmatmul.mubr.f32.gmra.mrb[16].mxu0 %v13466_v29 }
 0x230   :  { %8129 = vmatprep.mubr.f32.mxu0 %v13467_v56 }
 0x233   :  { %8130 = vmatmul.mubr.f32.gmra.mrb[18].mxu0 %v13468_v14 }
 0x234   :  { %8132 = vmatprep.mubr.f32.mxu0 %v13469_v1 }
 0x237   :  { %8133 = vmatmul.mubr.f32.gmra.mrb[20].mxu0 %v13470_v49 }
 0x238   :  { %8135 = vmatprep.mubr.f32.mxu0 %v13471_v47 }
 0x23b   :  { %8136 = vmatmul.mubr.f32.gmra.mrb[22].mxu0 %v13472_v60 }
 0x23c   :  { %8138 = vmatprep.mubr.f32.mxu0 %v13473_v28 }
 0x23f   :  { %8139 = vmatmul.mubr.f32.gmra.mrb[24].mxu0 %v13474_v54 }
 0x240   :  { %8141 = vmatprep.mubr.f32.mxu0 %v13475_v30 }
 0x243   :  { %8142 = vmatmul.mubr.f32.gmra.mrb[26].mxu0 %v13476_v45 }
 0x244   :  { %8144 = vmatprep.mubr.f32.mxu0 %v13477_v37 }
 0x247   :  { %8145 = vmatmul.mubr.f32.gmra.mrb[28].mxu0 %v13478_v40 }
 0x248   :  { %8147 = vmatprep.mubr.f32.mxu0 %v13479_v57 }
 0x24b   :  { %8148 = vmatmul.mubr.f32.gmra.mrb[30].mxu0 %v13480_v12 }
 0x24c   :  { %8150 = vmatprep.mubr.f32.mxu0 %v13481_v62 }
 0x24f   :  { %8151 = vmatmul.mubr.f32.gmra.mrb[32].mxu0 %v13482_v51 }
 0x250   :  { %8153 = vmatprep.mubr.f32.mxu0 %v13483_v2 }
 0x253   :  { %8154 = vmatmul.mubr.f32.gmra.mrb[34].mxu0 %v13484_v44 }
 0x254   :  { %8156 = vmatprep.mubr.f32.mxu0 %v13485_v41 }
 0x257   :  { %8157 = vmatmul.mubr.f32.gmra.mrb[36].mxu0 %v13486_v42 }
 0x258   :  { %8159 = vmatprep.mubr.f32.mxu0 %v13487_v11 }
 0x25b   :  { %8160 = vmatmul.mubr.f32.gmra.mrb[38].mxu0 %v13488_v61 }
 0x25c   :  { %8162 = vmatprep.mubr.f32.mxu0 %v13489_v8 }
 0x25f   :  { %8163 = vmatmul.mubr.f32.gmra.mrb[40].mxu0 %v13490_v52 }
 0x260   :  { %8165 = vmatprep.mubr.f32.mxu0 %v13491_v34 }
 0x263   :  { %8166 = vmatmul.mubr.f32.gmra.mrb[42].mxu0 %v13492_v39 }
 0x264   :  { %8168 = vmatprep.mubr.f32.mxu0 %v13493_v36 }
 0x267   :  { %8169 = vmatmul.mubr.f32.gmra.mrb[44].mxu0 %v13494_v35 }
 0x268   :  { %8171 = vmatprep.mubr.f32.mxu0 %v13495_v18 }
 0x26b   :  { %8172 = vmatmul.mubr.f32.gmra.mrb[46].mxu0 %v13496_v5 }
 0x26c   :  { %8174 = vmatprep.mubr.f32.mxu0 %v13497_v63 }
 0x26f   :  { %8175 = vmatmul.mubr.f32.gmra.mrb[48].mxu0 %v13498_v31 }
 0x270   :  { %8177 = vmatprep.mubr.f32.mxu0 %v13499_v48 }
 0x273   :  { %8178 = vmatmul.mubr.f32.gmra.mrb[50].mxu0 %v13500_v23 }
 0x274   :  { %8180 = vmatprep.mubr.f32.mxu0 %v13501_v38 }
 0x277   :  { %8181 = vmatmul.mubr.f32.gmra.mrb[52].mxu0 %v13502_v26 }
 0x278   :  { %8183 = vmatprep.mubr.f32.mxu0 %v13503_v21 }
 0x27b   :  { %8184 = vmatmul.mubr.f32.gmra.mrb[54].mxu0 %v13504_v10 }
 0x27c   :  { %8186 = vmatprep.mubr.f32.mxu0 %v13505_v16 }
 0x27f   :  { %8187 = vmatmul.mubr.f32.gmra.mrb[56].mxu0 %v13506_v15 }
 0x280   :  { %8189 = vmatprep.mubr.f32.mxu0 %v13507_v9 }
 0x283   :  { %8190 = vmatmul.mubr.f32.gmra.mrb[58].mxu0 %v13508_v17 }
 0x284   :  { %8192 = vmatprep.mubr.f32.mxu0 %v13509_v50 }
 0x287   :  { %8193 = vmatmul.mubr.f32.gmra.mrb[60].mxu0 %v13510_v22 }
 0x288   :  { %8195 = vmatprep.mubr.f32.mxu0 %v13511_v6 }
 0x28b   :  { %8196 = vmatmul.mubr.f32.gmra.mrb[62].mxu0 %v13512_v20 }
 0x28c   :  { %8200 = vmatprep.mubr.f32.mxu0 %v13449_v27  ;;  %v3429_v27 = vld [vmem:[%s12632_s1 + $0x8] sm:$0xff] }
 0x28f   :  { %8201 = vmatmul.mubr.f32.vlgmr.msra.gmra.mrb[0].mxu0 %v13450_v4  ;;  %v10536_v4 = vand.u32 4294901760, %v3429_v27 }
 0x290   :  { %8203 = vmatprep.mubr.f32.mxu0 %v13451_v58  ;;  %v3428_v58 = vld [vmem:[%s12632_s1] sm:$0xff]  ;;  %s9287_s1 = smov [#allocation2]  }
 0x291   :  { %13513 = vst [vmem:[#allocation9_spill] sm:$0xff] %v10536_v4  ;;  %3623 = vmatprep.subr.mxu0 %v10536_v4  ;;  %s7307_s5 = sshll.u32 %s9287_s1, 4  ;;  %s7308_s5 = int_to_ptr.vmem [resolvable:$true] %s7307_s5 }
 0x292   :  { %s9262_s6 = scalar_lea.vmem %s7308_s5, 16384  ;;  %p9267_p1 = scmp.lt.s32.totalorder %s7308_s5, %s7308_s5 }
 0x293   :  { %8204 = vmatmul.mubr.f32.gmra.mrb[2].mxu0 %v13452_v24  ;;  %v10542_v24 = vand.u32 4294901760, %v3428_v58  ;;  %p9263_p0 = scmp.ne.s32.totalorder %s7308_s5, %s9262_s6  ;;  %p9268_p2 = scmp.lt.s32.totalorder %s9262_s6, %s9262_s6 }
 0x294   :  { %8206 = vmatprep.mubr.f32.mxu0 %v13453_v46  ;;  %v12937_v46 = vmov 0.0  }
 0x295   :  { %13514 = vst [vmem:[#allocation10_spill] sm:$0xff] %v10542_v24  ;;  %3625 = vmatpush1.msra.mxu0 %v10542_v24  ;;  %4691 = vmatprep.mubr.f32.mxu1 %v12937_v46  ;;  %p9269_p3 = por %p9268_p2, %p9267_p1 }
 0x297   :  { %8207 = vmatmul.mubr.f32.gmra.mrb[4].mxu0 %v13454_v53  ;;  %v10564_v53 = vsub.f32 %v3429_v27, %v10536_v4  ;;  %p9270_p4 = pnand %p9269_p3, %p9263_p0 }
 0x298   :  { %8209 = vmatprep.mubr.f32.mxu0 %v13455_v43  ;;  %v10567_v43 = vsub.f32 %v3428_v58, %v10542_v24 }
 0x29a   :  { %13515 = vst [vmem:[#allocation13_spill] sm:$0xff] %v10567_v43 }
 0x29b   :  { %8210 = vmatmul.mubr.f32.gmra.mrb[6].mxu0 %v13456_v13  ;;  %v12929_v13 = vand.u32 4294901760, %v10564_v53 }
 0x29c   :  { %8212 = vmatprep.mubr.f32.mxu0 %v13457_v55  ;;  %v12926_v55 = vand.u32 4294901760, %v10567_v43 }
 0x29f   :  { %8213 = vmatmul.mubr.f32.gmra.mrb[8].mxu0 %v13458_v59  ;;  %v4396_v59 = vsub.f32 %v10564_v53, %v12929_v13 }
 0x2a0   :  { %8215 = vmatprep.mubr.f32.mxu0 %v13459_v33  ;;  %v4402_v33 = vsub.f32 %v10567_v43, %v12926_v55 }
 0x2a3   :  { %8216 = vmatmul.mubr.f32.gmra.mrb[10].mxu0 %v13460_v7  ;;  %v4397_v7 = vand.u32 4294901760, %v4396_v59 }
 0x2a4   :  { %8218 = vmatprep.mubr.f32.mxu0 %v13461_v3  ;;  %v4403_v3 = vand.u32 4294901760, %v4402_v33 }
 0x2a5   :  { %8296 = vmatprep.subr.mxu1 %v4397_v7  ;;  %4398 = vmatprep.subr.mxu0 %v4397_v7 }
 0x2a6   :  { %8297 = vmatpush1.msra.mxu1 %v4403_v3 }
 0x2a7   :  { %8219 = vmatmul.mubr.f32.gmra.mrb[12].mxu0 %v13462_v32  ;;  %4918 = vmatprep.subr.mxu1 %v10564_v53 }
 0x2a8   :  { %8221 = vmatprep.mubr.f32.mxu0 %v13463_v25 }
 0x2ab   :  { %8222 = vmatmul.mubr.f32.gmra.mrb[14].mxu0 %v13464_v0 }
 0x2ac   :  { %8224 = vmatprep.mubr.f32.mxu0 %v13465_v19 }
 0x2af   :  { %8225 = vmatmul.mubr.f32.gmra.mrb[16].mxu0 %v13466_v29 }
 0x2b0   :  { %8227 = vmatprep.mubr.f32.mxu0 %v13467_v56 }
 0x2b3   :  { %8228 = vmatmul.mubr.f32.gmra.mrb[18].mxu0 %v13468_v14 }
 0x2b4   :  { %8230 = vmatprep.mubr.f32.mxu0 %v13469_v1 }
 0x2b7   :  { %8231 = vmatmul.mubr.f32.gmra.mrb[20].mxu0 %v13470_v49 }
 0x2b8   :  { %8233 = vmatprep.mubr.f32.mxu0 %v13471_v47 }
 0x2bb   :  { %8234 = vmatmul.mubr.f32.gmra.mrb[22].mxu0 %v13472_v60 }
 0x2bc   :  { %8236 = vmatprep.mubr.f32.mxu0 %v13473_v28 }
 0x2bf   :  { %8237 = vmatmul.mubr.f32.gmra.mrb[24].mxu0 %v13474_v54 }
 0x2c0   :  { %8239 = vmatprep.mubr.f32.mxu0 %v13475_v30 }
 0x2c3   :  { %8240 = vmatmul.mubr.f32.gmra.mrb[26].mxu0 %v13476_v45 }
 0x2c4   :  { %8242 = vmatprep.mubr.f32.mxu0 %v13477_v37 }
 0x2c7   :  { %8243 = vmatmul.mubr.f32.gmra.mrb[28].mxu0 %v13478_v40 }
 0x2c8   :  { %8245 = vmatprep.mubr.f32.mxu0 %v13479_v57 }
 0x2cb   :  { %8246 = vmatmul.mubr.f32.gmra.mrb[30].mxu0 %v13480_v12 }
 0x2cc   :  { %8248 = vmatprep.mubr.f32.mxu0 %v13481_v62 }
 0x2cf   :  { %8249 = vmatmul.mubr.f32.gmra.mrb[32].mxu0 %v13482_v51 }
 0x2d0   :  { %8251 = vmatprep.mubr.f32.mxu0 %v13483_v2 }
 0x2d3   :  { %8252 = vmatmul.mubr.f32.gmra.mrb[34].mxu0 %v13484_v44 }
 0x2d4   :  { %8254 = vmatprep.mubr.f32.mxu0 %v13485_v41 }
 0x2d7   :  { %8255 = vmatmul.mubr.f32.gmra.mrb[36].mxu0 %v13486_v42 }
 0x2d8   :  { %8257 = vmatprep.mubr.f32.mxu0 %v13487_v11 }
 0x2db   :  { %8258 = vmatmul.mubr.f32.gmra.mrb[38].mxu0 %v13488_v61 }
 0x2dc   :  { %8260 = vmatprep.mubr.f32.mxu0 %v13489_v8 }
 0x2df   :  { %8261 = vmatmul.mubr.f32.gmra.mrb[40].mxu0 %v13490_v52 }
 0x2e0   :  { %8263 = vmatprep.mubr.f32.mxu0 %v13491_v34 }
 0x2e3   :  { %8264 = vmatmul.mubr.f32.gmra.mrb[42].mxu0 %v13492_v39 }
 0x2e4   :  { %8266 = vmatprep.mubr.f32.mxu0 %v13493_v36 }
 0x2e7   :  { %8267 = vmatmul.mubr.f32.gmra.mrb[44].mxu0 %v13494_v35 }
 0x2e8   :  { %8269 = vmatprep.mubr.f32.mxu0 %v13495_v18 }
 0x2eb   :  { %8270 = vmatmul.mubr.f32.gmra.mrb[46].mxu0 %v13496_v5 }
 0x2ec   :  { %8272 = vmatprep.mubr.f32.mxu0 %v13497_v63 }
 0x2ef   :  { %8273 = vmatmul.mubr.f32.gmra.mrb[48].mxu0 %v13498_v31 }
 0x2f0   :  { %8275 = vmatprep.mubr.f32.mxu0 %v13499_v48 }
 0x2f3   :  { %8276 = vmatmul.mubr.f32.gmra.mrb[50].mxu0 %v13500_v23 }
 0x2f4   :  { %8278 = vmatprep.mubr.f32.mxu0 %v13501_v38 }
 0x2f7   :  { %8279 = vmatmul.mubr.f32.gmra.mrb[52].mxu0 %v13502_v26 }
 0x2f8   :  { %8281 = vmatprep.mubr.f32.mxu0 %v13503_v21 }
 0x2fb   :  { %8282 = vmatmul.mubr.f32.gmra.mrb[54].mxu0 %v13504_v10 }
 0x2fc   :  { %8284 = vmatprep.mubr.f32.mxu0 %v13505_v16 }
 0x2ff   :  { %8285 = vmatmul.mubr.f32.gmra.mrb[56].mxu0 %v13506_v15 }
 0x300   :  { %8287 = vmatprep.mubr.f32.mxu0 %v13507_v9 }
 0x303   :  { %8288 = vmatmul.mubr.f32.gmra.mrb[58].mxu0 %v13508_v17 }
 0x304   :  { %8290 = vmatprep.mubr.f32.mxu0 %v13509_v50 }
 0x307   :  { %8291 = vmatmul.mubr.f32.gmra.mrb[60].mxu0 %v13510_v22 }
 0x308   :  { %8293 = vmatprep.mubr.f32.mxu0 %v13511_v6 }
 0x30b   :  { %8294 = vmatmul.mubr.f32.gmra.mrb[62].mxu0 %v13512_v20 }
 0x30c   :  { %3688 = vmatprep.mubr.f32.mxu0 %v12937_v46 }
 0x362   :  { %v8202_v32 = vpop.f32.mrb[0].mxu0 }
 0x363   :  { %v3434_v25 = vsel %vm80_vm0, %v8202_v32, 0  ;;  %v3046_v0 = vpop.f32.mrb[1].mxu0 }
 0x364   :  { %v10579_v19 = vand.u32 4294901760, %v3434_v25  ;;  %v3431_v29 = vsel %vm80_vm0, %v3046_v0, 0 }
 0x365   :  { %v10582_v56 = vand.u32 4294901760, %v3431_v29 }
 0x366   :  { %13516 = vst [vmem:[#allocation12_spill] sm:$0xff] %v10579_v19  ;;  %v10585_v14 = vsub.f32 %v3434_v25, %v10579_v19  ;;  %v8205_v1 = vpop.f32.mrb[2].mxu0 }
 0x367   :  { %13517 = vst [vmem:[#allocation14_spill] sm:$0xff] %v10582_v56  ;;  %v10588_v49 = vsub.f32 %v3431_v29, %v10582_v56  ;;  %v3440_v47 = vsel %vm80_vm0, %v8205_v1, 0  ;;  %v3058_v60 = vpop.f32.mrb[3].mxu0 }
 0x368   :  { %v12925_v28 = vand.u32 4294901760, %v10585_v14  ;;  %v10592_v54 = vand.u32 4294901760, %v3440_v47  ;;  %v3437_v30 = vsel %vm80_vm0, %v3058_v60, 0 }
 0x369   :  { %v12928_v45 = vand.u32 4294901760, %v10588_v49  ;;  %v10596_v37 = vand.u32 4294901760, %v3437_v30 }
 0x36a   :  { %13518 = vst [vmem:[#allocation16_spill] sm:$0xff] %v10592_v54  ;;  %v8208_v40 = vpop.f32.mrb[4].mxu0  ;;  %v10605_v51 = vsub.f32 %v3440_v47, %v10592_v54  ;;  %v3703_v44 = vsub.f32 %v10585_v14, %v12925_v28 }
 0x36b   :  { %13519 = vst [vmem:[#allocation17_spill] sm:$0xff] %v10596_v37  ;;  %v3692_v57 = vsub.f32 %v10588_v49, %v12928_v45  ;;  %v10602_v12 = vsub.f32 %v3437_v30, %v10596_v37  ;;  %v3070_v62 = vpop.f32.mrb[5].mxu0  ;;  %v3446_v11 = vsel %vm80_vm0, %v8208_v40, 0 }
 0x36c   :  { %v3443_v2 = vsel %vm80_vm0, %v3070_v62, 0  ;;  %v12922_v34 = vand.u32 4294901760, %v10605_v51  ;;  %v10616_v39 = vand.u32 4294901760, %v3446_v11  ;;  %v3704_v35 = vand.u32 4294901760, %v3703_v44 }
 0x36d   :  { %v3693_v41 = vand.u32 4294901760, %v3692_v57  ;;  %v12924_v42 = vand.u32 4294901760, %v10602_v12  ;;  %v10613_v61 = vand.u32 4294901760, %v3443_v2 }
 0x36e   :  { %v8211_v8 = vpop.f32.mrb[6].mxu0  ;;  %13521 = vst [vmem:[#allocation22_spill] sm:$0xff] %v10616_v39  ;;  %v10627_v48 = vsub.f32 %v3446_v11, %v10616_v39  ;;  %v3725_v23 = vsub.f32 %v10605_v51, %v12922_v34 }
 0x36f   :  { %13520 = vst [vmem:[#allocation19_spill] sm:$0xff] %v10613_v61  ;;  %v3082_v52 = vpop.f32.mrb[7].mxu0  ;;  %3694 = vmatmul.mubr.f32.vlgmr.msra.gmra.mrb[64].mxu0 %v3693_v41  ;;  %v10620_v36 = vsub.f32 %v3443_v2, %v10613_v61  ;;  %v3714_v18 = vsub.f32 %v10602_v12, %v12924_v42  ;;  %v3452_v26 = vsel %vm80_vm0, %v8211_v8, 0 }
 0x370   :  { %3699 = vmatprep.mubr.f32.mxu0 %v12937_v46  ;;  %4404 = vmatpush1.msra.mxu0 %v4403_v3  ;;  %v3449_v5 = vsel %vm80_vm0, %v3082_v52, 0  ;;  %13523 = vst [vmem:[#allocation26_spill] sm:$0xff] %v10627_v48  ;;  %v12920_v9 = vand.u32 4294901760, %v10627_v48  ;;  %v10638_v17 = vand.u32 4294901760, %v3452_v26  ;;  %v3726_v22 = vand.u32 4294901760, %v3725_v23 }
 0x371   :  { %13522 = vst [vmem:[#allocation25_spill] sm:$0xff] %v10620_v36  ;;  %v12921_v38 = vand.u32 4294901760, %v10620_v36  ;;  %v10635_v21 = vand.u32 4294901760, %v3449_v5  ;;  %v3715_v10 = vand.u32 4294901760, %v3714_v18 }
 0x372   :  { %v8214_v63 = vpop.f32.mrb[8].mxu0  ;;  %13525 = vst [vmem:[#allocation31_spill] sm:$0xff] %v10638_v17  ;;  %v10649_v59 = vsub.f32 %v3452_v26, %v10638_v17  ;;  %v3747_v33 = vsub.f32 %v10627_v48, %v12920_v9 }
 0x373   :  { %v3094_v31 = vpop.f32.mrb[9].mxu0  ;;  %3705 = vmatmul.mubr.f32.gmra.mrb[66].mxu0 %v3704_v35  ;;  %13524 = vst [vmem:[#allocation27_spill] sm:$0xff] %v10635_v21  ;;  %v10642_v50 = vsub.f32 %v3449_v5, %v10635_v21  ;;  %v3736_v6 = vsub.f32 %v10620_v36, %v12921_v38  ;;  %v3458_v3 = vsel %vm80_vm0, %v8214_v63, 0 }
 0x374   :  { %3710 = vmatprep.mubr.f32.mxu0 %v12937_v46  ;;  %v3455_v20 = vsel %vm80_vm0, %v3094_v31, 0  ;;  %13527 = vst [vmem:[#allocation33_spill] sm:$0xff] %v10649_v59  ;;  %v12917_v1 = vand.u32 4294901760, %v10649_v59  ;;  %v10660_v47 = vand.u32 4294901760, %v3458_v3  ;;  %v3748_v30 = vand.u32 4294901760, %v3747_v33 }
 0x375   :  { %13526 = vst [vmem:[#allocation32_spill] sm:$0xff] %v10642_v50  ;;  %v12918_v7 = vand.u32 4294901760, %v10642_v50  ;;  %v10657_v32 = vand.u32 4294901760, %v3455_v20  ;;  %v3737_v25 = vand.u32 4294901760, %v3736_v6 }
 0x376   :  { %v8217_v16 = vpop.f32.mrb[10].mxu0  ;;  %13529 = vst [vmem:[#allocation37_spill] sm:$0xff] %v10660_v47  ;;  %v10673_v44 = vsub.f32 %v3458_v3, %v10660_v47  ;;  %v3769_v41 = vsub.f32 %v10649_v59, %v12917_v1 }
 0x377   :  { %v3106_v15 = vpop.f32.mrb[11].mxu0  ;;  %3716 = vmatmul.mubr.f32.gmra.mrb[68].mxu0 %v3715_v10  ;;  %13528 = vst [vmem:[#allocation35_spill] sm:$0xff] %v10657_v32  ;;  %v10664_v60 = vsub.f32 %v3455_v20, %v10657_v32  ;;  %v3758_v40 = vsub.f32 %v10642_v50, %v12918_v7  ;;  %v3464_v8 = vsel %vm80_vm0, %v8217_v16, 0 }
 0x378   :  { %3721 = vmatprep.mubr.f32.mxu0 %v12937_v46  ;;  %v3461_v57 = vsel %vm80_vm0, %v3106_v15, 0  ;;  %13531 = vst [vmem:[#allocation42_spill] sm:$0xff] %v10673_v44  ;;  %v12914_v63 = vand.u32 4294901760, %v10673_v44  ;;  %v10688_v31 = vand.u32 4294901760, %v3464_v8  ;;  %v3770_v26 = vand.u32 4294901760, %v3769_v41 }
 0x379   :  { %13530 = vst [vmem:[#allocation41_spill] sm:$0xff] %v10664_v60  ;;  %v12916_v11 = vand.u32 4294901760, %v10664_v60  ;;  %v10681_v52 = vand.u32 4294901760, %v3461_v57  ;;  %v3759_v35 = vand.u32 4294901760, %v3758_v40 }
 0x37a   :  { %v8220_v27 = vpop.f32.mrb[12].mxu0  ;;  %13533 = vst [vmem:[#allocation47_spill] sm:$0xff] %v10688_v31  ;;  %v10703_v6 = vsub.f32 %v3464_v8, %v10688_v31  ;;  %v3791_v20 = vsub.f32 %v10673_v44, %v12914_v63 }
 0x37b   :  { %v3118_v58 = vpop.f32.mrb[13].mxu0  ;;  %3727 = vmatmul.mubr.f32.gmra.mrb[70].mxu0 %v3726_v22  ;;  %13532 = vst [vmem:[#allocation43_spill] sm:$0xff] %v10681_v52  ;;  %v10692_v23 = vsub.f32 %v3461_v57, %v10681_v52  ;;  %v3780_v10 = vsub.f32 %v10664_v60, %v12916_v11  ;;  %v3470_v3 = vsel %vm80_vm0, %v8220_v27, 0 }
 0x37c   :  { %3732 = vmatprep.mubr.f32.mxu0 %v12937_v46  ;;  %v3467_v16 = vsel %vm80_vm0, %v3118_v58, 0  ;;  %13535 = vst [vmem:[#allocation50_spill] sm:$0xff] %v10703_v6  ;;  %v12919_v57 = vand.u32 4294901760, %v10703_v6  ;;  %v10718_v41 = vand.u32 4294901760, %v3470_v3 }
 0x37d   :  { %13534 = vst [vmem:[#allocation49_spill] sm:$0xff] %v10692_v23  ;;  %v12915_v33 = vand.u32 4294901760, %v10692_v23  ;;  %v3781_v58 = vand.u32 4294901760, %v3780_v10 }
 0x37e   :  { %v8223_v0 = vpop.f32.mrb[14].mxu0  ;;  %13537 = vst [vmem:[#allocation54_spill] sm:$0xff] %v10718_v41 }
 0x37f   :  { %v3130_v29 = vpop.f32.mrb[15].mxu0  ;;  %3738 = vmatmul.mubr.f32.gmra.mrb[72].mxu0 %v3737_v25  ;;  %v10711_v25 = vand.u32 4294901760, %v3467_v16  ;;  %v3802_v27 = vsub.f32 %v10692_v23, %v12915_v33  ;;  %v3476_v33 = vsel %vm80_vm0, %v8223_v0, 0 }
 0x380   :  { %3743 = vmatprep.mubr.f32.mxu0 %v12937_v46 }
 0x381   :  { %13536 = vst [vmem:[#allocation52_spill] sm:$0xff] %v10711_v25  ;;  %v10722_v8 = vsub.f32 %v3467_v16, %v10711_v25  ;;  %v3813_v16 = vsub.f32 %v10703_v6, %v12919_v57 }
 0x382   :  { %v10670_v62 = vpop.f32.mrb[16].mxu0 }
 0x383   :  { %v3142_v2 = vpop.f32.mrb[17].mxu0  ;;  %3749 = vmatmul.mubr.f32.gmra.mrb[74].mxu0 %v3748_v30  ;;  %13538 = vst [vmem:[#allocation57_spill] sm:$0xff] %v10722_v8  ;;  %v3814_v9 = vand.u32 4294901760, %v3813_v16 }
 0x384   :  { %3754 = vmatprep.mubr.f32.mxu0 %v12937_v46 }
 0x386   :  { %v10683_v18 = vpop.f32.mrb[18].mxu0 }
 0x387   :  { %v10685_v5 = vpop.f32.mrb[19].mxu0  ;;  %3760 = vmatmul.mubr.f32.gmra.mrb[76].mxu0 %v3759_v35  ;;  %v3792_v35 = vand.u32 4294901760, %v3791_v20  ;;  %v12923_v20 = vand.u32 4294901760, %v10722_v8 }
 0x388   :  { %3765 = vmatprep.mubr.f32.mxu0 %v12937_v46 }
 0x389   :  { %v3824_v0 = vsub.f32 %v10722_v8, %v12923_v20  ;;  %v3482_v20 = vsel %vm80_vm0, %v10670_v62, 0 }
 0x38a   :  { %v10698_v15 = vpop.f32.mrb[20].mxu0  ;;  %v10779_v55 = vand.u32 4294901760, %v3482_v20 }
 0x38b   :  { %v10700_v22 = vpop.f32.mrb[21].mxu0  ;;  %3771 = vmatmul.mubr.f32.gmra.mrb[78].mxu0 %v3770_v26  ;;  %v3473_v26 = vsel %vm80_vm0, %v3130_v29, 0  ;;  %v3803_v29 = vand.u32 4294901760, %v3802_v27  ;;  %v3479_v27 = vsel %vm80_vm0, %v3142_v2, 0  ;;  %v3825_v42 = vand.u32 4294901760, %v3824_v0 }
 0x38c   :  { %3776 = vmatprep.mubr.f32.mxu0 %v12937_v46  ;;  %v10741_v11 = vand.u32 4294901760, %v3473_v26  ;;  %v10772_v2 = vand.u32 4294901760, %v3479_v27  ;;  %13545 = vst [vmem:[#allocation70_spill] sm:$0xff] %v10779_v55  ;;  %v3485_v0 = vsel %vm80_vm0, %v10685_v5, 0 }
 0x38e   :  { %v10713_v30 = vpop.f32.mrb[22].mxu0  ;;  %13540 = vst [vmem:[#allocation60_spill] sm:$0xff] %v10741_v11  ;;  %v10752_v57 = vsub.f32 %v3473_v26, %v10741_v11  ;;  %13544 = vst [vmem:[#allocation69_spill] sm:$0xff] %v10772_v2 }
 0x38f   :  { %v10715_v40 = vpop.f32.mrb[23].mxu0  ;;  %3782 = vmatmul.mubr.f32.gmra.mrb[80].mxu0 %v3781_v58  ;;  %v10733_v58 = vsub.f32 %v3470_v3, %v10718_v41 }
 0x390   :  { %3787 = vmatprep.mubr.f32.mxu0 %v12937_v46  ;;  %13542 = vst [vmem:[#allocation64_spill] sm:$0xff] %v10752_v57  ;;  %v12932_v16 = vand.u32 4294901760, %v10752_v57  ;;  %v3497_v52 = vsel %vm80_vm0, %v10715_v40, 0 }
 0x391   :  { %13539 = vst [vmem:[#allocation58_spill] sm:$0xff] %v10733_v58  ;;  %v12927_v3 = vand.u32 4294901760, %v10733_v58 }
 0x392   :  { %v10728_v10 = vpop.f32.mrb[24].mxu0  ;;  %v3846_v62 = vsub.f32 %v10752_v57, %v12932_v16 }
 0x393   :  { %v10730_v63 = vpop.f32.mrb[25].mxu0  ;;  %3793 = vmatmul.mubr.f32.gmra.mrb[82].mxu0 %v3792_v35  ;;  %v10748_v35 = vand.u32 4294901760, %v3476_v33  ;;  %v3835_v26 = vsub.f32 %v10733_v58, %v12927_v3  ;;  %v10783_v3 = vsub.f32 %v3479_v27, %v10772_v2  ;;  %v10803_v2 = vand.u32 4294901760, %v3485_v0 }
 0x394   :  { %3798 = vmatprep.mubr.f32.mxu0 %v12937_v46 }
 0x395   :  { %13541 = vst [vmem:[#allocation63_spill] sm:$0xff] %v10748_v35  ;;  %13546 = vst [vmem:[#allocation73_spill] sm:$0xff] %v10783_v3  ;;  %v3836_v45 = vand.u32 4294901760, %v3835_v26  ;;  %v10818_v5 = vsub.f32 %v3485_v0, %v10803_v2 }
 0x396   :  { %v10743_v1 = vpop.f32.mrb[26].mxu0  ;;  %13549 = vst [vmem:[#allocation75_spill] sm:$0xff] %v10803_v2 }
 0x397   :  { %v10745_v7 = vpop.f32.mrb[27].mxu0  ;;  %3804 = vmatmul.mubr.f32.gmra.mrb[84].mxu0 %v3803_v29  ;;  %v10763_v29 = vsub.f32 %v3476_v33, %v10748_v35  ;;  %v3488_v33 = vsel %vm80_vm0, %v10683_v18, 0  ;;  %13553 = vst [vmem:[#allocation82_spill] sm:$0xff] %v10818_v5 }
 0x398   :  { %3809 = vmatprep.mubr.f32.mxu0 %v12937_v46  ;;  %v10813_v11 = vand.u32 4294901760, %v3488_v33 }
 0x399   :  { %13543 = vst [vmem:[#allocation66_spill] sm:$0xff] %v10763_v29  ;;  %v13548_v26 = vand.u32 4294901760, %v10763_v29 }
 0x39a   :  { %v10758_v38 = vpop.f32.mrb[28].mxu0  ;;  %13551 = vst [vmem:[#allocation80_spill] sm:$0xff] %v10813_v11  ;;  %v10835_v25 = vsub.f32 %v3488_v33, %v10813_v11 }
 0x39b   :  { %v10760_v34 = vpop.f32.mrb[29].mxu0  ;;  %3815 = vmatmul.mubr.f32.gmra.mrb[86].mxu0 %v3814_v9  ;;  %v3857_v16 = vsub.f32 %v10763_v29, %v13548_v26  ;;  %v13552_v26 = vmov 0.0  }
 0x39c   :  { %3820 = vmatprep.mubr.f32.mxu0 %v12937_v46  ;;  %13556 = vst [vmem:[#allocation86_spill] sm:$0xff] %v10835_v25  ;;  %v13564_v40 = vand.u32 4294901760, %v10835_v25 }
 0x39e   :  { %v10774_v28 = vpop.f32.mrb[30].mxu0 }
 0x39f   :  { %v10776_v9 = vpop.f32.mrb[31].mxu0  ;;  %3826 = vmatmul.mubr.f32.gmra.mrb[88].mxu0 %v3825_v42  ;;  %v10791_v42 = vsub.f32 %v3482_v20, %v10779_v55  ;;  %v3847_v20 = vand.u32 4294901760, %v3846_v62 }
 0x3a0   :  { %3831 = vmatprep.mubr.f32.mxu0 %v12937_v46 }
 0x3a1   :  { %13547 = vst [vmem:[#allocation74_spill] sm:$0xff] %v10791_v42 }
 0x3a2   :  { %v8250_v13 = vpop.f32.mrb[32].mxu0 }
 0x3a3   :  { %v3238_v35 = vpop.f32.mrb[33].mxu0  ;;  %3837 = vmatmul.mubr.f32.gmra.mrb[90].mxu0 %v3836_v45  ;;  %v10809_v55 = vsel %vm80_vm0, %v8250_v13, 0  ;;  %v3858_v13 = vand.u32 4294901760, %v3857_v16  ;;  %v3494_v16 = vsel %vm80_vm0, %v10698_v15, 0 }
 0x3a4   :  { %v10796_v27 = vsel %vm80_vm0, %v3238_v35, 0  ;;  %3842 = vmatprep.mubr.f32.mxu0 %v12937_v46  ;;  %v10821_v62 = vand.u32 4294901760, %v10809_v55  ;;  %v3491_v46 = vsel %vm80_vm0, %v10700_v22, 0  ;;  %v13557_v22 = vand.u32 4294901760, %v10791_v42 }
 0x3a5   :  { %v10806_v45 = vand.u32 4294901760, %v10796_v27  ;;  %v10855_v47 = vand.u32 4294901760, %v3494_v16 }
 0x3a6   :  { %v8253_v18 = vpop.f32.mrb[34].mxu0  ;;  %13554 = vst [vmem:[#allocation84_spill] sm:$0xff] %v10821_v62 }
 0x3a7   :  { %13550 = vst [vmem:[#allocation79_spill] sm:$0xff] %v10806_v45  ;;  %v3250_v35 = vpop.f32.mrb[35].mxu0  ;;  %3848 = vmatmul.mubr.f32.gmra.mrb[92].mxu0 %v3847_v20  ;;  %4693 = vmatmul.mubr.f32.vlgmr.msra.gmra.mrb[0].mxu1 %v10806_v45  ;;  %v13555_v20 = vand.u32 4294901760, %v10783_v3  ;;  %v10851_v11 = vsel %vm80_vm0, %v8253_v18, 0  ;;  %13560 = vst [vmem:[#allocation92_spill] sm:$0xff] %v10855_v47 }
 0x3a8   :  { %4921 = vmatpush1.msra.mxu1 %v10567_v43  ;;  %3853 = vmatprep.mubr.f32.mxu0 %v13552_v26  ;;  %v10831_v43 = vsel %vm80_vm0, %v3250_v35, 0  ;;  %v3879_v35 = vsub.f32 %v10791_v42, %v13557_v22 }
 0x3a9   :  { %4698 = vmatprep.mubr.f32.mxu1 %v13552_v26  ;;  %v3868_v41 = vsub.f32 %v10783_v3, %v13555_v20  ;;  %5498 = vmatprep.subr.mxu1 %v10536_v4  ;;  %v12963_v20 = vand.u32 4294901760, %v10818_v5  ;;  %v10845_v4 = vand.u32 4294901760, %v3491_v46 }
 0x3aa   :  { %v8256_v0 = vpop.f32.mrb[36].mxu0  ;;  %v3880_v18 = vand.u32 4294901760, %v3879_v35  ;;  %v3500_v35 = vsel %vm80_vm0, %v10713_v30, 0 }
 0x3ab   :  { %v3262_v2 = vpop.f32.mrb[37].mxu0  ;;  %3859 = vmatmul.mubr.f32.gmra.mrb[94].mxu0 %v3858_v13  ;;  %4700 = vmatmul.mubr.f32.gmra.mrb[2].mxu1 %v10821_v62  ;;  %13558 = vst [vmem:[#allocation89_spill] sm:$0xff] %v10845_v4  ;;  %v10848_v13 = vand.u32 4294901760, %v10831_v43  ;;  %v3869_v33 = vand.u32 4294901760, %v3868_v41  ;;  %v10860_v22 = vsub.f32 %v3491_v46, %v10845_v4  ;;  %v10863_v41 = vand.u32 4294901760, %v10851_v11 }
 0x3ac   :  { %3864 = vmatprep.mubr.f32.mxu0 %v13552_v26  ;;  %4705 = vmatprep.mubr.f32.mxu1 %v13552_v26  ;;  %v10871_v32 = vsel %vm80_vm0, %v3262_v2, 0  ;;  %v10877_v46 = vsub.f32 %v3494_v16, %v10855_v47  ;;  %v3901_v2 = vsub.f32 %v10835_v25, %v13564_v40  ;;  %v10887_v4 = vand.u32 4294901760, %v3497_v52 }
 0x3ad   :  { %13559 = vst [vmem:[#allocation91_spill] sm:$0xff] %v10848_v13  ;;  %13561 = vst [vmem:[#allocation95_spill] sm:$0xff] %v10860_v22  ;;  %v10893_v47 = vsel %vm80_vm0, %v8256_v0, 0  ;;  %v10901_v61 = vand.u32 4294901760, %v3500_v35  ;;  %v13570_v54 = vand.u32 4294901760, %v10860_v22  ;;  %v3503_v40 = vsel %vm80_vm0, %v10730_v63, 0 }
 0x3ae   :  { %v8259_v15 = vpop.f32.mrb[38].mxu0  ;;  %13562 = vst [vmem:[#allocation96_spill] sm:$0xff] %v10863_v41  ;;  %13563 = vst [vmem:[#allocation100_spill] sm:$0xff] %v10877_v46  ;;  %v10909_v0 = vand.u32 4294901760, %v10893_v47 }
 0x3af   :  { %v3274_v31 = vpop.f32.mrb[39].mxu0  ;;  %3870 = vmatmul.mubr.f32.gmra.mrb[96].mxu0 %v3869_v33  ;;  %4707 = vmatmul.mubr.f32.gmra.mrb[4].mxu1 %v10848_v13  ;;  %v3890_v33 = vsub.f32 %v10818_v5, %v12963_v20  ;;  %13565 = vst [vmem:[#allocation102_spill] sm:$0xff] %v10887_v4  ;;  %13567 = vst [vmem:[#allocation107_spill] sm:$0xff] %v10901_v61  ;;  %v3902_v20 = vand.u32 4294901760, %v3901_v2  ;;  %v3506_v2 = vsel %vm80_vm0, %v10728_v10, 0 }
 0x3b0   :  { %3875 = vmatprep.mubr.f32.mxu0 %v13552_v26  ;;  %4712 = vmatprep.mubr.f32.mxu1 %v13552_v26  ;;  %13569 = vst [vmem:[#allocation113_spill] sm:$0xff] %v10909_v0  ;;  %v10917_v37 = vsel %vm80_vm0, %v3274_v31, 0 }
 0x3b1   :  { %v3891_v16 = vand.u32 4294901760, %v3890_v33  ;;  %v10906_v33 = vsub.f32 %v3497_v52, %v10887_v4  ;;  %v10925_v52 = vsub.f32 %v3500_v35, %v10901_v61  ;;  %v10935_v4 = vand.u32 4294901760, %v3503_v40 }
 0x3b2   :  { %v10873_v17 = vpop.f32.mrb[40].mxu0  ;;  %v10941_v61 = vsel %vm80_vm0, %v8259_v15, 0 }
 0x3b3   :  { %v3286_v21 = vpop.f32.mrb[41].mxu0  ;;  %3881 = vmatmul.mubr.f32.gmra.mrb[98].mxu0 %v3880_v18  ;;  %4714 = vmatmul.mubr.f32.gmra.mrb[6].mxu1 %v10863_v41  ;;  %v10890_v18 = vand.u32 4294901760, %v10871_v32  ;;  %13568 = vst [vmem:[#allocation112_spill] sm:$0xff] %v10906_v33  ;;  %13571 = vst [vmem:[#allocation114_spill] sm:$0xff] %v10925_v52  ;;  %v10957_v15 = vand.u32 4294901760, %v10941_v61  ;;  %v13578_v5 = vand.u32 4294901760, %v10906_v33 }
 0x3b4   :  { %3886 = vmatprep.mubr.f32.mxu0 %v13552_v26  ;;  %4719 = vmatprep.mubr.f32.mxu1 %v13552_v26  ;;  %13573 = vst [vmem:[#allocation121_spill] sm:$0xff] %v10935_v4  ;;  %v10965_v56 = vsel %vm80_vm0, %v3286_v21, 0  ;;  %v13580_v21 = vand.u32 4294901760, %v10925_v52 }
 0x3b5   :  { %13566 = vst [vmem:[#allocation106_spill] sm:$0xff] %v10890_v18  ;;  %13577 = vst [vmem:[#allocation115_spill] sm:$0xff] %v10957_v15 }
 0x3b6   :  { %v10895_v30 = vpop.f32.mrb[42].mxu0 }
 0x3b7   :  { %v10897_v39 = vpop.f32.mrb[43].mxu0  ;;  %3892 = vmatmul.mubr.f32.gmra.mrb[100].mxu0 %v3891_v16  ;;  %4721 = vmatmul.mubr.f32.gmra.mrb[8].mxu1 %v10890_v18  ;;  %v3912_v16 = vsub.f32 %v10860_v22, %v13570_v54  ;;  %v13572_v54 = vand.u32 4294901760, %v10877_v46 }
 0x3b8   :  { %3897 = vmatprep.mubr.f32.mxu0 %v13552_v26  ;;  %4726 = vmatprep.mubr.f32.mxu1 %v13552_v26  ;;  %v11015_v57 = vsel %vm80_vm0, %v10897_v39, 0 }
 0x3b9   :  { %v3923_v63 = vsub.f32 %v10877_v46, %v13572_v54  ;;  %v3913_v35 = vand.u32 4294901760, %v3912_v16  ;;  %v10949_v46 = vand.u32 4294901760, %v3506_v2  ;;  %v10954_v16 = vsub.f32 %v3503_v40, %v10935_v4 }
 0x3ba   :  { %v10919_v25 = vpop.f32.mrb[44].mxu0  ;;  %v3509_v54 = vsel %vm80_vm0, %v10745_v7, 0  ;;  %v3945_v7 = vsub.f32 %v10925_v52, %v13580_v21  ;;  %v3515_v21 = vsel %vm80_vm0, %v10760_v34, 0 }
 0x3bb   :  { %v10921_v19 = vpop.f32.mrb[45].mxu0  ;;  %3903 = vmatmul.mubr.f32.gmra.mrb[102].mxu0 %v3902_v20  ;;  %4728 = vmatmul.mubr.f32.gmra.mrb[10].mxu1 %v10909_v0  ;;  %v10938_v20 = vand.u32 4294901760, %v10917_v37  ;;  %13575 = vst [vmem:[#allocation98_spill] sm:$0xff] %v10949_v46  ;;  %13576 = vst [vmem:[#allocation105_spill] sm:$0xff] %v10954_v16  ;;  %v3924_v31 = vand.u32 4294901760, %v3923_v63  ;;  %v10973_v40 = vsub.f32 %v3506_v2, %v10949_v46  ;;  %v3512_v63 = vsel %vm80_vm0, %v10743_v1, 0 }
 0x3bc   :  { %3908 = vmatprep.mubr.f32.mxu0 %v13552_v26  ;;  %4733 = vmatprep.mubr.f32.mxu1 %v13552_v26  ;;  %v10983_v4 = vand.u32 4294901760, %v3509_v54  ;;  %v10990_v46 = vsel %vm80_vm0, %v10873_v17, 0  ;;  %v3946_v52 = vand.u32 4294901760, %v3945_v7  ;;  %v13586_v29 = vand.u32 4294901760, %v10954_v16 }
 0x3bd   :  { %13574 = vst [vmem:[#allocation125_spill] sm:$0xff] %v10938_v20  ;;  %13579 = vst [vmem:[#allocation118_spill] sm:$0xff] %v10973_v40  ;;  %v11006_v17 = vand.u32 4294901760, %v10990_v46  ;;  %v13588_v34 = vand.u32 4294901760, %v10973_v40  ;;  %v11065_v23 = vsel %vm80_vm0, %v10921_v19, 0 }
 0x3be   :  { %v10943_v10 = vpop.f32.mrb[46].mxu0  ;;  %13581 = vst [vmem:[#allocation122_spill] sm:$0xff] %v10983_v4 }
 0x3bf   :  { %v10945_v22 = vpop.f32.mrb[47].mxu0  ;;  %3914 = vmatmul.mubr.f32.gmra.mrb[104].mxu0 %v3913_v35  ;;  %4735 = vmatmul.mubr.f32.gmra.mrb[12].mxu1 %v10938_v20  ;;  %v3934_v35 = vsub.f32 %v10906_v33, %v13578_v5  ;;  %v10998_v5 = vand.u32 4294901760, %v3512_v63  ;;  %13585 = vst [vmem:[#allocation5_spill] sm:$0xff] %v11006_v17  ;;  %v3967_v39 = vsub.f32 %v10973_v40, %v13588_v34  ;;  %v3521_v34 = vsel %vm80_vm0, %v10776_v9, 0 }
 0x3c0   :  { %3919 = vmatprep.mubr.f32.mxu0 %v13552_v26  ;;  %4740 = vmatprep.mubr.f32.mxu1 %v13552_v26 }
 0x3c1   :  { %v3935_v2 = vand.u32 4294901760, %v3934_v35  ;;  %13583 = vst [vmem:[#allocation130_spill] sm:$0xff] %v10998_v5  ;;  %v11003_v35 = vsub.f32 %v3509_v54, %v10983_v4  ;;  %v11023_v54 = vsub.f32 %v3512_v63, %v10998_v5  ;;  %v11033_v4 = vand.u32 4294901760, %v3515_v21 }
 0x3c2   :  { %v10967_v42 = vpop.f32.mrb[48].mxu0  ;;  %v11040_v5 = vsel %vm80_vm0, %v10895_v30, 0  ;;  %v3968_v40 = vand.u32 4294901760, %v3967_v39 }
 0x3c3   :  { %v10969_v3 = vpop.f32.mrb[49].mxu0  ;;  %3925 = vmatmul.mubr.f32.gmra.mrb[106].mxu0 %v3924_v31  ;;  %4742 = vmatmul.mubr.f32.gmra.mrb[14].mxu1 %v10957_v15  ;;  %v10986_v31 = vand.u32 4294901760, %v10965_v56  ;;  %13584 = vst [vmem:[#allocation131_spill] sm:$0xff] %v11003_v35  ;;  %13587 = vst [vmem:[#allocation6_spill] sm:$0xff] %v11023_v54  ;;  %v11056_v30 = vand.u32 4294901760, %v11040_v5  ;;  %v13594_v6 = vand.u32 4294901760, %v11003_v35 }
 0x3c4   :  { %3930 = vmatprep.mubr.f32.mxu0 %v13552_v26  ;;  %4747 = vmatprep.mubr.f32.mxu1 %v13552_v26  ;;  %13589 = vst [vmem:[#allocation7_spill] sm:$0xff] %v11033_v4  ;;  %v13596_v19 = vand.u32 4294901760, %v11023_v54  ;;  %v11156_v36 = vsel %vm80_vm0, %v10969_v3, 0 }
 0x3c5   :  { %13582 = vst [vmem:[#allocation127_spill] sm:$0xff] %v10986_v31  ;;  %13593 = vst [vmem:[#allocation18_spill] sm:$0xff] %v11056_v30 }
 0x3c6   :  { %v10992_v1 = vpop.f32.mrb[50].mxu0  ;;  %v3989_v9 = vsub.f32 %v11023_v54, %v13596_v19  ;;  %v11113_v19 = vsel %vm80_vm0, %v10945_v22, 0 }
 0x3c7   :  { %v10994_v33 = vpop.f32.mrb[51].mxu0  ;;  %3936 = vmatmul.mubr.f32.gmra.mrb[108].mxu0 %v3935_v2  ;;  %4749 = vmatmul.mubr.f32.gmra.mrb[16].mxu1 %v10986_v31  ;;  %v3956_v2 = vsub.f32 %v10954_v16, %v13586_v29  ;;  %v3518_v29 = vsel %vm80_vm0, %v10758_v38, 0 }
 0x3c8   :  { %3941 = vmatprep.mubr.f32.mxu0 %v13552_v26  ;;  %4754 = vmatprep.mubr.f32.mxu1 %v13552_v26  ;;  %v11048_v7 = vand.u32 4294901760, %v3518_v29  ;;  %v3990_v54 = vand.u32 4294901760, %v3989_v9  ;;  %v11127_v9 = vand.u32 4294901760, %v11113_v19 }
 0x3c9   :  { %v3957_v63 = vand.u32 4294901760, %v3956_v2  ;;  %v11053_v2 = vsub.f32 %v3515_v21, %v11033_v4  ;;  %v11083_v4 = vand.u32 4294901760, %v3521_v34 }
 0x3ca   :  { %v11017_v58 = vpop.f32.mrb[52].mxu0  ;;  %13591 = vst [vmem:[#allocation11_spill] sm:$0xff] %v11048_v7  ;;  %v11073_v21 = vsub.f32 %v3518_v29, %v11048_v7  ;;  %v11090_v7 = vsel %vm80_vm0, %v10919_v25, 0  ;;  %13602 = vst [vmem:[#allocation29_spill] sm:$0xff] %v11127_v9 }
 0x3cb   :  { %v11019_v8 = vpop.f32.mrb[53].mxu0  ;;  %3947 = vmatmul.mubr.f32.gmra.mrb[110].mxu0 %v3946_v52  ;;  %4756 = vmatmul.mubr.f32.gmra.mrb[18].mxu1 %v11006_v17  ;;  %v11036_v52 = vand.u32 4294901760, %v11015_v57  ;;  %13592 = vst [vmem:[#allocation15_spill] sm:$0xff] %v11053_v2  ;;  %13597 = vst [vmem:[#allocation21_spill] sm:$0xff] %v11083_v4  ;;  %v11106_v25 = vand.u32 4294901760, %v11090_v7  ;;  %v13601_v59 = vand.u32 4294901760, %v11053_v2 }
 0x3cc   :  { %3952 = vmatprep.mubr.f32.mxu0 %v13552_v26  ;;  %4761 = vmatprep.mubr.f32.mxu1 %v13552_v26  ;;  %13595 = vst [vmem:[#allocation20_spill] sm:$0xff] %v11073_v21 }
 0x3cd   :  { %13590 = vst [vmem:[#allocation8_spill] sm:$0xff] %v11036_v52  ;;  %13600 = vst [vmem:[#allocation28_spill] sm:$0xff] %v11106_v25 }
 0x3ce   :  { %v11042_v38 = vpop.f32.mrb[54].mxu0 }
 0x3cf   :  { %v11044_v16 = vpop.f32.mrb[55].mxu0  ;;  %3958 = vmatmul.mubr.f32.gmra.mrb[112].mxu0 %v3957_v63  ;;  %4763 = vmatmul.mubr.f32.gmra.mrb[20].mxu1 %v11036_v52  ;;  %v3978_v63 = vsub.f32 %v11003_v35, %v13594_v6  ;;  %v3524_v6 = vsel %vm80_vm0, %v10774_v28, 0 }
 0x3d0   :  { %3963 = vmatprep.mubr.f32.mxu0 %v13552_v26  ;;  %4768 = vmatprep.mubr.f32.mxu1 %v13552_v26  ;;  %v11098_v39 = vand.u32 4294901760, %v3524_v6 }
 0x3d1   :  { %v3979_v29 = vand.u32 4294901760, %v3978_v63  ;;  %v11103_v63 = vsub.f32 %v3521_v34, %v11083_v4  ;;  %v13603_v4 = vand.u32 4294901760, %v11073_v21 }
 0x3d2   :  { %v11067_v44 = vpop.f32.mrb[56].mxu0  ;;  %13599 = vst [vmem:[#allocation24_spill] sm:$0xff] %v11098_v39  ;;  %v11121_v34 = vsub.f32 %v3524_v6, %v11098_v39 }
 0x3d3   :  { %v11069_v60 = vpop.f32.mrb[57].mxu0  ;;  %3969 = vmatmul.mubr.f32.gmra.mrb[114].mxu0 %v3968_v40  ;;  %4770 = vmatmul.mubr.f32.gmra.mrb[22].mxu1 %v11056_v30  ;;  %v11086_v40 = vand.u32 4294901760, %v11065_v23 }
 0x3d4   :  { %3974 = vmatprep.mubr.f32.mxu0 %v13552_v26  ;;  %4775 = vmatprep.mubr.f32.mxu1 %v13552_v26  ;;  %v13607_v3 = vand.u32 4294901760, %v11121_v34 }
 0x3d5   :  { %13598 = vst [vmem:[#allocation23_spill] sm:$0xff] %v11086_v40 }
 0x3d6   :  { %v11092_v28 = vpop.f32.mrb[58].mxu0 }
 0x3d7   :  { %v11094_v35 = vpop.f32.mrb[59].mxu0  ;;  %3980 = vmatmul.mubr.f32.gmra.mrb[116].mxu0 %v3979_v29  ;;  %4777 = vmatmul.mubr.f32.gmra.mrb[24].mxu1 %v11086_v40  ;;  %v4000_v29 = vsub.f32 %v11053_v2, %v13601_v59  ;;  %v4011_v2 = vsub.f32 %v11073_v21, %v13603_v4  ;;  %v11146_v4 = vsub.f32 %v10796_v27, %v10806_v45  ;;  %v13605_v21 = vand.u32 4294901760, %v11103_v63 }
 0x3d8   :  { %3985 = vmatprep.mubr.f32.mxu0 %v13552_v26  ;;  %4782 = vmatprep.mubr.f32.mxu1 %v13552_v26  ;;  %v11161_v59 = vsub.f32 %v10809_v55, %v10821_v62  ;;  %v11174_v45 = vsel %vm80_vm0, %v10967_v42, 0  ;;  %v11192_v62 = vsel %vm80_vm0, %v10994_v33, 0  ;;  %v11197_v55 = vsub.f32 %v10851_v11, %v10863_v41 }
 0x3d9   :  { %v4001_v22 = vand.u32 4294901760, %v4000_v29  ;;  %v4012_v29 = vand.u32 4294901760, %v4011_v2  ;;  %v11167_v2 = vand.u32 4294901760, %v11156_v36  ;;  %v11185_v27 = vand.u32 4294901760, %v11174_v45 }
 0x3da   :  { %v11115_v50 = vpop.f32.mrb[60].mxu0  ;;  %v13609_v42 = vand.u32 4294901760, %v11146_v4  ;;  %13610 = vst [vmem:[#allocation38_spill] sm:$0xff] %v11197_v55  ;;  %v13612_v33 = vand.u32 4294901760, %v11161_v59  ;;  %v11228_v41 = vsel %vm80_vm0, %v11019_v8, 0  ;;  %v11233_v11 = vsub.f32 %v10893_v47, %v10909_v0 }
 0x3db   :  { %v11117_v48 = vpop.f32.mrb[61].mxu0  ;;  %3991 = vmatmul.mubr.f32.gmra.mrb[118].mxu0 %v3990_v54  ;;  %4784 = vmatmul.mubr.f32.gmra.mrb[26].mxu1 %v11106_v25  ;;  %v11134_v54 = vsel %vm80_vm0, %v10943_v10, 0  ;;  %13606 = vst [vmem:[#allocation34_spill] sm:$0xff] %v11167_v2  ;;  %13608 = vst [vmem:[#allocation36_spill] sm:$0xff] %v11185_v27  ;;  %v13617_v8 = vand.u32 4294901760, %v11197_v55  ;;  %v11264_v0 = vsel %vm80_vm0, %v11044_v16, 0  ;;  %v11269_v47 = vsub.f32 %v10941_v61, %v10957_v15 }
 0x3dc   :  { %3996 = vmatprep.mubr.f32.mxu0 %v13552_v26  ;;  %4789 = vmatprep.mubr.f32.mxu1 %v13552_v26  ;;  %v11149_v10 = vand.u32 4294901760, %v11134_v54  ;;  %v13622_v16 = vand.u32 4294901760, %v11233_v11  ;;  %v11300_v15 = vsel %vm80_vm0, %v11069_v60, 0  ;;  %v11305_v61 = vsub.f32 %v10990_v46, %v11006_v17 }
 0x3dd   :  { %v13626_v60 = vand.u32 4294901760, %v11269_v47  ;;  %v11336_v17 = vsel %vm80_vm0, %v11094_v35, 0  ;;  %v11341_v46 = vsub.f32 %v11040_v5, %v11056_v30  ;;  %v11372_v30 = vsel %vm80_vm0, %v11117_v48, 0 }
 0x3de   :  { %v11136_v6 = vpop.f32.mrb[62].mxu0  ;;  %13604 = vst [vmem:[#allocation30_spill] sm:$0xff] %v11149_v10  ;;  %v13630_v35 = vand.u32 4294901760, %v11305_v61  ;;  %v11377_v5 = vsub.f32 %v11090_v7, %v11106_v25  ;;  %v11413_v7 = vsub.f32 %v11134_v54, %v11149_v10  ;;  %v11447_v54 = vsub.f32 %v11174_v45, %v11185_v27 }
 0x3df   :  { %v11138_v39 = vpop.f32.mrb[63].mxu0  ;;  %4002 = vmatmul.mubr.f32.gmra.mrb[120].mxu0 %v4001_v22  ;;  %4791 = vmatmul.mubr.f32.gmra.mrb[28].mxu1 %v11127_v9  ;;  %v4022_v22 = vsub.f32 %v11103_v63, %v13605_v21  ;;  %v13634_v48 = vand.u32 4294901760, %v11341_v46 }
 0x3e0   :  { %4007 = vmatprep.mubr.f32.mxu0 %v13552_v26  ;;  %4796 = vmatprep.mubr.f32.mxu1 %v13552_v26  ;;  %v11408_v25 = vsel %vm80_vm0, %v11138_v39, 0  ;;  %v13638_v39 = vand.u32 4294901760, %v11377_v5 }
 0x3e1   :  { %v4023_v21 = vand.u32 4294901760, %v4022_v22  ;;  %v11182_v22 = vsub.f32 %v10831_v43, %v10848_v13  ;;  %v11210_v13 = vsel %vm80_vm0, %v10992_v1, 0 }
 0x3e2   :  { %v11221_v43 = vand.u32 4294901760, %v11210_v13 }
 0x3e3   :  { %4013 = vmatmul.mubr.f32.gmra.mrb[122].mxu0 %v4012_v29  ;;  %4798 = vmatmul.mubr.f32.gmra.mrb[30].mxu1 %v11149_v10  ;;  %v4033_v29 = vsub.f32 %v11121_v34, %v13607_v3  ;;  %v13615_v1 = vand.u32 4294901760, %v11182_v22 }
 0x3e4   :  { %4018 = vmatprep.mubr.f32.mxu0 %v13552_v26  ;;  %4803 = vmatprep.mubr.f32.mxu1 %v13552_v26  ;;  %13614 = vst [vmem:[#allocation44_spill] sm:$0xff] %v11221_v43 }
 0x3e5   :  { %v4034_v3 = vand.u32 4294901760, %v4033_v29  ;;  %v11203_v29 = vand.u32 4294901760, %v11192_v62 }
 0x3e7   :  { %4024 = vmatmul.mubr.f32.gmra.mrb[124].mxu0 %v4023_v21  ;;  %4805 = vmatmul.mubr.f32.gmra.mrb[32].mxu1 %v11167_v2  ;;  %v4044_v21 = vsub.f32 %v11146_v4, %v13609_v42  ;;  %13611 = vst [vmem:[#allocation39_spill] sm:$0xff] %v11203_v29  ;;  %v11459_v45 = vsub.f32 %v11192_v62, %v11203_v29 }
 0x3e8   :  { %4029 = vmatprep.mubr.f32.mxu0 %v13552_v26  ;;  %4810 = vmatprep.mubr.f32.mxu1 %v13552_v26  ;;  %v11472_v62 = vsub.f32 %v11210_v13, %v11221_v43 }
 0x3e9   :  { %v4045_v42 = vand.u32 4294901760, %v4044_v21  ;;  %v11218_v21 = vsub.f32 %v10871_v32, %v10890_v18  ;;  %v11246_v18 = vsel %vm80_vm0, %v11017_v58, 0 }
 0x3ea   :  { %v11257_v32 = vand.u32 4294901760, %v11246_v18 }
 0x3eb   :  { %4035 = vmatmul.mubr.f32.gmra.mrb[126].mxu0 %v4034_v3  ;;  %4812 = vmatmul.mubr.f32.gmra.mrb[34].mxu1 %v11185_v27  ;;  %v4055_v3 = vsub.f32 %v11161_v59, %v13612_v33  ;;  %13613 = vst [vmem:[#allocation40_spill] sm:$0xff] %v11218_v21  ;;  %v13620_v58 = vand.u32 4294901760, %v11218_v21  ;;  %v13674_v27 = vld [vmem:[#allocation112_spill] sm:$0xff] }
 0x3ec   :  { %4040 = vmatprep.mubr.f32.mxu0 %v13552_v26  ;;  %4817 = vmatprep.mubr.f32.mxu1 %v13552_v26  ;;  %13619 = vst [vmem:[#allocation48_spill] sm:$0xff] %v11257_v32 }
 0x3ed   :  { %v4056_v33 = vand.u32 4294901760, %v4055_v3  ;;  %v11239_v3 = vand.u32 4294901760, %v11228_v41 }
 0x3ef   :  { %4046 = vmatmul.mubr.f32.gmra.mrb[128].mxu0 %v4045_v42  ;;  %4819 = vmatmul.mubr.f32.gmra.mrb[36].mxu1 %v11203_v29  ;;  %v4066_v42 = vsub.f32 %v11182_v22, %v13615_v1  ;;  %13616 = vst [vmem:[#allocation45_spill] sm:$0xff] %v11239_v3  ;;  %v11484_v13 = vsub.f32 %v11228_v41, %v11239_v3  ;;  %v13673_v29 = vld [vmem:[#allocation19_spill] sm:$0xff] }
 0x3f0   :  { %4051 = vmatprep.mubr.f32.mxu0 %v13552_v26  ;;  %4824 = vmatprep.mubr.f32.mxu1 %v13552_v26 }
 0x3f1   :  { %v4067_v1 = vand.u32 4294901760, %v4066_v42  ;;  %v11254_v42 = vsub.f32 %v10917_v37, %v10938_v20  ;;  %v11282_v20 = vsel %vm80_vm0, %v11042_v38, 0 }
 0x3f2   :  { %v11293_v37 = vand.u32 4294901760, %v11282_v20 }
 0x3f3   :  { %4057 = vmatmul.mubr.f32.gmra.mrb[130].mxu0 %v4056_v33  ;;  %4826 = vmatmul.mubr.f32.gmra.mrb[38].mxu1 %v11221_v43  ;;  %v4077_v33 = vsub.f32 %v11197_v55, %v13617_v8  ;;  %13618 = vst [vmem:[#allocation46_spill] sm:$0xff] %v11254_v42  ;;  %v13624_v38 = vand.u32 4294901760, %v11254_v42  ;;  %v13672_v43 = vld [vmem:[#allocation100_spill] sm:$0xff] }
 0x3f4   :  { %4062 = vmatprep.mubr.f32.mxu0 %v13552_v26  ;;  %4831 = vmatprep.mubr.f32.mxu1 %v13552_v26  ;;  %13623 = vst [vmem:[#allocation53_spill] sm:$0xff] %v11293_v37 }
 0x3f5   :  { %v4078_v8 = vand.u32 4294901760, %v4077_v33  ;;  %v11275_v33 = vand.u32 4294901760, %v11264_v0 }
 0x3f7   :  { %4068 = vmatmul.mubr.f32.gmra.mrb[132].mxu0 %v4067_v1  ;;  %4833 = vmatmul.mubr.f32.gmra.mrb[40].mxu1 %v11239_v3  ;;  %v4088_v1 = vsub.f32 %v11218_v21, %v13620_v58  ;;  %13621 = vst [vmem:[#allocation51_spill] sm:$0xff] %v11275_v33  ;;  %v13671_v3 = vld [vmem:[#allocation16_spill] sm:$0xff] }
 0x3f8   :  { %4073 = vmatprep.mubr.f32.mxu0 %v13552_v26  ;;  %4838 = vmatprep.mubr.f32.mxu1 %v13552_v26 }
 0x3f9   :  { %v4089_v58 = vand.u32 4294901760, %v4088_v1  ;;  %v11290_v1 = vsub.f32 %v10965_v56, %v10986_v31  ;;  %v11318_v31 = vsel %vm80_vm0, %v11067_v44, 0 }
 0x3fa   :  { %v11329_v56 = vand.u32 4294901760, %v11318_v31 }
 0x3fb   :  { %4079 = vmatmul.mubr.f32.gmra.mrb[134].mxu0 %v4078_v8  ;;  %4840 = vmatmul.mubr.f32.gmra.mrb[42].mxu1 %v11257_v32  ;;  %v4099_v8 = vsub.f32 %v11233_v11, %v13622_v16  ;;  %v13628_v44 = vand.u32 4294901760, %v11290_v1 }
 0x3fc   :  { %4084 = vmatprep.mubr.f32.mxu0 %v13552_v26  ;;  %4845 = vmatprep.mubr.f32.mxu1 %v13552_v26  ;;  %13627 = vst [vmem:[#allocation56_spill] sm:$0xff] %v11329_v56 }
 0x3fd   :  { %v4100_v16 = vand.u32 4294901760, %v4099_v8  ;;  %v11311_v8 = vand.u32 4294901760, %v11300_v15 }
 0x3ff   :  { %4090 = vmatmul.mubr.f32.gmra.mrb[136].mxu0 %v4089_v58  ;;  %4847 = vmatmul.mubr.f32.gmra.mrb[44].mxu1 %v11275_v33  ;;  %v4110_v58 = vsub.f32 %v11254_v42, %v13624_v38  ;;  %13625 = vst [vmem:[#allocation55_spill] sm:$0xff] %v11311_v8 }
 0x400   :  { %4095 = vmatprep.mubr.f32.mxu0 %v13552_v26  ;;  %4852 = vmatprep.mubr.f32.mxu1 %v13552_v26 }
 0x401   :  { %v4111_v38 = vand.u32 4294901760, %v4110_v58  ;;  %v11326_v58 = vsub.f32 %v11015_v57, %v11036_v52  ;;  %v11354_v52 = vsel %vm80_vm0, %v11092_v28, 0 }
 0x402   :  { %v11365_v57 = vand.u32 4294901760, %v11354_v52 }
 0x403   :  { %4101 = vmatmul.mubr.f32.gmra.mrb[138].mxu0 %v4100_v16  ;;  %4854 = vmatmul.mubr.f32.gmra.mrb[46].mxu1 %v11293_v37  ;;  %v4121_v16 = vsub.f32 %v11269_v47, %v13626_v60  ;;  %v13632_v28 = vand.u32 4294901760, %v11326_v58 }
 0x404   :  { %4106 = vmatprep.mubr.f32.mxu0 %v13552_v26  ;;  %4859 = vmatprep.mubr.f32.mxu1 %v13552_v26  ;;  %13631 = vst [vmem:[#allocation61_spill] sm:$0xff] %v11365_v57 }
 0x405   :  { %v4122_v60 = vand.u32 4294901760, %v4121_v16  ;;  %v11347_v16 = vand.u32 4294901760, %v11336_v17 }
 0x407   :  { %4112 = vmatmul.mubr.f32.gmra.mrb[140].mxu0 %v4111_v38  ;;  %4861 = vmatmul.mubr.f32.gmra.mrb[48].mxu1 %v11311_v8  ;;  %v4132_v38 = vsub.f32 %v11290_v1, %v13628_v44  ;;  %13629 = vst [vmem:[#allocation59_spill] sm:$0xff] %v11347_v16 }
 0x408   :  { %4117 = vmatprep.mubr.f32.mxu0 %v13552_v26  ;;  %4866 = vmatprep.mubr.f32.mxu1 %v13552_v26 }
 0x409   :  { %v4133_v44 = vand.u32 4294901760, %v4132_v38  ;;  %v11362_v38 = vsub.f32 %v11065_v23, %v11086_v40  ;;  %v11390_v40 = vsel %vm80_vm0, %v11115_v50, 0 }
 0x40a   :  { %v11401_v23 = vand.u32 4294901760, %v11390_v40 }
 0x40b   :  { %4123 = vmatmul.mubr.f32.gmra.mrb[142].mxu0 %v4122_v60  ;;  %4868 = vmatmul.mubr.f32.gmra.mrb[50].mxu1 %v11329_v56  ;;  %v4143_v60 = vsub.f32 %v11305_v61, %v13630_v35  ;;  %v13636_v50 = vand.u32 4294901760, %v11362_v38 }
 0x40c   :  { %4128 = vmatprep.mubr.f32.mxu0 %v13552_v26  ;;  %4873 = vmatprep.mubr.f32.mxu1 %v13552_v26  ;;  %13635 = vst [vmem:[#allocation65_spill] sm:$0xff] %v11401_v23 }
 0x40d   :  { %v4144_v35 = vand.u32 4294901760, %v4143_v60  ;;  %v11383_v60 = vand.u32 4294901760, %v11372_v30 }
 0x40f   :  { %4134 = vmatmul.mubr.f32.gmra.mrb[144].mxu0 %v4133_v44  ;;  %4875 = vmatmul.mubr.f32.gmra.mrb[52].mxu1 %v11347_v16  ;;  %v4154_v44 = vsub.f32 %v11326_v58, %v13632_v28  ;;  %13633 = vst [vmem:[#allocation62_spill] sm:$0xff] %v11383_v60 }
 0x410   :  { %4139 = vmatprep.mubr.f32.mxu0 %v13552_v26  ;;  %4880 = vmatprep.mubr.f32.mxu1 %v13552_v26 }
 0x411   :  { %v4155_v28 = vand.u32 4294901760, %v4154_v44  ;;  %v11398_v44 = vsub.f32 %v11113_v19, %v11127_v9  ;;  %v11426_v9 = vsel %vm80_vm0, %v11136_v6, 0 }
 0x412   :  { %v11437_v19 = vand.u32 4294901760, %v11426_v9 }
 0x413   :  { %4145 = vmatmul.mubr.f32.gmra.mrb[146].mxu0 %v4144_v35  ;;  %4882 = vmatmul.mubr.f32.gmra.mrb[54].mxu1 %v11365_v57  ;;  %v4165_v35 = vsub.f32 %v11341_v46, %v13634_v48  ;;  %v13641_v6 = vand.u32 4294901760, %v11398_v44 }
 0x414   :  { %4150 = vmatprep.mubr.f32.mxu0 %v13552_v26  ;;  %4887 = vmatprep.mubr.f32.mxu1 %v13552_v26  ;;  %13640 = vst [vmem:[#allocation71_spill] sm:$0xff] %v11437_v19 }
 0x415   :  { %v4166_v48 = vand.u32 4294901760, %v4165_v35  ;;  %v11419_v35 = vand.u32 4294901760, %v11408_v25 }
 0x417   :  { %4156 = vmatmul.mubr.f32.gmra.mrb[148].mxu0 %v4155_v28  ;;  %4889 = vmatmul.mubr.f32.gmra.mrb[56].mxu1 %v11383_v60  ;;  %v4176_v28 = vsub.f32 %v11362_v38, %v13636_v50  ;;  %13637 = vst [vmem:[#allocation67_spill] sm:$0xff] %v11419_v35 }
 0x418   :  { %4161 = vmatprep.mubr.f32.mxu0 %v13552_v26  ;;  %4894 = vmatprep.mubr.f32.mxu1 %v13552_v26 }
 0x419   :  { %v4177_v50 = vand.u32 4294901760, %v4176_v28  ;;  %v11434_v28 = vsub.f32 %v11156_v36, %v11167_v2 }
 0x41b   :  { %4167 = vmatmul.mubr.f32.gmra.mrb[150].mxu0 %v4166_v48  ;;  %4896 = vmatmul.mubr.f32.gmra.mrb[58].mxu1 %v11401_v23  ;;  %v4187_v48 = vsub.f32 %v11377_v5, %v13638_v39  ;;  %13639 = vst [vmem:[#allocation68_spill] sm:$0xff] %v11434_v28  ;;  %v13086_v36 = vand.u32 4294901760, %v11434_v28 }
 0x41c   :  { %4172 = vmatprep.mubr.f32.mxu0 %v13552_v26  ;;  %4901 = vmatprep.mubr.f32.mxu1 %v13552_v26 }
 0x41d   :  { %v4188_v39 = vand.u32 4294901760, %v4187_v48  ;;  %v13642_v48 = vand.u32 4294901760, %v11413_v7 }
 0x41f   :  { %4178 = vmatmul.mubr.f32.gmra.mrb[152].mxu0 %v4177_v50  ;;  %4903 = vmatmul.mubr.f32.gmra.mrb[60].mxu1 %v11419_v35  ;;  %v4198_v50 = vsub.f32 %v11398_v44, %v13641_v6  ;;  %v4209_v10 = vsub.f32 %v11413_v7, %v13642_v48 }
 0x420   :  { %4183 = vmatprep.mubr.f32.mxu0 %v13552_v26  ;;  %4908 = vmatprep.mubr.f32.mxu1 %v13552_v26 }
 0x421   :  { %v4199_v2 = vand.u32 4294901760, %v4198_v50  ;;  %v4210_v6 = vand.u32 4294901760, %v4209_v10  ;;  %v4220_v50 = vsub.f32 %v11434_v28, %v13086_v36  ;;  %v13087_v10 = vand.u32 4294901760, %v11459_v45 }
 0x423   :  { %4189 = vmatmul.mubr.f32.gmra.mrb[154].mxu0 %v4188_v39  ;;  %4910 = vmatmul.mubr.f32.gmra.mrb[62].mxu1 %v11437_v19  ;;  %v13088_v39 = vand.u32 4294901760, %v11447_v54  ;;  %v4221_v48 = vand.u32 4294901760, %v4220_v50  ;;  %v4242_v50 = vsub.f32 %v11459_v45, %v13087_v10  ;;  %v13644_v10 = vld [vmem:[#allocation25_spill] sm:$0xff] }
 0x424   :  { %4194 = vmatprep.mubr.f32.mxu0 %v13552_v26  ;;  %4984 = vmatprep.mubr.f32.mxu1 %v13552_v26 }
 0x425   :  { %v4231_v36 = vsub.f32 %v11447_v54, %v13088_v39  ;;  %v4243_v41 = vand.u32 4294901760, %v4242_v50 }
 0x427   :  { %4200 = vmatmul.mubr.f32.gmra.mrb[156].mxu0 %v4199_v2  ;;  %4987 = vmatmul.mubr.f32.vlgmr.msra.gmra.mrb[64].mxu1 %v10588_v49  ;;  %v13643_v2 = vand.u32 4294901760, %v10564_v53  ;;  %v13089_v53 = vand.u32 4294901760, %v11472_v62 }
 0x428   :  { %5500 = vmatpush1.msra.mxu1 %v10542_v24  ;;  %4205 = vmatprep.mubr.f32.mxu0 %v13552_v26  ;;  %v13678_v24 = vld [vmem:[#allocation105_spill] sm:$0xff] }
 0x429   :  { %4992 = vmatprep.mubr.f32.mxu1 %v13552_v26  ;;  %6143 = vmatprep.subr.mxu1 %v13643_v2  ;;  %v11494_v2 = vsub.f32 %v11246_v18, %v11257_v32  ;;  %v11506_v18 = vsub.f32 %v11264_v0, %v11275_v33 }
 0x42b   :  { %4211 = vmatmul.mubr.f32.gmra.mrb[158].mxu0 %v4210_v6  ;;  %4995 = vmatmul.mubr.f32.gmra.mrb[66].mxu1 %v10585_v14  ;;  %v4232_v6 = vand.u32 4294901760, %v4231_v36  ;;  %v4253_v36 = vsub.f32 %v11472_v62, %v13089_v53  ;;  %v13645_v53 = vld [vmem:[#allocation26_spill] sm:$0xff] }
 0x42c   :  { %4216 = vmatprep.mubr.f32.mxu0 %v13552_v26  ;;  %5000 = vmatprep.mubr.f32.mxu1 %v13552_v26 }
 0x42d   :  { %v4254_v39 = vand.u32 4294901760, %v4253_v36  ;;  %v13646_v36 = vand.u32 4294901760, %v11494_v2 }
 0x42f   :  { %4222 = vmatmul.mubr.f32.gmra.mrb[160].mxu0 %v4221_v48  ;;  %5003 = vmatmul.mubr.f32.gmra.mrb[68].mxu1 %v10602_v12  ;;  %v13092_v48 = vand.u32 4294901760, %v11484_v13  ;;  %v4275_v33 = vsub.f32 %v11494_v2, %v13646_v36  ;;  %v13648_v36 = vld [vmem:[#allocation33_spill] sm:$0xff] }
 0x430   :  { %4227 = vmatprep.mubr.f32.mxu0 %v13552_v26  ;;  %5008 = vmatprep.mubr.f32.mxu1 %v13552_v26 }
 0x431   :  { %v4264_v50 = vsub.f32 %v11484_v13, %v13092_v48  ;;  %v13647_v48 = vld [vmem:[#allocation32_spill] sm:$0xff] }
 0x433   :  { %4233 = vmatmul.mubr.f32.gmra.mrb[162].mxu0 %v4232_v6  ;;  %5011 = vmatmul.mubr.f32.gmra.mrb[70].mxu1 %v10605_v51  ;;  %v13097_v6 = vand.u32 4294901760, %v11506_v18  ;;  %v4265_v0 = vand.u32 4294901760, %v4264_v50 }
 0x434   :  { %4238 = vmatprep.mubr.f32.mxu0 %v13552_v26  ;;  %5016 = vmatprep.mubr.f32.mxu1 %v13552_v26 }
 0x435   :  { %v4286_v50 = vsub.f32 %v11506_v18, %v13097_v6  ;;  %v13650_v6 = vld [vmem:[#allocation41_spill] sm:$0xff] }
 0x437   :  { %4244 = vmatmul.mubr.f32.gmra.mrb[164].mxu0 %v4243_v41  ;;  %5019 = vmatmul.mubr.f32.gmra.mrb[72].mxu1 %v13644_v10  ;;  %v11516_v41 = vsub.f32 %v11282_v20, %v11293_v37  ;;  %v11528_v20 = vsub.f32 %v11300_v15, %v11311_v8  ;;  %v4276_v37 = vand.u32 4294901760, %v4275_v33  ;;  %v4287_v15 = vand.u32 4294901760, %v4286_v50 }
 0x438   :  { %4249 = vmatprep.mubr.f32.mxu0 %v13552_v26  ;;  %5024 = vmatprep.mubr.f32.mxu1 %v13552_v26 }
 0x439   :  { %v13649_v33 = vand.u32 4294901760, %v11516_v41 }
 0x43b   :  { %4255 = vmatmul.mubr.f32.gmra.mrb[166].mxu0 %v4254_v39  ;;  %5027 = vmatmul.mubr.f32.gmra.mrb[74].mxu1 %v13645_v53  ;;  %v13102_v39 = vand.u32 4294901760, %v11528_v20  ;;  %v4297_v8 = vsub.f32 %v11516_v41, %v13649_v33  ;;  %v13651_v33 = vld [vmem:[#allocation42_spill] sm:$0xff] }
 0x43c   :  { %4260 = vmatprep.mubr.f32.mxu0 %v13552_v26  ;;  %5032 = vmatprep.mubr.f32.mxu1 %v13552_v26 }
 0x43d   :  { %v4308_v50 = vsub.f32 %v11528_v20, %v13102_v39  ;;  %v13653_v39 = vld [vmem:[#allocation49_spill] sm:$0xff] }
 0x43f   :  { %4266 = vmatmul.mubr.f32.gmra.mrb[168].mxu0 %v4265_v0  ;;  %5035 = vmatmul.mubr.f32.gmra.mrb[76].mxu1 %v13647_v48  ;;  %v11538_v0 = vsub.f32 %v11318_v31, %v11329_v56  ;;  %v11550_v31 = vsub.f32 %v11336_v17, %v11347_v16  ;;  %v4298_v56 = vand.u32 4294901760, %v4297_v8  ;;  %v4309_v17 = vand.u32 4294901760, %v4308_v50 }
 0x440   :  { %4271 = vmatprep.mubr.f32.mxu0 %v13552_v26  ;;  %5040 = vmatprep.mubr.f32.mxu1 %v13552_v26 }
 0x441   :  { %v13652_v8 = vand.u32 4294901760, %v11538_v0 }
 0x443   :  { %4277 = vmatmul.mubr.f32.gmra.mrb[170].mxu0 %v4276_v37  ;;  %5043 = vmatmul.mubr.f32.gmra.mrb[78].mxu1 %v13648_v36  ;;  %v13107_v37 = vand.u32 4294901760, %v11550_v31  ;;  %v4319_v16 = vsub.f32 %v11538_v0, %v13652_v8  ;;  %v13654_v8 = vld [vmem:[#allocation50_spill] sm:$0xff] }
 0x444   :  { %4282 = vmatprep.mubr.f32.mxu0 %v13552_v26  ;;  %5048 = vmatprep.mubr.f32.mxu1 %v13552_v26 }
 0x445   :  { %v4330_v50 = vsub.f32 %v11550_v31, %v13107_v37  ;;  %v13656_v37 = vld [vmem:[#allocation57_spill] sm:$0xff] }
 0x447   :  { %4288 = vmatmul.mubr.f32.gmra.mrb[172].mxu0 %v4287_v15  ;;  %5051 = vmatmul.mubr.f32.gmra.mrb[80].mxu1 %v13650_v6  ;;  %v11560_v15 = vsub.f32 %v11354_v52, %v11365_v57  ;;  %v11572_v52 = vsub.f32 %v11372_v30, %v11383_v60  ;;  %v4320_v57 = vand.u32 4294901760, %v4319_v16  ;;  %v4331_v30 = vand.u32 4294901760, %v4330_v50 }
 0x448   :  { %4293 = vmatprep.mubr.f32.mxu0 %v13552_v26  ;;  %5056 = vmatprep.mubr.f32.mxu1 %v13552_v26 }
 0x449   :  { %v13655_v16 = vand.u32 4294901760, %v11560_v15 }
 0x44b   :  { %4299 = vmatmul.mubr.f32.gmra.mrb[174].mxu0 %v4298_v56  ;;  %5059 = vmatmul.mubr.f32.gmra.mrb[82].mxu1 %v13651_v33  ;;  %v13112_v56 = vand.u32 4294901760, %v11572_v52  ;;  %v4341_v60 = vsub.f32 %v11560_v15, %v13655_v16  ;;  %v13658_v16 = vld [vmem:[#allocation58_spill] sm:$0xff] }
 0x44c   :  { %4304 = vmatprep.mubr.f32.mxu0 %v13552_v26  ;;  %5064 = vmatprep.mubr.f32.mxu1 %v13552_v26 }
 0x44d   :  { %v4352_v50 = vsub.f32 %v11572_v52, %v13112_v56  ;;  %v13661_v56 = vld [vmem:[#allocation64_spill] sm:$0xff] }
 0x44f   :  { %4310 = vmatmul.mubr.f32.gmra.mrb[176].mxu0 %v4309_v17  ;;  %5067 = vmatmul.mubr.f32.gmra.mrb[84].mxu1 %v13653_v39  ;;  %v11582_v17 = vsub.f32 %v11390_v40, %v11401_v23  ;;  %v11594_v40 = vsub.f32 %v11408_v25, %v11419_v35  ;;  %v4342_v23 = vand.u32 4294901760, %v4341_v60  ;;  %v4353_v25 = vand.u32 4294901760, %v4352_v50  ;;  %v13662_v50 = vld [vmem:[#allocation66_spill] sm:$0xff] }
 0x450   :  { %4315 = vmatprep.mubr.f32.mxu0 %v13552_v26  ;;  %5072 = vmatprep.mubr.f32.mxu1 %v13552_v26 }
 0x451   :  { %13657 = vst [vmem:[#allocation72_spill] sm:$0xff] %v11594_v40  ;;  %v13660_v60 = vand.u32 4294901760, %v11582_v17 }
 0x453   :  { %4321 = vmatmul.mubr.f32.gmra.mrb[178].mxu0 %v4320_v57  ;;  %5075 = vmatmul.mubr.f32.gmra.mrb[86].mxu1 %v13654_v8  ;;  %v13117_v57 = vand.u32 4294901760, %v11594_v40  ;;  %v4363_v35 = vsub.f32 %v11582_v17, %v13660_v60 }
 0x454   :  { %4326 = vmatprep.mubr.f32.mxu0 %v13552_v26  ;;  %5080 = vmatprep.mubr.f32.mxu1 %v13552_v26 }
 0x455   :  { %v4364_v32 = vand.u32 4294901760, %v4363_v35 }
 0x457   :  { %4332 = vmatmul.mubr.f32.gmra.mrb[180].mxu0 %v4331_v30  ;;  %5083 = vmatmul.mubr.f32.gmra.mrb[88].mxu1 %v13656_v37  ;;  %v11604_v30 = vsub.f32 %v11426_v9, %v11437_v19  ;;  %v4374_v9 = vsub.f32 %v11594_v40, %v13117_v57  ;;  %v13663_v19 = vld [vmem:[#allocation73_spill] sm:$0xff]  ;;  %v13666_v57 = vld [vmem:[#allocation82_spill] sm:$0xff] }
 0x458   :  { %4337 = vmatprep.mubr.f32.mxu0 %v13552_v26  ;;  %5088 = vmatprep.mubr.f32.mxu1 %v13552_v26 }
 0x459   :  { %13659 = vst [vmem:[#allocation76_spill] sm:$0xff] %v11604_v30 }
 0x45b   :  { %4343 = vmatmul.mubr.f32.gmra.mrb[182].mxu0 %v4342_v23  ;;  %5091 = vmatmul.mubr.f32.gmra.mrb[90].mxu1 %v13658_v16  ;;  %v13118_v23 = vand.u32 4294901760, %v11604_v30 }
 0x45c   :  { %4348 = vmatprep.mubr.f32.mxu0 %v13552_v26  ;;  %5096 = vmatprep.mubr.f32.mxu1 %v13552_v26 }
 0x45d   :  { %v4385_v60 = vsub.f32 %v11604_v30, %v13118_v23  ;;  %v13668_v23 = vld [vmem:[#allocation86_spill] sm:$0xff] }
 0x45f   :  { %4354 = vmatmul.mubr.f32.gmra.mrb[184].mxu0 %v4353_v25  ;;  %5099 = vmatmul.mubr.f32.gmra.mrb[92].mxu1 %v13661_v56  ;;  %v4375_v25 = vand.u32 4294901760, %v4374_v9  ;;  %v4386_v35 = vand.u32 4294901760, %v4385_v60  ;;  %v13665_v9 = vld [vmem:[#allocation14_spill] sm:$0xff]  ;;  %v13669_v60 = vld [vmem:[#allocation17_spill] sm:$0xff] }
 0x460   :  { %4359 = vmatprep.mubr.f32.mxu0 %v13552_v26  ;;  %5104 = vmatprep.mubr.f32.mxu1 %v13552_v26 }
 0x463   :  { %4365 = vmatmul.mubr.f32.gmra.mrb[186].mxu0 %v4364_v32  ;;  %5107 = vmatmul.mubr.f32.gmra.mrb[94].mxu1 %v13662_v50  ;;  %v13664_v32 = vld [vmem:[#allocation74_spill] sm:$0xff] }
 0x464   :  { %4370 = vmatprep.mubr.f32.mxu0 %v13552_v26  ;;  %5112 = vmatprep.mubr.f32.mxu1 %v13552_v26 }
 0x467   :  { %4376 = vmatmul.mubr.f32.gmra.mrb[188].mxu0 %v4375_v25  ;;  %5115 = vmatmul.mubr.f32.gmra.mrb[96].mxu1 %v13663_v19  ;;  %v13667_v25 = vld [vmem:[#allocation12_spill] sm:$0xff] }
 0x468   :  { %4381 = vmatprep.mubr.f32.mxu0 %v13552_v26  ;;  %5120 = vmatprep.mubr.f32.mxu1 %v13552_v26 }
 0x46b   :  { %4387 = vmatmul.mubr.f32.gmra.mrb[190].mxu0 %v4386_v35  ;;  %5123 = vmatmul.mubr.f32.gmra.mrb[98].mxu1 %v13664_v32  ;;  %v13670_v35 = vld [vmem:[#allocation95_spill] sm:$0xff] }
 0x46c   :  { %4467 = vmatprep.mubr.f32.mxu0 %v13552_v26  ;;  %5128 = vmatprep.mubr.f32.mxu1 %v13552_v26 }
 0x46f   :  { %4469 = vmatmul.mubr.f32.vlgmr.msra.gmra.mrb[64].mxu0 %v13665_v9  ;;  %5131 = vmatmul.mubr.f32.gmra.mrb[100].mxu1 %v13666_v57  ;;  %v13680_v9 = vld [vmem:[#allocation118_spill] sm:$0xff] }
 0x470   :  { %4474 = vmatprep.mubr.f32.mxu0 %v13552_v26  ;;  %5136 = vmatprep.mubr.f32.mxu1 %v13552_v26 }
 0x473   :  { %4476 = vmatmul.mubr.f32.gmra.mrb[66].mxu0 %v13667_v25  ;;  %5139 = vmatmul.mubr.f32.gmra.mrb[102].mxu1 %v13668_v23  ;;  %v13676_v25 = vld [vmem:[#allocation114_spill] sm:$0xff] }
 0x474   :  { %4481 = vmatprep.mubr.f32.mxu0 %v13552_v26  ;;  %5144 = vmatprep.mubr.f32.mxu1 %v13552_v26 }
 0x477   :  { %4483 = vmatmul.mubr.f32.gmra.mrb[68].mxu0 %v13669_v60  ;;  %5147 = vmatmul.mubr.f32.gmra.mrb[104].mxu1 %v13670_v35  ;;  %v13675_v60 = vld [vmem:[#allocation22_spill] sm:$0xff] }
 0x478   :  { %4488 = vmatprep.mubr.f32.mxu0 %v13552_v26  ;;  %5152 = vmatprep.mubr.f32.mxu1 %v13552_v26 }
 0x47b   :  { %4490 = vmatmul.mubr.f32.gmra.mrb[70].mxu0 %v13671_v3  ;;  %5155 = vmatmul.mubr.f32.gmra.mrb[106].mxu1 %v13672_v43  ;;  %v13677_v3 = vld [vmem:[#allocation27_spill] sm:$0xff] }
 0x47c   :  { %4495 = vmatprep.mubr.f32.mxu0 %v13552_v26  ;;  %5160 = vmatprep.mubr.f32.mxu1 %v13552_v26 }
 0x47f   :  { %4497 = vmatmul.mubr.f32.gmra.mrb[72].mxu0 %v13673_v29  ;;  %5163 = vmatmul.mubr.f32.gmra.mrb[108].mxu1 %v13674_v27  ;;  %v13679_v29 = vld [vmem:[#allocation31_spill] sm:$0xff] }
 0x480   :  { %4502 = vmatprep.mubr.f32.mxu0 %v13552_v26  ;;  %5168 = vmatprep.mubr.f32.mxu1 %v13552_v26 }
 0x483   :  { %4504 = vmatmul.mubr.f32.gmra.mrb[74].mxu0 %v13675_v60  ;;  %5171 = vmatmul.mubr.f32.gmra.mrb[110].mxu1 %v13676_v25  ;;  %v13681_v60 = vld [vmem:[#allocation35_spill] sm:$0xff] }
 0x484   :  { %4509 = vmatprep.mubr.f32.mxu0 %v13552_v26  ;;  %5176 = vmatprep.mubr.f32.mxu1 %v13552_v26  ;;  %v13682_v25 = vld [vmem:[#allocation131_spill] sm:$0xff] }
 0x487   :  { %4511 = vmatmul.mubr.f32.gmra.mrb[76].mxu0 %v13677_v3  ;;  %5179 = vmatmul.mubr.f32.gmra.mrb[112].mxu1 %v13678_v24  ;;  %v13683_v3 = vld [vmem:[#allocation37_spill] sm:$0xff]  ;;  %v13684_v24 = vld [vmem:[#allocation6_spill] sm:$0xff] }
 0x488   :  { %4516 = vmatprep.mubr.f32.mxu0 %v13552_v26  ;;  %5184 = vmatprep.mubr.f32.mxu1 %v13552_v26 }
 0x48b   :  { %4518 = vmatmul.mubr.f32.gmra.mrb[78].mxu0 %v13679_v29  ;;  %5187 = vmatmul.mubr.f32.gmra.mrb[114].mxu1 %v13680_v9  ;;  %v13685_v29 = vld [vmem:[#allocation43_spill] sm:$0xff] }
 0x48c   :  { %4523 = vmatprep.mubr.f32.mxu0 %v13552_v26  ;;  %5192 = vmatprep.mubr.f32.mxu1 %v13552_v26  ;;  %v13686_v9 = vld [vmem:[#allocation15_spill] sm:$0xff] }
 0x48f   :  { %4525 = vmatmul.mubr.f32.gmra.mrb[80].mxu0 %v13681_v60  ;;  %5195 = vmatmul.mubr.f32.gmra.mrb[116].mxu1 %v13682_v25  ;;  %v13687_v60 = vld [vmem:[#allocation47_spill] sm:$0xff]  ;;  %v13688_v25 = vld [vmem:[#allocation20_spill] sm:$0xff] }
 0x490   :  { %4530 = vmatprep.mubr.f32.mxu0 %v13552_v26  ;;  %5200 = vmatprep.mubr.f32.mxu1 %v13552_v26 }
 0x493   :  { %4532 = vmatmul.mubr.f32.gmra.mrb[82].mxu0 %v13683_v3  ;;  %5203 = vmatmul.mubr.f32.gmra.mrb[118].mxu1 %v13684_v24  ;;  %v13689_v3 = vld [vmem:[#allocation52_spill] sm:$0xff] }
 0x494   :  { %4537 = vmatprep.mubr.f32.mxu0 %v13552_v26  ;;  %5208 = vmatprep.mubr.f32.mxu1 %v13552_v26 }
 0x497   :  { %4539 = vmatmul.mubr.f32.gmra.mrb[84].mxu0 %v13685_v29  ;;  %5211 = vmatmul.mubr.f32.gmra.mrb[120].mxu1 %v13686_v9  ;;  %v13690_v29 = vld [vmem:[#allocation54_spill] sm:$0xff] }
 0x498   :  { %4544 = vmatprep.mubr.f32.mxu0 %v13552_v26  ;;  %5216 = vmatprep.mubr.f32.mxu1 %v13552_v26 }
 0x49b   :  { %4546 = vmatmul.mubr.f32.gmra.mrb[86].mxu0 %v13687_v60  ;;  %5219 = vmatmul.mubr.f32.gmra.mrb[122].mxu1 %v13688_v25  ;;  %v13691_v60 = vld [vmem:[#allocation60_spill] sm:$0xff] }
 0x49c   :  { %4551 = vmatprep.mubr.f32.mxu0 %v13552_v26  ;;  %5224 = vmatprep.mubr.f32.mxu1 %v13552_v26 }
 0x49f   :  { %4553 = vmatmul.mubr.f32.gmra.mrb[88].mxu0 %v13689_v3  ;;  %5227 = vmatmul.mubr.f32.gmra.mrb[124].mxu1 %v11103_v63  ;;  %v13692_v3 = vld [vmem:[#allocation63_spill] sm:$0xff] }
 0x4a0   :  { %4558 = vmatprep.mubr.f32.mxu0 %v13552_v26  ;;  %5232 = vmatprep.mubr.f32.mxu1 %v13552_v26 }
 0x4a3   :  { %4560 = vmatmul.mubr.f32.gmra.mrb[90].mxu0 %v13690_v29  ;;  %5235 = vmatmul.mubr.f32.gmra.mrb[126].mxu1 %v11121_v34  ;;  %v13693_v29 = vld [vmem:[#allocation69_spill] sm:$0xff] }
 0x4a4   :  { %4565 = vmatprep.mubr.f32.mxu0 %v13552_v26  ;;  %5240 = vmatprep.mubr.f32.mxu1 %v13552_v26 }
 0x4a7   :  { %4567 = vmatmul.mubr.f32.gmra.mrb[92].mxu0 %v13691_v60  ;;  %5243 = vmatmul.mubr.f32.gmra.mrb[0].mxu1 %v11146_v4  ;;  %v13694_v60 = vld [vmem:[#allocation70_spill] sm:$0xff] }
 0x4a8   :  { %4572 = vmatprep.mubr.f32.mxu0 %v13552_v26  ;;  %5248 = vmatprep.mubr.f32.mxu1 %v13552_v26 }
 0x4ab   :  { %4574 = vmatmul.mubr.f32.gmra.mrb[94].mxu0 %v13692_v3  ;;  %5251 = vmatmul.mubr.f32.gmra.mrb[2].mxu1 %v11161_v59  ;;  %v13695_v3 = vld [vmem:[#allocation75_spill] sm:$0xff] }
 0x4ac   :  { %4579 = vmatprep.mubr.f32.mxu0 %v13552_v26  ;;  %5256 = vmatprep.mubr.f32.mxu1 %v13552_v26 }
 0x4af   :  { %4581 = vmatmul.mubr.f32.gmra.mrb[96].mxu0 %v13693_v29  ;;  %5259 = vmatmul.mubr.f32.gmra.mrb[4].mxu1 %v11182_v22  ;;  %v13696_v29 = vld [vmem:[#allocation80_spill] sm:$0xff] }
 0x4b0   :  { %4586 = vmatprep.mubr.f32.mxu0 %v13552_v26  ;;  %5264 = vmatprep.mubr.f32.mxu1 %v13552_v26 }
 0x4b3   :  { %4588 = vmatmul.mubr.f32.gmra.mrb[98].mxu0 %v13694_v60  ;;  %5267 = vmatmul.mubr.f32.gmra.mrb[6].mxu1 %v11197_v55  ;;  %v13697_v60 = vld [vmem:[#allocation89_spill] sm:$0xff]  ;;  %v13700_v55 = vld [vmem:[#allocation92_spill] sm:$0xff] }
 0x4b4   :  { %4593 = vmatprep.mubr.f32.mxu0 %v13552_v26  ;;  %5272 = vmatprep.mubr.f32.mxu1 %v13552_v26 }
 0x4b7   :  { %4595 = vmatmul.mubr.f32.gmra.mrb[100].mxu0 %v13695_v3  ;;  %5275 = vmatmul.mubr.f32.gmra.mrb[8].mxu1 %v11218_v21 }
 0x4b8   :  { %4600 = vmatprep.mubr.f32.mxu0 %v13552_v26  ;;  %5280 = vmatprep.mubr.f32.mxu1 %v13552_v26 }
 0x4bb   :  { %4602 = vmatmul.mubr.f32.gmra.mrb[102].mxu0 %v13696_v29  ;;  %5283 = vmatmul.mubr.f32.gmra.mrb[10].mxu1 %v11233_v11 }
 0x4bc   :  { %4607 = vmatprep.mubr.f32.mxu0 %v13552_v26  ;;  %5288 = vmatprep.mubr.f32.mxu1 %v13552_v26 }
 0x4bf   :  { %4609 = vmatmul.mubr.f32.gmra.mrb[104].mxu0 %v13697_v60  ;;  %5291 = vmatmul.mubr.f32.gmra.mrb[12].mxu1 %v11254_v42  ;;  %v13703_v42 = vld [vmem:[#allocation102_spill] sm:$0xff] }
 0x4c0   :  { %4614 = vmatprep.mubr.f32.mxu0 %v13552_v26  ;;  %5296 = vmatprep.mubr.f32.mxu1 %v13552_v26 }
 0x4c2   :  { %v11713_v3 = vpop.f32.mrb[128].mxu0 }
 0x4c3   :  { %13698 = vst [vmem:[#allocation77_spill] sm:$0xff] %v11713_v3  ;;  %v11715_v21 = vpop.f32.mrb[129].mxu0  ;;  %4616 = vmatmul.mubr.f32.gmra.mrb[106].mxu0 %v13700_v55  ;;  %5299 = vmatmul.mubr.f32.gmra.mrb[14].mxu1 %v11269_v47  ;;  %v13706_v55 = vld [vmem:[#allocation107_spill] sm:$0xff] }
 0x4c4   :  { %13699 = vst [vmem:[#allocation78_spill] sm:$0xff] %v11715_v21  ;;  %4621 = vmatprep.mubr.f32.mxu0 %v13552_v26  ;;  %5304 = vmatprep.mubr.f32.mxu1 %v13552_v26 }
 0x4c6   :  { %v11721_v29 = vpop.f32.mrb[130].mxu0 }
 0x4c7   :  { %13701 = vst [vmem:[#allocation81_spill] sm:$0xff] %v11721_v29  ;;  %v11723_v60 = vpop.f32.mrb[131].mxu0  ;;  %4623 = vmatmul.mubr.f32.gmra.mrb[108].mxu0 %v13703_v42  ;;  %5307 = vmatmul.mubr.f32.gmra.mrb[16].mxu1 %v11290_v1  ;;  %v13709_v42 = vld [vmem:[#allocation121_spill] sm:$0xff] }
 0x4c8   :  { %13702 = vst [vmem:[#allocation83_spill] sm:$0xff] %v11723_v60  ;;  %4628 = vmatprep.mubr.f32.mxu0 %v13552_v26  ;;  %5312 = vmatprep.mubr.f32.mxu1 %v13552_v26 }
 0x4ca   :  { %v11729_v21 = vpop.f32.mrb[132].mxu0 }
 0x4cb   :  { %13704 = vst [vmem:[#allocation85_spill] sm:$0xff] %v11729_v21  ;;  %v11731_v3 = vpop.f32.mrb[133].mxu0  ;;  %4630 = vmatmul.mubr.f32.gmra.mrb[110].mxu0 %v13706_v55  ;;  %5315 = vmatmul.mubr.f32.gmra.mrb[18].mxu1 %v11305_v61  ;;  %v13712_v55 = vld [vmem:[#allocation98_spill] sm:$0xff] }
 0x4cc   :  { %13705 = vst [vmem:[#allocation87_spill] sm:$0xff] %v11731_v3  ;;  %4635 = vmatprep.mubr.f32.mxu0 %v13552_v26  ;;  %5320 = vmatprep.mubr.f32.mxu1 %v13552_v26 }
 0x4ce   :  { %v11737_v60 = vpop.f32.mrb[134].mxu0 }
 0x4cf   :  { %13707 = vst [vmem:[#allocation88_spill] sm:$0xff] %v11737_v60  ;;  %v11739_v29 = vpop.f32.mrb[135].mxu0  ;;  %4637 = vmatmul.mubr.f32.gmra.mrb[112].mxu0 %v13709_v42  ;;  %5323 = vmatmul.mubr.f32.gmra.mrb[20].mxu1 %v11326_v58  ;;  %v13715_v42 = vld [vmem:[#allocation122_spill] sm:$0xff] }
 0x4d0   :  { %13708 = vst [vmem:[#allocation90_spill] sm:$0xff] %v11739_v29  ;;  %4642 = vmatprep.mubr.f32.mxu0 %v13552_v26  ;;  %5328 = vmatprep.mubr.f32.mxu1 %v13552_v26 }
 0x4d2   :  { %v11745_v3 = vpop.f32.mrb[136].mxu0 }
 0x4d3   :  { %13710 = vst [vmem:[#allocation93_spill] sm:$0xff] %v11745_v3  ;;  %v11747_v21 = vpop.f32.mrb[137].mxu0  ;;  %4644 = vmatmul.mubr.f32.gmra.mrb[114].mxu0 %v13712_v55  ;;  %5331 = vmatmul.mubr.f32.gmra.mrb[22].mxu1 %v11341_v46  ;;  %v13718_v55 = vld [vmem:[#allocation130_spill] sm:$0xff] }
 0x4d4   :  { %13711 = vst [vmem:[#allocation94_spill] sm:$0xff] %v11747_v21  ;;  %4649 = vmatprep.mubr.f32.mxu0 %v13552_v26  ;;  %5336 = vmatprep.mubr.f32.mxu1 %v13552_v26 }
 0x4d6   :  { %v11753_v29 = vpop.f32.mrb[138].mxu0 }
 0x4d7   :  { %13713 = vst [vmem:[#allocation97_spill] sm:$0xff] %v11753_v29  ;;  %v11755_v60 = vpop.f32.mrb[139].mxu0  ;;  %4651 = vmatmul.mubr.f32.gmra.mrb[116].mxu0 %v13715_v42  ;;  %5339 = vmatmul.mubr.f32.gmra.mrb[24].mxu1 %v11362_v38  ;;  %v13721_v42 = vld [vmem:[#allocation7_spill] sm:$0xff] }
 0x4d8   :  { %13714 = vst [vmem:[#allocation99_spill] sm:$0xff] %v11755_v60  ;;  %4656 = vmatprep.mubr.f32.mxu0 %v13552_v26  ;;  %5344 = vmatprep.mubr.f32.mxu1 %v13552_v26 }
 0x4da   :  { %v11761_v21 = vpop.f32.mrb[140].mxu0 }
 0x4db   :  { %13716 = vst [vmem:[#allocation101_spill] sm:$0xff] %v11761_v21  ;;  %v11763_v3 = vpop.f32.mrb[141].mxu0  ;;  %4658 = vmatmul.mubr.f32.gmra.mrb[118].mxu0 %v13718_v55  ;;  %5347 = vmatmul.mubr.f32.gmra.mrb[26].mxu1 %v11377_v5  ;;  %v13724_v55 = vld [vmem:[#allocation11_spill] sm:$0xff] }
 0x4dc   :  { %13717 = vst [vmem:[#allocation103_spill] sm:$0xff] %v11763_v3  ;;  %4663 = vmatprep.mubr.f32.mxu0 %v13552_v26  ;;  %5352 = vmatprep.mubr.f32.mxu1 %v13552_v26 }
 0x4de   :  { %v11769_v60 = vpop.f32.mrb[142].mxu0 }
 0x4df   :  { %13719 = vst [vmem:[#allocation104_spill] sm:$0xff] %v11769_v60  ;;  %v11771_v29 = vpop.f32.mrb[143].mxu0  ;;  %4665 = vmatmul.mubr.f32.gmra.mrb[120].mxu0 %v13721_v42  ;;  %5355 = vmatmul.mubr.f32.gmra.mrb[28].mxu1 %v11398_v44  ;;  %v13727_v42 = vld [vmem:[#allocation21_spill] sm:$0xff] }
 0x4e0   :  { %13720 = vst [vmem:[#allocation108_spill] sm:$0xff] %v11771_v29  ;;  %4670 = vmatprep.mubr.f32.mxu0 %v13552_v26  ;;  %5360 = vmatprep.mubr.f32.mxu1 %v13552_v26 }
 0x4e2   :  { %v11777_v3 = vpop.f32.mrb[144].mxu0 }
 0x4e3   :  { %13722 = vst [vmem:[#allocation109_spill] sm:$0xff] %v11777_v3  ;;  %v11779_v21 = vpop.f32.mrb[145].mxu0  ;;  %4672 = vmatmul.mubr.f32.gmra.mrb[122].mxu0 %v13724_v55  ;;  %5363 = vmatmul.mubr.f32.gmra.mrb[30].mxu1 %v11413_v7  ;;  %v13730_v55 = vld [vmem:[#allocation24_spill] sm:$0xff] }
 0x4e4   :  { %13723 = vst [vmem:[#allocation110_spill] sm:$0xff] %v11779_v21  ;;  %4677 = vmatprep.mubr.f32.mxu0 %v13552_v26  ;;  %5368 = vmatprep.mubr.f32.mxu1 %v13552_v26 }
 0x4e6   :  { %v11785_v29 = vpop.f32.mrb[146].mxu0 }
 0x4e7   :  { %13725 = vst [vmem:[#allocation111_spill] sm:$0xff] %v11785_v29  ;;  %v11787_v60 = vpop.f32.mrb[147].mxu0  ;;  %4679 = vmatmul.mubr.f32.gmra.mrb[124].mxu0 %v13727_v42  ;;  %5371 = vmatmul.mubr.f32.gmra.mrb[32].mxu1 %v11434_v28 }
 0x4e8   :  { %13726 = vst [vmem:[#allocation116_spill] sm:$0xff] %v11787_v60  ;;  %4684 = vmatprep.mubr.f32.mxu0 %v13552_v26  ;;  %5376 = vmatprep.mubr.f32.mxu1 %v13552_v26 }
 0x4ea   :  { %v11793_v21 = vpop.f32.mrb[148].mxu0 }
 0x4eb   :  { %13728 = vst [vmem:[#allocation117_spill] sm:$0xff] %v11793_v21  ;;  %v11795_v3 = vpop.f32.mrb[149].mxu0  ;;  %4686 = vmatmul.mubr.f32.gmra.mrb[126].mxu0 %v13730_v55  ;;  %5379 = vmatmul.mubr.f32.gmra.mrb[34].mxu1 %v11447_v54 }
 0x4ec   :  { %13729 = vst [vmem:[#allocation119_spill] sm:$0xff] %v11795_v3  ;;  %5384 = vmatprep.mubr.f32.mxu1 %v13552_v26 }
 0x4ee   :  { %v11800_v29 = vpop.f32.mrb[150].mxu0 }
 0x4ef   :  { %13731 = vst [vmem:[#allocation120_spill] sm:$0xff] %v11800_v29  ;;  %v11802_v60 = vpop.f32.mrb[151].mxu0  ;;  %5387 = vmatmul.mubr.f32.gmra.mrb[36].mxu1 %v11459_v45 }
 0x4f0   :  { %13732 = vst [vmem:[#allocation123_spill] sm:$0xff] %v11802_v60  ;;  %5392 = vmatprep.mubr.f32.mxu1 %v13552_v26 }
 0x4f2   :  { %v11806_v42 = vpop.f32.mrb[152].mxu0 }
 0x4f3   :  { %13733 = vst [vmem:[#allocation124_spill] sm:$0xff] %v11806_v42  ;;  %v11808_v28 = vpop.f32.mrb[153].mxu0  ;;  %5395 = vmatmul.mubr.f32.gmra.mrb[38].mxu1 %v11472_v62 }
 0x4f4   :  { %13734 = vst [vmem:[#allocation126_spill] sm:$0xff] %v11808_v28  ;;  %5400 = vmatprep.mubr.f32.mxu1 %v13552_v26 }
 0x4f6   :  { %v11812_v3 = vpop.f32.mrb[154].mxu0 }
 0x4f7   :  { %13735 = vst [vmem:[#allocation128_spill] sm:$0xff] %v11812_v3  ;;  %v11814_v21 = vpop.f32.mrb[155].mxu0  ;;  %5403 = vmatmul.mubr.f32.gmra.mrb[40].mxu1 %v11484_v13 }
 0x4f8   :  { %13736 = vst [vmem:[#allocation129_spill] sm:$0xff] %v11814_v21  ;;  %5408 = vmatprep.mubr.f32.mxu1 %v13552_v26 }
 0x4fa   :  { %v11818_v60 = vpop.f32.mrb[156].mxu0 }
 0x4fb   :  { %13737 = vst [vmem:[#allocation25_spill] sm:$0xff] %v11818_v60  ;;  %v11820_v29 = vpop.f32.mrb[157].mxu0  ;;  %5411 = vmatmul.mubr.f32.gmra.mrb[42].mxu1 %v11494_v2 }
 0x4fc   :  { %13738 = vst [vmem:[#allocation26_spill] sm:$0xff] %v11820_v29  ;;  %5416 = vmatprep.mubr.f32.mxu1 %v13552_v26 }
 0x4fe   :  { %v11824_v28 = vpop.f32.mrb[158].mxu0 }
 0x4ff   :  { %13739 = vst [vmem:[#allocation32_spill] sm:$0xff] %v11824_v28  ;;  %v11826_v42 = vpop.f32.mrb[159].mxu0  ;;  %5419 = vmatmul.mubr.f32.gmra.mrb[44].mxu1 %v11506_v18 }
 0x500   :  { %13740 = vst [vmem:[#allocation33_spill] sm:$0xff] %v11826_v42  ;;  %5424 = vmatprep.mubr.f32.mxu1 %v13552_v26 }
 0x502   :  { %v11830_v21 = vpop.f32.mrb[160].mxu0 }
 0x503   :  { %13741 = vst [vmem:[#allocation41_spill] sm:$0xff] %v11830_v21  ;;  %v11832_v3 = vpop.f32.mrb[161].mxu0  ;;  %5427 = vmatmul.mubr.f32.gmra.mrb[46].mxu1 %v11516_v41 }
 0x504   :  { %13742 = vst [vmem:[#allocation42_spill] sm:$0xff] %v11832_v3  ;;  %5432 = vmatprep.mubr.f32.mxu1 %v13552_v26 }
 0x506   :  { %v11836_v29 = vpop.f32.mrb[162].mxu0 }
 0x507   :  { %13743 = vst [vmem:[#allocation49_spill] sm:$0xff] %v11836_v29  ;;  %v11838_v60 = vpop.f32.mrb[163].mxu0  ;;  %5435 = vmatmul.mubr.f32.gmra.mrb[48].mxu1 %v11528_v20 }
 0x508   :  { %13744 = vst [vmem:[#allocation50_spill] sm:$0xff] %v11838_v60  ;;  %5440 = vmatprep.mubr.f32.mxu1 %v13552_v26 }
 0x50a   :  { %v11842_v42 = vpop.f32.mrb[164].mxu0 }
 0x50b   :  { %13745 = vst [vmem:[#allocation57_spill] sm:$0xff] %v11842_v42  ;;  %v11844_v28 = vpop.f32.mrb[165].mxu0  ;;  %5443 = vmatmul.mubr.f32.gmra.mrb[50].mxu1 %v11538_v0 }
 0x50c   :  { %13746 = vst [vmem:[#allocation58_spill] sm:$0xff] %v11844_v28  ;;  %5448 = vmatprep.mubr.f32.mxu1 %v13552_v26 }
 0x50e   :  { %v11848_v3 = vpop.f32.mrb[166].mxu0 }
 0x50f   :  { %13747 = vst [vmem:[#allocation64_spill] sm:$0xff] %v11848_v3  ;;  %v11850_v21 = vpop.f32.mrb[167].mxu0  ;;  %5451 = vmatmul.mubr.f32.gmra.mrb[52].mxu1 %v11550_v31 }
 0x510   :  { %13748 = vst [vmem:[#allocation66_spill] sm:$0xff] %v11850_v21  ;;  %5456 = vmatprep.mubr.f32.mxu1 %v13552_v26 }
 0x512   :  { %v11854_v60 = vpop.f32.mrb[168].mxu0 }
 0x513   :  { %13749 = vst [vmem:[#allocation73_spill] sm:$0xff] %v11854_v60  ;;  %v11856_v29 = vpop.f32.mrb[169].mxu0  ;;  %5459 = vmatmul.mubr.f32.gmra.mrb[54].mxu1 %v11560_v15 }
 0x514   :  { %13750 = vst [vmem:[#allocation74_spill] sm:$0xff] %v11856_v29  ;;  %5464 = vmatprep.mubr.f32.mxu1 %v13552_v26 }
 0x516   :  { %v11860_v28 = vpop.f32.mrb[170].mxu0 }
 0x517   :  { %13751 = vst [vmem:[#allocation82_spill] sm:$0xff] %v11860_v28  ;;  %v11862_v42 = vpop.f32.mrb[171].mxu0  ;;  %5467 = vmatmul.mubr.f32.gmra.mrb[56].mxu1 %v11572_v52 }
 0x518   :  { %13752 = vst [vmem:[#allocation86_spill] sm:$0xff] %v11862_v42  ;;  %5472 = vmatprep.mubr.f32.mxu1 %v13552_v26 }
 0x51a   :  { %v11866_v21 = vpop.f32.mrb[172].mxu0 }
 0x51b   :  { %13753 = vst [vmem:[#allocation95_spill] sm:$0xff] %v11866_v21  ;;  %v11868_v3 = vpop.f32.mrb[173].mxu0  ;;  %5475 = vmatmul.mubr.f32.gmra.mrb[58].mxu1 %v11582_v17 }
 0x51c   :  { %13754 = vst [vmem:[#allocation100_spill] sm:$0xff] %v11868_v3  ;;  %5480 = vmatprep.mubr.f32.mxu1 %v13552_v26 }
 0x51e   :  { %v11872_v29 = vpop.f32.mrb[174].mxu0 }
 0x51f   :  { %13755 = vst [vmem:[#allocation112_spill] sm:$0xff] %v11872_v29  ;;  %v11874_v60 = vpop.f32.mrb[175].mxu0  ;;  %5483 = vmatmul.mubr.f32.gmra.mrb[60].mxu1 %v11594_v40  ;;  %v13761_v29 = vand.u32 4294901760, %v10588_v49  ;;  %v13764_v40 = vld [vmem:[#allocation9_spill] sm:$0xff] }
 0x520   :  { %13756 = vst [vmem:[#allocation6_spill] sm:$0xff] %v11874_v60  ;;  %5488 = vmatprep.mubr.f32.mxu1 %v13552_v26  ;;  %v13762_v60 = vld [vmem:[#allocation13_spill] sm:$0xff] }
 0x521   :  { %v13763_v55 = vand.u32 4294901760, %v13762_v60  ;;  %v13773_v60 = vand.u32 4294901760, %v10605_v51 }
 0x522   :  { %v11878_v42 = vpop.f32.mrb[176].mxu0 }
 0x523   :  { %13757 = vst [vmem:[#allocation15_spill] sm:$0xff] %v11878_v42  ;;  %v11880_v28 = vpop.f32.mrb[177].mxu0  ;;  %5491 = vmatmul.mubr.f32.gmra.mrb[62].mxu1 %v11604_v30  ;;  %v13767_v30 = vand.u32 4294901760, %v10585_v14 }
 0x524   :  { %13758 = vst [vmem:[#allocation20_spill] sm:$0xff] %v11880_v28  ;;  %5563 = vmatprep.mubr.f32.mxu1 %v13552_v26 }
 0x526   :  { %v11884_v3 = vpop.f32.mrb[178].mxu0 }
 0x527   :  { %13759 = vst [vmem:[#allocation132_spill] sm:$0xff] %v11884_v3  ;;  %v11886_v21 = vpop.f32.mrb[179].mxu0  ;;  %5567 = vmatmul.mubr.f32.vlgmr.msra.gmra.mrb[64].mxu1 %v13761_v29  ;;  %v13770_v29 = vand.u32 4294901760, %v10602_v12  ;;  %v13809_v3 = vand.u32 4294901760, %v13663_v19 }
 0x528   :  { %13760 = vst [vmem:[#allocation133_spill] sm:$0xff] %v11886_v21  ;;  %6147 = vmatpush1.msra.mxu1 %v13763_v55  ;;  %5572 = vmatprep.mubr.f32.mxu1 %v13552_v26 }
 0x529   :  { %6660 = vmatprep.subr.mxu1 %v13764_v40 }
 0x52a   :  { %v11894_v42 = vpop.f32.mrb[180].mxu0 }
 0x52b   :  { %13765 = vst [vmem:[#allocation13_spill] sm:$0xff] %v11894_v42  ;;  %v11896_v28 = vpop.f32.mrb[181].mxu0  ;;  %5576 = vmatmul.mubr.f32.gmra.mrb[66].mxu1 %v13767_v30  ;;  %v13806_v42 = vand.u32 4294901760, %v13662_v50 }
 0x52c   :  { %13766 = vst [vmem:[#allocation9_spill] sm:$0xff] %v11896_v28  ;;  %5581 = vmatprep.mubr.f32.mxu1 %v13552_v26  ;;  %v13803_v28 = vand.u32 4294901760, %v13661_v56 }
 0x52e   :  { %v11901_v21 = vpop.f32.mrb[182].mxu0 }
 0x52f   :  { %13768 = vst [vmem:[#allocation134_spill] sm:$0xff] %v11901_v21  ;;  %v11903_v49 = vpop.f32.mrb[183].mxu0  ;;  %5585 = vmatmul.mubr.f32.gmra.mrb[68].mxu1 %v13770_v29  ;;  %v13800_v21 = vand.u32 4294901760, %v13658_v16 }
 0x530   :  { %13769 = vst [vmem:[#allocation135_spill] sm:$0xff] %v11903_v49  ;;  %5590 = vmatprep.mubr.f32.mxu1 %v13552_v26  ;;  %v13776_v49 = vand.u32 4294901760, %v13644_v10 }
 0x532   :  { %v11908_v55 = vpop.f32.mrb[184].mxu0 }
 0x533   :  { %13771 = vst [vmem:[#allocation136_spill] sm:$0xff] %v11908_v55  ;;  %v11910_v40 = vpop.f32.mrb[185].mxu0  ;;  %5594 = vmatmul.mubr.f32.gmra.mrb[70].mxu1 %v13773_v60  ;;  %v13797_v55 = vand.u32 4294901760, %v13656_v37 }
 0x534   :  { %13772 = vst [vmem:[#allocation137_spill] sm:$0xff] %v11910_v40  ;;  %5599 = vmatprep.mubr.f32.mxu1 %v13552_v26  ;;  %v13779_v40 = vand.u32 4294901760, %v13645_v53 }
 0x536   :  { %v11915_v14 = vpop.f32.mrb[186].mxu0 }
 0x537   :  { %13774 = vst [vmem:[#allocation138_spill] sm:$0xff] %v11915_v14  ;;  %v11917_v30 = vpop.f32.mrb[187].mxu0  ;;  %5603 = vmatmul.mubr.f32.gmra.mrb[72].mxu1 %v13776_v49  ;;  %v13794_v14 = vand.u32 4294901760, %v13654_v8 }
 0x538   :  { %13775 = vst [vmem:[#allocation139_spill] sm:$0xff] %v11917_v30  ;;  %5608 = vmatprep.mubr.f32.mxu1 %v13552_v26  ;;  %v13782_v30 = vand.u32 4294901760, %v13647_v48 }
 0x53a   :  { %v11922_v12 = vpop.f32.mrb[188].mxu0 }
 0x53b   :  { %13777 = vst [vmem:[#allocation140_spill] sm:$0xff] %v11922_v12  ;;  %v11924_v29 = vpop.f32.mrb[189].mxu0  ;;  %5612 = vmatmul.mubr.f32.gmra.mrb[74].mxu1 %v13779_v40  ;;  %v13791_v12 = vand.u32 4294901760, %v13653_v39 }
 0x53c   :  { %13778 = vst [vmem:[#allocation141_spill] sm:$0xff] %v11924_v29  ;;  %5617 = vmatprep.mubr.f32.mxu1 %v13552_v26  ;;  %v13783_v29 = vand.u32 4294901760, %v13648_v36 }
 0x53e   :  { %v11929_v51 = vpop.f32.mrb[190].mxu0 }
 0x53f   :  { %13780 = vst [vmem:[#allocation142_spill] sm:$0xff] %v11929_v51  ;;  %v11931_v60 = vpop.f32.mrb[191].mxu0  ;;  %5621 = vmatmul.mubr.f32.gmra.mrb[76].mxu1 %v13782_v30  ;;  %v13788_v51 = vand.u32 4294901760, %v13651_v33 }
 0x540   :  { %13781 = vst [vmem:[#allocation143_spill] sm:$0xff] %v11931_v60  ;;  %5626 = vmatprep.mubr.f32.mxu1 %v13552_v26  ;;  %v13785_v60 = vand.u32 4294901760, %v13650_v6 }
 0x542   :  { %v11936_v10 = vpop.f32.mrb[64].mxu0 }
 0x543   :  { %v11938_v49 = vpop.f32.mrb[65].mxu0  ;;  %5630 = vmatmul.mubr.f32.gmra.mrb[78].mxu1 %v13783_v29 }
 0x544   :  { %5635 = vmatprep.mubr.f32.mxu1 %v13552_v26 }
 0x546   :  { %v11943_v53 = vpop.f32.mrb[66].mxu0 }
 0x547   :  { %v11945_v40 = vpop.f32.mrb[67].mxu0  ;;  %5639 = vmatmul.mubr.f32.gmra.mrb[80].mxu1 %v13785_v60 }
 0x548   :  { %13784 = vst [vmem:[#allocation144_spill] sm:$0xff] %v11945_v40  ;;  %5644 = vmatprep.mubr.f32.mxu1 %v13552_v26  ;;  %v13971_v40 = vld [vmem:[#allocation61_spill] sm:$0xff] }
 0x54a   :  { %v11950_v48 = vpop.f32.mrb[68].mxu0 }
 0x54b   :  { %13786 = vst [vmem:[#allocation145_spill] sm:$0xff] %v11950_v48  ;;  %v11952_v30 = vpop.f32.mrb[69].mxu0  ;;  %5648 = vmatmul.mubr.f32.gmra.mrb[82].mxu1 %v13788_v51  ;;  %v13970_v48 = vld [vmem:[#allocation59_spill] sm:$0xff] }
 0x54c   :  { %13787 = vst [vmem:[#allocation146_spill] sm:$0xff] %v11952_v30  ;;  %5653 = vmatprep.mubr.f32.mxu1 %v13552_v26  ;;  %v13969_v30 = vld [vmem:[#allocation56_spill] sm:$0xff] }
 0x54e   :  { %v11957_v36 = vpop.f32.mrb[70].mxu0 }
 0x54f   :  { %13789 = vst [vmem:[#allocation147_spill] sm:$0xff] %v11957_v36  ;;  %v11959_v29 = vpop.f32.mrb[71].mxu0  ;;  %5657 = vmatmul.mubr.f32.gmra.mrb[84].mxu1 %v13791_v12  ;;  %v13968_v36 = vld [vmem:[#allocation55_spill] sm:$0xff] }
 0x550   :  { %13790 = vst [vmem:[#allocation148_spill] sm:$0xff] %v11959_v29  ;;  %5662 = vmatprep.mubr.f32.mxu1 %v13552_v26  ;;  %v13967_v29 = vld [vmem:[#allocation53_spill] sm:$0xff] }
 0x552   :  { %v11964_v6 = vpop.f32.mrb[72].mxu0 }
 0x553   :  { %13792 = vst [vmem:[#allocation149_spill] sm:$0xff] %v11964_v6  ;;  %v11966_v60 = vpop.f32.mrb[73].mxu0  ;;  %5666 = vmatmul.mubr.f32.gmra.mrb[86].mxu1 %v13794_v14  ;;  %v13966_v6 = vld [vmem:[#allocation51_spill] sm:$0xff] }
 0x554   :  { %13793 = vst [vmem:[#allocation150_spill] sm:$0xff] %v11966_v60  ;;  %5671 = vmatprep.mubr.f32.mxu1 %v13552_v26  ;;  %v13965_v60 = vld [vmem:[#allocation48_spill] sm:$0xff] }
 0x556   :  { %v11971_v33 = vpop.f32.mrb[74].mxu0 }
 0x557   :  { %13795 = vst [vmem:[#allocation151_spill] sm:$0xff] %v11971_v33  ;;  %v11973_v51 = vpop.f32.mrb[75].mxu0  ;;  %5675 = vmatmul.mubr.f32.gmra.mrb[88].mxu1 %v13797_v55  ;;  %v13964_v33 = vld [vmem:[#allocation45_spill] sm:$0xff] }
 0x558   :  { %13796 = vst [vmem:[#allocation152_spill] sm:$0xff] %v11973_v51  ;;  %5680 = vmatprep.mubr.f32.mxu1 %v13552_v26  ;;  %v13963_v51 = vld [vmem:[#allocation44_spill] sm:$0xff] }
 0x55a   :  { %v11978_v39 = vpop.f32.mrb[76].mxu0 }
 0x55b   :  { %13798 = vst [vmem:[#allocation153_spill] sm:$0xff] %v11978_v39  ;;  %v11980_v12 = vpop.f32.mrb[77].mxu0  ;;  %5684 = vmatmul.mubr.f32.gmra.mrb[90].mxu1 %v13800_v21  ;;  %v13962_v39 = vld [vmem:[#allocation39_spill] sm:$0xff] }
 0x55c   :  { %13799 = vst [vmem:[#allocation154_spill] sm:$0xff] %v11980_v12  ;;  %5689 = vmatprep.mubr.f32.mxu1 %v13552_v26  ;;  %v13961_v12 = vld [vmem:[#allocation36_spill] sm:$0xff] }
 0x55e   :  { %v11985_v8 = vpop.f32.mrb[78].mxu0 }
 0x55f   :  { %13801 = vst [vmem:[#allocation155_spill] sm:$0xff] %v11985_v8  ;;  %v11987_v14 = vpop.f32.mrb[79].mxu0  ;;  %5693 = vmatmul.mubr.f32.gmra.mrb[92].mxu1 %v13803_v28  ;;  %v13960_v8 = vld [vmem:[#allocation34_spill] sm:$0xff] }
 0x560   :  { %13802 = vst [vmem:[#allocation156_spill] sm:$0xff] %v11987_v14  ;;  %5698 = vmatprep.mubr.f32.mxu1 %v13552_v26  ;;  %v13959_v14 = vld [vmem:[#allocation30_spill] sm:$0xff] }
 0x562   :  { %v11992_v37 = vpop.f32.mrb[80].mxu0 }
 0x563   :  { %13804 = vst [vmem:[#allocation157_spill] sm:$0xff] %v11992_v37  ;;  %v11994_v55 = vpop.f32.mrb[81].mxu0  ;;  %5702 = vmatmul.mubr.f32.gmra.mrb[94].mxu1 %v13806_v42  ;;  %v13958_v37 = vld [vmem:[#allocation29_spill] sm:$0xff] }
 0x564   :  { %13805 = vst [vmem:[#allocation158_spill] sm:$0xff] %v11994_v55  ;;  %5707 = vmatprep.mubr.f32.mxu1 %v13552_v26  ;;  %v13812_v55 = vand.u32 4294901760, %v13664_v32 }
 0x566   :  { %v11999_v21 = vpop.f32.mrb[82].mxu0 }
 0x567   :  { %13807 = vst [vmem:[#allocation159_spill] sm:$0xff] %v11999_v21  ;;  %v12001_v16 = vpop.f32.mrb[83].mxu0  ;;  %5711 = vmatmul.mubr.f32.gmra.mrb[96].mxu1 %v13809_v3  ;;  %v13957_v21 = vld [vmem:[#allocation28_spill] sm:$0xff] }
 0x568   :  { %13808 = vst [vmem:[#allocation160_spill] sm:$0xff] %v12001_v16  ;;  %5716 = vmatprep.mubr.f32.mxu1 %v13552_v26  ;;  %v13815_v16 = vand.u32 4294901760, %v13666_v57 }
 0x56a   :  { %v12006_v28 = vpop.f32.mrb[84].mxu0 }
 0x56b   :  { %13810 = vst [vmem:[#allocation161_spill] sm:$0xff] %v12006_v28  ;;  %v12008_v56 = vpop.f32.mrb[85].mxu0  ;;  %5720 = vmatmul.mubr.f32.gmra.mrb[98].mxu1 %v13812_v55  ;;  %v13956_v28 = vld [vmem:[#allocation23_spill] sm:$0xff] }
 0x56c   :  { %13811 = vst [vmem:[#allocation162_spill] sm:$0xff] %v12008_v56  ;;  %5725 = vmatprep.mubr.f32.mxu1 %v13552_v26  ;;  %v13818_v56 = vand.u32 4294901760, %v13668_v23 }
 0x56e   :  { %v12013_v42 = vpop.f32.mrb[86].mxu0 }
 0x56f   :  { %13813 = vst [vmem:[#allocation163_spill] sm:$0xff] %v12013_v42  ;;  %v12015_v50 = vpop.f32.mrb[87].mxu0  ;;  %5729 = vmatmul.mubr.f32.gmra.mrb[100].mxu1 %v13815_v16  ;;  %v13955_v42 = vld [vmem:[#allocation18_spill] sm:$0xff] }
 0x570   :  { %13814 = vst [vmem:[#allocation164_spill] sm:$0xff] %v12015_v50  ;;  %5734 = vmatprep.mubr.f32.mxu1 %v13552_v26  ;;  %v13821_v50 = vand.u32 4294901760, %v13670_v35 }
 0x572   :  { %v12020_v3 = vpop.f32.mrb[88].mxu0 }
 0x573   :  { %13816 = vst [vmem:[#allocation165_spill] sm:$0xff] %v12020_v3  ;;  %v12022_v19 = vpop.f32.mrb[89].mxu0  ;;  %5738 = vmatmul.mubr.f32.gmra.mrb[102].mxu1 %v13818_v56  ;;  %v13954_v3 = vld [vmem:[#allocation8_spill] sm:$0xff] }
 0x574   :  { %13817 = vst [vmem:[#allocation166_spill] sm:$0xff] %v12022_v19  ;;  %5743 = vmatprep.mubr.f32.mxu1 %v13552_v26  ;;  %v13824_v19 = vand.u32 4294901760, %v13672_v43 }
 0x576   :  { %v12027_v32 = vpop.f32.mrb[90].mxu0 }
 0x577   :  { %13819 = vst [vmem:[#allocation167_spill] sm:$0xff] %v12027_v32  ;;  %v12029_v55 = vpop.f32.mrb[91].mxu0  ;;  %5747 = vmatmul.mubr.f32.gmra.mrb[104].mxu1 %v13821_v50  ;;  %v13953_v32 = vld [vmem:[#allocation5_spill] sm:$0xff] }
 0x578   :  { %13820 = vst [vmem:[#allocation168_spill] sm:$0xff] %v12029_v55  ;;  %5752 = vmatprep.mubr.f32.mxu1 %v13552_v26  ;;  %v13827_v55 = vand.u32 4294901760, %v13674_v27 }
 0x57a   :  { %v12034_v57 = vpop.f32.mrb[92].mxu0 }
 0x57b   :  { %13822 = vst [vmem:[#allocation169_spill] sm:$0xff] %v12034_v57  ;;  %v12036_v16 = vpop.f32.mrb[93].mxu0  ;;  %5756 = vmatmul.mubr.f32.gmra.mrb[106].mxu1 %v13824_v19  ;;  %v13830_v57 = vld [vmem:[#allocation114_spill] sm:$0xff] }
 0x57c   :  { %13823 = vst [vmem:[#allocation170_spill] sm:$0xff] %v12036_v16  ;;  %5761 = vmatprep.mubr.f32.mxu1 %v13552_v26  ;;  %v13831_v16 = vand.u32 4294901760, %v13830_v57 }
 0x57e   :  { %v12041_v23 = vpop.f32.mrb[94].mxu0 }
 0x57f   :  { %13825 = vst [vmem:[#allocation171_spill] sm:$0xff] %v12041_v23  ;;  %v12043_v56 = vpop.f32.mrb[95].mxu0  ;;  %5765 = vmatmul.mubr.f32.gmra.mrb[108].mxu1 %v13827_v55  ;;  %v13834_v23 = vld [vmem:[#allocation105_spill] sm:$0xff] }
 0x580   :  { %13826 = vst [vmem:[#allocation172_spill] sm:$0xff] %v12043_v56  ;;  %5770 = vmatprep.mubr.f32.mxu1 %v13552_v26  ;;  %v13835_v56 = vand.u32 4294901760, %v13834_v23 }
 0x582   :  { %v12048_v35 = vpop.f32.mrb[96].mxu0 }
 0x583   :  { %13828 = vst [vmem:[#allocation173_spill] sm:$0xff] %v12048_v35  ;;  %v12050_v50 = vpop.f32.mrb[97].mxu0  ;;  %5774 = vmatmul.mubr.f32.gmra.mrb[110].mxu1 %v13831_v16  ;;  %v13838_v35 = vld [vmem:[#allocation118_spill] sm:$0xff] }
 0x584   :  { %13829 = vst [vmem:[#allocation174_spill] sm:$0xff] %v12050_v50  ;;  %5779 = vmatprep.mubr.f32.mxu1 %v13552_v26  ;;  %v13839_v50 = vand.u32 4294901760, %v13838_v35 }
 0x586   :  { %v12055_v43 = vpop.f32.mrb[98].mxu0 }
 0x587   :  { %13832 = vst [vmem:[#allocation114_spill] sm:$0xff] %v12055_v43  ;;  %v12057_v19 = vpop.f32.mrb[99].mxu0  ;;  %5783 = vmatmul.mubr.f32.gmra.mrb[112].mxu1 %v13835_v56  ;;  %v13842_v43 = vld [vmem:[#allocation131_spill] sm:$0xff] }
 0x588   :  { %13833 = vst [vmem:[#allocation175_spill] sm:$0xff] %v12057_v19  ;;  %5788 = vmatprep.mubr.f32.mxu1 %v13552_v26  ;;  %v13843_v19 = vand.u32 4294901760, %v13842_v43 }
 0x58a   :  { %v12062_v27 = vpop.f32.mrb[100].mxu0 }
 0x58b   :  { %13836 = vst [vmem:[#allocation105_spill] sm:$0xff] %v12062_v27  ;;  %v12064_v55 = vpop.f32.mrb[101].mxu0  ;;  %5792 = vmatmul.mubr.f32.gmra.mrb[114].mxu1 %v13839_v50  ;;  %v13952_v27 = vld [vmem:[#allocation127_spill] sm:$0xff] }
 0x58c   :  { %13837 = vst [vmem:[#allocation176_spill] sm:$0xff] %v12064_v55  ;;  %5797 = vmatprep.mubr.f32.mxu1 %v13552_v26  ;;  %v13846_v55 = vand.u32 4294901760, %v13684_v24 }
 0x58e   :  { %v12069_v57 = vpop.f32.mrb[102].mxu0 }
 0x58f   :  { %13840 = vst [vmem:[#allocation118_spill] sm:$0xff] %v12069_v57  ;;  %v12071_v16 = vpop.f32.mrb[103].mxu0  ;;  %5801 = vmatmul.mubr.f32.gmra.mrb[116].mxu1 %v13843_v19  ;;  %v13951_v57 = vld [vmem:[#allocation115_spill] sm:$0xff] }
 0x590   :  { %13841 = vst [vmem:[#allocation177_spill] sm:$0xff] %v12071_v16  ;;  %5806 = vmatprep.mubr.f32.mxu1 %v13552_v26  ;;  %v13849_v16 = vand.u32 4294901760, %v13686_v9 }
 0x592   :  { %v12076_v23 = vpop.f32.mrb[104].mxu0 }
 0x593   :  { %13844 = vst [vmem:[#allocation131_spill] sm:$0xff] %v12076_v23  ;;  %v12078_v56 = vpop.f32.mrb[105].mxu0  ;;  %5810 = vmatmul.mubr.f32.gmra.mrb[118].mxu1 %v13846_v55  ;;  %v13950_v23 = vld [vmem:[#allocation125_spill] sm:$0xff] }
 0x594   :  { %13845 = vst [vmem:[#allocation178_spill] sm:$0xff] %v12078_v56  ;;  %5815 = vmatprep.mubr.f32.mxu1 %v13552_v26  ;;  %v13852_v56 = vand.u32 4294901760, %v13688_v25 }
 0x596   :  { %v12083_v35 = vpop.f32.mrb[106].mxu0 }
 0x597   :  { %13847 = vst [vmem:[#allocation179_spill] sm:$0xff] %v12083_v35  ;;  %v12085_v50 = vpop.f32.mrb[107].mxu0  ;;  %5819 = vmatmul.mubr.f32.gmra.mrb[120].mxu1 %v13849_v16  ;;  %v13949_v35 = vld [vmem:[#allocation113_spill] sm:$0xff] }
 0x598   :  { %13848 = vst [vmem:[#allocation180_spill] sm:$0xff] %v12085_v50  ;;  %5824 = vmatprep.mubr.f32.mxu1 %v13552_v26  ;;  %v13855_v50 = vand.u32 4294901760, %v11103_v63 }
 0x59a   :  { %v12090_v43 = vpop.f32.mrb[108].mxu0 }
 0x59b   :  { %13850 = vst [vmem:[#allocation181_spill] sm:$0xff] %v12090_v43  ;;  %v12092_v19 = vpop.f32.mrb[109].mxu0  ;;  %5828 = vmatmul.mubr.f32.gmra.mrb[122].mxu1 %v13852_v56  ;;  %v13948_v43 = vld [vmem:[#allocation106_spill] sm:$0xff] }
 0x59c   :  { %13851 = vst [vmem:[#allocation182_spill] sm:$0xff] %v12092_v19  ;;  %5833 = vmatprep.mubr.f32.mxu1 %v13552_v26  ;;  %v13858_v19 = vand.u32 4294901760, %v11121_v34 }
 0x59e   :  { %v12097_v24 = vpop.f32.mrb[110].mxu0 }
 0x59f   :  { %13853 = vst [vmem:[#allocation183_spill] sm:$0xff] %v12097_v24  ;;  %v12099_v55 = vpop.f32.mrb[111].mxu0  ;;  %5837 = vmatmul.mubr.f32.gmra.mrb[124].mxu1 %v13855_v50  ;;  %v13947_v24 = vld [vmem:[#allocation96_spill] sm:$0xff] }
 0x5a0   :  { %13854 = vst [vmem:[#allocation184_spill] sm:$0xff] %v12099_v55  ;;  %5842 = vmatprep.mubr.f32.mxu1 %v13552_v26  ;;  %v13861_v55 = vand.u32 4294901760, %v11146_v4 }
 0x5a2   :  { %v12104_v9 = vpop.f32.mrb[112].mxu0 }
 0x5a3   :  { %13856 = vst [vmem:[#allocation185_spill] sm:$0xff] %v12104_v9  ;;  %v12106_v16 = vpop.f32.mrb[113].mxu0  ;;  %5846 = vmatmul.mubr.f32.gmra.mrb[126].mxu1 %v13858_v19  ;;  %v13946_v9 = vld [vmem:[#allocation91_spill] sm:$0xff] }
 0x5a4   :  { %13857 = vst [vmem:[#allocation186_spill] sm:$0xff] %v12106_v16  ;;  %5851 = vmatprep.mubr.f32.mxu1 %v13552_v26  ;;  %v13864_v16 = vand.u32 4294901760, %v11161_v59 }
 0x5a6   :  { %v12111_v25 = vpop.f32.mrb[114].mxu0 }
 0x5a7   :  { %13859 = vst [vmem:[#allocation187_spill] sm:$0xff] %v12111_v25  ;;  %v12113_v56 = vpop.f32.mrb[115].mxu0  ;;  %5855 = vmatmul.mubr.f32.gmra.mrb[0].mxu1 %v13861_v55  ;;  %v13945_v25 = vld [vmem:[#allocation84_spill] sm:$0xff] }
 0x5a8   :  { %13860 = vst [vmem:[#allocation188_spill] sm:$0xff] %v12113_v56  ;;  %5860 = vmatprep.mubr.f32.mxu1 %v13552_v26  ;;  %v13867_v56 = vand.u32 4294901760, %v11182_v22 }
 0x5aa   :  { %v12118_v63 = vpop.f32.mrb[116].mxu0 }
 0x5ab   :  { %13862 = vst [vmem:[#allocation189_spill] sm:$0xff] %v12118_v63  ;;  %v12120_v50 = vpop.f32.mrb[117].mxu0  ;;  %5864 = vmatmul.mubr.f32.gmra.mrb[2].mxu1 %v13864_v16  ;;  %v13870_v63 = vld [vmem:[#allocation38_spill] sm:$0xff] }
 0x5ac   :  { %13863 = vst [vmem:[#allocation190_spill] sm:$0xff] %v12120_v50  ;;  %5869 = vmatprep.mubr.f32.mxu1 %v13552_v26  ;;  %v13871_v50 = vand.u32 4294901760, %v13870_v63 }
 0x5ae   :  { %v12125_v34 = vpop.f32.mrb[118].mxu0 }
 0x5af   :  { %13865 = vst [vmem:[#allocation191_spill] sm:$0xff] %v12125_v34  ;;  %v12127_v19 = vpop.f32.mrb[119].mxu0  ;;  %5873 = vmatmul.mubr.f32.gmra.mrb[4].mxu1 %v13867_v56  ;;  %v13874_v34 = vld [vmem:[#allocation40_spill] sm:$0xff] }
 0x5b0   :  { %13866 = vst [vmem:[#allocation192_spill] sm:$0xff] %v12127_v19  ;;  %5878 = vmatprep.mubr.f32.mxu1 %v13552_v26  ;;  %v13875_v19 = vand.u32 4294901760, %v13874_v34  ;;  %v13883_v34 = vand.u32 4294901760, %v11269_v47  ;;  %v13887_v47 = vand.u32 4294901760, %v11341_v46  ;;  %v13891_v46 = vand.u32 4294901760, %v11413_v7 }
 0x5b1   :  { %v13896_v7 = vand.u32 4294901760, %v11472_v62  ;;  %v13900_v62 = vand.u32 4294901760, %v11516_v41  ;;  %v13904_v41 = vand.u32 4294901760, %v11560_v15 }
 0x5b2   :  { %v12132_v4 = vpop.f32.mrb[120].mxu0 }
 0x5b3   :  { %13868 = vst [vmem:[#allocation193_spill] sm:$0xff] %v12132_v4  ;;  %v12134_v55 = vpop.f32.mrb[121].mxu0  ;;  %5882 = vmatmul.mubr.f32.gmra.mrb[6].mxu1 %v13871_v50  ;;  %v13944_v4 = vld [vmem:[#allocation79_spill] sm:$0xff] }
 0x5b4   :  { %13869 = vst [vmem:[#allocation194_spill] sm:$0xff] %v12134_v55  ;;  %5887 = vmatprep.mubr.f32.mxu1 %v13552_v26  ;;  %v13878_v55 = vand.u32 4294901760, %v11233_v11  ;;  %v13885_v11 = vand.u32 4294901760, %v11305_v61  ;;  %v13889_v61 = vand.u32 4294901760, %v11377_v5  ;;  %v13894_v5 = vand.u32 4294901760, %v11447_v54 }
 0x5b5   :  { %v13898_v54 = vand.u32 4294901760, %v11494_v2  ;;  %v13902_v2 = vand.u32 4294901760, %v11538_v0  ;;  %v13906_v0 = vand.u32 4294901760, %v11582_v17  ;;  %v13913_v17 = vld [vmem:[#allocation12_spill] sm:$0xff] }
 0x5b6   :  { %v12139_v59 = vpop.f32.mrb[122].mxu0 }
 0x5b7   :  { %13872 = vst [vmem:[#allocation38_spill] sm:$0xff] %v12139_v59  ;;  %v12141_v16 = vpop.f32.mrb[123].mxu0  ;;  %5891 = vmatmul.mubr.f32.gmra.mrb[8].mxu1 %v13875_v19  ;;  %v13881_v59 = vld [vmem:[#allocation46_spill] sm:$0xff]  ;;  %v13884_v19 = vand.u32 4294901760, %v11290_v1  ;;  %v13888_v1 = vand.u32 4294901760, %v11362_v38 }
 0x5b8   :  { %13873 = vst [vmem:[#allocation195_spill] sm:$0xff] %v12141_v16  ;;  %5896 = vmatprep.mubr.f32.mxu1 %v13552_v26  ;;  %v13882_v16 = vand.u32 4294901760, %v13881_v59  ;;  %v13892_v59 = vld [vmem:[#allocation68_spill] sm:$0xff] }
 0x5b9   :  { %v13893_v38 = vand.u32 4294901760, %v13892_v59  ;;  %v13920_v59 = vld [vmem:[#allocation35_spill] sm:$0xff] }
 0x5ba   :  { %v12146_v22 = vpop.f32.mrb[124].mxu0 }
 0x5bb   :  { %13876 = vst [vmem:[#allocation40_spill] sm:$0xff] %v12146_v22  ;;  %v12148_v56 = vpop.f32.mrb[125].mxu0  ;;  %5900 = vmatmul.mubr.f32.gmra.mrb[10].mxu1 %v13878_v55  ;;  %v13886_v55 = vand.u32 4294901760, %v11326_v58  ;;  %v13890_v58 = vand.u32 4294901760, %v11398_v44  ;;  %v13895_v44 = vand.u32 4294901760, %v11459_v45  ;;  %v13899_v45 = vand.u32 4294901760, %v11506_v18 }
 0x5bc   :  { %13877 = vst [vmem:[#allocation196_spill] sm:$0xff] %v12148_v56  ;;  %5905 = vmatprep.mubr.f32.mxu1 %v13552_v26  ;;  %v13903_v18 = vand.u32 4294901760, %v11550_v31  ;;  %v13942_v56 = vld [vmem:[#allocation21_spill] sm:$0xff]  ;;  %v13943_v22 = vld [vmem:[#allocation24_spill] sm:$0xff] }
 0x5be   :  { %v12153_v63 = vpop.f32.mrb[126].mxu0 }
 0x5bf   :  { %13879 = vst [vmem:[#allocation197_spill] sm:$0xff] %v12153_v63  ;;  %v12155_v50 = vpop.f32.mrb[127].mxu0  ;;  %5909 = vmatmul.mubr.f32.gmra.mrb[12].mxu1 %v13882_v16  ;;  %v13897_v16 = vand.u32 4294901760, %v11484_v13  ;;  %v13901_v13 = vand.u32 4294901760, %v11528_v20  ;;  %v13905_v20 = vand.u32 4294901760, %v11572_v52  ;;  %v13912_v52 = vld [vmem:[#allocation10_spill] sm:$0xff] }
 0x5c0   :  { %13880 = vst [vmem:[#allocation198_spill] sm:$0xff] %v12155_v50  ;;  %5914 = vmatprep.mubr.f32.mxu1 %v13552_v26  ;;  %v13940_v50 = vld [vmem:[#allocation7_spill] sm:$0xff] }
 0x5c1   :  { %v13941_v63 = vld [vmem:[#allocation11_spill] sm:$0xff] }
 0x5c3   :  { %5918 = vmatmul.mubr.f32.gmra.mrb[14].mxu1 %v13883_v34  ;;  %v13907_v34 = vld [vmem:[#allocation72_spill] sm:$0xff] }
 0x5c4   :  { %5923 = vmatprep.mubr.f32.mxu1 %v13552_v26  ;;  %v13908_v31 = vand.u32 4294901760, %v13907_v34  ;;  %v13935_v34 = vld [vmem:[#allocation107_spill] sm:$0xff] }
 0x5c7   :  { %5927 = vmatmul.mubr.f32.gmra.mrb[16].mxu1 %v13884_v19  ;;  %v13909_v19 = vld [vmem:[#allocation76_spill] sm:$0xff] }
 0x5c8   :  { %5932 = vmatprep.mubr.f32.mxu1 %v13552_v26  ;;  %v13910_v15 = vand.u32 4294901760, %v13909_v19  ;;  %v13937_v19 = vld [vmem:[#allocation98_spill] sm:$0xff] }
 0x5cb   :  { %5936 = vmatmul.mubr.f32.gmra.mrb[18].mxu1 %v13885_v11  ;;  %v13911_v11 = vld [vmem:[#allocation14_spill] sm:$0xff] }
 0x5cc   :  { %5941 = vmatprep.mubr.f32.mxu1 %v13552_v26 }
 0x5cf   :  { %5945 = vmatmul.mubr.f32.gmra.mrb[20].mxu1 %v13886_v55  ;;  %v13914_v55 = vld [vmem:[#allocation17_spill] sm:$0xff] }
 0x5d0   :  { %5950 = vmatprep.mubr.f32.mxu1 %v13552_v26 }
 0x5d3   :  { %5954 = vmatmul.mubr.f32.gmra.mrb[22].mxu1 %v13887_v47  ;;  %v13915_v47 = vld [vmem:[#allocation16_spill] sm:$0xff] }
 0x5d4   :  { %5959 = vmatprep.mubr.f32.mxu1 %v13552_v26 }
 0x5d7   :  { %5963 = vmatmul.mubr.f32.gmra.mrb[24].mxu1 %v13888_v1  ;;  %v13916_v1 = vld [vmem:[#allocation19_spill] sm:$0xff] }
 0x5d8   :  { %5968 = vmatprep.mubr.f32.mxu1 %v13552_v26 }
 0x5db   :  { %5972 = vmatmul.mubr.f32.gmra.mrb[26].mxu1 %v13889_v61  ;;  %v13917_v61 = vld [vmem:[#allocation22_spill] sm:$0xff] }
 0x5dc   :  { %5977 = vmatprep.mubr.f32.mxu1 %v13552_v26 }
 0x5df   :  { %5981 = vmatmul.mubr.f32.gmra.mrb[28].mxu1 %v13890_v58  ;;  %v13918_v58 = vld [vmem:[#allocation27_spill] sm:$0xff] }
 0x5e0   :  { %5986 = vmatprep.mubr.f32.mxu1 %v13552_v26 }
 0x5e3   :  { %5990 = vmatmul.mubr.f32.gmra.mrb[30].mxu1 %v13891_v46  ;;  %v13919_v46 = vld [vmem:[#allocation31_spill] sm:$0xff] }
 0x5e4   :  { %5995 = vmatprep.mubr.f32.mxu1 %v13552_v26 }
 0x5e7   :  { %5999 = vmatmul.mubr.f32.gmra.mrb[32].mxu1 %v13893_v38  ;;  %v13921_v38 = vld [vmem:[#allocation37_spill] sm:$0xff] }
 0x5e8   :  { %6004 = vmatprep.mubr.f32.mxu1 %v13552_v26 }
 0x5eb   :  { %6008 = vmatmul.mubr.f32.gmra.mrb[34].mxu1 %v13894_v5  ;;  %v13922_v5 = vld [vmem:[#allocation43_spill] sm:$0xff] }
 0x5ec   :  { %6013 = vmatprep.mubr.f32.mxu1 %v13552_v26 }
 0x5ef   :  { %6017 = vmatmul.mubr.f32.gmra.mrb[36].mxu1 %v13895_v44  ;;  %v13923_v44 = vld [vmem:[#allocation47_spill] sm:$0xff] }
 0x5f0   :  { %6022 = vmatprep.mubr.f32.mxu1 %v13552_v26 }
 0x5f3   :  { %6026 = vmatmul.mubr.f32.gmra.mrb[38].mxu1 %v13896_v7  ;;  %v13924_v7 = vld [vmem:[#allocation52_spill] sm:$0xff] }
 0x5f4   :  { %6031 = vmatprep.mubr.f32.mxu1 %v13552_v26 }
 0x5f7   :  { %6035 = vmatmul.mubr.f32.gmra.mrb[40].mxu1 %v13897_v16  ;;  %v13925_v16 = vld [vmem:[#allocation54_spill] sm:$0xff] }
 0x5f8   :  { %6040 = vmatprep.mubr.f32.mxu1 %v13552_v26 }
 0x5fb   :  { %6044 = vmatmul.mubr.f32.gmra.mrb[42].mxu1 %v13898_v54  ;;  %v13926_v54 = vld [vmem:[#allocation60_spill] sm:$0xff] }
 0x5fc   :  { %6049 = vmatprep.mubr.f32.mxu1 %v13552_v26 }
 0x5ff   :  { %6053 = vmatmul.mubr.f32.gmra.mrb[44].mxu1 %v13899_v45  ;;  %v13927_v45 = vld [vmem:[#allocation63_spill] sm:$0xff] }
 0x600   :  { %6058 = vmatprep.mubr.f32.mxu1 %v13552_v26 }
 0x603   :  { %6062 = vmatmul.mubr.f32.gmra.mrb[46].mxu1 %v13900_v62  ;;  %v13928_v62 = vld [vmem:[#allocation69_spill] sm:$0xff] }
 0x604   :  { %6067 = vmatprep.mubr.f32.mxu1 %v13552_v26 }
 0x607   :  { %6071 = vmatmul.mubr.f32.gmra.mrb[48].mxu1 %v13901_v13  ;;  %v13929_v13 = vld [vmem:[#allocation70_spill] sm:$0xff] }
 0x608   :  { %6076 = vmatprep.mubr.f32.mxu1 %v13552_v26 }
 0x60b   :  { %6080 = vmatmul.mubr.f32.gmra.mrb[50].mxu1 %v13902_v2  ;;  %v13930_v2 = vld [vmem:[#allocation75_spill] sm:$0xff] }
 0x60c   :  { %6085 = vmatprep.mubr.f32.mxu1 %v13552_v26 }
 0x60f   :  { %6089 = vmatmul.mubr.f32.gmra.mrb[52].mxu1 %v13903_v18  ;;  %v13931_v18 = vld [vmem:[#allocation80_spill] sm:$0xff] }
 0x610   :  { %6094 = vmatprep.mubr.f32.mxu1 %v13552_v26 }
 0x613   :  { %6098 = vmatmul.mubr.f32.gmra.mrb[54].mxu1 %v13904_v41  ;;  %v13932_v41 = vld [vmem:[#allocation89_spill] sm:$0xff] }
 0x614   :  { %6103 = vmatprep.mubr.f32.mxu1 %v13552_v26 }
 0x617   :  { %6107 = vmatmul.mubr.f32.gmra.mrb[56].mxu1 %v13905_v20  ;;  %v13933_v20 = vld [vmem:[#allocation92_spill] sm:$0xff] }
 0x618   :  { %6112 = vmatprep.mubr.f32.mxu1 %v13552_v26 }
 0x61b   :  { %6116 = vmatmul.mubr.f32.gmra.mrb[58].mxu1 %v13906_v0  ;;  %v13934_v0 = vld [vmem:[#allocation102_spill] sm:$0xff] }
 0x61c   :  { %6121 = vmatprep.mubr.f32.mxu1 %v13552_v26 }
 0x61f   :  { %6125 = vmatmul.mubr.f32.gmra.mrb[60].mxu1 %v13908_v31  ;;  %v13936_v31 = vld [vmem:[#allocation121_spill] sm:$0xff] }
 0x620   :  { %6130 = vmatprep.mubr.f32.mxu1 %v13552_v26 }
 0x623   :  { %6134 = vmatmul.mubr.f32.gmra.mrb[62].mxu1 %v13910_v15  ;;  %v13938_v15 = vld [vmem:[#allocation122_spill] sm:$0xff] }
 0x624   :  { %6210 = vmatprep.mubr.f32.mxu1 %v13552_v26 }
 0x627   :  { %6212 = vmatmul.mubr.f32.vlgmr.msra.gmra.mrb[64].mxu1 %v13911_v11 }
 0x628   :  { %6662 = vmatpush1.msra.mxu1 %v13912_v52  ;;  %6217 = vmatprep.mubr.f32.mxu1 %v13552_v26  ;;  %v13939_v52 = vld [vmem:[#allocation130_spill] sm:$0xff] }
 0x62b   :  { %6219 = vmatmul.mubr.f32.gmra.mrb[66].mxu1 %v13913_v17 }
 0x62c   :  { %6224 = vmatprep.mubr.f32.mxu1 %v13552_v26 }
 0x62f   :  { %6226 = vmatmul.mubr.f32.gmra.mrb[68].mxu1 %v13914_v55 }
 0x630   :  { %6231 = vmatprep.mubr.f32.mxu1 %v13552_v26 }
 0x633   :  { %6233 = vmatmul.mubr.f32.gmra.mrb[70].mxu1 %v13915_v47 }
 0x634   :  { %6238 = vmatprep.mubr.f32.mxu1 %v13552_v26 }
 0x637   :  { %6240 = vmatmul.mubr.f32.gmra.mrb[72].mxu1 %v13916_v1 }
 0x638   :  { %6245 = vmatprep.mubr.f32.mxu1 %v13552_v26 }
 0x63b   :  { %6247 = vmatmul.mubr.f32.gmra.mrb[74].mxu1 %v13917_v61 }
 0x63c   :  { %6252 = vmatprep.mubr.f32.mxu1 %v13552_v26 }
 0x63f   :  { %6254 = vmatmul.mubr.f32.gmra.mrb[76].mxu1 %v13918_v58 }
 0x640   :  { %6259 = vmatprep.mubr.f32.mxu1 %v13552_v26 }
 0x643   :  { %6261 = vmatmul.mubr.f32.gmra.mrb[78].mxu1 %v13919_v46 }
 0x644   :  { %6266 = vmatprep.mubr.f32.mxu1 %v13552_v26 }
 0x647   :  { %6268 = vmatmul.mubr.f32.gmra.mrb[80].mxu1 %v13920_v59 }
 0x648   :  { %6273 = vmatprep.mubr.f32.mxu1 %v13552_v26 }
 0x64b   :  { %6275 = vmatmul.mubr.f32.gmra.mrb[82].mxu1 %v13921_v38 }
 0x64c   :  { %6280 = vmatprep.mubr.f32.mxu1 %v13552_v26 }
 0x64f   :  { %6282 = vmatmul.mubr.f32.gmra.mrb[84].mxu1 %v13922_v5 }
 0x650   :  { %6287 = vmatprep.mubr.f32.mxu1 %v13552_v26 }
 0x653   :  { %6289 = vmatmul.mubr.f32.gmra.mrb[86].mxu1 %v13923_v44 }
 0x654   :  { %6294 = vmatprep.mubr.f32.mxu1 %v13552_v26 }
 0x657   :  { %6296 = vmatmul.mubr.f32.gmra.mrb[88].mxu1 %v13924_v7 }
 0x658   :  { %6301 = vmatprep.mubr.f32.mxu1 %v13552_v26 }
 0x65b   :  { %6303 = vmatmul.mubr.f32.gmra.mrb[90].mxu1 %v13925_v16 }
 0x65c   :  { %6308 = vmatprep.mubr.f32.mxu1 %v13552_v26 }
 0x65f   :  { %6310 = vmatmul.mubr.f32.gmra.mrb[92].mxu1 %v13926_v54 }
 0x660   :  { %6315 = vmatprep.mubr.f32.mxu1 %v13552_v26 }
 0x663   :  { %6317 = vmatmul.mubr.f32.gmra.mrb[94].mxu1 %v13927_v45 }
 0x664   :  { %6322 = vmatprep.mubr.f32.mxu1 %v13552_v26 }
 0x667   :  { %6324 = vmatmul.mubr.f32.gmra.mrb[96].mxu1 %v13928_v62 }
 0x668   :  { %6329 = vmatprep.mubr.f32.mxu1 %v13552_v26 }
 0x66b   :  { %6331 = vmatmul.mubr.f32.gmra.mrb[98].mxu1 %v13929_v13 }
 0x66c   :  { %6336 = vmatprep.mubr.f32.mxu1 %v13552_v26 }
 0x66f   :  { %6338 = vmatmul.mubr.f32.gmra.mrb[100].mxu1 %v13930_v2 }
 0x670   :  { %6343 = vmatprep.mubr.f32.mxu1 %v13552_v26 }
 0x673   :  { %6345 = vmatmul.mubr.f32.gmra.mrb[102].mxu1 %v13931_v18 }
 0x674   :  { %6350 = vmatprep.mubr.f32.mxu1 %v13552_v26 }
 0x677   :  { %6352 = vmatmul.mubr.f32.gmra.mrb[104].mxu1 %v13932_v41 }
 0x678   :  { %6357 = vmatprep.mubr.f32.mxu1 %v13552_v26 }
 0x67b   :  { %6359 = vmatmul.mubr.f32.gmra.mrb[106].mxu1 %v13933_v20 }
 0x67c   :  { %6364 = vmatprep.mubr.f32.mxu1 %v13552_v26 }
 0x67f   :  { %6366 = vmatmul.mubr.f32.gmra.mrb[108].mxu1 %v13934_v0 }
 0x680   :  { %6371 = vmatprep.mubr.f32.mxu1 %v13552_v26 }
 0x683   :  { %6373 = vmatmul.mubr.f32.gmra.mrb[110].mxu1 %v13935_v34 }
 0x684   :  { %6378 = vmatprep.mubr.f32.mxu1 %v13552_v26 }
 0x687   :  { %6380 = vmatmul.mubr.f32.gmra.mrb[112].mxu1 %v13936_v31 }
 0x688   :  { %6385 = vmatprep.mubr.f32.mxu1 %v13552_v26 }
 0x68b   :  { %6387 = vmatmul.mubr.f32.gmra.mrb[114].mxu1 %v13937_v19 }
 0x68c   :  { %6392 = vmatprep.mubr.f32.mxu1 %v13552_v26 }
 0x68f   :  { %6394 = vmatmul.mubr.f32.gmra.mrb[116].mxu1 %v13938_v15 }
 0x690   :  { %6399 = vmatprep.mubr.f32.mxu1 %v13552_v26 }
 0x693   :  { %6401 = vmatmul.mubr.f32.gmra.mrb[118].mxu1 %v13939_v52 }
 0x694   :  { %6406 = vmatprep.mubr.f32.mxu1 %v13552_v26 }
 0x697   :  { %6408 = vmatmul.mubr.f32.gmra.mrb[120].mxu1 %v13940_v50 }
 0x698   :  { %6413 = vmatprep.mubr.f32.mxu1 %v13552_v26 }
 0x69b   :  { %6415 = vmatmul.mubr.f32.gmra.mrb[122].mxu1 %v13941_v63 }
 0x69c   :  { %6420 = vmatprep.mubr.f32.mxu1 %v13552_v26 }
 0x69f   :  { %6422 = vmatmul.mubr.f32.gmra.mrb[124].mxu1 %v13942_v56 }
 0x6a0   :  { %6427 = vmatprep.mubr.f32.mxu1 %v13552_v26 }
 0x6a3   :  { %6429 = vmatmul.mubr.f32.gmra.mrb[126].mxu1 %v13943_v22 }
 0x6a4   :  { %6434 = vmatprep.mubr.f32.mxu1 %v13552_v26 }
 0x6a7   :  { %6436 = vmatmul.mubr.f32.gmra.mrb[0].mxu1 %v13944_v4 }
 0x6a8   :  { %6441 = vmatprep.mubr.f32.mxu1 %v13552_v26 }
 0x6ab   :  { %6443 = vmatmul.mubr.f32.gmra.mrb[2].mxu1 %v13945_v25 }
 0x6ac   :  { %6448 = vmatprep.mubr.f32.mxu1 %v13552_v26 }
 0x6af   :  { %6450 = vmatmul.mubr.f32.gmra.mrb[4].mxu1 %v13946_v9 }
 0x6b0   :  { %6455 = vmatprep.mubr.f32.mxu1 %v13552_v26 }
 0x6b3   :  { %6457 = vmatmul.mubr.f32.gmra.mrb[6].mxu1 %v13947_v24 }
 0x6b4   :  { %6462 = vmatprep.mubr.f32.mxu1 %v13552_v26 }
 0x6b7   :  { %6464 = vmatmul.mubr.f32.gmra.mrb[8].mxu1 %v13948_v43 }
 0x6b8   :  { %6469 = vmatprep.mubr.f32.mxu1 %v13552_v26 }
 0x6bb   :  { %6471 = vmatmul.mubr.f32.gmra.mrb[10].mxu1 %v13949_v35 }
 0x6bc   :  { %6476 = vmatprep.mubr.f32.mxu1 %v13552_v26 }
 0x6bf   :  { %6478 = vmatmul.mubr.f32.gmra.mrb[12].mxu1 %v13950_v23 }
 0x6c0   :  { %6483 = vmatprep.mubr.f32.mxu1 %v13552_v26 }
 0x6c3   :  { %6485 = vmatmul.mubr.f32.gmra.mrb[14].mxu1 %v13951_v57 }
 0x6c4   :  { %6490 = vmatprep.mubr.f32.mxu1 %v13552_v26 }
 0x6c7   :  { %6492 = vmatmul.mubr.f32.gmra.mrb[16].mxu1 %v13952_v27 }
 0x6c8   :  { %6497 = vmatprep.mubr.f32.mxu1 %v13552_v26 }
 0x6cb   :  { %6499 = vmatmul.mubr.f32.gmra.mrb[18].mxu1 %v13953_v32 }
 0x6cc   :  { %6504 = vmatprep.mubr.f32.mxu1 %v13552_v26 }
 0x6cf   :  { %6506 = vmatmul.mubr.f32.gmra.mrb[20].mxu1 %v13954_v3 }
 0x6d0   :  { %6511 = vmatprep.mubr.f32.mxu1 %v13552_v26 }
 0x6d3   :  { %6513 = vmatmul.mubr.f32.gmra.mrb[22].mxu1 %v13955_v42 }
 0x6d4   :  { %6518 = vmatprep.mubr.f32.mxu1 %v13552_v26 }
 0x6d7   :  { %6520 = vmatmul.mubr.f32.gmra.mrb[24].mxu1 %v13956_v28 }
 0x6d8   :  { %6525 = vmatprep.mubr.f32.mxu1 %v13552_v26 }
 0x6db   :  { %6527 = vmatmul.mubr.f32.gmra.mrb[26].mxu1 %v13957_v21 }
 0x6dc   :  { %6532 = vmatprep.mubr.f32.mxu1 %v13552_v26 }
 0x6df   :  { %6534 = vmatmul.mubr.f32.gmra.mrb[28].mxu1 %v13958_v37 }
 0x6e0   :  { %6539 = vmatprep.mubr.f32.mxu1 %v13552_v26 }
 0x6e3   :  { %6541 = vmatmul.mubr.f32.gmra.mrb[30].mxu1 %v13959_v14 }
 0x6e4   :  { %6546 = vmatprep.mubr.f32.mxu1 %v13552_v26 }
 0x6e7   :  { %6548 = vmatmul.mubr.f32.gmra.mrb[32].mxu1 %v13960_v8 }
 0x6e8   :  { %6553 = vmatprep.mubr.f32.mxu1 %v13552_v26 }
 0x6eb   :  { %6555 = vmatmul.mubr.f32.gmra.mrb[34].mxu1 %v13961_v12 }
 0x6ec   :  { %6560 = vmatprep.mubr.f32.mxu1 %v13552_v26 }
 0x6ef   :  { %6562 = vmatmul.mubr.f32.gmra.mrb[36].mxu1 %v13962_v39 }
 0x6f0   :  { %6567 = vmatprep.mubr.f32.mxu1 %v13552_v26 }
 0x6f3   :  { %6569 = vmatmul.mubr.f32.gmra.mrb[38].mxu1 %v13963_v51 }
 0x6f4   :  { %6574 = vmatprep.mubr.f32.mxu1 %v13552_v26 }
 0x6f7   :  { %6576 = vmatmul.mubr.f32.gmra.mrb[40].mxu1 %v13964_v33 }
 0x6f8   :  { %6581 = vmatprep.mubr.f32.mxu1 %v13552_v26 }
 0x6fb   :  { %6583 = vmatmul.mubr.f32.gmra.mrb[42].mxu1 %v13965_v60 }
 0x6fc   :  { %6588 = vmatprep.mubr.f32.mxu1 %v13552_v26 }
 0x6ff   :  { %6590 = vmatmul.mubr.f32.gmra.mrb[44].mxu1 %v13966_v6  ;;  %v13972_v6 = vld [vmem:[#allocation62_spill] sm:$0xff] }
 0x700   :  { %6595 = vmatprep.mubr.f32.mxu1 %v13552_v26 }
 0x703   :  { %6597 = vmatmul.mubr.f32.gmra.mrb[46].mxu1 %v13967_v29  ;;  %v13973_v29 = vld [vmem:[#allocation65_spill] sm:$0xff] }
 0x704   :  { %6602 = vmatprep.mubr.f32.mxu1 %v13552_v26 }
 0x707   :  { %6604 = vmatmul.mubr.f32.gmra.mrb[48].mxu1 %v13968_v36  ;;  %v13974_v36 = vld [vmem:[#allocation67_spill] sm:$0xff] }
 0x708   :  { %6609 = vmatprep.mubr.f32.mxu1 %v13552_v26 }
 0x70b   :  { %6611 = vmatmul.mubr.f32.gmra.mrb[50].mxu1 %v13969_v30  ;;  %v13975_v30 = vld [vmem:[#allocation71_spill] sm:$0xff] }
 0x70c   :  { %6616 = vmatprep.mubr.f32.mxu1 %v13552_v26 }
 0x70f   :  { %6618 = vmatmul.mubr.f32.gmra.mrb[52].mxu1 %v13970_v48 }
 0x710   :  { %6623 = vmatprep.mubr.f32.mxu1 %v13552_v26 }
 0x713   :  { %6625 = vmatmul.mubr.f32.gmra.mrb[54].mxu1 %v13971_v40 }
 0x714   :  { %6630 = vmatprep.mubr.f32.mxu1 %v13552_v26 }
 0x717   :  { %6632 = vmatmul.mubr.f32.gmra.mrb[56].mxu1 %v13972_v6 }
 0x718   :  { %6637 = vmatprep.mubr.f32.mxu1 %v13552_v26 }
 0x71b   :  { %6639 = vmatmul.mubr.f32.gmra.mrb[58].mxu1 %v13973_v29 }
 0x71c   :  { %6644 = vmatprep.mubr.f32.mxu1 %v13552_v26 }
 0x71f   :  { %6646 = vmatmul.mubr.f32.gmra.mrb[60].mxu1 %v13974_v36 }
 0x720   :  { %6651 = vmatprep.mubr.f32.mxu1 %v13552_v26 }
 0x723   :  { %6653 = vmatmul.mubr.f32.gmra.mrb[62].mxu1 %v13975_v30 }
 0x724   :  { %6725 = vmatprep.mubr.f32.mxu1 %v13552_v26 }
 0x727   :  { %6727 = vmatmul.mubr.f32.vlgmr.msra.gmra.mrb[64].mxu1 %v13911_v11  ;;  %v13986_v11 = vld [vmem:[#allocation150_spill] sm:$0xff] }
 0x728   :  { %6732 = vmatprep.mubr.f32.mxu1 %v13552_v26 }
 0x72b   :  { %6734 = vmatmul.mubr.f32.gmra.mrb[66].mxu1 %v13913_v17 }
 0x72c   :  { %6739 = vmatprep.mubr.f32.mxu1 %v13552_v26 }
 0x72f   :  { %6741 = vmatmul.mubr.f32.gmra.mrb[68].mxu1 %v13914_v55 }
 0x730   :  { %6746 = vmatprep.mubr.f32.mxu1 %v13552_v26 }
 0x733   :  { %6748 = vmatmul.mubr.f32.gmra.mrb[70].mxu1 %v13915_v47  ;;  %v13987_v47 = vld [vmem:[#allocation151_spill] sm:$0xff] }
 0x734   :  { %6753 = vmatprep.mubr.f32.mxu1 %v13552_v26 }
 0x737   :  { %6755 = vmatmul.mubr.f32.gmra.mrb[72].mxu1 %v13916_v1 }
 0x738   :  { %6760 = vmatprep.mubr.f32.mxu1 %v13552_v26 }
 0x73b   :  { %6762 = vmatmul.mubr.f32.gmra.mrb[74].mxu1 %v13917_v61 }
 0x73c   :  { %6767 = vmatprep.mubr.f32.mxu1 %v13552_v26 }
 0x73f   :  { %6769 = vmatmul.mubr.f32.gmra.mrb[76].mxu1 %v13918_v58  ;;  %v13988_v58 = vld [vmem:[#allocation152_spill] sm:$0xff] }
 0x740   :  { %6774 = vmatprep.mubr.f32.mxu1 %v13552_v26 }
 0x743   :  { %6776 = vmatmul.mubr.f32.gmra.mrb[78].mxu1 %v13919_v46 }
 0x744   :  { %6781 = vmatprep.mubr.f32.mxu1 %v13552_v26 }
 0x747   :  { %6783 = vmatmul.mubr.f32.gmra.mrb[80].mxu1 %v13920_v59 }
 0x748   :  { %6788 = vmatprep.mubr.f32.mxu1 %v13552_v26 }
 0x74b   :  { %6790 = vmatmul.mubr.f32.gmra.mrb[82].mxu1 %v13921_v38  ;;  %v13989_v38 = vld [vmem:[#allocation153_spill] sm:$0xff] }
 0x74c   :  { %6795 = vmatprep.mubr.f32.mxu1 %v13552_v26 }
 0x74f   :  { %6797 = vmatmul.mubr.f32.gmra.mrb[84].mxu1 %v13922_v5 }
 0x750   :  { %6802 = vmatprep.mubr.f32.mxu1 %v13552_v26 }
 0x753   :  { %6804 = vmatmul.mubr.f32.gmra.mrb[86].mxu1 %v13923_v44 }
 0x754   :  { %6809 = vmatprep.mubr.f32.mxu1 %v13552_v26 }
 0x757   :  { %6811 = vmatmul.mubr.f32.gmra.mrb[88].mxu1 %v13924_v7  ;;  %v13990_v7 = vld [vmem:[#allocation154_spill] sm:$0xff] }
 0x758   :  { %6816 = vmatprep.mubr.f32.mxu1 %v13552_v26 }
 0x75b   :  { %6818 = vmatmul.mubr.f32.gmra.mrb[90].mxu1 %v13925_v16 }
 0x75c   :  { %6823 = vmatprep.mubr.f32.mxu1 %v13552_v26 }
 0x75f   :  { %6825 = vmatmul.mubr.f32.gmra.mrb[92].mxu1 %v13926_v54 }
 0x760   :  { %6830 = vmatprep.mubr.f32.mxu1 %v13552_v26 }
 0x763   :  { %6832 = vmatmul.mubr.f32.gmra.mrb[94].mxu1 %v13927_v45 }
 0x764   :  { %6837 = vmatprep.mubr.f32.mxu1 %v13552_v26 }
 0x767   :  { %6839 = vmatmul.mubr.f32.gmra.mrb[96].mxu1 %v13928_v62 }
 0x768   :  { %6844 = vmatprep.mubr.f32.mxu1 %v13552_v26 }
 0x76b   :  { %6846 = vmatmul.mubr.f32.gmra.mrb[98].mxu1 %v13929_v13  ;;  %v13992_v13 = vld [vmem:[#allocation156_spill] sm:$0xff] }
 0x76c   :  { %6851 = vmatprep.mubr.f32.mxu1 %v13552_v26 }
 0x76f   :  { %6853 = vmatmul.mubr.f32.gmra.mrb[100].mxu1 %v13930_v2 }
 0x770   :  { %6858 = vmatprep.mubr.f32.mxu1 %v13552_v26 }
 0x773   :  { %6860 = vmatmul.mubr.f32.gmra.mrb[102].mxu1 %v13931_v18 }
 0x774   :  { %6865 = vmatprep.mubr.f32.mxu1 %v13552_v26 }
 0x777   :  { %6867 = vmatmul.mubr.f32.gmra.mrb[104].mxu1 %v13932_v41 }
 0x778   :  { %6872 = vmatprep.mubr.f32.mxu1 %v13552_v26 }
 0x77b   :  { %6874 = vmatmul.mubr.f32.gmra.mrb[106].mxu1 %v13933_v20 }
 0x77c   :  { %6879 = vmatprep.mubr.f32.mxu1 %v13552_v26 }
 0x77f   :  { %6881 = vmatmul.mubr.f32.gmra.mrb[108].mxu1 %v13934_v0  ;;  %v13994_v0 = vld [vmem:[#allocation158_spill] sm:$0xff] }
 0x780   :  { %6886 = vmatprep.mubr.f32.mxu1 %v13552_v26 }
 0x783   :  { %6888 = vmatmul.mubr.f32.gmra.mrb[110].mxu1 %v13935_v34 }
 0x784   :  { %6893 = vmatprep.mubr.f32.mxu1 %v13552_v26 }
 0x787   :  { %6895 = vmatmul.mubr.f32.gmra.mrb[112].mxu1 %v13936_v31 }
 0x788   :  { %6900 = vmatprep.mubr.f32.mxu1 %v13552_v26 }
 0x78b   :  { %6902 = vmatmul.mubr.f32.gmra.mrb[114].mxu1 %v13937_v19 }
 0x78c   :  { %6907 = vmatprep.mubr.f32.mxu1 %v13552_v26 }
 0x78f   :  { %6909 = vmatmul.mubr.f32.gmra.mrb[116].mxu1 %v13938_v15 }
 0x790   :  { %6914 = vmatprep.mubr.f32.mxu1 %v13552_v26 }
 0x793   :  { %6916 = vmatmul.mubr.f32.gmra.mrb[118].mxu1 %v13939_v52  ;;  %v13996_v52 = vld [vmem:[#allocation160_spill] sm:$0xff] }
 0x794   :  { %6921 = vmatprep.mubr.f32.mxu1 %v13552_v26 }
 0x797   :  { %6923 = vmatmul.mubr.f32.gmra.mrb[120].mxu1 %v13940_v50  ;;  %v13985_v50 = vld [vmem:[#allocation56_spill] sm:$0xff] }
 0x798   :  { %6928 = vmatprep.mubr.f32.mxu1 %v13552_v26 }
 0x79b   :  { %6930 = vmatmul.mubr.f32.gmra.mrb[122].mxu1 %v13941_v63 }
 0x79c   :  { %6935 = vmatprep.mubr.f32.mxu1 %v13552_v26 }
 0x79f   :  { %6937 = vmatmul.mubr.f32.gmra.mrb[124].mxu1 %v13942_v56 }
 0x7a0   :  { %6942 = vmatprep.mubr.f32.mxu1 %v13552_v26 }
 0x7a3   :  { %6944 = vmatmul.mubr.f32.gmra.mrb[126].mxu1 %v13943_v22  ;;  %v13984_v22 = vld [vmem:[#allocation149_spill] sm:$0xff] }
 0x7a4   :  { %6949 = vmatprep.mubr.f32.mxu1 %v13552_v26 }
 0x7a7   :  { %6951 = vmatmul.mubr.f32.gmra.mrb[0].mxu1 %v13944_v4 }
 0x7a8   :  { %6956 = vmatprep.mubr.f32.mxu1 %v13552_v26 }
 0x7ab   :  { %6958 = vmatmul.mubr.f32.gmra.mrb[2].mxu1 %v13945_v25 }
 0x7ac   :  { %6963 = vmatprep.mubr.f32.mxu1 %v13552_v26 }
 0x7af   :  { %6965 = vmatmul.mubr.f32.gmra.mrb[4].mxu1 %v13946_v9  ;;  %v13983_v9 = vld [vmem:[#allocation148_spill] sm:$0xff] }
 0x7b0   :  { %6970 = vmatprep.mubr.f32.mxu1 %v13552_v26 }
 0x7b3   :  { %6972 = vmatmul.mubr.f32.gmra.mrb[6].mxu1 %v13947_v24  ;;  %v13982_v24 = vld [vmem:[#allocation55_spill] sm:$0xff] }
 0x7b4   :  { %6977 = vmatprep.mubr.f32.mxu1 %v13552_v26 }
 0x7b7   :  { %6979 = vmatmul.mubr.f32.gmra.mrb[8].mxu1 %v13948_v43 }
 0x7b8   :  { %6984 = vmatprep.mubr.f32.mxu1 %v13552_v26 }
 0x7bb   :  { %6986 = vmatmul.mubr.f32.gmra.mrb[10].mxu1 %v13949_v35 }
 0x7bc   :  { %6991 = vmatprep.mubr.f32.mxu1 %v13552_v26 }
 0x7bf   :  { %6993 = vmatmul.mubr.f32.gmra.mrb[12].mxu1 %v13950_v23  ;;  %v13981_v23 = vld [vmem:[#allocation147_spill] sm:$0xff] }
 0x7c0   :  { %6998 = vmatprep.mubr.f32.mxu1 %v13552_v26 }
 0x7c3   :  { %7000 = vmatmul.mubr.f32.gmra.mrb[14].mxu1 %v13951_v57 }
 0x7c4   :  { %7005 = vmatprep.mubr.f32.mxu1 %v13552_v26 }
 0x7c7   :  { %7007 = vmatmul.mubr.f32.gmra.mrb[16].mxu1 %v13952_v27  ;;  %v13980_v27 = vld [vmem:[#allocation146_spill] sm:$0xff] }
 0x7c8   :  { %7012 = vmatprep.mubr.f32.mxu1 %v13552_v26 }
 0x7cb   :  { %7014 = vmatmul.mubr.f32.gmra.mrb[18].mxu1 %v13953_v32  ;;  %v13979_v32 = vld [vmem:[#allocation53_spill] sm:$0xff] }
 0x7cc   :  { %7019 = vmatprep.mubr.f32.mxu1 %v13552_v26 }
 0x7cf   :  { %7021 = vmatmul.mubr.f32.gmra.mrb[20].mxu1 %v13954_v3 }
 0x7d0   :  { %7026 = vmatprep.mubr.f32.mxu1 %v13552_v26 }
 0x7d3   :  { %7028 = vmatmul.mubr.f32.gmra.mrb[22].mxu1 %v13955_v42 }
 0x7d4   :  { %7033 = vmatprep.mubr.f32.mxu1 %v13552_v26 }
 0x7d7   :  { %7035 = vmatmul.mubr.f32.gmra.mrb[24].mxu1 %v13956_v28  ;;  %v13976_v28 = vld [vmem:[#allocation51_spill] sm:$0xff] }
 0x7d8   :  { %7040 = vmatprep.mubr.f32.mxu1 %v13552_v26 }
 0x7db   :  { %7042 = vmatmul.mubr.f32.gmra.mrb[26].mxu1 %v13957_v21 }
 0x7dc   :  { %7047 = vmatprep.mubr.f32.mxu1 %v13552_v26 }
 0x7df   :  { %7049 = vmatmul.mubr.f32.gmra.mrb[28].mxu1 %v13958_v37 }
 0x7e0   :  { %7054 = vmatprep.mubr.f32.mxu1 %v13552_v26 }
 0x7e3   :  { %7056 = vmatmul.mubr.f32.gmra.mrb[30].mxu1 %v13959_v14 }
 0x7e4   :  { %7061 = vmatprep.mubr.f32.mxu1 %v13552_v26 }
 0x7e7   :  { %7063 = vmatmul.mubr.f32.gmra.mrb[32].mxu1 %v13960_v8 }
 0x7e8   :  { %7068 = vmatprep.mubr.f32.mxu1 %v13552_v26 }
 0x7eb   :  { %7070 = vmatmul.mubr.f32.gmra.mrb[34].mxu1 %v13961_v12 }
 0x7ec   :  { %7075 = vmatprep.mubr.f32.mxu1 %v13552_v26 }
 0x7ef   :  { %7077 = vmatmul.mubr.f32.gmra.mrb[36].mxu1 %v13962_v39 }
 0x7f0   :  { %7082 = vmatprep.mubr.f32.mxu1 %v13552_v26 }
 0x7f3   :  { %7084 = vmatmul.mubr.f32.gmra.mrb[38].mxu1 %v13963_v51 }
 0x7f4   :  { %7089 = vmatprep.mubr.f32.mxu1 %v13552_v26 }
 0x7f7   :  { %7091 = vmatmul.mubr.f32.gmra.mrb[40].mxu1 %v13964_v33  ;;  %v13977_v33 = vld [vmem:[#allocation144_spill] sm:$0xff] }
 0x7f8   :  { %7096 = vmatprep.mubr.f32.mxu1 %v13552_v26 }
 0x7fa   :  { %v6728_v14 = vpop.f32.mrb[64].mxu1 }
 0x7fb   :  { %v8298_v8 = vadd.f32 %v6728_v14, %v11936_v10  ;;  %v6730_v37 = vpop.f32.mrb[65].mxu1  ;;  %7098 = vmatmul.mubr.f32.gmra.mrb[42].mxu1 %v13965_v60  ;;  %v13978_v60 = vld [vmem:[#allocation145_spill] sm:$0xff] }
 0x7fc   :  { %v8299_v12 = vadd.f32 %v6730_v37, %v11938_v49  ;;  %7103 = vmatprep.mubr.f32.mxu1 %v13552_v26 }
 0x7fd   :  { %7174 = vst [vmem:[#allocation2] sm:$0xff] %v8298_v8 }
 0x7fe   :  { %7175 = vst [vmem:[#allocation2 + $0x8] sm:$0xff] %v8299_v12  ;;  %v6735_v39 = vpop.f32.mrb[66].mxu1 }
 0x7ff   :  { %v8300_v51 = vadd.f32 %v6735_v39, %v11943_v53  ;;  %v6737_v21 = vpop.f32.mrb[67].mxu1  ;;  %7105 = vmatmul.mubr.f32.gmra.mrb[44].mxu1 %v13976_v28  ;;  %v13998_v39 = vld [vmem:[#allocation162_spill] sm:$0xff]  ;;  %v13999_v28 = vld [vmem:[#allocation163_spill] sm:$0xff] }
 0x800   :  { %v8301_v42 = vadd.f32 %v6737_v21, %v13977_v33  ;;  %7110 = vmatprep.mubr.f32.mxu1 %v13552_v26 }
 0x801   :  { %7176 = vst [vmem:[#allocation2 + $0x10] sm:$0xff] %v8300_v51 }
 0x802   :  { %7177 = vst [vmem:[#allocation2 + $0x18] sm:$0xff] %v8301_v42  ;;  %v6742_v10 = vpop.f32.mrb[68].mxu1  ;;  %v14000_v42 = vld [vmem:[#allocation164_spill] sm:$0xff] }
 0x803   :  { %v8302_v3 = vadd.f32 %v6742_v10, %v13978_v60  ;;  %v6744_v49 = vpop.f32.mrb[69].mxu1  ;;  %7112 = vmatmul.mubr.f32.gmra.mrb[46].mxu1 %v13979_v32  ;;  %v14001_v60 = vld [vmem:[#allocation165_spill] sm:$0xff]  ;;  %v14002_v32 = vld [vmem:[#allocation166_spill] sm:$0xff] }
 0x804   :  { %v8303_v57 = vadd.f32 %v6744_v49, %v13980_v27  ;;  %7117 = vmatprep.mubr.f32.mxu1 %v13552_v26 }
 0x805   :  { %7178 = vst [vmem:[#allocation2 + $0x20] sm:$0xff] %v8302_v3 }
 0x806   :  { %7179 = vst [vmem:[#allocation2 + $0x28] sm:$0xff] %v8303_v57  ;;  %v6749_v53 = vpop.f32.mrb[70].mxu1  ;;  %v14003_v57 = vld [vmem:[#allocation167_spill] sm:$0xff] }
 0x807   :  { %v8304_v35 = vadd.f32 %v6749_v53, %v13981_v23  ;;  %v6751_v43 = vpop.f32.mrb[71].mxu1  ;;  %7119 = vmatmul.mubr.f32.gmra.mrb[48].mxu1 %v13982_v24 }
 0x808   :  { %v8305_v25 = vadd.f32 %v6751_v43, %v13983_v9  ;;  %7124 = vmatprep.mubr.f32.mxu1 %v13552_v26  ;;  %v14005_v9 = vld [vmem:[#allocation169_spill] sm:$0xff] }
 0x809   :  { %7180 = vst [vmem:[#allocation2 + $0x30] sm:$0xff] %v8304_v35  ;;  %v14004_v35 = vld [vmem:[#allocation168_spill] sm:$0xff] }
 0x80a   :  { %7181 = vst [vmem:[#allocation2 + $0x38] sm:$0xff] %v8305_v25  ;;  %v6756_v4 = vpop.f32.mrb[72].mxu1 }
 0x80b   :  { %v8306_v56 = vadd.f32 %v6756_v4, %v13984_v22  ;;  %v6758_v63 = vpop.f32.mrb[73].mxu1  ;;  %7126 = vmatmul.mubr.f32.gmra.mrb[50].mxu1 %v13985_v50  ;;  %v14006_v22 = vld [vmem:[#allocation170_spill] sm:$0xff]  ;;  %v14007_v50 = vld [vmem:[#allocation171_spill] sm:$0xff] }
 0x80c   :  { %v8307_v17 = vadd.f32 %v6758_v63, %v13986_v11  ;;  %7131 = vmatprep.mubr.f32.mxu1 %v13552_v26 }
 0x80d   :  { %7182 = vst [vmem:[#allocation2 + $0x40] sm:$0xff] %v8306_v56 }
 0x80e   :  { %7183 = vst [vmem:[#allocation2 + $0x48] sm:$0xff] %v8307_v17  ;;  %v6763_v55 = vpop.f32.mrb[74].mxu1 }
 0x80f   :  { %v8308_v1 = vadd.f32 %v6763_v55, %v13987_v47  ;;  %v6765_v61 = vpop.f32.mrb[75].mxu1  ;;  %7133 = vmatmul.mubr.f32.gmra.mrb[52].mxu1 %v13970_v48  ;;  %v13991_v48 = vld [vmem:[#allocation155_spill] sm:$0xff]  ;;  %v14008_v55 = vld [vmem:[#allocation172_spill] sm:$0xff] }
 0x810   :  { %v8309_v46 = vadd.f32 %v6765_v61, %v13988_v58  ;;  %7138 = vmatprep.mubr.f32.mxu1 %v13552_v26  ;;  %v14009_v61 = vld [vmem:[#allocation173_spill] sm:$0xff] }
 0x811   :  { %7184 = vst [vmem:[#allocation2 + $0x50] sm:$0xff] %v8308_v1 }
 0x812   :  { %7185 = vst [vmem:[#allocation2 + $0x58] sm:$0xff] %v8309_v46  ;;  %v6770_v59 = vpop.f32.mrb[76].mxu1 }
 0x813   :  { %v8310_v5 = vadd.f32 %v6770_v59, %v13989_v38  ;;  %v6772_v44 = vpop.f32.mrb[77].mxu1  ;;  %7140 = vmatmul.mubr.f32.gmra.mrb[54].mxu1 %v13971_v40  ;;  %v13993_v40 = vld [vmem:[#allocation157_spill] sm:$0xff]  ;;  %v14010_v59 = vld [vmem:[#allocation174_spill] sm:$0xff] }
 0x814   :  { %v8311_v16 = vadd.f32 %v6772_v44, %v13990_v7  ;;  %7145 = vmatprep.mubr.f32.mxu1 %v13552_v26  ;;  %v14011_v44 = vld [vmem:[#allocation114_spill] sm:$0xff] }
 0x815   :  { %7186 = vst [vmem:[#allocation2 + $0x60] sm:$0xff] %v8310_v5 }
 0x816   :  { %7187 = vst [vmem:[#allocation2 + $0x68] sm:$0xff] %v8311_v16  ;;  %v6777_v54 = vpop.f32.mrb[78].mxu1 }
 0x817   :  { %v8312_v45 = vadd.f32 %v6777_v54, %v13991_v48  ;;  %v6779_v62 = vpop.f32.mrb[79].mxu1  ;;  %7147 = vmatmul.mubr.f32.gmra.mrb[56].mxu1 %v13972_v6  ;;  %v13995_v6 = vld [vmem:[#allocation159_spill] sm:$0xff] }
 0x818   :  { %v8313_v2 = vadd.f32 %v6779_v62, %v13992_v13  ;;  %7152 = vmatprep.mubr.f32.mxu1 %v13552_v26  ;;  %v14012_v54 = vld [vmem:[#allocation175_spill] sm:$0xff]  ;;  %v14013_v62 = vld [vmem:[#allocation105_spill] sm:$0xff] }
 0x819   :  { %7188 = vst [vmem:[#allocation2 + $0x70] sm:$0xff] %v8312_v45 }
 0x81a   :  { %7189 = vst [vmem:[#allocation2 + $0x78] sm:$0xff] %v8313_v2  ;;  %v6784_v18 = vpop.f32.mrb[80].mxu1 }
 0x81b   :  { %v8314_v41 = vadd.f32 %v6784_v18, %v13993_v40  ;;  %v6786_v20 = vpop.f32.mrb[81].mxu1  ;;  %7154 = vmatmul.mubr.f32.gmra.mrb[58].mxu1 %v13973_v29  ;;  %v13997_v29 = vld [vmem:[#allocation161_spill] sm:$0xff]  ;;  %v14014_v18 = vld [vmem:[#allocation176_spill] sm:$0xff] }
 0x81c   :  { %v8315_v34 = vadd.f32 %v6786_v20, %v13994_v0  ;;  %7159 = vmatprep.mubr.f32.mxu1 %v13552_v26  ;;  %v14015_v20 = vld [vmem:[#allocation118_spill] sm:$0xff] }
 0x81d   :  { %7190 = vst [vmem:[#allocation2 + $0x80] sm:$0xff] %v8314_v41 }
 0x81e   :  { %7191 = vst [vmem:[#allocation2 + $0x88] sm:$0xff] %v8315_v34  ;;  %v6791_v31 = vpop.f32.mrb[82].mxu1 }
 0x81f   :  { %v8316_v19 = vadd.f32 %v6791_v31, %v13995_v6  ;;  %v6793_v15 = vpop.f32.mrb[83].mxu1  ;;  %7161 = vmatmul.mubr.f32.gmra.mrb[60].mxu1 %v13974_v36  ;;  %v14016_v31 = vld [vmem:[#allocation177_spill] sm:$0xff] }
 0x820   :  { %v8317_v14 = vadd.f32 %v6793_v15, %v13996_v52  ;;  %7166 = vmatprep.mubr.f32.mxu1 %v13552_v26  ;;  %v14017_v15 = vld [vmem:[#allocation131_spill] sm:$0xff] }
 0x821   :  { %7192 = vst [vmem:[#allocation2 + $0x90] sm:$0xff] %v8316_v19 }
 0x822   :  { %7193 = vst [vmem:[#allocation2 + $0x98] sm:$0xff] %v8317_v14  ;;  %v6798_v8 = vpop.f32.mrb[84].mxu1 }
 0x823   :  { %v8318_v37 = vadd.f32 %v6798_v8, %v13997_v29  ;;  %v6800_v12 = vpop.f32.mrb[85].mxu1  ;;  %7168 = vmatmul.mubr.f32.gmra.mrb[62].mxu1 %v13975_v30  ;;  %v14018_v8 = vld [vmem:[#allocation178_spill] sm:$0xff] }
 0x824   :  { %v8319_v51 = vadd.f32 %v6800_v12, %v13998_v39  ;;  %v14019_v12 = vld [vmem:[#allocation179_spill] sm:$0xff] }
 0x825   :  { %7194 = vst [vmem:[#allocation2 + $0xa0] sm:$0xff] %v8318_v37 }
 0x826   :  { %7195 = vst [vmem:[#allocation2 + $0xa8] sm:$0xff] %v8319_v51  ;;  %v6805_v21 = vpop.f32.mrb[86].mxu1 }
 0x827   :  { %v8320_v33 = vadd.f32 %v6805_v21, %v13999_v28  ;;  %v6807_v36 = vpop.f32.mrb[87].mxu1  ;;  %v14020_v21 = vld [vmem:[#allocation180_spill] sm:$0xff] }
 0x828   :  { %v8321_v10 = vadd.f32 %v6807_v36, %v14000_v42  ;;  %v14021_v36 = vld [vmem:[#allocation181_spill] sm:$0xff] }
 0x829   :  { %7196 = vst [vmem:[#allocation2 + $0xb0] sm:$0xff] %v8320_v33 }
 0x82a   :  { %7197 = vst [vmem:[#allocation2 + $0xb8] sm:$0xff] %v8321_v10  ;;  %v6812_v26 = vpop.f32.mrb[88].mxu1 }
 0x82b   :  { %v8322_v3 = vadd.f32 %v6812_v26, %v14001_v60  ;;  %v6814_v49 = vpop.f32.mrb[89].mxu1  ;;  %v14022_v26 = vld [vmem:[#allocation182_spill] sm:$0xff] }
 0x82c   :  { %v8323_v27 = vadd.f32 %v6814_v49, %v14002_v32  ;;  %v14023_v49 = vld [vmem:[#allocation183_spill] sm:$0xff] }
 0x82d   :  { %7198 = vst [vmem:[#allocation2 + $0xc0] sm:$0xff] %v8322_v3 }
 0x82e   :  { %7199 = vst [vmem:[#allocation2 + $0xc8] sm:$0xff] %v8323_v27  ;;  %v6819_v30 = vpop.f32.mrb[90].mxu1 }
 0x82f   :  { %v8324_v53 = vadd.f32 %v6819_v30, %v14003_v57  ;;  %v6821_v23 = vpop.f32.mrb[91].mxu1  ;;  %v14024_v30 = vld [vmem:[#allocation184_spill] sm:$0xff] }
 0x830   :  { %v8325_v43 = vadd.f32 %v6821_v23, %v14004_v35  ;;  %v14025_v23 = vld [vmem:[#allocation185_spill] sm:$0xff] }
 0x831   :  { %7200 = vst [vmem:[#allocation2 + $0xd0] sm:$0xff] %v8324_v53 }
 0x832   :  { %7201 = vst [vmem:[#allocation2 + $0xd8] sm:$0xff] %v8325_v43  ;;  %v6826_v24 = vpop.f32.mrb[92].mxu1 }
 0x833   :  { %v8326_v25 = vadd.f32 %v6826_v24, %v14005_v9  ;;  %v6828_v4 = vpop.f32.mrb[93].mxu1  ;;  %v14026_v24 = vld [vmem:[#allocation186_spill] sm:$0xff] }
 0x834   :  { %v8327_v56 = vadd.f32 %v6828_v4, %v14006_v22  ;;  %v14027_v4 = vld [vmem:[#allocation187_spill] sm:$0xff] }
 0x835   :  { %7202 = vst [vmem:[#allocation2 + $0xe0] sm:$0xff] %v8326_v25 }
 0x836   :  { %7203 = vst [vmem:[#allocation2 + $0xe8] sm:$0xff] %v8327_v56  ;;  %v6833_v63 = vpop.f32.mrb[94].mxu1 }
 0x837   :  { %v8328_v11 = vadd.f32 %v6833_v63, %v14007_v50  ;;  %v6835_v17 = vpop.f32.mrb[95].mxu1  ;;  %v14028_v63 = vld [vmem:[#allocation188_spill] sm:$0xff] }
 0x838   :  { %v8329_v47 = vadd.f32 %v6835_v17, %v14008_v55  ;;  %v14029_v17 = vld [vmem:[#allocation189_spill] sm:$0xff] }
 0x839   :  { %7204 = vst [vmem:[#allocation2 + $0xf0] sm:$0xff] %v8328_v11 }
 0x83a   :  { %7205 = vst [vmem:[#allocation2 + $0xf8] sm:$0xff] %v8329_v47  ;;  %v6840_v1 = vpop.f32.mrb[96].mxu1 }
 0x83b   :  { %v8330_v58 = vadd.f32 %v6840_v1, %v14009_v61  ;;  %v6842_v46 = vpop.f32.mrb[97].mxu1  ;;  %v14030_v1 = vld [vmem:[#allocation190_spill] sm:$0xff] }
 0x83c   :  { %v8331_v38 = vadd.f32 %v6842_v46, %v14010_v59  ;;  %v14031_v46 = vld [vmem:[#allocation191_spill] sm:$0xff] }
 0x83d   :  { %7206 = vst [vmem:[#allocation2 + $0x100] sm:$0xff] %v8330_v58 }
 0x83e   :  { %7207 = vst [vmem:[#allocation2 + $0x108] sm:$0xff] %v8331_v38  ;;  %v6847_v5 = vpop.f32.mrb[98].mxu1 }
 0x83f   :  { %v8332_v7 = vadd.f32 %v6847_v5, %v14011_v44  ;;  %v6849_v16 = vpop.f32.mrb[99].mxu1  ;;  %v14032_v5 = vld [vmem:[#allocation192_spill] sm:$0xff] }
 0x840   :  { %v8333_v48 = vadd.f32 %v6849_v16, %v14012_v54  ;;  %v14033_v16 = vld [vmem:[#allocation193_spill] sm:$0xff] }
 0x841   :  { %7208 = vst [vmem:[#allocation2 + $0x110] sm:$0xff] %v8332_v7 }
 0x842   :  { %7209 = vst [vmem:[#allocation2 + $0x118] sm:$0xff] %v8333_v48  ;;  %v6854_v45 = vpop.f32.mrb[100].mxu1 }
 0x843   :  { %v8334_v13 = vadd.f32 %v6854_v45, %v14013_v62  ;;  %v6856_v2 = vpop.f32.mrb[101].mxu1  ;;  %v14034_v45 = vld [vmem:[#allocation194_spill] sm:$0xff] }
 0x844   :  { %v8335_v40 = vadd.f32 %v6856_v2, %v14014_v18  ;;  %v14035_v2 = vld [vmem:[#allocation38_spill] sm:$0xff] }
 0x845   :  { %7210 = vst [vmem:[#allocation2 + $0x120] sm:$0xff] %v8334_v13 }
 0x846   :  { %7211 = vst [vmem:[#allocation2 + $0x128] sm:$0xff] %v8335_v40  ;;  %v6861_v41 = vpop.f32.mrb[102].mxu1 }
 0x847   :  { %v8336_v0 = vadd.f32 %v6861_v41, %v14015_v20  ;;  %v6863_v34 = vpop.f32.mrb[103].mxu1  ;;  %v14036_v41 = vld [vmem:[#allocation195_spill] sm:$0xff] }
 0x848   :  { %v8337_v6 = vadd.f32 %v6863_v34, %v14016_v31  ;;  %v14037_v34 = vld [vmem:[#allocation40_spill] sm:$0xff] }
 0x849   :  { %7212 = vst [vmem:[#allocation2 + $0x130] sm:$0xff] %v8336_v0 }
 0x84a   :  { %7213 = vst [vmem:[#allocation2 + $0x138] sm:$0xff] %v8337_v6  ;;  %v6868_v19 = vpop.f32.mrb[104].mxu1 }
 0x84b   :  { %v8338_v52 = vadd.f32 %v6868_v19, %v14017_v15  ;;  %v6870_v14 = vpop.f32.mrb[105].mxu1  ;;  %v14038_v19 = vld [vmem:[#allocation196_spill] sm:$0xff] }
 0x84c   :  { %v8339_v29 = vadd.f32 %v6870_v14, %v14018_v8  ;;  %v14039_v14 = vld [vmem:[#allocation197_spill] sm:$0xff] }
 0x84d   :  { %7214 = vst [vmem:[#allocation2 + $0x140] sm:$0xff] %v8338_v52 }
 0x84e   :  { %7215 = vst [vmem:[#allocation2 + $0x148] sm:$0xff] %v8339_v29  ;;  %v6875_v37 = vpop.f32.mrb[106].mxu1 }
 0x84f   :  { %v8340_v39 = vadd.f32 %v6875_v37, %v14019_v12  ;;  %v6877_v51 = vpop.f32.mrb[107].mxu1  ;;  %v14040_v37 = vld [vmem:[#allocation198_spill] sm:$0xff] }
 0x850   :  { %v8341_v28 = vadd.f32 %v6877_v51, %v14020_v21  ;;  %v14041_v51 = vld [vmem:[#allocation77_spill] sm:$0xff] }
 0x851   :  { %7216 = vst [vmem:[#allocation2 + $0x150] sm:$0xff] %v8340_v39 }
 0x852   :  { %7217 = vst [vmem:[#allocation2 + $0x158] sm:$0xff] %v8341_v28  ;;  %v6882_v33 = vpop.f32.mrb[108].mxu1 }
 0x853   :  { %v8342_v42 = vadd.f32 %v6882_v33, %v14021_v36  ;;  %v6884_v10 = vpop.f32.mrb[109].mxu1  ;;  %v14042_v33 = vld [vmem:[#allocation78_spill] sm:$0xff] }
 0x854   :  { %v8343_v60 = vadd.f32 %v6884_v10, %v14022_v26  ;;  %v14043_v10 = vld [vmem:[#allocation81_spill] sm:$0xff] }
 0x855   :  { %7218 = vst [vmem:[#allocation2 + $0x160] sm:$0xff] %v8342_v42 }
 0x856   :  { %7219 = vst [vmem:[#allocation2 + $0x168] sm:$0xff] %v8343_v60  ;;  %v6889_v3 = vpop.f32.mrb[110].mxu1 }
 0x857   :  { %v8344_v32 = vadd.f32 %v6889_v3, %v14023_v49  ;;  %v6891_v27 = vpop.f32.mrb[111].mxu1  ;;  %v14044_v3 = vld [vmem:[#allocation83_spill] sm:$0xff] }
 0x858   :  { %v8345_v57 = vadd.f32 %v6891_v27, %v14024_v30  ;;  %v14045_v27 = vld [vmem:[#allocation85_spill] sm:$0xff] }
 0x859   :  { %7220 = vst [vmem:[#allocation2 + $0x170] sm:$0xff] %v8344_v32 }
 0x85a   :  { %7221 = vst [vmem:[#allocation2 + $0x178] sm:$0xff] %v8345_v57  ;;  %v6896_v53 = vpop.f32.mrb[112].mxu1 }
 0x85b   :  { %v8346_v35 = vadd.f32 %v6896_v53, %v14025_v23  ;;  %v6898_v43 = vpop.f32.mrb[113].mxu1  ;;  %v14046_v53 = vld [vmem:[#allocation87_spill] sm:$0xff] }
 0x85c   :  { %v8347_v9 = vadd.f32 %v6898_v43, %v14026_v24  ;;  %v14047_v43 = vld [vmem:[#allocation88_spill] sm:$0xff] }
 0x85d   :  { %7222 = vst [vmem:[#allocation2 + $0x180] sm:$0xff] %v8346_v35 }
 0x85e   :  { %7223 = vst [vmem:[#allocation2 + $0x188] sm:$0xff] %v8347_v9  ;;  %v6903_v25 = vpop.f32.mrb[114].mxu1 }
 0x85f   :  { %v8348_v22 = vadd.f32 %v6903_v25, %v14027_v4  ;;  %v6905_v56 = vpop.f32.mrb[115].mxu1  ;;  %v14048_v25 = vld [vmem:[#allocation90_spill] sm:$0xff] }
 0x860   :  { %v8349_v50 = vadd.f32 %v6905_v56, %v14028_v63  ;;  %v14049_v56 = vld [vmem:[#allocation93_spill] sm:$0xff] }
 0x861   :  { %7224 = vst [vmem:[#allocation2 + $0x190] sm:$0xff] %v8348_v22 }
 0x862   :  { %7225 = vst [vmem:[#allocation2 + $0x198] sm:$0xff] %v8349_v50  ;;  %v6910_v11 = vpop.f32.mrb[116].mxu1 }
 0x863   :  { %v8350_v55 = vadd.f32 %v6910_v11, %v14029_v17  ;;  %v6912_v47 = vpop.f32.mrb[117].mxu1  ;;  %v14050_v11 = vld [vmem:[#allocation94_spill] sm:$0xff] }
 0x864   :  { %v8351_v61 = vadd.f32 %v6912_v47, %v14030_v1  ;;  %v14051_v47 = vld [vmem:[#allocation97_spill] sm:$0xff] }
 0x865   :  { %7226 = vst [vmem:[#allocation2 + $0x1a0] sm:$0xff] %v8350_v55 }
 0x866   :  { %7227 = vst [vmem:[#allocation2 + $0x1a8] sm:$0xff] %v8351_v61  ;;  %v6917_v58 = vpop.f32.mrb[118].mxu1 }
 0x867   :  { %v8352_v59 = vadd.f32 %v6917_v58, %v14031_v46  ;;  %v6919_v38 = vpop.f32.mrb[119].mxu1  ;;  %v14052_v58 = vld [vmem:[#allocation99_spill] sm:$0xff] }
 0x868   :  { %v8353_v44 = vadd.f32 %v6919_v38, %v14032_v5  ;;  %v14053_v38 = vld [vmem:[#allocation101_spill] sm:$0xff] }
 0x869   :  { %7228 = vst [vmem:[#allocation2 + $0x1b0] sm:$0xff] %v8352_v59 }
 0x86a   :  { %7229 = vst [vmem:[#allocation2 + $0x1b8] sm:$0xff] %v8353_v44  ;;  %v6924_v7 = vpop.f32.mrb[120].mxu1 }
 0x86b   :  { %v8354_v54 = vadd.f32 %v6924_v7, %v14033_v16  ;;  %v6926_v48 = vpop.f32.mrb[121].mxu1  ;;  %v14054_v7 = vld [vmem:[#allocation103_spill] sm:$0xff] }
 0x86c   :  { %v8355_v62 = vadd.f32 %v6926_v48, %v14034_v45  ;;  %v14055_v48 = vld [vmem:[#allocation104_spill] sm:$0xff] }
 0x86d   :  { %7230 = vst [vmem:[#allocation2 + $0x1c0] sm:$0xff] %v8354_v54 }
 0x86e   :  { %7231 = vst [vmem:[#allocation2 + $0x1c8] sm:$0xff] %v8355_v62  ;;  %v6931_v13 = vpop.f32.mrb[122].mxu1 }
 0x86f   :  { %v8356_v18 = vadd.f32 %v6931_v13, %v14035_v2  ;;  %v6933_v40 = vpop.f32.mrb[123].mxu1  ;;  %v14056_v13 = vld [vmem:[#allocation108_spill] sm:$0xff] }
 0x870   :  { %v8357_v20 = vadd.f32 %v6933_v40, %v14036_v41  ;;  %v14057_v40 = vld [vmem:[#allocation109_spill] sm:$0xff] }
 0x871   :  { %7232 = vst [vmem:[#allocation2 + $0x1d0] sm:$0xff] %v8356_v18 }
 0x872   :  { %7233 = vst [vmem:[#allocation2 + $0x1d8] sm:$0xff] %v8357_v20  ;;  %v6938_v0 = vpop.f32.mrb[124].mxu1 }
 0x873   :  { %v8358_v31 = vadd.f32 %v6938_v0, %v14037_v34  ;;  %v6940_v6 = vpop.f32.mrb[125].mxu1  ;;  %v14058_v0 = vld [vmem:[#allocation110_spill] sm:$0xff] }
 0x874   :  { %v8359_v15 = vadd.f32 %v6940_v6, %v14038_v19  ;;  %v14059_v6 = vld [vmem:[#allocation111_spill] sm:$0xff] }
 0x875   :  { %7234 = vst [vmem:[#allocation2 + $0x1e0] sm:$0xff] %v8358_v31 }
 0x876   :  { %7235 = vst [vmem:[#allocation2 + $0x1e8] sm:$0xff] %v8359_v15  ;;  %v6945_v52 = vpop.f32.mrb[126].mxu1 }
 0x877   :  { %v8360_v8 = vadd.f32 %v6945_v52, %v14039_v14  ;;  %v6947_v29 = vpop.f32.mrb[127].mxu1  ;;  %v14060_v52 = vld [vmem:[#allocation116_spill] sm:$0xff] }
 0x878   :  { %v8361_v12 = vadd.f32 %v6947_v29, %v14040_v37  ;;  %v14061_v29 = vld [vmem:[#allocation117_spill] sm:$0xff] }
 0x879   :  { %7236 = vst [vmem:[#allocation2 + $0x1f0] sm:$0xff] %v8360_v8 }
 0x87a   :  { %7237 = vst [vmem:[#allocation2 + $0x1f8] sm:$0xff] %v8361_v12  ;;  %v6952_v39 = vpop.f32.mrb[0].mxu1 }
 0x87b   :  { %v8362_v21 = vadd.f32 %v6952_v39, %v14041_v51  ;;  %v6954_v28 = vpop.f32.mrb[1].mxu1  ;;  %v14062_v39 = vld [vmem:[#allocation119_spill] sm:$0xff] }
 0x87c   :  { %v8363_v36 = vadd.f32 %v6954_v28, %v14042_v33  ;;  %v14063_v28 = vld [vmem:[#allocation120_spill] sm:$0xff] }
 0x87d   :  { %7238 = vst [vmem:[#allocation2 + $0x200] sm:$0xff] %v8362_v21 }
 0x87e   :  { %7239 = vst [vmem:[#allocation2 + $0x208] sm:$0xff] %v8363_v36  ;;  %v6959_v42 = vpop.f32.mrb[2].mxu1 }
 0x87f   :  { %v8364_v26 = vadd.f32 %v6959_v42, %v14043_v10  ;;  %v6961_v60 = vpop.f32.mrb[3].mxu1  ;;  %v14064_v42 = vld [vmem:[#allocation123_spill] sm:$0xff] }
 0x880   :  { %v8365_v49 = vadd.f32 %v6961_v60, %v14044_v3  ;;  %v14065_v60 = vld [vmem:[#allocation124_spill] sm:$0xff] }
 0x881   :  { %7240 = vst [vmem:[#allocation2 + $0x210] sm:$0xff] %v8364_v26 }
 0x882   :  { %7241 = vst [vmem:[#allocation2 + $0x218] sm:$0xff] %v8365_v49  ;;  %v6966_v32 = vpop.f32.mrb[4].mxu1 }
 0x883   :  { %v8366_v30 = vadd.f32 %v6966_v32, %v14045_v27  ;;  %v6968_v57 = vpop.f32.mrb[5].mxu1  ;;  %v14066_v32 = vld [vmem:[#allocation126_spill] sm:$0xff] }
 0x884   :  { %v8367_v23 = vadd.f32 %v6968_v57, %v14046_v53  ;;  %v14067_v57 = vld [vmem:[#allocation128_spill] sm:$0xff] }
 0x885   :  { %7242 = vst [vmem:[#allocation2 + $0x220] sm:$0xff] %v8366_v30 }
 0x886   :  { %7243 = vst [vmem:[#allocation2 + $0x228] sm:$0xff] %v8367_v23  ;;  %v6973_v35 = vpop.f32.mrb[6].mxu1 }
 0x887   :  { %v8368_v24 = vadd.f32 %v6973_v35, %v14047_v43  ;;  %v6975_v9 = vpop.f32.mrb[7].mxu1  ;;  %v14068_v35 = vld [vmem:[#allocation129_spill] sm:$0xff] }
 0x888   :  { %v8369_v4 = vadd.f32 %v6975_v9, %v14048_v25  ;;  %v14069_v9 = vld [vmem:[#allocation25_spill] sm:$0xff] }
 0x889   :  { %7244 = vst [vmem:[#allocation2 + $0x230] sm:$0xff] %v8368_v24 }
 0x88a   :  { %7245 = vst [vmem:[#allocation2 + $0x238] sm:$0xff] %v8369_v4  ;;  %v6980_v22 = vpop.f32.mrb[8].mxu1 }
 0x88b   :  { %v8370_v63 = vadd.f32 %v6980_v22, %v14049_v56  ;;  %v6982_v50 = vpop.f32.mrb[9].mxu1  ;;  %v14070_v22 = vld [vmem:[#allocation26_spill] sm:$0xff] }
 0x88c   :  { %v8371_v17 = vadd.f32 %v6982_v50, %v14050_v11  ;;  %v14071_v50 = vld [vmem:[#allocation32_spill] sm:$0xff] }
 0x88d   :  { %7246 = vst [vmem:[#allocation2 + $0x240] sm:$0xff] %v8370_v63 }
 0x88e   :  { %7247 = vst [vmem:[#allocation2 + $0x248] sm:$0xff] %v8371_v17  ;;  %v6987_v55 = vpop.f32.mrb[10].mxu1 }
 0x88f   :  { %v8372_v1 = vadd.f32 %v6987_v55, %v14051_v47  ;;  %v6989_v61 = vpop.f32.mrb[11].mxu1  ;;  %v14072_v55 = vld [vmem:[#allocation33_spill] sm:$0xff] }
 0x890   :  { %v8373_v46 = vadd.f32 %v6989_v61, %v14052_v58  ;;  %v14073_v61 = vld [vmem:[#allocation41_spill] sm:$0xff] }
 0x891   :  { %7248 = vst [vmem:[#allocation2 + $0x250] sm:$0xff] %v8372_v1 }
 0x892   :  { %7249 = vst [vmem:[#allocation2 + $0x258] sm:$0xff] %v8373_v46  ;;  %v6994_v59 = vpop.f32.mrb[12].mxu1 }
 0x893   :  { %v8374_v5 = vadd.f32 %v6994_v59, %v14053_v38  ;;  %v6996_v44 = vpop.f32.mrb[13].mxu1  ;;  %v14074_v59 = vld [vmem:[#allocation42_spill] sm:$0xff] }
 0x894   :  { %v8375_v16 = vadd.f32 %v6996_v44, %v14054_v7  ;;  %v14075_v44 = vld [vmem:[#allocation49_spill] sm:$0xff] }
 0x895   :  { %7250 = vst [vmem:[#allocation2 + $0x260] sm:$0xff] %v8374_v5 }
 0x896   :  { %7251 = vst [vmem:[#allocation2 + $0x268] sm:$0xff] %v8375_v16  ;;  %v7001_v54 = vpop.f32.mrb[14].mxu1 }
 0x897   :  { %v8376_v45 = vadd.f32 %v7001_v54, %v14055_v48  ;;  %v7003_v62 = vpop.f32.mrb[15].mxu1  ;;  %v14076_v54 = vld [vmem:[#allocation50_spill] sm:$0xff] }
 0x898   :  { %v8377_v2 = vadd.f32 %v7003_v62, %v14056_v13  ;;  %v14077_v62 = vld [vmem:[#allocation57_spill] sm:$0xff] }
 0x899   :  { %7252 = vst [vmem:[#allocation2 + $0x270] sm:$0xff] %v8376_v45 }
 0x89a   :  { %7253 = vst [vmem:[#allocation2 + $0x278] sm:$0xff] %v8377_v2  ;;  %v7008_v18 = vpop.f32.mrb[16].mxu1 }
 0x89b   :  { %v8378_v41 = vadd.f32 %v7008_v18, %v14057_v40  ;;  %v7010_v20 = vpop.f32.mrb[17].mxu1  ;;  %v14078_v18 = vld [vmem:[#allocation58_spill] sm:$0xff] }
 0x89c   :  { %v8379_v34 = vadd.f32 %v7010_v20, %v14058_v0  ;;  %v14079_v20 = vld [vmem:[#allocation64_spill] sm:$0xff] }
 0x89d   :  { %7254 = vst [vmem:[#allocation2 + $0x280] sm:$0xff] %v8378_v41 }
 0x89e   :  { %7255 = vst [vmem:[#allocation2 + $0x288] sm:$0xff] %v8379_v34  ;;  %v7015_v31 = vpop.f32.mrb[18].mxu1 }
 0x89f   :  { %v8380_v19 = vadd.f32 %v7015_v31, %v14059_v6  ;;  %v7017_v15 = vpop.f32.mrb[19].mxu1  ;;  %v14080_v31 = vld [vmem:[#allocation66_spill] sm:$0xff] }
 0x8a0   :  { %v8381_v14 = vadd.f32 %v7017_v15, %v14060_v52  ;;  %v14081_v15 = vld [vmem:[#allocation73_spill] sm:$0xff] }
 0x8a1   :  { %7256 = vst [vmem:[#allocation2 + $0x290] sm:$0xff] %v8380_v19 }
 0x8a2   :  { %7257 = vst [vmem:[#allocation2 + $0x298] sm:$0xff] %v8381_v14  ;;  %v7022_v8 = vpop.f32.mrb[20].mxu1 }
 0x8a3   :  { %v8382_v37 = vadd.f32 %v7022_v8, %v14061_v29  ;;  %v7024_v12 = vpop.f32.mrb[21].mxu1  ;;  %v14082_v8 = vld [vmem:[#allocation74_spill] sm:$0xff] }
 0x8a4   :  { %v8383_v51 = vadd.f32 %v7024_v12, %v14062_v39  ;;  %v14083_v12 = vld [vmem:[#allocation82_spill] sm:$0xff] }
 0x8a5   :  { %7258 = vst [vmem:[#allocation2 + $0x2a0] sm:$0xff] %v8382_v37 }
 0x8a6   :  { %7259 = vst [vmem:[#allocation2 + $0x2a8] sm:$0xff] %v8383_v51  ;;  %v7029_v21 = vpop.f32.mrb[22].mxu1 }
 0x8a7   :  { %v8384_v33 = vadd.f32 %v7029_v21, %v14063_v28  ;;  %v7031_v36 = vpop.f32.mrb[23].mxu1  ;;  %v14084_v21 = vld [vmem:[#allocation86_spill] sm:$0xff] }
 0x8a8   :  { %v8385_v10 = vadd.f32 %v7031_v36, %v14064_v42  ;;  %v14085_v36 = vld [vmem:[#allocation95_spill] sm:$0xff] }
 0x8a9   :  { %7260 = vst [vmem:[#allocation2 + $0x2b0] sm:$0xff] %v8384_v33 }
 0x8aa   :  { %7261 = vst [vmem:[#allocation2 + $0x2b8] sm:$0xff] %v8385_v10  ;;  %v7036_v26 = vpop.f32.mrb[24].mxu1 }
 0x8ab   :  { %v8386_v3 = vadd.f32 %v7036_v26, %v14065_v60  ;;  %v7038_v49 = vpop.f32.mrb[25].mxu1  ;;  %v14086_v26 = vld [vmem:[#allocation100_spill] sm:$0xff] }
 0x8ac   :  { %v8387_v27 = vadd.f32 %v7038_v49, %v14066_v32  ;;  %v14087_v49 = vld [vmem:[#allocation112_spill] sm:$0xff] }
 0x8ad   :  { %7262 = vst [vmem:[#allocation2 + $0x2c0] sm:$0xff] %v8386_v3 }
 0x8ae   :  { %7263 = vst [vmem:[#allocation2 + $0x2c8] sm:$0xff] %v8387_v27  ;;  %v7043_v30 = vpop.f32.mrb[26].mxu1 }
 0x8af   :  { %v8388_v53 = vadd.f32 %v7043_v30, %v14067_v57  ;;  %v7045_v23 = vpop.f32.mrb[27].mxu1  ;;  %v14088_v30 = vld [vmem:[#allocation6_spill] sm:$0xff] }
 0x8b0   :  { %v8389_v43 = vadd.f32 %v7045_v23, %v14068_v35  ;;  %v14089_v23 = vld [vmem:[#allocation15_spill] sm:$0xff] }
 0x8b1   :  { %7264 = vst [vmem:[#allocation2 + $0x2d0] sm:$0xff] %v8388_v53 }
 0x8b2   :  { %7265 = vst [vmem:[#allocation2 + $0x2d8] sm:$0xff] %v8389_v43  ;;  %v7050_v24 = vpop.f32.mrb[28].mxu1 }
 0x8b3   :  { %v8390_v25 = vadd.f32 %v7050_v24, %v14069_v9  ;;  %v7052_v4 = vpop.f32.mrb[29].mxu1  ;;  %v14090_v24 = vld [vmem:[#allocation20_spill] sm:$0xff] }
 0x8b4   :  { %v8391_v56 = vadd.f32 %v7052_v4, %v14070_v22  ;;  %v14091_v4 = vld [vmem:[#allocation132_spill] sm:$0xff] }
 0x8b5   :  { %7266 = vst [vmem:[#allocation2 + $0x2e0] sm:$0xff] %v8390_v25 }
 0x8b6   :  { %7267 = vst [vmem:[#allocation2 + $0x2e8] sm:$0xff] %v8391_v56  ;;  %v7057_v63 = vpop.f32.mrb[30].mxu1 }
 0x8b7   :  { %v8392_v11 = vadd.f32 %v7057_v63, %v14071_v50  ;;  %v7059_v17 = vpop.f32.mrb[31].mxu1  ;;  %v14092_v63 = vld [vmem:[#allocation133_spill] sm:$0xff] }
 0x8b8   :  { %v8393_v47 = vadd.f32 %v7059_v17, %v14072_v55  ;;  %v14093_v17 = vld [vmem:[#allocation13_spill] sm:$0xff] }
 0x8b9   :  { %7268 = vst [vmem:[#allocation2 + $0x2f0] sm:$0xff] %v8392_v11 }
 0x8ba   :  { %7269 = vst [vmem:[#allocation2 + $0x2f8] sm:$0xff] %v8393_v47  ;;  %v7064_v1 = vpop.f32.mrb[32].mxu1 }
 0x8bb   :  { %v8394_v58 = vadd.f32 %v7064_v1, %v14073_v61  ;;  %v7066_v46 = vpop.f32.mrb[33].mxu1  ;;  %v14094_v1 = vld [vmem:[#allocation9_spill] sm:$0xff] }
 0x8bc   :  { %v8395_v38 = vadd.f32 %v7066_v46, %v14074_v59  ;;  %v14095_v46 = vld [vmem:[#allocation134_spill] sm:$0xff] }
 0x8bd   :  { %7270 = vst [vmem:[#allocation2 + $0x300] sm:$0xff] %v8394_v58 }
 0x8be   :  { %7271 = vst [vmem:[#allocation2 + $0x308] sm:$0xff] %v8395_v38  ;;  %v7071_v5 = vpop.f32.mrb[34].mxu1 }
 0x8bf   :  { %v8396_v7 = vadd.f32 %v7071_v5, %v14075_v44  ;;  %v7073_v16 = vpop.f32.mrb[35].mxu1  ;;  %v14096_v5 = vld [vmem:[#allocation135_spill] sm:$0xff] }
 0x8c0   :  { %v8397_v48 = vadd.f32 %v7073_v16, %v14076_v54  ;;  %v14097_v16 = vld [vmem:[#allocation136_spill] sm:$0xff] }
 0x8c1   :  { %7272 = vst [vmem:[#allocation2 + $0x310] sm:$0xff] %v8396_v7 }
 0x8c2   :  { %7273 = vst [vmem:[#allocation2 + $0x318] sm:$0xff] %v8397_v48  ;;  %v7078_v45 = vpop.f32.mrb[36].mxu1 }
 0x8c3   :  { %v8398_v13 = vadd.f32 %v7078_v45, %v14077_v62  ;;  %v7080_v2 = vpop.f32.mrb[37].mxu1  ;;  %v14098_v45 = vld [vmem:[#allocation137_spill] sm:$0xff] }
 0x8c4   :  { %v8399_v40 = vadd.f32 %v7080_v2, %v14078_v18  ;;  %v14099_v2 = vld [vmem:[#allocation138_spill] sm:$0xff] }
 0x8c5   :  { %7274 = vst [vmem:[#allocation2 + $0x320] sm:$0xff] %v8398_v13 }
 0x8c6   :  { %7275 = vst [vmem:[#allocation2 + $0x328] sm:$0xff] %v8399_v40  ;;  %v7085_v41 = vpop.f32.mrb[38].mxu1 }
 0x8c7   :  { %v8400_v0 = vadd.f32 %v7085_v41, %v14079_v20  ;;  %v7087_v34 = vpop.f32.mrb[39].mxu1  ;;  %v14100_v41 = vld [vmem:[#allocation139_spill] sm:$0xff] }
 0x8c8   :  { %v8401_v6 = vadd.f32 %v7087_v34, %v14080_v31  ;;  %v14101_v34 = vld [vmem:[#allocation140_spill] sm:$0xff] }
 0x8c9   :  { %7276 = vst [vmem:[#allocation2 + $0x330] sm:$0xff] %v8400_v0 }
 0x8ca   :  { %7277 = vst [vmem:[#allocation2 + $0x338] sm:$0xff] %v8401_v6  ;;  %v7092_v19 = vpop.f32.mrb[40].mxu1 }
 0x8cb   :  { %v8402_v52 = vadd.f32 %v7092_v19, %v14081_v15  ;;  %v7094_v14 = vpop.f32.mrb[41].mxu1  ;;  %v14102_v19 = vld [vmem:[#allocation141_spill] sm:$0xff] }
 0x8cc   :  { %v8403_v29 = vadd.f32 %v7094_v14, %v14082_v8  ;;  %v14103_v14 = vld [vmem:[#allocation142_spill] sm:$0xff] }
 0x8cd   :  { %7278 = vst [vmem:[#allocation2 + $0x340] sm:$0xff] %v8402_v52 }
 0x8ce   :  { %7279 = vst [vmem:[#allocation2 + $0x348] sm:$0xff] %v8403_v29  ;;  %v7099_v37 = vpop.f32.mrb[42].mxu1 }
 0x8cf   :  { %v8404_v39 = vadd.f32 %v7099_v37, %v14083_v12  ;;  %v7101_v51 = vpop.f32.mrb[43].mxu1  ;;  %v14104_v37 = vld [vmem:[#allocation143_spill] sm:$0xff] }
 0x8d0   :  { %v8405_v28 = vadd.f32 %v7101_v51, %v14084_v21 }
 0x8d1   :  { %7280 = vst [vmem:[#allocation2 + $0x350] sm:$0xff] %v8404_v39 }
 0x8d2   :  { %7281 = vst [vmem:[#allocation2 + $0x358] sm:$0xff] %v8405_v28  ;;  %v7106_v33 = vpop.f32.mrb[44].mxu1 }
 0x8d3   :  { %v8406_v42 = vadd.f32 %v7106_v33, %v14085_v36  ;;  %v7108_v10 = vpop.f32.mrb[45].mxu1 }
 0x8d4   :  { %v8407_v60 = vadd.f32 %v7108_v10, %v14086_v26 }
 0x8d5   :  { %7282 = vst [vmem:[#allocation2 + $0x360] sm:$0xff] %v8406_v42 }
 0x8d6   :  { %7283 = vst [vmem:[#allocation2 + $0x368] sm:$0xff] %v8407_v60  ;;  %v7113_v3 = vpop.f32.mrb[46].mxu1 }
 0x8d7   :  { %v8408_v32 = vadd.f32 %v7113_v3, %v14087_v49  ;;  %v7115_v27 = vpop.f32.mrb[47].mxu1 }
 0x8d8   :  { %v8409_v57 = vadd.f32 %v7115_v27, %v14088_v30 }
 0x8d9   :  { %7284 = vst [vmem:[#allocation2 + $0x370] sm:$0xff] %v8408_v32 }
 0x8da   :  { %7285 = vst [vmem:[#allocation2 + $0x378] sm:$0xff] %v8409_v57  ;;  %v7120_v53 = vpop.f32.mrb[48].mxu1 }
 0x8db   :  { %v8410_v35 = vadd.f32 %v7120_v53, %v14089_v23  ;;  %v7122_v43 = vpop.f32.mrb[49].mxu1 }
 0x8dc   :  { %v8411_v9 = vadd.f32 %v7122_v43, %v14090_v24 }
 0x8dd   :  { %7286 = vst [vmem:[#allocation2 + $0x380] sm:$0xff] %v8410_v35 }
 0x8de   :  { %7287 = vst [vmem:[#allocation2 + $0x388] sm:$0xff] %v8411_v9  ;;  %v7127_v25 = vpop.f32.mrb[50].mxu1 }
 0x8df   :  { %v8412_v22 = vadd.f32 %v7127_v25, %v14091_v4  ;;  %v7129_v56 = vpop.f32.mrb[51].mxu1 }
 0x8e0   :  { %v8413_v50 = vadd.f32 %v7129_v56, %v14092_v63 }
 0x8e1   :  { %7288 = vst [vmem:[#allocation2 + $0x390] sm:$0xff] %v8412_v22 }
 0x8e2   :  { %7289 = vst [vmem:[#allocation2 + $0x398] sm:$0xff] %v8413_v50  ;;  %v7134_v11 = vpop.f32.mrb[52].mxu1 }
 0x8e3   :  { %v8414_v55 = vadd.f32 %v7134_v11, %v14093_v17  ;;  %v7136_v47 = vpop.f32.mrb[53].mxu1 }
 0x8e4   :  { %v8415_v61 = vadd.f32 %v7136_v47, %v14094_v1 }
 0x8e5   :  { %7290 = vst [vmem:[#allocation2 + $0x3a0] sm:$0xff] %v8414_v55 }
 0x8e6   :  { %7291 = vst [vmem:[#allocation2 + $0x3a8] sm:$0xff] %v8415_v61  ;;  %v7141_v58 = vpop.f32.mrb[54].mxu1 }
 0x8e7   :  { %v8416_v59 = vadd.f32 %v7141_v58, %v14095_v46  ;;  %v7143_v38 = vpop.f32.mrb[55].mxu1 }
 0x8e8   :  { %v8417_v44 = vadd.f32 %v7143_v38, %v14096_v5 }
 0x8e9   :  { %7292 = vst [vmem:[#allocation2 + $0x3b0] sm:$0xff] %v8416_v59 }
 0x8ea   :  { %7293 = vst [vmem:[#allocation2 + $0x3b8] sm:$0xff] %v8417_v44  ;;  %v7148_v7 = vpop.f32.mrb[56].mxu1 }
 0x8eb   :  { %v8418_v54 = vadd.f32 %v7148_v7, %v14097_v16  ;;  %v7150_v48 = vpop.f32.mrb[57].mxu1 }
 0x8ec   :  { %v8419_v62 = vadd.f32 %v7150_v48, %v14098_v45 }
 0x8ed   :  { %7294 = vst [vmem:[#allocation2 + $0x3c0] sm:$0xff] %v8418_v54 }
 0x8ee   :  { %7295 = vst [vmem:[#allocation2 + $0x3c8] sm:$0xff] %v8419_v62  ;;  %v7155_v13 = vpop.f32.mrb[58].mxu1 }
 0x8ef   :  { %v8420_v18 = vadd.f32 %v7155_v13, %v14099_v2  ;;  %v7157_v40 = vpop.f32.mrb[59].mxu1 }
 0x8f0   :  { %v8421_v20 = vadd.f32 %v7157_v40, %v14100_v41 }
 0x8f1   :  { %7296 = vst [vmem:[#allocation2 + $0x3d0] sm:$0xff] %v8420_v18 }
 0x8f2   :  { %7297 = vst [vmem:[#allocation2 + $0x3d8] sm:$0xff] %v8421_v20  ;;  %v7162_v0 = vpop.f32.mrb[60].mxu1 }
 0x8f3   :  { %v8422_v31 = vadd.f32 %v7162_v0, %v14101_v34  ;;  %v7164_v6 = vpop.f32.mrb[61].mxu1 }
 0x8f4   :  { %v8423_v15 = vadd.f32 %v7164_v6, %v14102_v19 }
 0x8f5   :  { %7298 = vst [vmem:[#allocation2 + $0x3e0] sm:$0xff] %v8422_v31 }
 0x8f6   :  { %7299 = vst [vmem:[#allocation2 + $0x3e8] sm:$0xff] %v8423_v15  ;;  %v7169_v52 = vpop.f32.mrb[62].mxu1 }
 0x8f7   :  { %v8424_v8 = vadd.f32 %v7169_v52, %v14103_v14  ;;  %v7171_v29 = vpop.f32.mrb[63].mxu1 }
 0x8f8   :  { %v8425_v12 = vadd.f32 %v7171_v29, %v14104_v37 }
 0x8f9   :  { %7300 = vst [vmem:[#allocation2 + $0x3f0] sm:$0xff] %v8424_v8 }
 0x8fa   :  { %7301 = vst [vmem:[#allocation2 + $0x3f8] sm:$0xff] %v8425_v12 }
 0x8fb   :  { %9273 = shalt.err (!%p9270_p4)
}
 0x8fc   :  { %s9274_s9 = scalar_lea.hbm %s12634_s3, 16384 }
 0x8fd   :  { %p9275_p5 = scmp.ne.s32.totalorder %s12634_s3, %s9274_s9  ;;  %p9278_p6 = scmp.lt.u32.totalorder %s9274_s9, %s12634_s3 }
 0x8ff   :  { %p9280_p7 = pnand %p9278_p6, %p9275_p5 }
 0x901   :  { %9283 = shalt.err (!%p9280_p7)
}
 0x902   :  { %s9288_s14 = smov 256   ;;  %s9289_s15 = smov 16  }
 0x903   :  { %7313 = dma.vmem_to_hbm [thread:$0]  %s7308_s5, 16384, %s12634_s3, [#allocation3], %s9288_s14, %s9288_s14, %s9289_s15  }
 0x904   :  { %9284 = dma.done.wait [#allocation3], 16384  }
 0x905   :  { %9285 = vsyncadd [#allocation3], 4294950912 }
 0x906   :  { %7317 = vsyncpa [#allocation3], 1 }

</bundles_post_ra>
